<compile_context>
chip_gen: v7x
topology: tpu7x:2x2x1
jax: 0.10.0
libtpu: 0.0.40
codegen_flags: <defaults>
</compile_context>

<pallas_src>
import functools

import jax
import jax.numpy as jnp
from jax.experimental import pallas as pl
from jax.experimental.pallas import tpu as pltpu

K_BREAK = 101          # num_breakpoints from the module's __init__
LANES = 512            # lane-dense slab width (multiple of 128) -> unmasked vst
CHUNK_ROWS = 8         # rows per inner step: 8x512 f32 = 4 vregs per tensor (no spill risk)
MAX_BLOCK_ROWS = 256   # per-grid-step rows: 512 KiB/plane; 2 in + 2 out dbl-buffered ~ 4 MiB VMEM
TARGET_GRID = 8        # aim for >= 8 grid steps so both v7x TensorCores get work


def _pwl_kernel(params_ref, re_ref, im_ref, ore_ref, oim_ref):
    """params_ref: SMEM (2K+2,) f32 = [xp_sorted(101) | dslopes(101) | bias | s0].
    re_ref/im_ref/ore_ref/oim_ref: (block_rows, LANES) f32 VMEM tiles."""
    # Hoist ALL scalar parameter reads out of the chunk loop: they are
    # loop-invariant, so the 2K+2 SMEM loads (and any splats) happen once per
    # grid step instead of once per chunk iteration.
    xp = [params_ref[j] for j in range(K_BREAK)]
    dd = [params_ref[K_BREAK + j] for j in range(K_BREAK)]
    bias = params_ref[2 * K_BREAK]
    s0 = params_ref[2 * K_BREAK + 1]
    x0 = xp[0]
    n_chunks = re_ref.shape[0] // CHUNK_ROWS

    def chunk_body(c, carry):
        r0 = pl.multiple_of(c * CHUNK_ROWS, CHUNK_ROWS)
        # Real and imag chunks are independent -> extra ILP for the 4 VALU slots.
        for x_ref, o_ref in ((re_ref, ore_ref), (im_ref, oim_ref)):
            x = x_ref[pl.ds(r0, CHUNK_ROWS), :]
            # ReLU-basis PWL, fully unrolled over the 101 breakpoints with two
            # partial accumulators (breaks the serial add chain).
            acc0 = bias + s0 * (x - x0)
            acc1 = jnp.zeros_like(x)
            for j in range(K_BREAK):
                t = dd[j] * jnp.maximum(x - xp[j], 0.0)
                if j & 1:
                    acc1 = acc1 + t
                else:
                    acc0 = acc0 + t
            o_ref[pl.ds(r0, CHUNK_ROWS), :] = acc0 + acc1
        return carry

    jax.lax.fori_loop(0, n_chunks, chunk_body, 0)


def _round_up(v, m):
    return ((v + m - 1) // m) * m


def _choose_block_rows(rows_needed):
    # At least TARGET_GRID grid steps (megacore load balance), capped so the
    # per-step VMEM footprint stays small; always a multiple of CHUNK_ROWS.
    br = _round_up(max(1, -(-rows_needed // TARGET_GRID)), CHUNK_ROWS)
    return max(CHUNK_ROWS, min(br, MAX_BLOCK_ROWS))


@functools.partial(jax.jit, static_argnames=("block_rows",))
def _pwl_apply_2d(params, re2d, im2d, *, block_rows):
    rows, cols = re2d.shape
    spec = pl.BlockSpec((block_rows, cols), lambda i: (i, 0))
    return pl.pallas_call(
        _pwl_kernel,
        out_shape=(jax.ShapeDtypeStruct((rows, cols), jnp.float32),
                   jax.ShapeDtypeStruct((rows, cols), jnp.float32)),
        grid=(rows // block_rows,),
        in_specs=[
            pl.BlockSpec(memory_space=pltpu.MemorySpace.SMEM),  # merged PWL params
            spec,                                               # real plane
            spec,                                               # imag plane
        ],
        out_specs=(spec, spec),
        compiler_params=pltpu.CompilerParams(dimension_semantics=("parallel",)),
    )(params, re2d, im2d)


def nonlinear_layer_mid(x_dict, xp_sorted, dslopes, misc):
    """Forward of NonlinearLayer_mid. x_dict['add_output'] is complex64 (N, H, W)."""
    add_out = x_dict["add_output"]
    # Planar real/imag views (no interleaved stack; lax.complex recombines planar
    # outputs at the end, so no strided gather either).
    re = jnp.real(add_out).astype(jnp.float32)
    im = jnp.imag(add_out).astype(jnp.float32)
    shape = re.shape
    total = re.size

    rows_needed = -(-total // LANES)                 # cdiv
    block_rows = _choose_block_rows(rows_needed)
    rows = _round_up(rows_needed, block_rows)
    pad = rows * LANES - total                       # pad only the flat tail, if needed

    def to_slab(a):
        f = a.reshape(-1)
        if pad:
            f = jnp.pad(f, (0, pad))
        return f.reshape(rows, LANES)

    params = jnp.concatenate([
        xp_sorted.astype(jnp.float32),
        dslopes.astype(jnp.float32),
        misc.astype(jnp.float32),
    ])

    yr2d, yi2d = _pwl_apply_2d(params, to_slab(re), to_slab(im),
                               block_rows=block_rows)

    yr = yr2d.reshape(-1)[:total].reshape(shape)
    yi = yi2d.reshape(-1)[:total].reshape(shape)

    out = dict(x_dict)
    out["nonlinear_output"] = jax.lax.complex(yr, yi)   # complex64 (N, H, W)
    return out


if __name__ == "__main__":
    key = jax.random.PRNGKey(0)
    k_re, k_im, k_xp, k_sl = jax.random.split(key, 4)

    # Deterministic synthetic PWL parameters (torchpwl.PWL shapes with
    # num_channels=1): x_positions (1,101), slopes (1,102), bias (1,).
    # TODO(synk): in production take bias from the learned torchpwl parameter,
    # not from xp_sorted[0].
    xp = 2.0 * jax.random.normal(k_xp, (K_BREAK,), jnp.float32)
    xp_sorted = jnp.sort(xp)
    slopes = 1.0 + 0.1 * jax.random.normal(k_sl, (K_BREAK + 1,), jnp.float32)
    bias = xp_sorted[0]                                  # value at first breakpoint
    dslopes = slopes[1:] - slopes[:-1]                   # (K,)
    misc = jnp.stack([bias, slopes[0]])                  # (2,) = [bias, s0]

    # Pure-JAX reference using torchpwl's gather/index formulation.
    def pwl_ref(v):
        skips = xp_sorted[1:] - xp_sorted[:-1]
        betas = jnp.concatenate(
            [bias[None], bias + jnp.cumsum(skips * slopes[1:K_BREAK])]
        )                                                 # y-values at breakpoints
        k = jnp.sum(v[..., None] > xp_sorted, axis=-1)    # segment index in [0, K]
        idx = jnp.maximum(k - 1, 0)
        return betas[idx] + slopes[k] * (v - xp_sorted[idx])

    def run_case(n, h, w, ka, kb):
        re_in = jax.random.normal(ka, (n, h, w), jnp.float32)
        im_in = jax.random.normal(kb, (n, h, w), jnp.float32)
        add_output = jax.lax.complex(re_in, im_in)        # complex64
        out = nonlinear_layer_mid({"add_output": add_output},
                                  xp_sorted, dslopes, misc)
        result = jax.block_until_ready(out["nonlinear_output"])
        ref = jax.lax.complex(pwl_ref(re_in), pwl_ref(im_in))
        assert result.shape == (n, h, w) and result.dtype == jnp.complex64
        assert jnp.allclose(result, ref, atol=2e-3, rtol=2e-3)

    run_case(2, 16, 16, k_re, k_im)   # small module-consistent shape (grid = 1)
    run_case(3, 40, 48, k_im, k_re)   # ragged total -> padding path + grid = 2

    print("KERNEL_OK")
</pallas_src>

<mosaic_0001>
module attributes {stable_mosaic.version = 11 : i64} {
  func.func @_pwl_kernel(%arg0: i32, %arg1: memref<204xf32, #tpu.memory_space<smem>>, %arg2: memref<8x512xf32, #tpu.memory_space<vmem>>, %arg3: memref<8x512xf32, #tpu.memory_space<vmem>>, %arg4: memref<8x512xf32, #tpu.memory_space<vmem>>, %arg5: memref<8x512xf32, #tpu.memory_space<vmem>>) attributes {dimension_semantics = [#tpu.dimension_semantics<parallel>], iteration_bounds = array<i64: 1>, scalar_prefetch = 0 : i64, scratch_operands = 0 : i64, tpu.core_type = #tpu.core_type<tc>, window_params = [{transform_indices = @transform_0, window_bounds = array<i64: 204>}, {transform_indices = @transform_1, window_bounds = array<i64: 8, 512>}, {transform_indices = @transform_2, window_bounds = array<i64: 8, 512>}, {transform_indices = @transform_3, window_bounds = array<i64: 8, 512>}, {transform_indices = @transform_4, window_bounds = array<i64: 8, 512>}]} {
    %c0 = arith.constant 0 : index
    %0 = memref.load %arg1[%c0] : memref<204xf32, #tpu.memory_space<smem>>
    %c1 = arith.constant 1 : index
    %1 = memref.load %arg1[%c1] : memref<204xf32, #tpu.memory_space<smem>>
    %c2 = arith.constant 2 : index
    %2 = memref.load %arg1[%c2] : memref<204xf32, #tpu.memory_space<smem>>
    %c3 = arith.constant 3 : index
    %3 = memref.load %arg1[%c3] : memref<204xf32, #tpu.memory_space<smem>>
    %c4 = arith.constant 4 : index
    %4 = memref.load %arg1[%c4] : memref<204xf32, #tpu.memory_space<smem>>
    %c5 = arith.constant 5 : index
    %5 = memref.load %arg1[%c5] : memref<204xf32, #tpu.memory_space<smem>>
    %c6 = arith.constant 6 : index
    %6 = memref.load %arg1[%c6] : memref<204xf32, #tpu.memory_space<smem>>
    %c7 = arith.constant 7 : index
    %7 = memref.load %arg1[%c7] : memref<204xf32, #tpu.memory_space<smem>>
    %c8 = arith.constant 8 : index
    %8 = memref.load %arg1[%c8] : memref<204xf32, #tpu.memory_space<smem>>
    %c9 = arith.constant 9 : index
    %9 = memref.load %arg1[%c9] : memref<204xf32, #tpu.memory_space<smem>>
    %c10 = arith.constant 10 : index
    %10 = memref.load %arg1[%c10] : memref<204xf32, #tpu.memory_space<smem>>
    %c11 = arith.constant 11 : index
    %11 = memref.load %arg1[%c11] : memref<204xf32, #tpu.memory_space<smem>>
    %c12 = arith.constant 12 : index
    %12 = memref.load %arg1[%c12] : memref<204xf32, #tpu.memory_space<smem>>
    %c13 = arith.constant 13 : index
    %13 = memref.load %arg1[%c13] : memref<204xf32, #tpu.memory_space<smem>>
    %c14 = arith.constant 14 : index
    %14 = memref.load %arg1[%c14] : memref<204xf32, #tpu.memory_space<smem>>
    %c15 = arith.constant 15 : index
    %15 = memref.load %arg1[%c15] : memref<204xf32, #tpu.memory_space<smem>>
    %c16 = arith.constant 16 : index
    %16 = memref.load %arg1[%c16] : memref<204xf32, #tpu.memory_space<smem>>
    %c17 = arith.constant 17 : index
    %17 = memref.load %arg1[%c17] : memref<204xf32, #tpu.memory_space<smem>>
    %c18 = arith.constant 18 : index
    %18 = memref.load %arg1[%c18] : memref<204xf32, #tpu.memory_space<smem>>
    %c19 = arith.constant 19 : index
    %19 = memref.load %arg1[%c19] : memref<204xf32, #tpu.memory_space<smem>>
    %c20 = arith.constant 20 : index
    %20 = memref.load %arg1[%c20] : memref<204xf32, #tpu.memory_space<smem>>
    %c21 = arith.constant 21 : index
    %21 = memref.load %arg1[%c21] : memref<204xf32, #tpu.memory_space<smem>>
    %c22 = arith.constant 22 : index
    %22 = memref.load %arg1[%c22] : memref<204xf32, #tpu.memory_space<smem>>
    %c23 = arith.constant 23 : index
    %23 = memref.load %arg1[%c23] : memref<204xf32, #tpu.memory_space<smem>>
    %c24 = arith.constant 24 : index
    %24 = memref.load %arg1[%c24] : memref<204xf32, #tpu.memory_space<smem>>
    %c25 = arith.constant 25 : index
    %25 = memref.load %arg1[%c25] : memref<204xf32, #tpu.memory_space<smem>>
    %c26 = arith.constant 26 : index
    %26 = memref.load %arg1[%c26] : memref<204xf32, #tpu.memory_space<smem>>
    %c27 = arith.constant 27 : index
    %27 = memref.load %arg1[%c27] : memref<204xf32, #tpu.memory_space<smem>>
    %c28 = arith.constant 28 : index
    %28 = memref.load %arg1[%c28] : memref<204xf32, #tpu.memory_space<smem>>
    %c29 = arith.constant 29 : index
    %29 = memref.load %arg1[%c29] : memref<204xf32, #tpu.memory_space<smem>>
    %c30 = arith.constant 30 : index
    %30 = memref.load %arg1[%c30] : memref<204xf32, #tpu.memory_space<smem>>
    %c31 = arith.constant 31 : index
    %31 = memref.load %arg1[%c31] : memref<204xf32, #tpu.memory_space<smem>>
    %c32 = arith.constant 32 : index
    %32 = memref.load %arg1[%c32] : memref<204xf32, #tpu.memory_space<smem>>
    %c33 = arith.constant 33 : index
    %33 = memref.load %arg1[%c33] : memref<204xf32, #tpu.memory_space<smem>>
    %c34 = arith.constant 34 : index
    %34 = memref.load %arg1[%c34] : memref<204xf32, #tpu.memory_space<smem>>
    %c35 = arith.constant 35 : index
    %35 = memref.load %arg1[%c35] : memref<204xf32, #tpu.memory_space<smem>>
    %c36 = arith.constant 36 : index
    %36 = memref.load %arg1[%c36] : memref<204xf32, #tpu.memory_space<smem>>
    %c37 = arith.constant 37 : index
    %37 = memref.load %arg1[%c37] : memref<204xf32, #tpu.memory_space<smem>>
    %c38 = arith.constant 38 : index
    %38 = memref.load %arg1[%c38] : memref<204xf32, #tpu.memory_space<smem>>
    %c39 = arith.constant 39 : index
    %39 = memref.load %arg1[%c39] : memref<204xf32, #tpu.memory_space<smem>>
    %c40 = arith.constant 40 : index
    %40 = memref.load %arg1[%c40] : memref<204xf32, #tpu.memory_space<smem>>
    %c41 = arith.constant 41 : index
    %41 = memref.load %arg1[%c41] : memref<204xf32, #tpu.memory_space<smem>>
    %c42 = arith.constant 42 : index
    %42 = memref.load %arg1[%c42] : memref<204xf32, #tpu.memory_space<smem>>
    %c43 = arith.constant 43 : index
    %43 = memref.load %arg1[%c43] : memref<204xf32, #tpu.memory_space<smem>>
    %c44 = arith.constant 44 : index
    %44 = memref.load %arg1[%c44] : memref<204xf32, #tpu.memory_space<smem>>
    %c45 = arith.constant 45 : index
    %45 = memref.load %arg1[%c45] : memref<204xf32, #tpu.memory_space<smem>>
    %c46 = arith.constant 46 : index
    %46 = memref.load %arg1[%c46] : memref<204xf32, #tpu.memory_space<smem>>
    %c47 = arith.constant 47 : index
    %47 = memref.load %arg1[%c47] : memref<204xf32, #tpu.memory_space<smem>>
    %c48 = arith.constant 48 : index
    %48 = memref.load %arg1[%c48] : memref<204xf32, #tpu.memory_space<smem>>
    %c49 = arith.constant 49 : index
    %49 = memref.load %arg1[%c49] : memref<204xf32, #tpu.memory_space<smem>>
    %c50 = arith.constant 50 : index
    %50 = memref.load %arg1[%c50] : memref<204xf32, #tpu.memory_space<smem>>
    %c51 = arith.constant 51 : index
    %51 = memref.load %arg1[%c51] : memref<204xf32, #tpu.memory_space<smem>>
    %c52 = arith.constant 52 : index
    %52 = memref.load %arg1[%c52] : memref<204xf32, #tpu.memory_space<smem>>
    %c53 = arith.constant 53 : index
    %53 = memref.load %arg1[%c53] : memref<204xf32, #tpu.memory_space<smem>>
    %c54 = arith.constant 54 : index
    %54 = memref.load %arg1[%c54] : memref<204xf32, #tpu.memory_space<smem>>
    %c55 = arith.constant 55 : index
    %55 = memref.load %arg1[%c55] : memref<204xf32, #tpu.memory_space<smem>>
    %c56 = arith.constant 56 : index
    %56 = memref.load %arg1[%c56] : memref<204xf32, #tpu.memory_space<smem>>
    %c57 = arith.constant 57 : index
    %57 = memref.load %arg1[%c57] : memref<204xf32, #tpu.memory_space<smem>>
    %c58 = arith.constant 58 : index
    %58 = memref.load %arg1[%c58] : memref<204xf32, #tpu.memory_space<smem>>
    %c59 = arith.constant 59 : index
    %59 = memref.load %arg1[%c59] : memref<204xf32, #tpu.memory_space<smem>>
    %c60 = arith.constant 60 : index
    %60 = memref.load %arg1[%c60] : memref<204xf32, #tpu.memory_space<smem>>
    %c61 = arith.constant 61 : index
    %61 = memref.load %arg1[%c61] : memref<204xf32, #tpu.memory_space<smem>>
    %c62 = arith.constant 62 : index
    %62 = memref.load %arg1[%c62] : memref<204xf32, #tpu.memory_space<smem>>
    %c63 = arith.constant 63 : index
    %63 = memref.load %arg1[%c63] : memref<204xf32, #tpu.memory_space<smem>>
    %c64 = arith.constant 64 : index
    %64 = memref.load %arg1[%c64] : memref<204xf32, #tpu.memory_space<smem>>
    %c65 = arith.constant 65 : index
    %65 = memref.load %arg1[%c65] : memref<204xf32, #tpu.memory_space<smem>>
    %c66 = arith.constant 66 : index
    %66 = memref.load %arg1[%c66] : memref<204xf32, #tpu.memory_space<smem>>
    %c67 = arith.constant 67 : index
    %67 = memref.load %arg1[%c67] : memref<204xf32, #tpu.memory_space<smem>>
    %c68 = arith.constant 68 : index
    %68 = memref.load %arg1[%c68] : memref<204xf32, #tpu.memory_space<smem>>
    %c69 = arith.constant 69 : index
    %69 = memref.load %arg1[%c69] : memref<204xf32, #tpu.memory_space<smem>>
    %c70 = arith.constant 70 : index
    %70 = memref.load %arg1[%c70] : memref<204xf32, #tpu.memory_space<smem>>
    %c71 = arith.constant 71 : index
    %71 = memref.load %arg1[%c71] : memref<204xf32, #tpu.memory_space<smem>>
    %c72 = arith.constant 72 : index
    %72 = memref.load %arg1[%c72] : memref<204xf32, #tpu.memory_space<smem>>
    %c73 = arith.constant 73 : index
    %73 = memref.load %arg1[%c73] : memref<204xf32, #tpu.memory_space<smem>>
    %c74 = arith.constant 74 : index
    %74 = memref.load %arg1[%c74] : memref<204xf32, #tpu.memory_space<smem>>
    %c75 = arith.constant 75 : index
    %75 = memref.load %arg1[%c75] : memref<204xf32, #tpu.memory_space<smem>>
    %c76 = arith.constant 76 : index
    %76 = memref.load %arg1[%c76] : memref<204xf32, #tpu.memory_space<smem>>
    %c77 = arith.constant 77 : index
    %77 = memref.load %arg1[%c77] : memref<204xf32, #tpu.memory_space<smem>>
    %c78 = arith.constant 78 : index
    %78 = memref.load %arg1[%c78] : memref<204xf32, #tpu.memory_space<smem>>
    %c79 = arith.constant 79 : index
    %79 = memref.load %arg1[%c79] : memref<204xf32, #tpu.memory_space<smem>>
    %c80 = arith.constant 80 : index
    %80 = memref.load %arg1[%c80] : memref<204xf32, #tpu.memory_space<smem>>
    %c81 = arith.constant 81 : index
    %81 = memref.load %arg1[%c81] : memref<204xf32, #tpu.memory_space<smem>>
    %c82 = arith.constant 82 : index
    %82 = memref.load %arg1[%c82] : memref<204xf32, #tpu.memory_space<smem>>
    %c83 = arith.constant 83 : index
    %83 = memref.load %arg1[%c83] : memref<204xf32, #tpu.memory_space<smem>>
    %c84 = arith.constant 84 : index
    %84 = memref.load %arg1[%c84] : memref<204xf32, #tpu.memory_space<smem>>
    %c85 = arith.constant 85 : index
    %85 = memref.load %arg1[%c85] : memref<204xf32, #tpu.memory_space<smem>>
    %c86 = arith.constant 86 : index
    %86 = memref.load %arg1[%c86] : memref<204xf32, #tpu.memory_space<smem>>
    %c87 = arith.constant 87 : index
    %87 = memref.load %arg1[%c87] : memref<204xf32, #tpu.memory_space<smem>>
    %c88 = arith.constant 88 : index
    %88 = memref.load %arg1[%c88] : memref<204xf32, #tpu.memory_space<smem>>
    %c89 = arith.constant 89 : index
    %89 = memref.load %arg1[%c89] : memref<204xf32, #tpu.memory_space<smem>>
    %c90 = arith.constant 90 : index
    %90 = memref.load %arg1[%c90] : memref<204xf32, #tpu.memory_space<smem>>
    %c91 = arith.constant 91 : index
    %91 = memref.load %arg1[%c91] : memref<204xf32, #tpu.memory_space<smem>>
    %c92 = arith.constant 92 : index
    %92 = memref.load %arg1[%c92] : memref<204xf32, #tpu.memory_space<smem>>
    %c93 = arith.constant 93 : index
    %93 = memref.load %arg1[%c93] : memref<204xf32, #tpu.memory_space<smem>>
    %c94 = arith.constant 94 : index
    %94 = memref.load %arg1[%c94] : memref<204xf32, #tpu.memory_space<smem>>
    %c95 = arith.constant 95 : index
    %95 = memref.load %arg1[%c95] : memref<204xf32, #tpu.memory_space<smem>>
    %c96 = arith.constant 96 : index
    %96 = memref.load %arg1[%c96] : memref<204xf32, #tpu.memory_space<smem>>
    %c97 = arith.constant 97 : index
    %97 = memref.load %arg1[%c97] : memref<204xf32, #tpu.memory_space<smem>>
    %c98 = arith.constant 98 : index
    %98 = memref.load %arg1[%c98] : memref<204xf32, #tpu.memory_space<smem>>
    %c99 = arith.constant 99 : index
    %99 = memref.load %arg1[%c99] : memref<204xf32, #tpu.memory_space<smem>>
    %c100 = arith.constant 100 : index
    %100 = memref.load %arg1[%c100] : memref<204xf32, #tpu.memory_space<smem>>
    %c101 = arith.constant 101 : index
    %101 = memref.load %arg1[%c101] : memref<204xf32, #tpu.memory_space<smem>>
    %c102 = arith.constant 102 : index
    %102 = memref.load %arg1[%c102] : memref<204xf32, #tpu.memory_space<smem>>
    %c103 = arith.constant 103 : index
    %103 = memref.load %arg1[%c103] : memref<204xf32, #tpu.memory_space<smem>>
    %c104 = arith.constant 104 : index
    %104 = memref.load %arg1[%c104] : memref<204xf32, #tpu.memory_space<smem>>
    %c105 = arith.constant 105 : index
    %105 = memref.load %arg1[%c105] : memref<204xf32, #tpu.memory_space<smem>>
    %c106 = arith.constant 106 : index
    %106 = memref.load %arg1[%c106] : memref<204xf32, #tpu.memory_space<smem>>
    %c107 = arith.constant 107 : index
    %107 = memref.load %arg1[%c107] : memref<204xf32, #tpu.memory_space<smem>>
    %c108 = arith.constant 108 : index
    %108 = memref.load %arg1[%c108] : memref<204xf32, #tpu.memory_space<smem>>
    %c109 = arith.constant 109 : index
    %109 = memref.load %arg1[%c109] : memref<204xf32, #tpu.memory_space<smem>>
    %c110 = arith.constant 110 : index
    %110 = memref.load %arg1[%c110] : memref<204xf32, #tpu.memory_space<smem>>
    %c111 = arith.constant 111 : index
    %111 = memref.load %arg1[%c111] : memref<204xf32, #tpu.memory_space<smem>>
    %c112 = arith.constant 112 : index
    %112 = memref.load %arg1[%c112] : memref<204xf32, #tpu.memory_space<smem>>
    %c113 = arith.constant 113 : index
    %113 = memref.load %arg1[%c113] : memref<204xf32, #tpu.memory_space<smem>>
    %c114 = arith.constant 114 : index
    %114 = memref.load %arg1[%c114] : memref<204xf32, #tpu.memory_space<smem>>
    %c115 = arith.constant 115 : index
    %115 = memref.load %arg1[%c115] : memref<204xf32, #tpu.memory_space<smem>>
    %c116 = arith.constant 116 : index
    %116 = memref.load %arg1[%c116] : memref<204xf32, #tpu.memory_space<smem>>
    %c117 = arith.constant 117 : index
    %117 = memref.load %arg1[%c117] : memref<204xf32, #tpu.memory_space<smem>>
    %c118 = arith.constant 118 : index
    %118 = memref.load %arg1[%c118] : memref<204xf32, #tpu.memory_space<smem>>
    %c119 = arith.constant 119 : index
    %119 = memref.load %arg1[%c119] : memref<204xf32, #tpu.memory_space<smem>>
    %c120 = arith.constant 120 : index
    %120 = memref.load %arg1[%c120] : memref<204xf32, #tpu.memory_space<smem>>
    %c121 = arith.constant 121 : index
    %121 = memref.load %arg1[%c121] : memref<204xf32, #tpu.memory_space<smem>>
    %c122 = arith.constant 122 : index
    %122 = memref.load %arg1[%c122] : memref<204xf32, #tpu.memory_space<smem>>
    %c123 = arith.constant 123 : index
    %123 = memref.load %arg1[%c123] : memref<204xf32, #tpu.memory_space<smem>>
    %c124 = arith.constant 124 : index
    %124 = memref.load %arg1[%c124] : memref<204xf32, #tpu.memory_space<smem>>
    %c125 = arith.constant 125 : index
    %125 = memref.load %arg1[%c125] : memref<204xf32, #tpu.memory_space<smem>>
    %c126 = arith.constant 126 : index
    %126 = memref.load %arg1[%c126] : memref<204xf32, #tpu.memory_space<smem>>
    %c127 = arith.constant 127 : index
    %127 = memref.load %arg1[%c127] : memref<204xf32, #tpu.memory_space<smem>>
    %c128 = arith.constant 128 : index
    %128 = memref.load %arg1[%c128] : memref<204xf32, #tpu.memory_space<smem>>
    %c129 = arith.constant 129 : index
    %129 = memref.load %arg1[%c129] : memref<204xf32, #tpu.memory_space<smem>>
    %c130 = arith.constant 130 : index
    %130 = memref.load %arg1[%c130] : memref<204xf32, #tpu.memory_space<smem>>
    %c131 = arith.constant 131 : index
    %131 = memref.load %arg1[%c131] : memref<204xf32, #tpu.memory_space<smem>>
    %c132 = arith.constant 132 : index
    %132 = memref.load %arg1[%c132] : memref<204xf32, #tpu.memory_space<smem>>
    %c133 = arith.constant 133 : index
    %133 = memref.load %arg1[%c133] : memref<204xf32, #tpu.memory_space<smem>>
    %c134 = arith.constant 134 : index
    %134 = memref.load %arg1[%c134] : memref<204xf32, #tpu.memory_space<smem>>
    %c135 = arith.constant 135 : index
    %135 = memref.load %arg1[%c135] : memref<204xf32, #tpu.memory_space<smem>>
    %c136 = arith.constant 136 : index
    %136 = memref.load %arg1[%c136] : memref<204xf32, #tpu.memory_space<smem>>
    %c137 = arith.constant 137 : index
    %137 = memref.load %arg1[%c137] : memref<204xf32, #tpu.memory_space<smem>>
    %c138 = arith.constant 138 : index
    %138 = memref.load %arg1[%c138] : memref<204xf32, #tpu.memory_space<smem>>
    %c139 = arith.constant 139 : index
    %139 = memref.load %arg1[%c139] : memref<204xf32, #tpu.memory_space<smem>>
    %c140 = arith.constant 140 : index
    %140 = memref.load %arg1[%c140] : memref<204xf32, #tpu.memory_space<smem>>
    %c141 = arith.constant 141 : index
    %141 = memref.load %arg1[%c141] : memref<204xf32, #tpu.memory_space<smem>>
    %c142 = arith.constant 142 : index
    %142 = memref.load %arg1[%c142] : memref<204xf32, #tpu.memory_space<smem>>
    %c143 = arith.constant 143 : index
    %143 = memref.load %arg1[%c143] : memref<204xf32, #tpu.memory_space<smem>>
    %c144 = arith.constant 144 : index
    %144 = memref.load %arg1[%c144] : memref<204xf32, #tpu.memory_space<smem>>
    %c145 = arith.constant 145 : index
    %145 = memref.load %arg1[%c145] : memref<204xf32, #tpu.memory_space<smem>>
    %c146 = arith.constant 146 : index
    %146 = memref.load %arg1[%c146] : memref<204xf32, #tpu.memory_space<smem>>
    %c147 = arith.constant 147 : index
    %147 = memref.load %arg1[%c147] : memref<204xf32, #tpu.memory_space<smem>>
    %c148 = arith.constant 148 : index
    %148 = memref.load %arg1[%c148] : memref<204xf32, #tpu.memory_space<smem>>
    %c149 = arith.constant 149 : index
    %149 = memref.load %arg1[%c149] : memref<204xf32, #tpu.memory_space<smem>>
    %c150 = arith.constant 150 : index
    %150 = memref.load %arg1[%c150] : memref<204xf32, #tpu.memory_space<smem>>
    %c151 = arith.constant 151 : index
    %151 = memref.load %arg1[%c151] : memref<204xf32, #tpu.memory_space<smem>>
    %c152 = arith.constant 152 : index
    %152 = memref.load %arg1[%c152] : memref<204xf32, #tpu.memory_space<smem>>
    %c153 = arith.constant 153 : index
    %153 = memref.load %arg1[%c153] : memref<204xf32, #tpu.memory_space<smem>>
    %c154 = arith.constant 154 : index
    %154 = memref.load %arg1[%c154] : memref<204xf32, #tpu.memory_space<smem>>
    %c155 = arith.constant 155 : index
    %155 = memref.load %arg1[%c155] : memref<204xf32, #tpu.memory_space<smem>>
    %c156 = arith.constant 156 : index
    %156 = memref.load %arg1[%c156] : memref<204xf32, #tpu.memory_space<smem>>
    %c157 = arith.constant 157 : index
    %157 = memref.load %arg1[%c157] : memref<204xf32, #tpu.memory_space<smem>>
    %c158 = arith.constant 158 : index
    %158 = memref.load %arg1[%c158] : memref<204xf32, #tpu.memory_space<smem>>
    %c159 = arith.constant 159 : index
    %159 = memref.load %arg1[%c159] : memref<204xf32, #tpu.memory_space<smem>>
    %c160 = arith.constant 160 : index
    %160 = memref.load %arg1[%c160] : memref<204xf32, #tpu.memory_space<smem>>
    %c161 = arith.constant 161 : index
    %161 = memref.load %arg1[%c161] : memref<204xf32, #tpu.memory_space<smem>>
    %c162 = arith.constant 162 : index
    %162 = memref.load %arg1[%c162] : memref<204xf32, #tpu.memory_space<smem>>
    %c163 = arith.constant 163 : index
    %163 = memref.load %arg1[%c163] : memref<204xf32, #tpu.memory_space<smem>>
    %c164 = arith.constant 164 : index
    %164 = memref.load %arg1[%c164] : memref<204xf32, #tpu.memory_space<smem>>
    %c165 = arith.constant 165 : index
    %165 = memref.load %arg1[%c165] : memref<204xf32, #tpu.memory_space<smem>>
    %c166 = arith.constant 166 : index
    %166 = memref.load %arg1[%c166] : memref<204xf32, #tpu.memory_space<smem>>
    %c167 = arith.constant 167 : index
    %167 = memref.load %arg1[%c167] : memref<204xf32, #tpu.memory_space<smem>>
    %c168 = arith.constant 168 : index
    %168 = memref.load %arg1[%c168] : memref<204xf32, #tpu.memory_space<smem>>
    %c169 = arith.constant 169 : index
    %169 = memref.load %arg1[%c169] : memref<204xf32, #tpu.memory_space<smem>>
    %c170 = arith.constant 170 : index
    %170 = memref.load %arg1[%c170] : memref<204xf32, #tpu.memory_space<smem>>
    %c171 = arith.constant 171 : index
    %171 = memref.load %arg1[%c171] : memref<204xf32, #tpu.memory_space<smem>>
    %c172 = arith.constant 172 : index
    %172 = memref.load %arg1[%c172] : memref<204xf32, #tpu.memory_space<smem>>
    %c173 = arith.constant 173 : index
    %173 = memref.load %arg1[%c173] : memref<204xf32, #tpu.memory_space<smem>>
    %c174 = arith.constant 174 : index
    %174 = memref.load %arg1[%c174] : memref<204xf32, #tpu.memory_space<smem>>
    %c175 = arith.constant 175 : index
    %175 = memref.load %arg1[%c175] : memref<204xf32, #tpu.memory_space<smem>>
    %c176 = arith.constant 176 : index
    %176 = memref.load %arg1[%c176] : memref<204xf32, #tpu.memory_space<smem>>
    %c177 = arith.constant 177 : index
    %177 = memref.load %arg1[%c177] : memref<204xf32, #tpu.memory_space<smem>>
    %c178 = arith.constant 178 : index
    %178 = memref.load %arg1[%c178] : memref<204xf32, #tpu.memory_space<smem>>
    %c179 = arith.constant 179 : index
    %179 = memref.load %arg1[%c179] : memref<204xf32, #tpu.memory_space<smem>>
    %c180 = arith.constant 180 : index
    %180 = memref.load %arg1[%c180] : memref<204xf32, #tpu.memory_space<smem>>
    %c181 = arith.constant 181 : index
    %181 = memref.load %arg1[%c181] : memref<204xf32, #tpu.memory_space<smem>>
    %c182 = arith.constant 182 : index
    %182 = memref.load %arg1[%c182] : memref<204xf32, #tpu.memory_space<smem>>
    %c183 = arith.constant 183 : index
    %183 = memref.load %arg1[%c183] : memref<204xf32, #tpu.memory_space<smem>>
    %c184 = arith.constant 184 : index
    %184 = memref.load %arg1[%c184] : memref<204xf32, #tpu.memory_space<smem>>
    %c185 = arith.constant 185 : index
    %185 = memref.load %arg1[%c185] : memref<204xf32, #tpu.memory_space<smem>>
    %c186 = arith.constant 186 : index
    %186 = memref.load %arg1[%c186] : memref<204xf32, #tpu.memory_space<smem>>
    %c187 = arith.constant 187 : index
    %187 = memref.load %arg1[%c187] : memref<204xf32, #tpu.memory_space<smem>>
    %c188 = arith.constant 188 : index
    %188 = memref.load %arg1[%c188] : memref<204xf32, #tpu.memory_space<smem>>
    %c189 = arith.constant 189 : index
    %189 = memref.load %arg1[%c189] : memref<204xf32, #tpu.memory_space<smem>>
    %c190 = arith.constant 190 : index
    %190 = memref.load %arg1[%c190] : memref<204xf32, #tpu.memory_space<smem>>
    %c191 = arith.constant 191 : index
    %191 = memref.load %arg1[%c191] : memref<204xf32, #tpu.memory_space<smem>>
    %c192 = arith.constant 192 : index
    %192 = memref.load %arg1[%c192] : memref<204xf32, #tpu.memory_space<smem>>
    %c193 = arith.constant 193 : index
    %193 = memref.load %arg1[%c193] : memref<204xf32, #tpu.memory_space<smem>>
    %c194 = arith.constant 194 : index
    %194 = memref.load %arg1[%c194] : memref<204xf32, #tpu.memory_space<smem>>
    %c195 = arith.constant 195 : index
    %195 = memref.load %arg1[%c195] : memref<204xf32, #tpu.memory_space<smem>>
    %c196 = arith.constant 196 : index
    %196 = memref.load %arg1[%c196] : memref<204xf32, #tpu.memory_space<smem>>
    %c197 = arith.constant 197 : index
    %197 = memref.load %arg1[%c197] : memref<204xf32, #tpu.memory_space<smem>>
    %c198 = arith.constant 198 : index
    %198 = memref.load %arg1[%c198] : memref<204xf32, #tpu.memory_space<smem>>
    %c199 = arith.constant 199 : index
    %199 = memref.load %arg1[%c199] : memref<204xf32, #tpu.memory_space<smem>>
    %c200 = arith.constant 200 : index
    %200 = memref.load %arg1[%c200] : memref<204xf32, #tpu.memory_space<smem>>
    %c201 = arith.constant 201 : index
    %201 = memref.load %arg1[%c201] : memref<204xf32, #tpu.memory_space<smem>>
    %c202 = arith.constant 202 : index
    %202 = memref.load %arg1[%c202] : memref<204xf32, #tpu.memory_space<smem>>
    %c203 = arith.constant 203 : index
    %203 = memref.load %arg1[%c203] : memref<204xf32, #tpu.memory_space<smem>>
    %c0_i32 = arith.constant 0 : i32
    %c8_i32 = arith.constant 8 : i32
    %204 = arith.muli %c0_i32, %c8_i32 : i32
    %205 = tpu.assume_multiple %204, 8 : i32
    %206 = arith.index_cast %205 : i32 to index
    %c0_0 = arith.constant 0 : index
    %207 = vector.load %arg2[%206, %c0_0] : memref<8x512xf32, #tpu.memory_space<vmem>>, vector<8x512xf32>
    %208 = vector.broadcast %0 : f32 to vector<8x512xf32>
    %209 = arith.subf %207, %208 : vector<8x512xf32>
    %210 = vector.broadcast %203 : f32 to vector<8x512xf32>
    %211 = arith.mulf %210, %209 : vector<8x512xf32>
    %212 = vector.broadcast %202 : f32 to vector<8x512xf32>
    %213 = arith.addf %212, %211 : vector<8x512xf32>
    %cst = arith.constant 0.000000e+00 : f32
    %214 = vector.broadcast %cst : f32 to vector<8x512xf32>
    %215 = vector.broadcast %0 : f32 to vector<8x512xf32>
    %216 = arith.subf %207, %215 : vector<8x512xf32>
    %cst_1 = arith.constant 0.000000e+00 : f32
    %217 = vector.broadcast %cst_1 : f32 to vector<8x512xf32>
    %218 = arith.maximumf %216, %217 : vector<8x512xf32>
    %219 = vector.broadcast %101 : f32 to vector<8x512xf32>
    %220 = arith.mulf %219, %218 : vector<8x512xf32>
    %221 = arith.addf %213, %220 : vector<8x512xf32>
    %222 = vector.broadcast %1 : f32 to vector<8x512xf32>
    %223 = arith.subf %207, %222 : vector<8x512xf32>
    %cst_2 = arith.constant 0.000000e+00 : f32
    %224 = vector.broadcast %cst_2 : f32 to vector<8x512xf32>
    %225 = arith.maximumf %223, %224 : vector<8x512xf32>
    %226 = vector.broadcast %102 : f32 to vector<8x512xf32>
    %227 = arith.mulf %226, %225 : vector<8x512xf32>
    %228 = arith.addf %214, %227 : vector<8x512xf32>
    %229 = vector.broadcast %2 : f32 to vector<8x512xf32>
    %230 = arith.subf %207, %229 : vector<8x512xf32>
    %cst_3 = arith.constant 0.000000e+00 : f32
    %231 = vector.broadcast %cst_3 : f32 to vector<8x512xf32>
    %232 = arith.maximumf %230, %231 : vector<8x512xf32>
    %233 = vector.broadcast %103 : f32 to vector<8x512xf32>
    %234 = arith.mulf %233, %232 : vector<8x512xf32>
    %235 = arith.addf %221, %234 : vector<8x512xf32>
    %236 = vector.broadcast %3 : f32 to vector<8x512xf32>
    %237 = arith.subf %207, %236 : vector<8x512xf32>
    %cst_4 = arith.constant 0.000000e+00 : f32
    %238 = vector.broadcast %cst_4 : f32 to vector<8x512xf32>
    %239 = arith.maximumf %237, %238 : vector<8x512xf32>
    %240 = vector.broadcast %104 : f32 to vector<8x512xf32>
    %241 = arith.mulf %240, %239 : vector<8x512xf32>
    %242 = arith.addf %228, %241 : vector<8x512xf32>
    %243 = vector.broadcast %4 : f32 to vector<8x512xf32>
    %244 = arith.subf %207, %243 : vector<8x512xf32>
    %cst_5 = arith.constant 0.000000e+00 : f32
    %245 = vector.broadcast %cst_5 : f32 to vector<8x512xf32>
    %246 = arith.maximumf %244, %245 : vector<8x512xf32>
    %247 = vector.broadcast %105 : f32 to vector<8x512xf32>
    %248 = arith.mulf %247, %246 : vector<8x512xf32>
    %249 = arith.addf %235, %248 : vector<8x512xf32>
    %250 = vector.broadcast %5 : f32 to vector<8x512xf32>
    %251 = arith.subf %207, %250 : vector<8x512xf32>
    %cst_6 = arith.constant 0.000000e+00 : f32
    %252 = vector.broadcast %cst_6 : f32 to vector<8x512xf32>
    %253 = arith.maximumf %251, %252 : vector<8x512xf32>
    %254 = vector.broadcast %106 : f32 to vector<8x512xf32>
    %255 = arith.mulf %254, %253 : vector<8x512xf32>
    %256 = arith.addf %242, %255 : vector<8x512xf32>
    %257 = vector.broadcast %6 : f32 to vector<8x512xf32>
    %258 = arith.subf %207, %257 : vector<8x512xf32>
    %cst_7 = arith.constant 0.000000e+00 : f32
    %259 = vector.broadcast %cst_7 : f32 to vector<8x512xf32>
    %260 = arith.maximumf %258, %259 : vector<8x512xf32>
    %261 = vector.broadcast %107 : f32 to vector<8x512xf32>
    %262 = arith.mulf %261, %260 : vector<8x512xf32>
    %263 = arith.addf %249, %262 : vector<8x512xf32>
    %264 = vector.broadcast %7 : f32 to vector<8x512xf32>
    %265 = arith.subf %207, %264 : vector<8x512xf32>
    %cst_8 = arith.constant 0.000000e+00 : f32
    %266 = vector.broadcast %cst_8 : f32 to vector<8x512xf32>
    %267 = arith.maximumf %265, %266 : vector<8x512xf32>
    %268 = vector.broadcast %108 : f32 to vector<8x512xf32>
    %269 = arith.mulf %268, %267 : vector<8x512xf32>
    %270 = arith.addf %256, %269 : vector<8x512xf32>
    %271 = vector.broadcast %8 : f32 to vector<8x512xf32>
    %272 = arith.subf %207, %271 : vector<8x512xf32>
    %cst_9 = arith.constant 0.000000e+00 : f32
    %273 = vector.broadcast %cst_9 : f32 to vector<8x512xf32>
    %274 = arith.maximumf %272, %273 : vector<8x512xf32>
    %275 = vector.broadcast %109 : f32 to vector<8x512xf32>
    %276 = arith.mulf %275, %274 : vector<8x512xf32>
    %277 = arith.addf %263, %276 : vector<8x512xf32>
    %278 = vector.broadcast %9 : f32 to vector<8x512xf32>
    %279 = arith.subf %207, %278 : vector<8x512xf32>
    %cst_10 = arith.constant 0.000000e+00 : f32
    %280 = vector.broadcast %cst_10 : f32 to vector<8x512xf32>
    %281 = arith.maximumf %279, %280 : vector<8x512xf32>
    %282 = vector.broadcast %110 : f32 to vector<8x512xf32>
    %283 = arith.mulf %282, %281 : vector<8x512xf32>
    %284 = arith.addf %270, %283 : vector<8x512xf32>
    %285 = vector.broadcast %10 : f32 to vector<8x512xf32>
    %286 = arith.subf %207, %285 : vector<8x512xf32>
    %cst_11 = arith.constant 0.000000e+00 : f32
    %287 = vector.broadcast %cst_11 : f32 to vector<8x512xf32>
    %288 = arith.maximumf %286, %287 : vector<8x512xf32>
    %289 = vector.broadcast %111 : f32 to vector<8x512xf32>
    %290 = arith.mulf %289, %288 : vector<8x512xf32>
    %291 = arith.addf %277, %290 : vector<8x512xf32>
    %292 = vector.broadcast %11 : f32 to vector<8x512xf32>
    %293 = arith.subf %207, %292 : vector<8x512xf32>
    %cst_12 = arith.constant 0.000000e+00 : f32
    %294 = vector.broadcast %cst_12 : f32 to vector<8x512xf32>
    %295 = arith.maximumf %293, %294 : vector<8x512xf32>
    %296 = vector.broadcast %112 : f32 to vector<8x512xf32>
    %297 = arith.mulf %296, %295 : vector<8x512xf32>
    %298 = arith.addf %284, %297 : vector<8x512xf32>
    %299 = vector.broadcast %12 : f32 to vector<8x512xf32>
    %300 = arith.subf %207, %299 : vector<8x512xf32>
    %cst_13 = arith.constant 0.000000e+00 : f32
    %301 = vector.broadcast %cst_13 : f32 to vector<8x512xf32>
    %302 = arith.maximumf %300, %301 : vector<8x512xf32>
    %303 = vector.broadcast %113 : f32 to vector<8x512xf32>
    %304 = arith.mulf %303, %302 : vector<8x512xf32>
    %305 = arith.addf %291, %304 : vector<8x512xf32>
    %306 = vector.broadcast %13 : f32 to vector<8x512xf32>
    %307 = arith.subf %207, %306 : vector<8x512xf32>
    %cst_14 = arith.constant 0.000000e+00 : f32
    %308 = vector.broadcast %cst_14 : f32 to vector<8x512xf32>
    %309 = arith.maximumf %307, %308 : vector<8x512xf32>
    %310 = vector.broadcast %114 : f32 to vector<8x512xf32>
    %311 = arith.mulf %310, %309 : vector<8x512xf32>
    %312 = arith.addf %298, %311 : vector<8x512xf32>
    %313 = vector.broadcast %14 : f32 to vector<8x512xf32>
    %314 = arith.subf %207, %313 : vector<8x512xf32>
    %cst_15 = arith.constant 0.000000e+00 : f32
    %315 = vector.broadcast %cst_15 : f32 to vector<8x512xf32>
    %316 = arith.maximumf %314, %315 : vector<8x512xf32>
    %317 = vector.broadcast %115 : f32 to vector<8x512xf32>
    %318 = arith.mulf %317, %316 : vector<8x512xf32>
    %319 = arith.addf %305, %318 : vector<8x512xf32>
    %320 = vector.broadcast %15 : f32 to vector<8x512xf32>
    %321 = arith.subf %207, %320 : vector<8x512xf32>
    %cst_16 = arith.constant 0.000000e+00 : f32
    %322 = vector.broadcast %cst_16 : f32 to vector<8x512xf32>
    %323 = arith.maximumf %321, %322 : vector<8x512xf32>
    %324 = vector.broadcast %116 : f32 to vector<8x512xf32>
    %325 = arith.mulf %324, %323 : vector<8x512xf32>
    %326 = arith.addf %312, %325 : vector<8x512xf32>
    %327 = vector.broadcast %16 : f32 to vector<8x512xf32>
    %328 = arith.subf %207, %327 : vector<8x512xf32>
    %cst_17 = arith.constant 0.000000e+00 : f32
    %329 = vector.broadcast %cst_17 : f32 to vector<8x512xf32>
    %330 = arith.maximumf %328, %329 : vector<8x512xf32>
    %331 = vector.broadcast %117 : f32 to vector<8x512xf32>
    %332 = arith.mulf %331, %330 : vector<8x512xf32>
    %333 = arith.addf %319, %332 : vector<8x512xf32>
    %334 = vector.broadcast %17 : f32 to vector<8x512xf32>
    %335 = arith.subf %207, %334 : vector<8x512xf32>
    %cst_18 = arith.constant 0.000000e+00 : f32
    %336 = vector.broadcast %cst_18 : f32 to vector<8x512xf32>
    %337 = arith.maximumf %335, %336 : vector<8x512xf32>
    %338 = vector.broadcast %118 : f32 to vector<8x512xf32>
    %339 = arith.mulf %338, %337 : vector<8x512xf32>
    %340 = arith.addf %326, %339 : vector<8x512xf32>
    %341 = vector.broadcast %18 : f32 to vector<8x512xf32>
    %342 = arith.subf %207, %341 : vector<8x512xf32>
    %cst_19 = arith.constant 0.000000e+00 : f32
    %343 = vector.broadcast %cst_19 : f32 to vector<8x512xf32>
    %344 = arith.maximumf %342, %343 : vector<8x512xf32>
    %345 = vector.broadcast %119 : f32 to vector<8x512xf32>
    %346 = arith.mulf %345, %344 : vector<8x512xf32>
    %347 = arith.addf %333, %346 : vector<8x512xf32>
    %348 = vector.broadcast %19 : f32 to vector<8x512xf32>
    %349 = arith.subf %207, %348 : vector<8x512xf32>
    %cst_20 = arith.constant 0.000000e+00 : f32
    %350 = vector.broadcast %cst_20 : f32 to vector<8x512xf32>
    %351 = arith.maximumf %349, %350 : vector<8x512xf32>
    %352 = vector.broadcast %120 : f32 to vector<8x512xf32>
    %353 = arith.mulf %352, %351 : vector<8x512xf32>
    %354 = arith.addf %340, %353 : vector<8x512xf32>
    %355 = vector.broadcast %20 : f32 to vector<8x512xf32>
    %356 = arith.subf %207, %355 : vector<8x512xf32>
    %cst_21 = arith.constant 0.000000e+00 : f32
    %357 = vector.broadcast %cst_21 : f32 to vector<8x512xf32>
    %358 = arith.maximumf %356, %357 : vector<8x512xf32>
    %359 = vector.broadcast %121 : f32 to vector<8x512xf32>
    %360 = arith.mulf %359, %358 : vector<8x512xf32>
    %361 = arith.addf %347, %360 : vector<8x512xf32>
    %362 = vector.broadcast %21 : f32 to vector<8x512xf32>
    %363 = arith.subf %207, %362 : vector<8x512xf32>
    %cst_22 = arith.constant 0.000000e+00 : f32
    %364 = vector.broadcast %cst_22 : f32 to vector<8x512xf32>
    %365 = arith.maximumf %363, %364 : vector<8x512xf32>
    %366 = vector.broadcast %122 : f32 to vector<8x512xf32>
    %367 = arith.mulf %366, %365 : vector<8x512xf32>
    %368 = arith.addf %354, %367 : vector<8x512xf32>
    %369 = vector.broadcast %22 : f32 to vector<8x512xf32>
    %370 = arith.subf %207, %369 : vector<8x512xf32>
    %cst_23 = arith.constant 0.000000e+00 : f32
    %371 = vector.broadcast %cst_23 : f32 to vector<8x512xf32>
    %372 = arith.maximumf %370, %371 : vector<8x512xf32>
    %373 = vector.broadcast %123 : f32 to vector<8x512xf32>
    %374 = arith.mulf %373, %372 : vector<8x512xf32>
    %375 = arith.addf %361, %374 : vector<8x512xf32>
    %376 = vector.broadcast %23 : f32 to vector<8x512xf32>
    %377 = arith.subf %207, %376 : vector<8x512xf32>
    %cst_24 = arith.constant 0.000000e+00 : f32
    %378 = vector.broadcast %cst_24 : f32 to vector<8x512xf32>
    %379 = arith.maximumf %377, %378 : vector<8x512xf32>
    %380 = vector.broadcast %124 : f32 to vector<8x512xf32>
    %381 = arith.mulf %380, %379 : vector<8x512xf32>
    %382 = arith.addf %368, %381 : vector<8x512xf32>
    %383 = vector.broadcast %24 : f32 to vector<8x512xf32>
    %384 = arith.subf %207, %383 : vector<8x512xf32>
    %cst_25 = arith.constant 0.000000e+00 : f32
    %385 = vector.broadcast %cst_25 : f32 to vector<8x512xf32>
    %386 = arith.maximumf %384, %385 : vector<8x512xf32>
    %387 = vector.broadcast %125 : f32 to vector<8x512xf32>
    %388 = arith.mulf %387, %386 : vector<8x512xf32>
    %389 = arith.addf %375, %388 : vector<8x512xf32>
    %390 = vector.broadcast %25 : f32 to vector<8x512xf32>
    %391 = arith.subf %207, %390 : vector<8x512xf32>
    %cst_26 = arith.constant 0.000000e+00 : f32
    %392 = vector.broadcast %cst_26 : f32 to vector<8x512xf32>
    %393 = arith.maximumf %391, %392 : vector<8x512xf32>
    %394 = vector.broadcast %126 : f32 to vector<8x512xf32>
    %395 = arith.mulf %394, %393 : vector<8x512xf32>
    %396 = arith.addf %382, %395 : vector<8x512xf32>
    %397 = vector.broadcast %26 : f32 to vector<8x512xf32>
    %398 = arith.subf %207, %397 : vector<8x512xf32>
    %cst_27 = arith.constant 0.000000e+00 : f32
    %399 = vector.broadcast %cst_27 : f32 to vector<8x512xf32>
    %400 = arith.maximumf %398, %399 : vector<8x512xf32>
    %401 = vector.broadcast %127 : f32 to vector<8x512xf32>
    %402 = arith.mulf %401, %400 : vector<8x512xf32>
    %403 = arith.addf %389, %402 : vector<8x512xf32>
    %404 = vector.broadcast %27 : f32 to vector<8x512xf32>
    %405 = arith.subf %207, %404 : vector<8x512xf32>
    %cst_28 = arith.constant 0.000000e+00 : f32
    %406 = vector.broadcast %cst_28 : f32 to vector<8x512xf32>
    %407 = arith.maximumf %405, %406 : vector<8x512xf32>
    %408 = vector.broadcast %128 : f32 to vector<8x512xf32>
    %409 = arith.mulf %408, %407 : vector<8x512xf32>
    %410 = arith.addf %396, %409 : vector<8x512xf32>
    %411 = vector.broadcast %28 : f32 to vector<8x512xf32>
    %412 = arith.subf %207, %411 : vector<8x512xf32>
    %cst_29 = arith.constant 0.000000e+00 : f32
    %413 = vector.broadcast %cst_29 : f32 to vector<8x512xf32>
    %414 = arith.maximumf %412, %413 : vector<8x512xf32>
    %415 = vector.broadcast %129 : f32 to vector<8x512xf32>
    %416 = arith.mulf %415, %414 : vector<8x512xf32>
    %417 = arith.addf %403, %416 : vector<8x512xf32>
    %418 = vector.broadcast %29 : f32 to vector<8x512xf32>
    %419 = arith.subf %207, %418 : vector<8x512xf32>
    %cst_30 = arith.constant 0.000000e+00 : f32
    %420 = vector.broadcast %cst_30 : f32 to vector<8x512xf32>
    %421 = arith.maximumf %419, %420 : vector<8x512xf32>
    %422 = vector.broadcast %130 : f32 to vector<8x512xf32>
    %423 = arith.mulf %422, %421 : vector<8x512xf32>
    %424 = arith.addf %410, %423 : vector<8x512xf32>
    %425 = vector.broadcast %30 : f32 to vector<8x512xf32>
    %426 = arith.subf %207, %425 : vector<8x512xf32>
    %cst_31 = arith.constant 0.000000e+00 : f32
    %427 = vector.broadcast %cst_31 : f32 to vector<8x512xf32>
    %428 = arith.maximumf %426, %427 : vector<8x512xf32>
    %429 = vector.broadcast %131 : f32 to vector<8x512xf32>
    %430 = arith.mulf %429, %428 : vector<8x512xf32>
    %431 = arith.addf %417, %430 : vector<8x512xf32>
    %432 = vector.broadcast %31 : f32 to vector<8x512xf32>
    %433 = arith.subf %207, %432 : vector<8x512xf32>
    %cst_32 = arith.constant 0.000000e+00 : f32
    %434 = vector.broadcast %cst_32 : f32 to vector<8x512xf32>
    %435 = arith.maximumf %433, %434 : vector<8x512xf32>
    %436 = vector.broadcast %132 : f32 to vector<8x512xf32>
    %437 = arith.mulf %436, %435 : vector<8x512xf32>
    %438 = arith.addf %424, %437 : vector<8x512xf32>
    %439 = vector.broadcast %32 : f32 to vector<8x512xf32>
    %440 = arith.subf %207, %439 : vector<8x512xf32>
    %cst_33 = arith.constant 0.000000e+00 : f32
    %441 = vector.broadcast %cst_33 : f32 to vector<8x512xf32>
    %442 = arith.maximumf %440, %441 : vector<8x512xf32>
    %443 = vector.broadcast %133 : f32 to vector<8x512xf32>
    %444 = arith.mulf %443, %442 : vector<8x512xf32>
    %445 = arith.addf %431, %444 : vector<8x512xf32>
    %446 = vector.broadcast %33 : f32 to vector<8x512xf32>
    %447 = arith.subf %207, %446 : vector<8x512xf32>
    %cst_34 = arith.constant 0.000000e+00 : f32
    %448 = vector.broadcast %cst_34 : f32 to vector<8x512xf32>
    %449 = arith.maximumf %447, %448 : vector<8x512xf32>
    %450 = vector.broadcast %134 : f32 to vector<8x512xf32>
    %451 = arith.mulf %450, %449 : vector<8x512xf32>
    %452 = arith.addf %438, %451 : vector<8x512xf32>
    %453 = vector.broadcast %34 : f32 to vector<8x512xf32>
    %454 = arith.subf %207, %453 : vector<8x512xf32>
    %cst_35 = arith.constant 0.000000e+00 : f32
    %455 = vector.broadcast %cst_35 : f32 to vector<8x512xf32>
    %456 = arith.maximumf %454, %455 : vector<8x512xf32>
    %457 = vector.broadcast %135 : f32 to vector<8x512xf32>
    %458 = arith.mulf %457, %456 : vector<8x512xf32>
    %459 = arith.addf %445, %458 : vector<8x512xf32>
    %460 = vector.broadcast %35 : f32 to vector<8x512xf32>
    %461 = arith.subf %207, %460 : vector<8x512xf32>
    %cst_36 = arith.constant 0.000000e+00 : f32
    %462 = vector.broadcast %cst_36 : f32 to vector<8x512xf32>
    %463 = arith.maximumf %461, %462 : vector<8x512xf32>
    %464 = vector.broadcast %136 : f32 to vector<8x512xf32>
    %465 = arith.mulf %464, %463 : vector<8x512xf32>
    %466 = arith.addf %452, %465 : vector<8x512xf32>
    %467 = vector.broadcast %36 : f32 to vector<8x512xf32>
    %468 = arith.subf %207, %467 : vector<8x512xf32>
    %cst_37 = arith.constant 0.000000e+00 : f32
    %469 = vector.broadcast %cst_37 : f32 to vector<8x512xf32>
    %470 = arith.maximumf %468, %469 : vector<8x512xf32>
    %471 = vector.broadcast %137 : f32 to vector<8x512xf32>
    %472 = arith.mulf %471, %470 : vector<8x512xf32>
    %473 = arith.addf %459, %472 : vector<8x512xf32>
    %474 = vector.broadcast %37 : f32 to vector<8x512xf32>
    %475 = arith.subf %207, %474 : vector<8x512xf32>
    %cst_38 = arith.constant 0.000000e+00 : f32
    %476 = vector.broadcast %cst_38 : f32 to vector<8x512xf32>
    %477 = arith.maximumf %475, %476 : vector<8x512xf32>
    %478 = vector.broadcast %138 : f32 to vector<8x512xf32>
    %479 = arith.mulf %478, %477 : vector<8x512xf32>
    %480 = arith.addf %466, %479 : vector<8x512xf32>
    %481 = vector.broadcast %38 : f32 to vector<8x512xf32>
    %482 = arith.subf %207, %481 : vector<8x512xf32>
    %cst_39 = arith.constant 0.000000e+00 : f32
    %483 = vector.broadcast %cst_39 : f32 to vector<8x512xf32>
    %484 = arith.maximumf %482, %483 : vector<8x512xf32>
    %485 = vector.broadcast %139 : f32 to vector<8x512xf32>
    %486 = arith.mulf %485, %484 : vector<8x512xf32>
    %487 = arith.addf %473, %486 : vector<8x512xf32>
    %488 = vector.broadcast %39 : f32 to vector<8x512xf32>
    %489 = arith.subf %207, %488 : vector<8x512xf32>
    %cst_40 = arith.constant 0.000000e+00 : f32
    %490 = vector.broadcast %cst_40 : f32 to vector<8x512xf32>
    %491 = arith.maximumf %489, %490 : vector<8x512xf32>
    %492 = vector.broadcast %140 : f32 to vector<8x512xf32>
    %493 = arith.mulf %492, %491 : vector<8x512xf32>
    %494 = arith.addf %480, %493 : vector<8x512xf32>
    %495 = vector.broadcast %40 : f32 to vector<8x512xf32>
    %496 = arith.subf %207, %495 : vector<8x512xf32>
    %cst_41 = arith.constant 0.000000e+00 : f32
    %497 = vector.broadcast %cst_41 : f32 to vector<8x512xf32>
    %498 = arith.maximumf %496, %497 : vector<8x512xf32>
    %499 = vector.broadcast %141 : f32 to vector<8x512xf32>
    %500 = arith.mulf %499, %498 : vector<8x512xf32>
    %501 = arith.addf %487, %500 : vector<8x512xf32>
    %502 = vector.broadcast %41 : f32 to vector<8x512xf32>
    %503 = arith.subf %207, %502 : vector<8x512xf32>
    %cst_42 = arith.constant 0.000000e+00 : f32
    %504 = vector.broadcast %cst_42 : f32 to vector<8x512xf32>
    %505 = arith.maximumf %503, %504 : vector<8x512xf32>
    %506 = vector.broadcast %142 : f32 to vector<8x512xf32>
    %507 = arith.mulf %506, %505 : vector<8x512xf32>
    %508 = arith.addf %494, %507 : vector<8x512xf32>
    %509 = vector.broadcast %42 : f32 to vector<8x512xf32>
    %510 = arith.subf %207, %509 : vector<8x512xf32>
    %cst_43 = arith.constant 0.000000e+00 : f32
    %511 = vector.broadcast %cst_43 : f32 to vector<8x512xf32>
    %512 = arith.maximumf %510, %511 : vector<8x512xf32>
    %513 = vector.broadcast %143 : f32 to vector<8x512xf32>
    %514 = arith.mulf %513, %512 : vector<8x512xf32>
    %515 = arith.addf %501, %514 : vector<8x512xf32>
    %516 = vector.broadcast %43 : f32 to vector<8x512xf32>
    %517 = arith.subf %207, %516 : vector<8x512xf32>
    %cst_44 = arith.constant 0.000000e+00 : f32
    %518 = vector.broadcast %cst_44 : f32 to vector<8x512xf32>
    %519 = arith.maximumf %517, %518 : vector<8x512xf32>
    %520 = vector.broadcast %144 : f32 to vector<8x512xf32>
    %521 = arith.mulf %520, %519 : vector<8x512xf32>
    %522 = arith.addf %508, %521 : vector<8x512xf32>
    %523 = vector.broadcast %44 : f32 to vector<8x512xf32>
    %524 = arith.subf %207, %523 : vector<8x512xf32>
    %cst_45 = arith.constant 0.000000e+00 : f32
    %525 = vector.broadcast %cst_45 : f32 to vector<8x512xf32>
    %526 = arith.maximumf %524, %525 : vector<8x512xf32>
    %527 = vector.broadcast %145 : f32 to vector<8x512xf32>
    %528 = arith.mulf %527, %526 : vector<8x512xf32>
    %529 = arith.addf %515, %528 : vector<8x512xf32>
    %530 = vector.broadcast %45 : f32 to vector<8x512xf32>
    %531 = arith.subf %207, %530 : vector<8x512xf32>
    %cst_46 = arith.constant 0.000000e+00 : f32
    %532 = vector.broadcast %cst_46 : f32 to vector<8x512xf32>
    %533 = arith.maximumf %531, %532 : vector<8x512xf32>
    %534 = vector.broadcast %146 : f32 to vector<8x512xf32>
    %535 = arith.mulf %534, %533 : vector<8x512xf32>
    %536 = arith.addf %522, %535 : vector<8x512xf32>
    %537 = vector.broadcast %46 : f32 to vector<8x512xf32>
    %538 = arith.subf %207, %537 : vector<8x512xf32>
    %cst_47 = arith.constant 0.000000e+00 : f32
    %539 = vector.broadcast %cst_47 : f32 to vector<8x512xf32>
    %540 = arith.maximumf %538, %539 : vector<8x512xf32>
    %541 = vector.broadcast %147 : f32 to vector<8x512xf32>
    %542 = arith.mulf %541, %540 : vector<8x512xf32>
    %543 = arith.addf %529, %542 : vector<8x512xf32>
    %544 = vector.broadcast %47 : f32 to vector<8x512xf32>
    %545 = arith.subf %207, %544 : vector<8x512xf32>
    %cst_48 = arith.constant 0.000000e+00 : f32
    %546 = vector.broadcast %cst_48 : f32 to vector<8x512xf32>
    %547 = arith.maximumf %545, %546 : vector<8x512xf32>
    %548 = vector.broadcast %148 : f32 to vector<8x512xf32>
    %549 = arith.mulf %548, %547 : vector<8x512xf32>
    %550 = arith.addf %536, %549 : vector<8x512xf32>
    %551 = vector.broadcast %48 : f32 to vector<8x512xf32>
    %552 = arith.subf %207, %551 : vector<8x512xf32>
    %cst_49 = arith.constant 0.000000e+00 : f32
    %553 = vector.broadcast %cst_49 : f32 to vector<8x512xf32>
    %554 = arith.maximumf %552, %553 : vector<8x512xf32>
    %555 = vector.broadcast %149 : f32 to vector<8x512xf32>
    %556 = arith.mulf %555, %554 : vector<8x512xf32>
    %557 = arith.addf %543, %556 : vector<8x512xf32>
    %558 = vector.broadcast %49 : f32 to vector<8x512xf32>
    %559 = arith.subf %207, %558 : vector<8x512xf32>
    %cst_50 = arith.constant 0.000000e+00 : f32
    %560 = vector.broadcast %cst_50 : f32 to vector<8x512xf32>
    %561 = arith.maximumf %559, %560 : vector<8x512xf32>
    %562 = vector.broadcast %150 : f32 to vector<8x512xf32>
    %563 = arith.mulf %562, %561 : vector<8x512xf32>
    %564 = arith.addf %550, %563 : vector<8x512xf32>
    %565 = vector.broadcast %50 : f32 to vector<8x512xf32>
    %566 = arith.subf %207, %565 : vector<8x512xf32>
    %cst_51 = arith.constant 0.000000e+00 : f32
    %567 = vector.broadcast %cst_51 : f32 to vector<8x512xf32>
    %568 = arith.maximumf %566, %567 : vector<8x512xf32>
    %569 = vector.broadcast %151 : f32 to vector<8x512xf32>
    %570 = arith.mulf %569, %568 : vector<8x512xf32>
    %571 = arith.addf %557, %570 : vector<8x512xf32>
    %572 = vector.broadcast %51 : f32 to vector<8x512xf32>
    %573 = arith.subf %207, %572 : vector<8x512xf32>
    %cst_52 = arith.constant 0.000000e+00 : f32
    %574 = vector.broadcast %cst_52 : f32 to vector<8x512xf32>
    %575 = arith.maximumf %573, %574 : vector<8x512xf32>
    %576 = vector.broadcast %152 : f32 to vector<8x512xf32>
    %577 = arith.mulf %576, %575 : vector<8x512xf32>
    %578 = arith.addf %564, %577 : vector<8x512xf32>
    %579 = vector.broadcast %52 : f32 to vector<8x512xf32>
    %580 = arith.subf %207, %579 : vector<8x512xf32>
    %cst_53 = arith.constant 0.000000e+00 : f32
    %581 = vector.broadcast %cst_53 : f32 to vector<8x512xf32>
    %582 = arith.maximumf %580, %581 : vector<8x512xf32>
    %583 = vector.broadcast %153 : f32 to vector<8x512xf32>
    %584 = arith.mulf %583, %582 : vector<8x512xf32>
    %585 = arith.addf %571, %584 : vector<8x512xf32>
    %586 = vector.broadcast %53 : f32 to vector<8x512xf32>
    %587 = arith.subf %207, %586 : vector<8x512xf32>
    %cst_54 = arith.constant 0.000000e+00 : f32
    %588 = vector.broadcast %cst_54 : f32 to vector<8x512xf32>
    %589 = arith.maximumf %587, %588 : vector<8x512xf32>
    %590 = vector.broadcast %154 : f32 to vector<8x512xf32>
    %591 = arith.mulf %590, %589 : vector<8x512xf32>
    %592 = arith.addf %578, %591 : vector<8x512xf32>
    %593 = vector.broadcast %54 : f32 to vector<8x512xf32>
    %594 = arith.subf %207, %593 : vector<8x512xf32>
    %cst_55 = arith.constant 0.000000e+00 : f32
    %595 = vector.broadcast %cst_55 : f32 to vector<8x512xf32>
    %596 = arith.maximumf %594, %595 : vector<8x512xf32>
    %597 = vector.broadcast %155 : f32 to vector<8x512xf32>
    %598 = arith.mulf %597, %596 : vector<8x512xf32>
    %599 = arith.addf %585, %598 : vector<8x512xf32>
    %600 = vector.broadcast %55 : f32 to vector<8x512xf32>
    %601 = arith.subf %207, %600 : vector<8x512xf32>
    %cst_56 = arith.constant 0.000000e+00 : f32
    %602 = vector.broadcast %cst_56 : f32 to vector<8x512xf32>
    %603 = arith.maximumf %601, %602 : vector<8x512xf32>
    %604 = vector.broadcast %156 : f32 to vector<8x512xf32>
    %605 = arith.mulf %604, %603 : vector<8x512xf32>
    %606 = arith.addf %592, %605 : vector<8x512xf32>
    %607 = vector.broadcast %56 : f32 to vector<8x512xf32>
    %608 = arith.subf %207, %607 : vector<8x512xf32>
    %cst_57 = arith.constant 0.000000e+00 : f32
    %609 = vector.broadcast %cst_57 : f32 to vector<8x512xf32>
    %610 = arith.maximumf %608, %609 : vector<8x512xf32>
    %611 = vector.broadcast %157 : f32 to vector<8x512xf32>
    %612 = arith.mulf %611, %610 : vector<8x512xf32>
    %613 = arith.addf %599, %612 : vector<8x512xf32>
    %614 = vector.broadcast %57 : f32 to vector<8x512xf32>
    %615 = arith.subf %207, %614 : vector<8x512xf32>
    %cst_58 = arith.constant 0.000000e+00 : f32
    %616 = vector.broadcast %cst_58 : f32 to vector<8x512xf32>
    %617 = arith.maximumf %615, %616 : vector<8x512xf32>
    %618 = vector.broadcast %158 : f32 to vector<8x512xf32>
    %619 = arith.mulf %618, %617 : vector<8x512xf32>
    %620 = arith.addf %606, %619 : vector<8x512xf32>
    %621 = vector.broadcast %58 : f32 to vector<8x512xf32>
    %622 = arith.subf %207, %621 : vector<8x512xf32>
    %cst_59 = arith.constant 0.000000e+00 : f32
    %623 = vector.broadcast %cst_59 : f32 to vector<8x512xf32>
    %624 = arith.maximumf %622, %623 : vector<8x512xf32>
    %625 = vector.broadcast %159 : f32 to vector<8x512xf32>
    %626 = arith.mulf %625, %624 : vector<8x512xf32>
    %627 = arith.addf %613, %626 : vector<8x512xf32>
    %628 = vector.broadcast %59 : f32 to vector<8x512xf32>
    %629 = arith.subf %207, %628 : vector<8x512xf32>
    %cst_60 = arith.constant 0.000000e+00 : f32
    %630 = vector.broadcast %cst_60 : f32 to vector<8x512xf32>
    %631 = arith.maximumf %629, %630 : vector<8x512xf32>
    %632 = vector.broadcast %160 : f32 to vector<8x512xf32>
    %633 = arith.mulf %632, %631 : vector<8x512xf32>
    %634 = arith.addf %620, %633 : vector<8x512xf32>
    %635 = vector.broadcast %60 : f32 to vector<8x512xf32>
    %636 = arith.subf %207, %635 : vector<8x512xf32>
    %cst_61 = arith.constant 0.000000e+00 : f32
    %637 = vector.broadcast %cst_61 : f32 to vector<8x512xf32>
    %638 = arith.maximumf %636, %637 : vector<8x512xf32>
    %639 = vector.broadcast %161 : f32 to vector<8x512xf32>
    %640 = arith.mulf %639, %638 : vector<8x512xf32>
    %641 = arith.addf %627, %640 : vector<8x512xf32>
    %642 = vector.broadcast %61 : f32 to vector<8x512xf32>
    %643 = arith.subf %207, %642 : vector<8x512xf32>
    %cst_62 = arith.constant 0.000000e+00 : f32
    %644 = vector.broadcast %cst_62 : f32 to vector<8x512xf32>
    %645 = arith.maximumf %643, %644 : vector<8x512xf32>
    %646 = vector.broadcast %162 : f32 to vector<8x512xf32>
    %647 = arith.mulf %646, %645 : vector<8x512xf32>
    %648 = arith.addf %634, %647 : vector<8x512xf32>
    %649 = vector.broadcast %62 : f32 to vector<8x512xf32>
    %650 = arith.subf %207, %649 : vector<8x512xf32>
    %cst_63 = arith.constant 0.000000e+00 : f32
    %651 = vector.broadcast %cst_63 : f32 to vector<8x512xf32>
    %652 = arith.maximumf %650, %651 : vector<8x512xf32>
    %653 = vector.broadcast %163 : f32 to vector<8x512xf32>
    %654 = arith.mulf %653, %652 : vector<8x512xf32>
    %655 = arith.addf %641, %654 : vector<8x512xf32>
    %656 = vector.broadcast %63 : f32 to vector<8x512xf32>
    %657 = arith.subf %207, %656 : vector<8x512xf32>
    %cst_64 = arith.constant 0.000000e+00 : f32
    %658 = vector.broadcast %cst_64 : f32 to vector<8x512xf32>
    %659 = arith.maximumf %657, %658 : vector<8x512xf32>
    %660 = vector.broadcast %164 : f32 to vector<8x512xf32>
    %661 = arith.mulf %660, %659 : vector<8x512xf32>
    %662 = arith.addf %648, %661 : vector<8x512xf32>
    %663 = vector.broadcast %64 : f32 to vector<8x512xf32>
    %664 = arith.subf %207, %663 : vector<8x512xf32>
    %cst_65 = arith.constant 0.000000e+00 : f32
    %665 = vector.broadcast %cst_65 : f32 to vector<8x512xf32>
    %666 = arith.maximumf %664, %665 : vector<8x512xf32>
    %667 = vector.broadcast %165 : f32 to vector<8x512xf32>
    %668 = arith.mulf %667, %666 : vector<8x512xf32>
    %669 = arith.addf %655, %668 : vector<8x512xf32>
    %670 = vector.broadcast %65 : f32 to vector<8x512xf32>
    %671 = arith.subf %207, %670 : vector<8x512xf32>
    %cst_66 = arith.constant 0.000000e+00 : f32
    %672 = vector.broadcast %cst_66 : f32 to vector<8x512xf32>
    %673 = arith.maximumf %671, %672 : vector<8x512xf32>
    %674 = vector.broadcast %166 : f32 to vector<8x512xf32>
    %675 = arith.mulf %674, %673 : vector<8x512xf32>
    %676 = arith.addf %662, %675 : vector<8x512xf32>
    %677 = vector.broadcast %66 : f32 to vector<8x512xf32>
    %678 = arith.subf %207, %677 : vector<8x512xf32>
    %cst_67 = arith.constant 0.000000e+00 : f32
    %679 = vector.broadcast %cst_67 : f32 to vector<8x512xf32>
    %680 = arith.maximumf %678, %679 : vector<8x512xf32>
    %681 = vector.broadcast %167 : f32 to vector<8x512xf32>
    %682 = arith.mulf %681, %680 : vector<8x512xf32>
    %683 = arith.addf %669, %682 : vector<8x512xf32>
    %684 = vector.broadcast %67 : f32 to vector<8x512xf32>
    %685 = arith.subf %207, %684 : vector<8x512xf32>
    %cst_68 = arith.constant 0.000000e+00 : f32
    %686 = vector.broadcast %cst_68 : f32 to vector<8x512xf32>
    %687 = arith.maximumf %685, %686 : vector<8x512xf32>
    %688 = vector.broadcast %168 : f32 to vector<8x512xf32>
    %689 = arith.mulf %688, %687 : vector<8x512xf32>
    %690 = arith.addf %676, %689 : vector<8x512xf32>
    %691 = vector.broadcast %68 : f32 to vector<8x512xf32>
    %692 = arith.subf %207, %691 : vector<8x512xf32>
    %cst_69 = arith.constant 0.000000e+00 : f32
    %693 = vector.broadcast %cst_69 : f32 to vector<8x512xf32>
    %694 = arith.maximumf %692, %693 : vector<8x512xf32>
    %695 = vector.broadcast %169 : f32 to vector<8x512xf32>
    %696 = arith.mulf %695, %694 : vector<8x512xf32>
    %697 = arith.addf %683, %696 : vector<8x512xf32>
    %698 = vector.broadcast %69 : f32 to vector<8x512xf32>
    %699 = arith.subf %207, %698 : vector<8x512xf32>
    %cst_70 = arith.constant 0.000000e+00 : f32
    %700 = vector.broadcast %cst_70 : f32 to vector<8x512xf32>
    %701 = arith.maximumf %699, %700 : vector<8x512xf32>
    %702 = vector.broadcast %170 : f32 to vector<8x512xf32>
    %703 = arith.mulf %702, %701 : vector<8x512xf32>
    %704 = arith.addf %690, %703 : vector<8x512xf32>
    %705 = vector.broadcast %70 : f32 to vector<8x512xf32>
    %706 = arith.subf %207, %705 : vector<8x512xf32>
    %cst_71 = arith.constant 0.000000e+00 : f32
    %707 = vector.broadcast %cst_71 : f32 to vector<8x512xf32>
    %708 = arith.maximumf %706, %707 : vector<8x512xf32>
    %709 = vector.broadcast %171 : f32 to vector<8x512xf32>
    %710 = arith.mulf %709, %708 : vector<8x512xf32>
    %711 = arith.addf %697, %710 : vector<8x512xf32>
    %712 = vector.broadcast %71 : f32 to vector<8x512xf32>
    %713 = arith.subf %207, %712 : vector<8x512xf32>
    %cst_72 = arith.constant 0.000000e+00 : f32
    %714 = vector.broadcast %cst_72 : f32 to vector<8x512xf32>
    %715 = arith.maximumf %713, %714 : vector<8x512xf32>
    %716 = vector.broadcast %172 : f32 to vector<8x512xf32>
    %717 = arith.mulf %716, %715 : vector<8x512xf32>
    %718 = arith.addf %704, %717 : vector<8x512xf32>
    %719 = vector.broadcast %72 : f32 to vector<8x512xf32>
    %720 = arith.subf %207, %719 : vector<8x512xf32>
    %cst_73 = arith.constant 0.000000e+00 : f32
    %721 = vector.broadcast %cst_73 : f32 to vector<8x512xf32>
    %722 = arith.maximumf %720, %721 : vector<8x512xf32>
    %723 = vector.broadcast %173 : f32 to vector<8x512xf32>
    %724 = arith.mulf %723, %722 : vector<8x512xf32>
    %725 = arith.addf %711, %724 : vector<8x512xf32>
    %726 = vector.broadcast %73 : f32 to vector<8x512xf32>
    %727 = arith.subf %207, %726 : vector<8x512xf32>
    %cst_74 = arith.constant 0.000000e+00 : f32
    %728 = vector.broadcast %cst_74 : f32 to vector<8x512xf32>
    %729 = arith.maximumf %727, %728 : vector<8x512xf32>
    %730 = vector.broadcast %174 : f32 to vector<8x512xf32>
    %731 = arith.mulf %730, %729 : vector<8x512xf32>
    %732 = arith.addf %718, %731 : vector<8x512xf32>
    %733 = vector.broadcast %74 : f32 to vector<8x512xf32>
    %734 = arith.subf %207, %733 : vector<8x512xf32>
    %cst_75 = arith.constant 0.000000e+00 : f32
    %735 = vector.broadcast %cst_75 : f32 to vector<8x512xf32>
    %736 = arith.maximumf %734, %735 : vector<8x512xf32>
    %737 = vector.broadcast %175 : f32 to vector<8x512xf32>
    %738 = arith.mulf %737, %736 : vector<8x512xf32>
    %739 = arith.addf %725, %738 : vector<8x512xf32>
    %740 = vector.broadcast %75 : f32 to vector<8x512xf32>
    %741 = arith.subf %207, %740 : vector<8x512xf32>
    %cst_76 = arith.constant 0.000000e+00 : f32
    %742 = vector.broadcast %cst_76 : f32 to vector<8x512xf32>
    %743 = arith.maximumf %741, %742 : vector<8x512xf32>
    %744 = vector.broadcast %176 : f32 to vector<8x512xf32>
    %745 = arith.mulf %744, %743 : vector<8x512xf32>
    %746 = arith.addf %732, %745 : vector<8x512xf32>
    %747 = vector.broadcast %76 : f32 to vector<8x512xf32>
    %748 = arith.subf %207, %747 : vector<8x512xf32>
    %cst_77 = arith.constant 0.000000e+00 : f32
    %749 = vector.broadcast %cst_77 : f32 to vector<8x512xf32>
    %750 = arith.maximumf %748, %749 : vector<8x512xf32>
    %751 = vector.broadcast %177 : f32 to vector<8x512xf32>
    %752 = arith.mulf %751, %750 : vector<8x512xf32>
    %753 = arith.addf %739, %752 : vector<8x512xf32>
    %754 = vector.broadcast %77 : f32 to vector<8x512xf32>
    %755 = arith.subf %207, %754 : vector<8x512xf32>
    %cst_78 = arith.constant 0.000000e+00 : f32
    %756 = vector.broadcast %cst_78 : f32 to vector<8x512xf32>
    %757 = arith.maximumf %755, %756 : vector<8x512xf32>
    %758 = vector.broadcast %178 : f32 to vector<8x512xf32>
    %759 = arith.mulf %758, %757 : vector<8x512xf32>
    %760 = arith.addf %746, %759 : vector<8x512xf32>
    %761 = vector.broadcast %78 : f32 to vector<8x512xf32>
    %762 = arith.subf %207, %761 : vector<8x512xf32>
    %cst_79 = arith.constant 0.000000e+00 : f32
    %763 = vector.broadcast %cst_79 : f32 to vector<8x512xf32>
    %764 = arith.maximumf %762, %763 : vector<8x512xf32>
    %765 = vector.broadcast %179 : f32 to vector<8x512xf32>
    %766 = arith.mulf %765, %764 : vector<8x512xf32>
    %767 = arith.addf %753, %766 : vector<8x512xf32>
    %768 = vector.broadcast %79 : f32 to vector<8x512xf32>
    %769 = arith.subf %207, %768 : vector<8x512xf32>
    %cst_80 = arith.constant 0.000000e+00 : f32
    %770 = vector.broadcast %cst_80 : f32 to vector<8x512xf32>
    %771 = arith.maximumf %769, %770 : vector<8x512xf32>
    %772 = vector.broadcast %180 : f32 to vector<8x512xf32>
    %773 = arith.mulf %772, %771 : vector<8x512xf32>
    %774 = arith.addf %760, %773 : vector<8x512xf32>
    %775 = vector.broadcast %80 : f32 to vector<8x512xf32>
    %776 = arith.subf %207, %775 : vector<8x512xf32>
    %cst_81 = arith.constant 0.000000e+00 : f32
    %777 = vector.broadcast %cst_81 : f32 to vector<8x512xf32>
    %778 = arith.maximumf %776, %777 : vector<8x512xf32>
    %779 = vector.broadcast %181 : f32 to vector<8x512xf32>
    %780 = arith.mulf %779, %778 : vector<8x512xf32>
    %781 = arith.addf %767, %780 : vector<8x512xf32>
    %782 = vector.broadcast %81 : f32 to vector<8x512xf32>
    %783 = arith.subf %207, %782 : vector<8x512xf32>
    %cst_82 = arith.constant 0.000000e+00 : f32
    %784 = vector.broadcast %cst_82 : f32 to vector<8x512xf32>
    %785 = arith.maximumf %783, %784 : vector<8x512xf32>
    %786 = vector.broadcast %182 : f32 to vector<8x512xf32>
    %787 = arith.mulf %786, %785 : vector<8x512xf32>
    %788 = arith.addf %774, %787 : vector<8x512xf32>
    %789 = vector.broadcast %82 : f32 to vector<8x512xf32>
    %790 = arith.subf %207, %789 : vector<8x512xf32>
    %cst_83 = arith.constant 0.000000e+00 : f32
    %791 = vector.broadcast %cst_83 : f32 to vector<8x512xf32>
    %792 = arith.maximumf %790, %791 : vector<8x512xf32>
    %793 = vector.broadcast %183 : f32 to vector<8x512xf32>
    %794 = arith.mulf %793, %792 : vector<8x512xf32>
    %795 = arith.addf %781, %794 : vector<8x512xf32>
    %796 = vector.broadcast %83 : f32 to vector<8x512xf32>
    %797 = arith.subf %207, %796 : vector<8x512xf32>
    %cst_84 = arith.constant 0.000000e+00 : f32
    %798 = vector.broadcast %cst_84 : f32 to vector<8x512xf32>
    %799 = arith.maximumf %797, %798 : vector<8x512xf32>
    %800 = vector.broadcast %184 : f32 to vector<8x512xf32>
    %801 = arith.mulf %800, %799 : vector<8x512xf32>
    %802 = arith.addf %788, %801 : vector<8x512xf32>
    %803 = vector.broadcast %84 : f32 to vector<8x512xf32>
    %804 = arith.subf %207, %803 : vector<8x512xf32>
    %cst_85 = arith.constant 0.000000e+00 : f32
    %805 = vector.broadcast %cst_85 : f32 to vector<8x512xf32>
    %806 = arith.maximumf %804, %805 : vector<8x512xf32>
    %807 = vector.broadcast %185 : f32 to vector<8x512xf32>
    %808 = arith.mulf %807, %806 : vector<8x512xf32>
    %809 = arith.addf %795, %808 : vector<8x512xf32>
    %810 = vector.broadcast %85 : f32 to vector<8x512xf32>
    %811 = arith.subf %207, %810 : vector<8x512xf32>
    %cst_86 = arith.constant 0.000000e+00 : f32
    %812 = vector.broadcast %cst_86 : f32 to vector<8x512xf32>
    %813 = arith.maximumf %811, %812 : vector<8x512xf32>
    %814 = vector.broadcast %186 : f32 to vector<8x512xf32>
    %815 = arith.mulf %814, %813 : vector<8x512xf32>
    %816 = arith.addf %802, %815 : vector<8x512xf32>
    %817 = vector.broadcast %86 : f32 to vector<8x512xf32>
    %818 = arith.subf %207, %817 : vector<8x512xf32>
    %cst_87 = arith.constant 0.000000e+00 : f32
    %819 = vector.broadcast %cst_87 : f32 to vector<8x512xf32>
    %820 = arith.maximumf %818, %819 : vector<8x512xf32>
    %821 = vector.broadcast %187 : f32 to vector<8x512xf32>
    %822 = arith.mulf %821, %820 : vector<8x512xf32>
    %823 = arith.addf %809, %822 : vector<8x512xf32>
    %824 = vector.broadcast %87 : f32 to vector<8x512xf32>
    %825 = arith.subf %207, %824 : vector<8x512xf32>
    %cst_88 = arith.constant 0.000000e+00 : f32
    %826 = vector.broadcast %cst_88 : f32 to vector<8x512xf32>
    %827 = arith.maximumf %825, %826 : vector<8x512xf32>
    %828 = vector.broadcast %188 : f32 to vector<8x512xf32>
    %829 = arith.mulf %828, %827 : vector<8x512xf32>
    %830 = arith.addf %816, %829 : vector<8x512xf32>
    %831 = vector.broadcast %88 : f32 to vector<8x512xf32>
    %832 = arith.subf %207, %831 : vector<8x512xf32>
    %cst_89 = arith.constant 0.000000e+00 : f32
    %833 = vector.broadcast %cst_89 : f32 to vector<8x512xf32>
    %834 = arith.maximumf %832, %833 : vector<8x512xf32>
    %835 = vector.broadcast %189 : f32 to vector<8x512xf32>
    %836 = arith.mulf %835, %834 : vector<8x512xf32>
    %837 = arith.addf %823, %836 : vector<8x512xf32>
    %838 = vector.broadcast %89 : f32 to vector<8x512xf32>
    %839 = arith.subf %207, %838 : vector<8x512xf32>
    %cst_90 = arith.constant 0.000000e+00 : f32
    %840 = vector.broadcast %cst_90 : f32 to vector<8x512xf32>
    %841 = arith.maximumf %839, %840 : vector<8x512xf32>
    %842 = vector.broadcast %190 : f32 to vector<8x512xf32>
    %843 = arith.mulf %842, %841 : vector<8x512xf32>
    %844 = arith.addf %830, %843 : vector<8x512xf32>
    %845 = vector.broadcast %90 : f32 to vector<8x512xf32>
    %846 = arith.subf %207, %845 : vector<8x512xf32>
    %cst_91 = arith.constant 0.000000e+00 : f32
    %847 = vector.broadcast %cst_91 : f32 to vector<8x512xf32>
    %848 = arith.maximumf %846, %847 : vector<8x512xf32>
    %849 = vector.broadcast %191 : f32 to vector<8x512xf32>
    %850 = arith.mulf %849, %848 : vector<8x512xf32>
    %851 = arith.addf %837, %850 : vector<8x512xf32>
    %852 = vector.broadcast %91 : f32 to vector<8x512xf32>
    %853 = arith.subf %207, %852 : vector<8x512xf32>
    %cst_92 = arith.constant 0.000000e+00 : f32
    %854 = vector.broadcast %cst_92 : f32 to vector<8x512xf32>
    %855 = arith.maximumf %853, %854 : vector<8x512xf32>
    %856 = vector.broadcast %192 : f32 to vector<8x512xf32>
    %857 = arith.mulf %856, %855 : vector<8x512xf32>
    %858 = arith.addf %844, %857 : vector<8x512xf32>
    %859 = vector.broadcast %92 : f32 to vector<8x512xf32>
    %860 = arith.subf %207, %859 : vector<8x512xf32>
    %cst_93 = arith.constant 0.000000e+00 : f32
    %861 = vector.broadcast %cst_93 : f32 to vector<8x512xf32>
    %862 = arith.maximumf %860, %861 : vector<8x512xf32>
    %863 = vector.broadcast %193 : f32 to vector<8x512xf32>
    %864 = arith.mulf %863, %862 : vector<8x512xf32>
    %865 = arith.addf %851, %864 : vector<8x512xf32>
    %866 = vector.broadcast %93 : f32 to vector<8x512xf32>
    %867 = arith.subf %207, %866 : vector<8x512xf32>
    %cst_94 = arith.constant 0.000000e+00 : f32
    %868 = vector.broadcast %cst_94 : f32 to vector<8x512xf32>
    %869 = arith.maximumf %867, %868 : vector<8x512xf32>
    %870 = vector.broadcast %194 : f32 to vector<8x512xf32>
    %871 = arith.mulf %870, %869 : vector<8x512xf32>
    %872 = arith.addf %858, %871 : vector<8x512xf32>
    %873 = vector.broadcast %94 : f32 to vector<8x512xf32>
    %874 = arith.subf %207, %873 : vector<8x512xf32>
    %cst_95 = arith.constant 0.000000e+00 : f32
    %875 = vector.broadcast %cst_95 : f32 to vector<8x512xf32>
    %876 = arith.maximumf %874, %875 : vector<8x512xf32>
    %877 = vector.broadcast %195 : f32 to vector<8x512xf32>
    %878 = arith.mulf %877, %876 : vector<8x512xf32>
    %879 = arith.addf %865, %878 : vector<8x512xf32>
    %880 = vector.broadcast %95 : f32 to vector<8x512xf32>
    %881 = arith.subf %207, %880 : vector<8x512xf32>
    %cst_96 = arith.constant 0.000000e+00 : f32
    %882 = vector.broadcast %cst_96 : f32 to vector<8x512xf32>
    %883 = arith.maximumf %881, %882 : vector<8x512xf32>
    %884 = vector.broadcast %196 : f32 to vector<8x512xf32>
    %885 = arith.mulf %884, %883 : vector<8x512xf32>
    %886 = arith.addf %872, %885 : vector<8x512xf32>
    %887 = vector.broadcast %96 : f32 to vector<8x512xf32>
    %888 = arith.subf %207, %887 : vector<8x512xf32>
    %cst_97 = arith.constant 0.000000e+00 : f32
    %889 = vector.broadcast %cst_97 : f32 to vector<8x512xf32>
    %890 = arith.maximumf %888, %889 : vector<8x512xf32>
    %891 = vector.broadcast %197 : f32 to vector<8x512xf32>
    %892 = arith.mulf %891, %890 : vector<8x512xf32>
    %893 = arith.addf %879, %892 : vector<8x512xf32>
    %894 = vector.broadcast %97 : f32 to vector<8x512xf32>
    %895 = arith.subf %207, %894 : vector<8x512xf32>
    %cst_98 = arith.constant 0.000000e+00 : f32
    %896 = vector.broadcast %cst_98 : f32 to vector<8x512xf32>
    %897 = arith.maximumf %895, %896 : vector<8x512xf32>
    %898 = vector.broadcast %198 : f32 to vector<8x512xf32>
    %899 = arith.mulf %898, %897 : vector<8x512xf32>
    %900 = arith.addf %886, %899 : vector<8x512xf32>
    %901 = vector.broadcast %98 : f32 to vector<8x512xf32>
    %902 = arith.subf %207, %901 : vector<8x512xf32>
    %cst_99 = arith.constant 0.000000e+00 : f32
    %903 = vector.broadcast %cst_99 : f32 to vector<8x512xf32>
    %904 = arith.maximumf %902, %903 : vector<8x512xf32>
    %905 = vector.broadcast %199 : f32 to vector<8x512xf32>
    %906 = arith.mulf %905, %904 : vector<8x512xf32>
    %907 = arith.addf %893, %906 : vector<8x512xf32>
    %908 = vector.broadcast %99 : f32 to vector<8x512xf32>
    %909 = arith.subf %207, %908 : vector<8x512xf32>
    %cst_100 = arith.constant 0.000000e+00 : f32
    %910 = vector.broadcast %cst_100 : f32 to vector<8x512xf32>
    %911 = arith.maximumf %909, %910 : vector<8x512xf32>
    %912 = vector.broadcast %200 : f32 to vector<8x512xf32>
    %913 = arith.mulf %912, %911 : vector<8x512xf32>
    %914 = arith.addf %900, %913 : vector<8x512xf32>
    %915 = vector.broadcast %100 : f32 to vector<8x512xf32>
    %916 = arith.subf %207, %915 : vector<8x512xf32>
    %cst_101 = arith.constant 0.000000e+00 : f32
    %917 = vector.broadcast %cst_101 : f32 to vector<8x512xf32>
    %918 = arith.maximumf %916, %917 : vector<8x512xf32>
    %919 = vector.broadcast %201 : f32 to vector<8x512xf32>
    %920 = arith.mulf %919, %918 : vector<8x512xf32>
    %921 = arith.addf %907, %920 : vector<8x512xf32>
    %922 = arith.addf %921, %914 : vector<8x512xf32>
    %923 = arith.index_cast %205 : i32 to index
    %c0_102 = arith.constant 0 : index
    %924 = vector.load %arg4[%923, %c0_102] : memref<8x512xf32, #tpu.memory_space<vmem>>, vector<8x512xf32>
    tpu.vector_store %arg4[%923, %c0_102], %922 {strides = array<i32>} : memref<8x512xf32, #tpu.memory_space<vmem>>, vector<8x512xf32>,
    %925 = arith.index_cast %205 : i32 to index
    %c0_103 = arith.constant 0 : index
    %926 = vector.load %arg3[%925, %c0_103] : memref<8x512xf32, #tpu.memory_space<vmem>>, vector<8x512xf32>
    %927 = vector.broadcast %0 : f32 to vector<8x512xf32>
    %928 = arith.subf %926, %927 : vector<8x512xf32>
    %929 = vector.broadcast %203 : f32 to vector<8x512xf32>
    %930 = arith.mulf %929, %928 : vector<8x512xf32>
    %931 = vector.broadcast %202 : f32 to vector<8x512xf32>
    %932 = arith.addf %931, %930 : vector<8x512xf32>
    %cst_104 = arith.constant 0.000000e+00 : f32
    %933 = vector.broadcast %cst_104 : f32 to vector<8x512xf32>
    %934 = vector.broadcast %0 : f32 to vector<8x512xf32>
    %935 = arith.subf %926, %934 : vector<8x512xf32>
    %cst_105 = arith.constant 0.000000e+00 : f32
    %936 = vector.broadcast %cst_105 : f32 to vector<8x512xf32>
    %937 = arith.maximumf %935, %936 : vector<8x512xf32>
    %938 = vector.broadcast %101 : f32 to vector<8x512xf32>
    %939 = arith.mulf %938, %937 : vector<8x512xf32>
    %940 = arith.addf %932, %939 : vector<8x512xf32>
    %941 = vector.broadcast %1 : f32 to vector<8x512xf32>
    %942 = arith.subf %926, %941 : vector<8x512xf32>
    %cst_106 = arith.constant 0.000000e+00 : f32
    %943 = vector.broadcast %cst_106 : f32 to vector<8x512xf32>
    %944 = arith.maximumf %942, %943 : vector<8x512xf32>
    %945 = vector.broadcast %102 : f32 to vector<8x512xf32>
    %946 = arith.mulf %945, %944 : vector<8x512xf32>
    %947 = arith.addf %933, %946 : vector<8x512xf32>
    %948 = vector.broadcast %2 : f32 to vector<8x512xf32>
    %949 = arith.subf %926, %948 : vector<8x512xf32>
    %cst_107 = arith.constant 0.000000e+00 : f32
    %950 = vector.broadcast %cst_107 : f32 to vector<8x512xf32>
    %951 = arith.maximumf %949, %950 : vector<8x512xf32>
    %952 = vector.broadcast %103 : f32 to vector<8x512xf32>
    %953 = arith.mulf %952, %951 : vector<8x512xf32>
    %954 = arith.addf %940, %953 : vector<8x512xf32>
    %955 = vector.broadcast %3 : f32 to vector<8x512xf32>
    %956 = arith.subf %926, %955 : vector<8x512xf32>
    %cst_108 = arith.constant 0.000000e+00 : f32
    %957 = vector.broadcast %cst_108 : f32 to vector<8x512xf32>
    %958 = arith.maximumf %956, %957 : vector<8x512xf32>
    %959 = vector.broadcast %104 : f32 to vector<8x512xf32>
    %960 = arith.mulf %959, %958 : vector<8x512xf32>
    %961 = arith.addf %947, %960 : vector<8x512xf32>
    %962 = vector.broadcast %4 : f32 to vector<8x512xf32>
    %963 = arith.subf %926, %962 : vector<8x512xf32>
    %cst_109 = arith.constant 0.000000e+00 : f32
    %964 = vector.broadcast %cst_109 : f32 to vector<8x512xf32>
    %965 = arith.maximumf %963, %964 : vector<8x512xf32>
    %966 = vector.broadcast %105 : f32 to vector<8x512xf32>
    %967 = arith.mulf %966, %965 : vector<8x512xf32>
    %968 = arith.addf %954, %967 : vector<8x512xf32>
    %969 = vector.broadcast %5 : f32 to vector<8x512xf32>
    %970 = arith.subf %926, %969 : vector<8x512xf32>
    %cst_110 = arith.constant 0.000000e+00 : f32
    %971 = vector.broadcast %cst_110 : f32 to vector<8x512xf32>
    %972 = arith.maximumf %970, %971 : vector<8x512xf32>
    %973 = vector.broadcast %106 : f32 to vector<8x512xf32>
    %974 = arith.mulf %973, %972 : vector<8x512xf32>
    %975 = arith.addf %961, %974 : vector<8x512xf32>
    %976 = vector.broadcast %6 : f32 to vector<8x512xf32>
    %977 = arith.subf %926, %976 : vector<8x512xf32>
    %cst_111 = arith.constant 0.000000e+00 : f32
    %978 = vector.broadcast %cst_111 : f32 to vector<8x512xf32>
    %979 = arith.maximumf %977, %978 : vector<8x512xf32>
    %980 = vector.broadcast %107 : f32 to vector<8x512xf32>
    %981 = arith.mulf %980, %979 : vector<8x512xf32>
    %982 = arith.addf %968, %981 : vector<8x512xf32>
    %983 = vector.broadcast %7 : f32 to vector<8x512xf32>
    %984 = arith.subf %926, %983 : vector<8x512xf32>
    %cst_112 = arith.constant 0.000000e+00 : f32
    %985 = vector.broadcast %cst_112 : f32 to vector<8x512xf32>
    %986 = arith.maximumf %984, %985 : vector<8x512xf32>
    %987 = vector.broadcast %108 : f32 to vector<8x512xf32>
    %988 = arith.mulf %987, %986 : vector<8x512xf32>
    %989 = arith.addf %975, %988 : vector<8x512xf32>
    %990 = vector.broadcast %8 : f32 to vector<8x512xf32>
    %991 = arith.subf %926, %990 : vector<8x512xf32>
    %cst_113 = arith.constant 0.000000e+00 : f32
    %992 = vector.broadcast %cst_113 : f32 to vector<8x512xf32>
    %993 = arith.maximumf %991, %992 : vector<8x512xf32>
    %994 = vector.broadcast %109 : f32 to vector<8x512xf32>
    %995 = arith.mulf %994, %993 : vector<8x512xf32>
    %996 = arith.addf %982, %995 : vector<8x512xf32>
    %997 = vector.broadcast %9 : f32 to vector<8x512xf32>
    %998 = arith.subf %926, %997 : vector<8x512xf32>
    %cst_114 = arith.constant 0.000000e+00 : f32
    %999 = vector.broadcast %cst_114 : f32 to vector<8x512xf32>
    %1000 = arith.maximumf %998, %999 : vector<8x512xf32>
    %1001 = vector.broadcast %110 : f32 to vector<8x512xf32>
    %1002 = arith.mulf %1001, %1000 : vector<8x512xf32>
    %1003 = arith.addf %989, %1002 : vector<8x512xf32>
    %1004 = vector.broadcast %10 : f32 to vector<8x512xf32>
    %1005 = arith.subf %926, %1004 : vector<8x512xf32>
    %cst_115 = arith.constant 0.000000e+00 : f32
    %1006 = vector.broadcast %cst_115 : f32 to vector<8x512xf32>
    %1007 = arith.maximumf %1005, %1006 : vector<8x512xf32>
    %1008 = vector.broadcast %111 : f32 to vector<8x512xf32>
    %1009 = arith.mulf %1008, %1007 : vector<8x512xf32>
    %1010 = arith.addf %996, %1009 : vector<8x512xf32>
    %1011 = vector.broadcast %11 : f32 to vector<8x512xf32>
    %1012 = arith.subf %926, %1011 : vector<8x512xf32>
    %cst_116 = arith.constant 0.000000e+00 : f32
    %1013 = vector.broadcast %cst_116 : f32 to vector<8x512xf32>
    %1014 = arith.maximumf %1012, %1013 : vector<8x512xf32>
    %1015 = vector.broadcast %112 : f32 to vector<8x512xf32>
    %1016 = arith.mulf %1015, %1014 : vector<8x512xf32>
    %1017 = arith.addf %1003, %1016 : vector<8x512xf32>
    %1018 = vector.broadcast %12 : f32 to vector<8x512xf32>
    %1019 = arith.subf %926, %1018 : vector<8x512xf32>
    %cst_117 = arith.constant 0.000000e+00 : f32
    %1020 = vector.broadcast %cst_117 : f32 to vector<8x512xf32>
    %1021 = arith.maximumf %1019, %1020 : vector<8x512xf32>
    %1022 = vector.broadcast %113 : f32 to vector<8x512xf32>
    %1023 = arith.mulf %1022, %1021 : vector<8x512xf32>
    %1024 = arith.addf %1010, %1023 : vector<8x512xf32>
    %1025 = vector.broadcast %13 : f32 to vector<8x512xf32>
    %1026 = arith.subf %926, %1025 : vector<8x512xf32>
    %cst_118 = arith.constant 0.000000e+00 : f32
    %1027 = vector.broadcast %cst_118 : f32 to vector<8x512xf32>
    %1028 = arith.maximumf %1026, %1027 : vector<8x512xf32>
    %1029 = vector.broadcast %114 : f32 to vector<8x512xf32>
    %1030 = arith.mulf %1029, %1028 : vector<8x512xf32>
    %1031 = arith.addf %1017, %1030 : vector<8x512xf32>
    %1032 = vector.broadcast %14 : f32 to vector<8x512xf32>
    %1033 = arith.subf %926, %1032 : vector<8x512xf32>
    %cst_119 = arith.constant 0.000000e+00 : f32
    %1034 = vector.broadcast %cst_119 : f32 to vector<8x512xf32>
    %1035 = arith.maximumf %1033, %1034 : vector<8x512xf32>
    %1036 = vector.broadcast %115 : f32 to vector<8x512xf32>
    %1037 = arith.mulf %1036, %1035 : vector<8x512xf32>
    %1038 = arith.addf %1024, %1037 : vector<8x512xf32>
    %1039 = vector.broadcast %15 : f32 to vector<8x512xf32>
    %1040 = arith.subf %926, %1039 : vector<8x512xf32>
    %cst_120 = arith.constant 0.000000e+00 : f32
    %1041 = vector.broadcast %cst_120 : f32 to vector<8x512xf32>
    %1042 = arith.maximumf %1040, %1041 : vector<8x512xf32>
    %1043 = vector.broadcast %116 : f32 to vector<8x512xf32>
    %1044 = arith.mulf %1043, %1042 : vector<8x512xf32>
    %1045 = arith.addf %1031, %1044 : vector<8x512xf32>
    %1046 = vector.broadcast %16 : f32 to vector<8x512xf32>
    %1047 = arith.subf %926, %1046 : vector<8x512xf32>
    %cst_121 = arith.constant 0.000000e+00 : f32
    %1048 = vector.broadcast %cst_121 : f32 to vector<8x512xf32>
    %1049 = arith.maximumf %1047, %1048 : vector<8x512xf32>
    %1050 = vector.broadcast %117 : f32 to vector<8x512xf32>
    %1051 = arith.mulf %1050, %1049 : vector<8x512xf32>
    %1052 = arith.addf %1038, %1051 : vector<8x512xf32>
    %1053 = vector.broadcast %17 : f32 to vector<8x512xf32>
    %1054 = arith.subf %926, %1053 : vector<8x512xf32>
    %cst_122 = arith.constant 0.000000e+00 : f32
    %1055 = vector.broadcast %cst_122 : f32 to vector<8x512xf32>
    %1056 = arith.maximumf %1054, %1055 : vector<8x512xf32>
    %1057 = vector.broadcast %118 : f32 to vector<8x512xf32>
    %1058 = arith.mulf %1057, %1056 : vector<8x512xf32>
    %1059 = arith.addf %1045, %1058 : vector<8x512xf32>
    %1060 = vector.broadcast %18 : f32 to vector<8x512xf32>
    %1061 = arith.subf %926, %1060 : vector<8x512xf32>
    %cst_123 = arith.constant 0.000000e+00 : f32
    %1062 = vector.broadcast %cst_123 : f32 to vector<8x512xf32>
    %1063 = arith.maximumf %1061, %1062 : vector<8x512xf32>
    %1064 = vector.broadcast %119 : f32 to vector<8x512xf32>
    %1065 = arith.mulf %1064, %1063 : vector<8x512xf32>
    %1066 = arith.addf %1052, %1065 : vector<8x512xf32>
    %1067 = vector.broadcast %19 : f32 to vector<8x512xf32>
    %1068 = arith.subf %926, %1067 : vector<8x512xf32>
    %cst_124 = arith.constant 0.000000e+00 : f32
    %1069 = vector.broadcast %cst_124 : f32 to vector<8x512xf32>
    %1070 = arith.maximumf %1068, %1069 : vector<8x512xf32>
    %1071 = vector.broadcast %120 : f32 to vector<8x512xf32>
    %1072 = arith.mulf %1071, %1070 : vector<8x512xf32>
    %1073 = arith.addf %1059, %1072 : vector<8x512xf32>
    %1074 = vector.broadcast %20 : f32 to vector<8x512xf32>
    %1075 = arith.subf %926, %1074 : vector<8x512xf32>
    %cst_125 = arith.constant 0.000000e+00 : f32
    %1076 = vector.broadcast %cst_125 : f32 to vector<8x512xf32>
    %1077 = arith.maximumf %1075, %1076 : vector<8x512xf32>
    %1078 = vector.broadcast %121 : f32 to vector<8x512xf32>
    %1079 = arith.mulf %1078, %1077 : vector<8x512xf32>
    %1080 = arith.addf %1066, %1079 : vector<8x512xf32>
    %1081 = vector.broadcast %21 : f32 to vector<8x512xf32>
    %1082 = arith.subf %926, %1081 : vector<8x512xf32>
    %cst_126 = arith.constant 0.000000e+00 : f32
    %1083 = vector.broadcast %cst_126 : f32 to vector<8x512xf32>
    %1084 = arith.maximumf %1082, %1083 : vector<8x512xf32>
    %1085 = vector.broadcast %122 : f32 to vector<8x512xf32>
    %1086 = arith.mulf %1085, %1084 : vector<8x512xf32>
    %1087 = arith.addf %1073, %1086 : vector<8x512xf32>
    %1088 = vector.broadcast %22 : f32 to vector<8x512xf32>
    %1089 = arith.subf %926, %1088 : vector<8x512xf32>
    %cst_127 = arith.constant 0.000000e+00 : f32
    %1090 = vector.broadcast %cst_127 : f32 to vector<8x512xf32>
    %1091 = arith.maximumf %1089, %1090 : vector<8x512xf32>
    %1092 = vector.broadcast %123 : f32 to vector<8x512xf32>
    %1093 = arith.mulf %1092, %1091 : vector<8x512xf32>
    %1094 = arith.addf %1080, %1093 : vector<8x512xf32>
    %1095 = vector.broadcast %23 : f32 to vector<8x512xf32>
    %1096 = arith.subf %926, %1095 : vector<8x512xf32>
    %cst_128 = arith.constant 0.000000e+00 : f32
    %1097 = vector.broadcast %cst_128 : f32 to vector<8x512xf32>
    %1098 = arith.maximumf %1096, %1097 : vector<8x512xf32>
    %1099 = vector.broadcast %124 : f32 to vector<8x512xf32>
    %1100 = arith.mulf %1099, %1098 : vector<8x512xf32>
    %1101 = arith.addf %1087, %1100 : vector<8x512xf32>
    %1102 = vector.broadcast %24 : f32 to vector<8x512xf32>
    %1103 = arith.subf %926, %1102 : vector<8x512xf32>
    %cst_129 = arith.constant 0.000000e+00 : f32
    %1104 = vector.broadcast %cst_129 : f32 to vector<8x512xf32>
    %1105 = arith.maximumf %1103, %1104 : vector<8x512xf32>
    %1106 = vector.broadcast %125 : f32 to vector<8x512xf32>
    %1107 = arith.mulf %1106, %1105 : vector<8x512xf32>
    %1108 = arith.addf %1094, %1107 : vector<8x512xf32>
    %1109 = vector.broadcast %25 : f32 to vector<8x512xf32>
    %1110 = arith.subf %926, %1109 : vector<8x512xf32>
    %cst_130 = arith.constant 0.000000e+00 : f32
    %1111 = vector.broadcast %cst_130 : f32 to vector<8x512xf32>
    %1112 = arith.maximumf %1110, %1111 : vector<8x512xf32>
    %1113 = vector.broadcast %126 : f32 to vector<8x512xf32>
    %1114 = arith.mulf %1113, %1112 : vector<8x512xf32>
    %1115 = arith.addf %1101, %1114 : vector<8x512xf32>
    %1116 = vector.broadcast %26 : f32 to vector<8x512xf32>
    %1117 = arith.subf %926, %1116 : vector<8x512xf32>
    %cst_131 = arith.constant 0.000000e+00 : f32
    %1118 = vector.broadcast %cst_131 : f32 to vector<8x512xf32>
    %1119 = arith.maximumf %1117, %1118 : vector<8x512xf32>
    %1120 = vector.broadcast %127 : f32 to vector<8x512xf32>
    %1121 = arith.mulf %1120, %1119 : vector<8x512xf32>
    %1122 = arith.addf %1108, %1121 : vector<8x512xf32>
    %1123 = vector.broadcast %27 : f32 to vector<8x512xf32>
    %1124 = arith.subf %926, %1123 : vector<8x512xf32>
    %cst_132 = arith.constant 0.000000e+00 : f32
    %1125 = vector.broadcast %cst_132 : f32 to vector<8x512xf32>
    %1126 = arith.maximumf %1124, %1125 : vector<8x512xf32>
    %1127 = vector.broadcast %128 : f32 to vector<8x512xf32>
    %1128 = arith.mulf %1127, %1126 : vector<8x512xf32>
    %1129 = arith.addf %1115, %1128 : vector<8x512xf32>
    %1130 = vector.broadcast %28 : f32 to vector<8x512xf32>
    %1131 = arith.subf %926, %1130 : vector<8x512xf32>
    %cst_133 = arith.constant 0.000000e+00 : f32
    %1132 = vector.broadcast %cst_133 : f32 to vector<8x512xf32>
    %1133 = arith.maximumf %1131, %1132 : vector<8x512xf32>
    %1134 = vector.broadcast %129 : f32 to vector<8x512xf32>
    %1135 = arith.mulf %1134, %1133 : vector<8x512xf32>
    %1136 = arith.addf %1122, %1135 : vector<8x512xf32>
    %1137 = vector.broadcast %29 : f32 to vector<8x512xf32>
    %1138 = arith.subf %926, %1137 : vector<8x512xf32>
    %cst_134 = arith.constant 0.000000e+00 : f32
    %1139 = vector.broadcast %cst_134 : f32 to vector<8x512xf32>
    %1140 = arith.maximumf %1138, %1139 : vector<8x512xf32>
    %1141 = vector.broadcast %130 : f32 to vector<8x512xf32>
    %1142 = arith.mulf %1141, %1140 : vector<8x512xf32>
    %1143 = arith.addf %1129, %1142 : vector<8x512xf32>
    %1144 = vector.broadcast %30 : f32 to vector<8x512xf32>
    %1145 = arith.subf %926, %1144 : vector<8x512xf32>
    %cst_135 = arith.constant 0.000000e+00 : f32
    %1146 = vector.broadcast %cst_135 : f32 to vector<8x512xf32>
    %1147 = arith.maximumf %1145, %1146 : vector<8x512xf32>
    %1148 = vector.broadcast %131 : f32 to vector<8x512xf32>
    %1149 = arith.mulf %1148, %1147 : vector<8x512xf32>
    %1150 = arith.addf %1136, %1149 : vector<8x512xf32>
    %1151 = vector.broadcast %31 : f32 to vector<8x512xf32>
    %1152 = arith.subf %926, %1151 : vector<8x512xf32>
    %cst_136 = arith.constant 0.000000e+00 : f32
    %1153 = vector.broadcast %cst_136 : f32 to vector<8x512xf32>
    %1154 = arith.maximumf %1152, %1153 : vector<8x512xf32>
    %1155 = vector.broadcast %132 : f32 to vector<8x512xf32>
    %1156 = arith.mulf %1155, %1154 : vector<8x512xf32>
    %1157 = arith.addf %1143, %1156 : vector<8x512xf32>
    %1158 = vector.broadcast %32 : f32 to vector<8x512xf32>
    %1159 = arith.subf %926, %1158 : vector<8x512xf32>
    %cst_137 = arith.constant 0.000000e+00 : f32
    %1160 = vector.broadcast %cst_137 : f32 to vector<8x512xf32>
    %1161 = arith.maximumf %1159, %1160 : vector<8x512xf32>
    %1162 = vector.broadcast %133 : f32 to vector<8x512xf32>
    %1163 = arith.mulf %1162, %1161 : vector<8x512xf32>
    %1164 = arith.addf %1150, %1163 : vector<8x512xf32>
    %1165 = vector.broadcast %33 : f32 to vector<8x512xf32>
    %1166 = arith.subf %926, %1165 : vector<8x512xf32>
    %cst_138 = arith.constant 0.000000e+00 : f32
    %1167 = vector.broadcast %cst_138 : f32 to vector<8x512xf32>
    %1168 = arith.maximumf %1166, %1167 : vector<8x512xf32>
    %1169 = vector.broadcast %134 : f32 to vector<8x512xf32>
    %1170 = arith.mulf %1169, %1168 : vector<8x512xf32>
    %1171 = arith.addf %1157, %1170 : vector<8x512xf32>
    %1172 = vector.broadcast %34 : f32 to vector<8x512xf32>
    %1173 = arith.subf %926, %1172 : vector<8x512xf32>
    %cst_139 = arith.constant 0.000000e+00 : f32
    %1174 = vector.broadcast %cst_139 : f32 to vector<8x512xf32>
    %1175 = arith.maximumf %1173, %1174 : vector<8x512xf32>
    %1176 = vector.broadcast %135 : f32 to vector<8x512xf32>
    %1177 = arith.mulf %1176, %1175 : vector<8x512xf32>
    %1178 = arith.addf %1164, %1177 : vector<8x512xf32>
    %1179 = vector.broadcast %35 : f32 to vector<8x512xf32>
    %1180 = arith.subf %926, %1179 : vector<8x512xf32>
    %cst_140 = arith.constant 0.000000e+00 : f32
    %1181 = vector.broadcast %cst_140 : f32 to vector<8x512xf32>
    %1182 = arith.maximumf %1180, %1181 : vector<8x512xf32>
    %1183 = vector.broadcast %136 : f32 to vector<8x512xf32>
    %1184 = arith.mulf %1183, %1182 : vector<8x512xf32>
    %1185 = arith.addf %1171, %1184 : vector<8x512xf32>
    %1186 = vector.broadcast %36 : f32 to vector<8x512xf32>
    %1187 = arith.subf %926, %1186 : vector<8x512xf32>
    %cst_141 = arith.constant 0.000000e+00 : f32
    %1188 = vector.broadcast %cst_141 : f32 to vector<8x512xf32>
    %1189 = arith.maximumf %1187, %1188 : vector<8x512xf32>
    %1190 = vector.broadcast %137 : f32 to vector<8x512xf32>
    %1191 = arith.mulf %1190, %1189 : vector<8x512xf32>
    %1192 = arith.addf %1178, %1191 : vector<8x512xf32>
    %1193 = vector.broadcast %37 : f32 to vector<8x512xf32>
    %1194 = arith.subf %926, %1193 : vector<8x512xf32>
    %cst_142 = arith.constant 0.000000e+00 : f32
    %1195 = vector.broadcast %cst_142 : f32 to vector<8x512xf32>
    %1196 = arith.maximumf %1194, %1195 : vector<8x512xf32>
    %1197 = vector.broadcast %138 : f32 to vector<8x512xf32>
    %1198 = arith.mulf %1197, %1196 : vector<8x512xf32>
    %1199 = arith.addf %1185, %1198 : vector<8x512xf32>
    %1200 = vector.broadcast %38 : f32 to vector<8x512xf32>
    %1201 = arith.subf %926, %1200 : vector<8x512xf32>
    %cst_143 = arith.constant 0.000000e+00 : f32
    %1202 = vector.broadcast %cst_143 : f32 to vector<8x512xf32>
    %1203 = arith.maximumf %1201, %1202 : vector<8x512xf32>
    %1204 = vector.broadcast %139 : f32 to vector<8x512xf32>
    %1205 = arith.mulf %1204, %1203 : vector<8x512xf32>
    %1206 = arith.addf %1192, %1205 : vector<8x512xf32>
    %1207 = vector.broadcast %39 : f32 to vector<8x512xf32>
    %1208 = arith.subf %926, %1207 : vector<8x512xf32>
    %cst_144 = arith.constant 0.000000e+00 : f32
    %1209 = vector.broadcast %cst_144 : f32 to vector<8x512xf32>
    %1210 = arith.maximumf %1208, %1209 : vector<8x512xf32>
    %1211 = vector.broadcast %140 : f32 to vector<8x512xf32>
    %1212 = arith.mulf %1211, %1210 : vector<8x512xf32>
    %1213 = arith.addf %1199, %1212 : vector<8x512xf32>
    %1214 = vector.broadcast %40 : f32 to vector<8x512xf32>
    %1215 = arith.subf %926, %1214 : vector<8x512xf32>
    %cst_145 = arith.constant 0.000000e+00 : f32
    %1216 = vector.broadcast %cst_145 : f32 to vector<8x512xf32>
    %1217 = arith.maximumf %1215, %1216 : vector<8x512xf32>
    %1218 = vector.broadcast %141 : f32 to vector<8x512xf32>
    %1219 = arith.mulf %1218, %1217 : vector<8x512xf32>
    %1220 = arith.addf %1206, %1219 : vector<8x512xf32>
    %1221 = vector.broadcast %41 : f32 to vector<8x512xf32>
    %1222 = arith.subf %926, %1221 : vector<8x512xf32>
    %cst_146 = arith.constant 0.000000e+00 : f32
    %1223 = vector.broadcast %cst_146 : f32 to vector<8x512xf32>
    %1224 = arith.maximumf %1222, %1223 : vector<8x512xf32>
    %1225 = vector.broadcast %142 : f32 to vector<8x512xf32>
    %1226 = arith.mulf %1225, %1224 : vector<8x512xf32>
    %1227 = arith.addf %1213, %1226 : vector<8x512xf32>
    %1228 = vector.broadcast %42 : f32 to vector<8x512xf32>
    %1229 = arith.subf %926, %1228 : vector<8x512xf32>
    %cst_147 = arith.constant 0.000000e+00 : f32
    %1230 = vector.broadcast %cst_147 : f32 to vector<8x512xf32>
    %1231 = arith.maximumf %1229, %1230 : vector<8x512xf32>
    %1232 = vector.broadcast %143 : f32 to vector<8x512xf32>
    %1233 = arith.mulf %1232, %1231 : vector<8x512xf32>
    %1234 = arith.addf %1220, %1233 : vector<8x512xf32>
    %1235 = vector.broadcast %43 : f32 to vector<8x512xf32>
    %1236 = arith.subf %926, %1235 : vector<8x512xf32>
    %cst_148 = arith.constant 0.000000e+00 : f32
    %1237 = vector.broadcast %cst_148 : f32 to vector<8x512xf32>
    %1238 = arith.maximumf %1236, %1237 : vector<8x512xf32>
    %1239 = vector.broadcast %144 : f32 to vector<8x512xf32>
    %1240 = arith.mulf %1239, %1238 : vector<8x512xf32>
    %1241 = arith.addf %1227, %1240 : vector<8x512xf32>
    %1242 = vector.broadcast %44 : f32 to vector<8x512xf32>
    %1243 = arith.subf %926, %1242 : vector<8x512xf32>
    %cst_149 = arith.constant 0.000000e+00 : f32
    %1244 = vector.broadcast %cst_149 : f32 to vector<8x512xf32>
    %1245 = arith.maximumf %1243, %1244 : vector<8x512xf32>
    %1246 = vector.broadcast %145 : f32 to vector<8x512xf32>
    %1247 = arith.mulf %1246, %1245 : vector<8x512xf32>
    %1248 = arith.addf %1234, %1247 : vector<8x512xf32>
    %1249 = vector.broadcast %45 : f32 to vector<8x512xf32>
    %1250 = arith.subf %926, %1249 : vector<8x512xf32>
    %cst_150 = arith.constant 0.000000e+00 : f32
    %1251 = vector.broadcast %cst_150 : f32 to vector<8x512xf32>
    %1252 = arith.maximumf %1250, %1251 : vector<8x512xf32>
    %1253 = vector.broadcast %146 : f32 to vector<8x512xf32>
    %1254 = arith.mulf %1253, %1252 : vector<8x512xf32>
    %1255 = arith.addf %1241, %1254 : vector<8x512xf32>
    %1256 = vector.broadcast %46 : f32 to vector<8x512xf32>
    %1257 = arith.subf %926, %1256 : vector<8x512xf32>
    %cst_151 = arith.constant 0.000000e+00 : f32
    %1258 = vector.broadcast %cst_151 : f32 to vector<8x512xf32>
    %1259 = arith.maximumf %1257, %1258 : vector<8x512xf32>
    %1260 = vector.broadcast %147 : f32 to vector<8x512xf32>
    %1261 = arith.mulf %1260, %1259 : vector<8x512xf32>
    %1262 = arith.addf %1248, %1261 : vector<8x512xf32>
    %1263 = vector.broadcast %47 : f32 to vector<8x512xf32>
    %1264 = arith.subf %926, %1263 : vector<8x512xf32>
    %cst_152 = arith.constant 0.000000e+00 : f32
    %1265 = vector.broadcast %cst_152 : f32 to vector<8x512xf32>
    %1266 = arith.maximumf %1264, %1265 : vector<8x512xf32>
    %1267 = vector.broadcast %148 : f32 to vector<8x512xf32>
    %1268 = arith.mulf %1267, %1266 : vector<8x512xf32>
    %1269 = arith.addf %1255, %1268 : vector<8x512xf32>
    %1270 = vector.broadcast %48 : f32 to vector<8x512xf32>
    %1271 = arith.subf %926, %1270 : vector<8x512xf32>
    %cst_153 = arith.constant 0.000000e+00 : f32
    %1272 = vector.broadcast %cst_153 : f32 to vector<8x512xf32>
    %1273 = arith.maximumf %1271, %1272 : vector<8x512xf32>
    %1274 = vector.broadcast %149 : f32 to vector<8x512xf32>
    %1275 = arith.mulf %1274, %1273 : vector<8x512xf32>
    %1276 = arith.addf %1262, %1275 : vector<8x512xf32>
    %1277 = vector.broadcast %49 : f32 to vector<8x512xf32>
    %1278 = arith.subf %926, %1277 : vector<8x512xf32>
    %cst_154 = arith.constant 0.000000e+00 : f32
    %1279 = vector.broadcast %cst_154 : f32 to vector<8x512xf32>
    %1280 = arith.maximumf %1278, %1279 : vector<8x512xf32>
    %1281 = vector.broadcast %150 : f32 to vector<8x512xf32>
    %1282 = arith.mulf %1281, %1280 : vector<8x512xf32>
    %1283 = arith.addf %1269, %1282 : vector<8x512xf32>
    %1284 = vector.broadcast %50 : f32 to vector<8x512xf32>
    %1285 = arith.subf %926, %1284 : vector<8x512xf32>
    %cst_155 = arith.constant 0.000000e+00 : f32
    %1286 = vector.broadcast %cst_155 : f32 to vector<8x512xf32>
    %1287 = arith.maximumf %1285, %1286 : vector<8x512xf32>
    %1288 = vector.broadcast %151 : f32 to vector<8x512xf32>
    %1289 = arith.mulf %1288, %1287 : vector<8x512xf32>
    %1290 = arith.addf %1276, %1289 : vector<8x512xf32>
    %1291 = vector.broadcast %51 : f32 to vector<8x512xf32>
    %1292 = arith.subf %926, %1291 : vector<8x512xf32>
    %cst_156 = arith.constant 0.000000e+00 : f32
    %1293 = vector.broadcast %cst_156 : f32 to vector<8x512xf32>
    %1294 = arith.maximumf %1292, %1293 : vector<8x512xf32>
    %1295 = vector.broadcast %152 : f32 to vector<8x512xf32>
    %1296 = arith.mulf %1295, %1294 : vector<8x512xf32>
    %1297 = arith.addf %1283, %1296 : vector<8x512xf32>
    %1298 = vector.broadcast %52 : f32 to vector<8x512xf32>
    %1299 = arith.subf %926, %1298 : vector<8x512xf32>
    %cst_157 = arith.constant 0.000000e+00 : f32
    %1300 = vector.broadcast %cst_157 : f32 to vector<8x512xf32>
    %1301 = arith.maximumf %1299, %1300 : vector<8x512xf32>
    %1302 = vector.broadcast %153 : f32 to vector<8x512xf32>
    %1303 = arith.mulf %1302, %1301 : vector<8x512xf32>
    %1304 = arith.addf %1290, %1303 : vector<8x512xf32>
    %1305 = vector.broadcast %53 : f32 to vector<8x512xf32>
    %1306 = arith.subf %926, %1305 : vector<8x512xf32>
    %cst_158 = arith.constant 0.000000e+00 : f32
    %1307 = vector.broadcast %cst_158 : f32 to vector<8x512xf32>
    %1308 = arith.maximumf %1306, %1307 : vector<8x512xf32>
    %1309 = vector.broadcast %154 : f32 to vector<8x512xf32>
    %1310 = arith.mulf %1309, %1308 : vector<8x512xf32>
    %1311 = arith.addf %1297, %1310 : vector<8x512xf32>
    %1312 = vector.broadcast %54 : f32 to vector<8x512xf32>
    %1313 = arith.subf %926, %1312 : vector<8x512xf32>
    %cst_159 = arith.constant 0.000000e+00 : f32
    %1314 = vector.broadcast %cst_159 : f32 to vector<8x512xf32>
    %1315 = arith.maximumf %1313, %1314 : vector<8x512xf32>
    %1316 = vector.broadcast %155 : f32 to vector<8x512xf32>
    %1317 = arith.mulf %1316, %1315 : vector<8x512xf32>
    %1318 = arith.addf %1304, %1317 : vector<8x512xf32>
    %1319 = vector.broadcast %55 : f32 to vector<8x512xf32>
    %1320 = arith.subf %926, %1319 : vector<8x512xf32>
    %cst_160 = arith.constant 0.000000e+00 : f32
    %1321 = vector.broadcast %cst_160 : f32 to vector<8x512xf32>
    %1322 = arith.maximumf %1320, %1321 : vector<8x512xf32>
    %1323 = vector.broadcast %156 : f32 to vector<8x512xf32>
    %1324 = arith.mulf %1323, %1322 : vector<8x512xf32>
    %1325 = arith.addf %1311, %1324 : vector<8x512xf32>
    %1326 = vector.broadcast %56 : f32 to vector<8x512xf32>
    %1327 = arith.subf %926, %1326 : vector<8x512xf32>
    %cst_161 = arith.constant 0.000000e+00 : f32
    %1328 = vector.broadcast %cst_161 : f32 to vector<8x512xf32>
    %1329 = arith.maximumf %1327, %1328 : vector<8x512xf32>
    %1330 = vector.broadcast %157 : f32 to vector<8x512xf32>
    %1331 = arith.mulf %1330, %1329 : vector<8x512xf32>
    %1332 = arith.addf %1318, %1331 : vector<8x512xf32>
    %1333 = vector.broadcast %57 : f32 to vector<8x512xf32>
    %1334 = arith.subf %926, %1333 : vector<8x512xf32>
    %cst_162 = arith.constant 0.000000e+00 : f32
    %1335 = vector.broadcast %cst_162 : f32 to vector<8x512xf32>
    %1336 = arith.maximumf %1334, %1335 : vector<8x512xf32>
    %1337 = vector.broadcast %158 : f32 to vector<8x512xf32>
    %1338 = arith.mulf %1337, %1336 : vector<8x512xf32>
    %1339 = arith.addf %1325, %1338 : vector<8x512xf32>
    %1340 = vector.broadcast %58 : f32 to vector<8x512xf32>
    %1341 = arith.subf %926, %1340 : vector<8x512xf32>
    %cst_163 = arith.constant 0.000000e+00 : f32
    %1342 = vector.broadcast %cst_163 : f32 to vector<8x512xf32>
    %1343 = arith.maximumf %1341, %1342 : vector<8x512xf32>
    %1344 = vector.broadcast %159 : f32 to vector<8x512xf32>
    %1345 = arith.mulf %1344, %1343 : vector<8x512xf32>
    %1346 = arith.addf %1332, %1345 : vector<8x512xf32>
    %1347 = vector.broadcast %59 : f32 to vector<8x512xf32>
    %1348 = arith.subf %926, %1347 : vector<8x512xf32>
    %cst_164 = arith.constant 0.000000e+00 : f32
    %1349 = vector.broadcast %cst_164 : f32 to vector<8x512xf32>
    %1350 = arith.maximumf %1348, %1349 : vector<8x512xf32>
    %1351 = vector.broadcast %160 : f32 to vector<8x512xf32>
    %1352 = arith.mulf %1351, %1350 : vector<8x512xf32>
    %1353 = arith.addf %1339, %1352 : vector<8x512xf32>
    %1354 = vector.broadcast %60 : f32 to vector<8x512xf32>
    %1355 = arith.subf %926, %1354 : vector<8x512xf32>
    %cst_165 = arith.constant 0.000000e+00 : f32
    %1356 = vector.broadcast %cst_165 : f32 to vector<8x512xf32>
    %1357 = arith.maximumf %1355, %1356 : vector<8x512xf32>
    %1358 = vector.broadcast %161 : f32 to vector<8x512xf32>
    %1359 = arith.mulf %1358, %1357 : vector<8x512xf32>
    %1360 = arith.addf %1346, %1359 : vector<8x512xf32>
    %1361 = vector.broadcast %61 : f32 to vector<8x512xf32>
    %1362 = arith.subf %926, %1361 : vector<8x512xf32>
    %cst_166 = arith.constant 0.000000e+00 : f32
    %1363 = vector.broadcast %cst_166 : f32 to vector<8x512xf32>
    %1364 = arith.maximumf %1362, %1363 : vector<8x512xf32>
    %1365 = vector.broadcast %162 : f32 to vector<8x512xf32>
    %1366 = arith.mulf %1365, %1364 : vector<8x512xf32>
    %1367 = arith.addf %1353, %1366 : vector<8x512xf32>
    %1368 = vector.broadcast %62 : f32 to vector<8x512xf32>
    %1369 = arith.subf %926, %1368 : vector<8x512xf32>
    %cst_167 = arith.constant 0.000000e+00 : f32
    %1370 = vector.broadcast %cst_167 : f32 to vector<8x512xf32>
    %1371 = arith.maximumf %1369, %1370 : vector<8x512xf32>
    %1372 = vector.broadcast %163 : f32 to vector<8x512xf32>
    %1373 = arith.mulf %1372, %1371 : vector<8x512xf32>
    %1374 = arith.addf %1360, %1373 : vector<8x512xf32>
    %1375 = vector.broadcast %63 : f32 to vector<8x512xf32>
    %1376 = arith.subf %926, %1375 : vector<8x512xf32>
    %cst_168 = arith.constant 0.000000e+00 : f32
    %1377 = vector.broadcast %cst_168 : f32 to vector<8x512xf32>
    %1378 = arith.maximumf %1376, %1377 : vector<8x512xf32>
    %1379 = vector.broadcast %164 : f32 to vector<8x512xf32>
    %1380 = arith.mulf %1379, %1378 : vector<8x512xf32>
    %1381 = arith.addf %1367, %1380 : vector<8x512xf32>
    %1382 = vector.broadcast %64 : f32 to vector<8x512xf32>
    %1383 = arith.subf %926, %1382 : vector<8x512xf32>
    %cst_169 = arith.constant 0.000000e+00 : f32
    %1384 = vector.broadcast %cst_169 : f32 to vector<8x512xf32>
    %1385 = arith.maximumf %1383, %1384 : vector<8x512xf32>
    %1386 = vector.broadcast %165 : f32 to vector<8x512xf32>
    %1387 = arith.mulf %1386, %1385 : vector<8x512xf32>
    %1388 = arith.addf %1374, %1387 : vector<8x512xf32>
    %1389 = vector.broadcast %65 : f32 to vector<8x512xf32>
    %1390 = arith.subf %926, %1389 : vector<8x512xf32>
    %cst_170 = arith.constant 0.000000e+00 : f32
    %1391 = vector.broadcast %cst_170 : f32 to vector<8x512xf32>
    %1392 = arith.maximumf %1390, %1391 : vector<8x512xf32>
    %1393 = vector.broadcast %166 : f32 to vector<8x512xf32>
    %1394 = arith.mulf %1393, %1392 : vector<8x512xf32>
    %1395 = arith.addf %1381, %1394 : vector<8x512xf32>
    %1396 = vector.broadcast %66 : f32 to vector<8x512xf32>
    %1397 = arith.subf %926, %1396 : vector<8x512xf32>
    %cst_171 = arith.constant 0.000000e+00 : f32
    %1398 = vector.broadcast %cst_171 : f32 to vector<8x512xf32>
    %1399 = arith.maximumf %1397, %1398 : vector<8x512xf32>
    %1400 = vector.broadcast %167 : f32 to vector<8x512xf32>
    %1401 = arith.mulf %1400, %1399 : vector<8x512xf32>
    %1402 = arith.addf %1388, %1401 : vector<8x512xf32>
    %1403 = vector.broadcast %67 : f32 to vector<8x512xf32>
    %1404 = arith.subf %926, %1403 : vector<8x512xf32>
    %cst_172 = arith.constant 0.000000e+00 : f32
    %1405 = vector.broadcast %cst_172 : f32 to vector<8x512xf32>
    %1406 = arith.maximumf %1404, %1405 : vector<8x512xf32>
    %1407 = vector.broadcast %168 : f32 to vector<8x512xf32>
    %1408 = arith.mulf %1407, %1406 : vector<8x512xf32>
    %1409 = arith.addf %1395, %1408 : vector<8x512xf32>
    %1410 = vector.broadcast %68 : f32 to vector<8x512xf32>
    %1411 = arith.subf %926, %1410 : vector<8x512xf32>
    %cst_173 = arith.constant 0.000000e+00 : f32
    %1412 = vector.broadcast %cst_173 : f32 to vector<8x512xf32>
    %1413 = arith.maximumf %1411, %1412 : vector<8x512xf32>
    %1414 = vector.broadcast %169 : f32 to vector<8x512xf32>
    %1415 = arith.mulf %1414, %1413 : vector<8x512xf32>
    %1416 = arith.addf %1402, %1415 : vector<8x512xf32>
    %1417 = vector.broadcast %69 : f32 to vector<8x512xf32>
    %1418 = arith.subf %926, %1417 : vector<8x512xf32>
    %cst_174 = arith.constant 0.000000e+00 : f32
    %1419 = vector.broadcast %cst_174 : f32 to vector<8x512xf32>
    %1420 = arith.maximumf %1418, %1419 : vector<8x512xf32>
    %1421 = vector.broadcast %170 : f32 to vector<8x512xf32>
    %1422 = arith.mulf %1421, %1420 : vector<8x512xf32>
    %1423 = arith.addf %1409, %1422 : vector<8x512xf32>
    %1424 = vector.broadcast %70 : f32 to vector<8x512xf32>
    %1425 = arith.subf %926, %1424 : vector<8x512xf32>
    %cst_175 = arith.constant 0.000000e+00 : f32
    %1426 = vector.broadcast %cst_175 : f32 to vector<8x512xf32>
    %1427 = arith.maximumf %1425, %1426 : vector<8x512xf32>
    %1428 = vector.broadcast %171 : f32 to vector<8x512xf32>
    %1429 = arith.mulf %1428, %1427 : vector<8x512xf32>
    %1430 = arith.addf %1416, %1429 : vector<8x512xf32>
    %1431 = vector.broadcast %71 : f32 to vector<8x512xf32>
    %1432 = arith.subf %926, %1431 : vector<8x512xf32>
    %cst_176 = arith.constant 0.000000e+00 : f32
    %1433 = vector.broadcast %cst_176 : f32 to vector<8x512xf32>
    %1434 = arith.maximumf %1432, %1433 : vector<8x512xf32>
    %1435 = vector.broadcast %172 : f32 to vector<8x512xf32>
    %1436 = arith.mulf %1435, %1434 : vector<8x512xf32>
    %1437 = arith.addf %1423, %1436 : vector<8x512xf32>
    %1438 = vector.broadcast %72 : f32 to vector<8x512xf32>
    %1439 = arith.subf %926, %1438 : vector<8x512xf32>
    %cst_177 = arith.constant 0.000000e+00 : f32
    %1440 = vector.broadcast %cst_177 : f32 to vector<8x512xf32>
    %1441 = arith.maximumf %1439, %1440 : vector<8x512xf32>
    %1442 = vector.broadcast %173 : f32 to vector<8x512xf32>
    %1443 = arith.mulf %1442, %1441 : vector<8x512xf32>
    %1444 = arith.addf %1430, %1443 : vector<8x512xf32>
    %1445 = vector.broadcast %73 : f32 to vector<8x512xf32>
    %1446 = arith.subf %926, %1445 : vector<8x512xf32>
    %cst_178 = arith.constant 0.000000e+00 : f32
    %1447 = vector.broadcast %cst_178 : f32 to vector<8x512xf32>
    %1448 = arith.maximumf %1446, %1447 : vector<8x512xf32>
    %1449 = vector.broadcast %174 : f32 to vector<8x512xf32>
    %1450 = arith.mulf %1449, %1448 : vector<8x512xf32>
    %1451 = arith.addf %1437, %1450 : vector<8x512xf32>
    %1452 = vector.broadcast %74 : f32 to vector<8x512xf32>
    %1453 = arith.subf %926, %1452 : vector<8x512xf32>
    %cst_179 = arith.constant 0.000000e+00 : f32
    %1454 = vector.broadcast %cst_179 : f32 to vector<8x512xf32>
    %1455 = arith.maximumf %1453, %1454 : vector<8x512xf32>
    %1456 = vector.broadcast %175 : f32 to vector<8x512xf32>
    %1457 = arith.mulf %1456, %1455 : vector<8x512xf32>
    %1458 = arith.addf %1444, %1457 : vector<8x512xf32>
    %1459 = vector.broadcast %75 : f32 to vector<8x512xf32>
    %1460 = arith.subf %926, %1459 : vector<8x512xf32>
    %cst_180 = arith.constant 0.000000e+00 : f32
    %1461 = vector.broadcast %cst_180 : f32 to vector<8x512xf32>
    %1462 = arith.maximumf %1460, %1461 : vector<8x512xf32>
    %1463 = vector.broadcast %176 : f32 to vector<8x512xf32>
    %1464 = arith.mulf %1463, %1462 : vector<8x512xf32>
    %1465 = arith.addf %1451, %1464 : vector<8x512xf32>
    %1466 = vector.broadcast %76 : f32 to vector<8x512xf32>
    %1467 = arith.subf %926, %1466 : vector<8x512xf32>
    %cst_181 = arith.constant 0.000000e+00 : f32
    %1468 = vector.broadcast %cst_181 : f32 to vector<8x512xf32>
    %1469 = arith.maximumf %1467, %1468 : vector<8x512xf32>
    %1470 = vector.broadcast %177 : f32 to vector<8x512xf32>
    %1471 = arith.mulf %1470, %1469 : vector<8x512xf32>
    %1472 = arith.addf %1458, %1471 : vector<8x512xf32>
    %1473 = vector.broadcast %77 : f32 to vector<8x512xf32>
    %1474 = arith.subf %926, %1473 : vector<8x512xf32>
    %cst_182 = arith.constant 0.000000e+00 : f32
    %1475 = vector.broadcast %cst_182 : f32 to vector<8x512xf32>
    %1476 = arith.maximumf %1474, %1475 : vector<8x512xf32>
    %1477 = vector.broadcast %178 : f32 to vector<8x512xf32>
    %1478 = arith.mulf %1477, %1476 : vector<8x512xf32>
    %1479 = arith.addf %1465, %1478 : vector<8x512xf32>
    %1480 = vector.broadcast %78 : f32 to vector<8x512xf32>
    %1481 = arith.subf %926, %1480 : vector<8x512xf32>
    %cst_183 = arith.constant 0.000000e+00 : f32
    %1482 = vector.broadcast %cst_183 : f32 to vector<8x512xf32>
    %1483 = arith.maximumf %1481, %1482 : vector<8x512xf32>
    %1484 = vector.broadcast %179 : f32 to vector<8x512xf32>
    %1485 = arith.mulf %1484, %1483 : vector<8x512xf32>
    %1486 = arith.addf %1472, %1485 : vector<8x512xf32>
    %1487 = vector.broadcast %79 : f32 to vector<8x512xf32>
    %1488 = arith.subf %926, %1487 : vector<8x512xf32>
    %cst_184 = arith.constant 0.000000e+00 : f32
    %1489 = vector.broadcast %cst_184 : f32 to vector<8x512xf32>
    %1490 = arith.maximumf %1488, %1489 : vector<8x512xf32>
    %1491 = vector.broadcast %180 : f32 to vector<8x512xf32>
    %1492 = arith.mulf %1491, %1490 : vector<8x512xf32>
    %1493 = arith.addf %1479, %1492 : vector<8x512xf32>
    %1494 = vector.broadcast %80 : f32 to vector<8x512xf32>
    %1495 = arith.subf %926, %1494 : vector<8x512xf32>
    %cst_185 = arith.constant 0.000000e+00 : f32
    %1496 = vector.broadcast %cst_185 : f32 to vector<8x512xf32>
    %1497 = arith.maximumf %1495, %1496 : vector<8x512xf32>
    %1498 = vector.broadcast %181 : f32 to vector<8x512xf32>
    %1499 = arith.mulf %1498, %1497 : vector<8x512xf32>
    %1500 = arith.addf %1486, %1499 : vector<8x512xf32>
    %1501 = vector.broadcast %81 : f32 to vector<8x512xf32>
    %1502 = arith.subf %926, %1501 : vector<8x512xf32>
    %cst_186 = arith.constant 0.000000e+00 : f32
    %1503 = vector.broadcast %cst_186 : f32 to vector<8x512xf32>
    %1504 = arith.maximumf %1502, %1503 : vector<8x512xf32>
    %1505 = vector.broadcast %182 : f32 to vector<8x512xf32>
    %1506 = arith.mulf %1505, %1504 : vector<8x512xf32>
    %1507 = arith.addf %1493, %1506 : vector<8x512xf32>
    %1508 = vector.broadcast %82 : f32 to vector<8x512xf32>
    %1509 = arith.subf %926, %1508 : vector<8x512xf32>
    %cst_187 = arith.constant 0.000000e+00 : f32
    %1510 = vector.broadcast %cst_187 : f32 to vector<8x512xf32>
    %1511 = arith.maximumf %1509, %1510 : vector<8x512xf32>
    %1512 = vector.broadcast %183 : f32 to vector<8x512xf32>
    %1513 = arith.mulf %1512, %1511 : vector<8x512xf32>
    %1514 = arith.addf %1500, %1513 : vector<8x512xf32>
    %1515 = vector.broadcast %83 : f32 to vector<8x512xf32>
    %1516 = arith.subf %926, %1515 : vector<8x512xf32>
    %cst_188 = arith.constant 0.000000e+00 : f32
    %1517 = vector.broadcast %cst_188 : f32 to vector<8x512xf32>
    %1518 = arith.maximumf %1516, %1517 : vector<8x512xf32>
    %1519 = vector.broadcast %184 : f32 to vector<8x512xf32>
    %1520 = arith.mulf %1519, %1518 : vector<8x512xf32>
    %1521 = arith.addf %1507, %1520 : vector<8x512xf32>
    %1522 = vector.broadcast %84 : f32 to vector<8x512xf32>
    %1523 = arith.subf %926, %1522 : vector<8x512xf32>
    %cst_189 = arith.constant 0.000000e+00 : f32
    %1524 = vector.broadcast %cst_189 : f32 to vector<8x512xf32>
    %1525 = arith.maximumf %1523, %1524 : vector<8x512xf32>
    %1526 = vector.broadcast %185 : f32 to vector<8x512xf32>
    %1527 = arith.mulf %1526, %1525 : vector<8x512xf32>
    %1528 = arith.addf %1514, %1527 : vector<8x512xf32>
    %1529 = vector.broadcast %85 : f32 to vector<8x512xf32>
    %1530 = arith.subf %926, %1529 : vector<8x512xf32>
    %cst_190 = arith.constant 0.000000e+00 : f32
    %1531 = vector.broadcast %cst_190 : f32 to vector<8x512xf32>
    %1532 = arith.maximumf %1530, %1531 : vector<8x512xf32>
    %1533 = vector.broadcast %186 : f32 to vector<8x512xf32>
    %1534 = arith.mulf %1533, %1532 : vector<8x512xf32>
    %1535 = arith.addf %1521, %1534 : vector<8x512xf32>
    %1536 = vector.broadcast %86 : f32 to vector<8x512xf32>
    %1537 = arith.subf %926, %1536 : vector<8x512xf32>
    %cst_191 = arith.constant 0.000000e+00 : f32
    %1538 = vector.broadcast %cst_191 : f32 to vector<8x512xf32>
    %1539 = arith.maximumf %1537, %1538 : vector<8x512xf32>
    %1540 = vector.broadcast %187 : f32 to vector<8x512xf32>
    %1541 = arith.mulf %1540, %1539 : vector<8x512xf32>
    %1542 = arith.addf %1528, %1541 : vector<8x512xf32>
    %1543 = vector.broadcast %87 : f32 to vector<8x512xf32>
    %1544 = arith.subf %926, %1543 : vector<8x512xf32>
    %cst_192 = arith.constant 0.000000e+00 : f32
    %1545 = vector.broadcast %cst_192 : f32 to vector<8x512xf32>
    %1546 = arith.maximumf %1544, %1545 : vector<8x512xf32>
    %1547 = vector.broadcast %188 : f32 to vector<8x512xf32>
    %1548 = arith.mulf %1547, %1546 : vector<8x512xf32>
    %1549 = arith.addf %1535, %1548 : vector<8x512xf32>
    %1550 = vector.broadcast %88 : f32 to vector<8x512xf32>
    %1551 = arith.subf %926, %1550 : vector<8x512xf32>
    %cst_193 = arith.constant 0.000000e+00 : f32
    %1552 = vector.broadcast %cst_193 : f32 to vector<8x512xf32>
    %1553 = arith.maximumf %1551, %1552 : vector<8x512xf32>
    %1554 = vector.broadcast %189 : f32 to vector<8x512xf32>
    %1555 = arith.mulf %1554, %1553 : vector<8x512xf32>
    %1556 = arith.addf %1542, %1555 : vector<8x512xf32>
    %1557 = vector.broadcast %89 : f32 to vector<8x512xf32>
    %1558 = arith.subf %926, %1557 : vector<8x512xf32>
    %cst_194 = arith.constant 0.000000e+00 : f32
    %1559 = vector.broadcast %cst_194 : f32 to vector<8x512xf32>
    %1560 = arith.maximumf %1558, %1559 : vector<8x512xf32>
    %1561 = vector.broadcast %190 : f32 to vector<8x512xf32>
    %1562 = arith.mulf %1561, %1560 : vector<8x512xf32>
    %1563 = arith.addf %1549, %1562 : vector<8x512xf32>
    %1564 = vector.broadcast %90 : f32 to vector<8x512xf32>
    %1565 = arith.subf %926, %1564 : vector<8x512xf32>
    %cst_195 = arith.constant 0.000000e+00 : f32
    %1566 = vector.broadcast %cst_195 : f32 to vector<8x512xf32>
    %1567 = arith.maximumf %1565, %1566 : vector<8x512xf32>
    %1568 = vector.broadcast %191 : f32 to vector<8x512xf32>
    %1569 = arith.mulf %1568, %1567 : vector<8x512xf32>
    %1570 = arith.addf %1556, %1569 : vector<8x512xf32>
    %1571 = vector.broadcast %91 : f32 to vector<8x512xf32>
    %1572 = arith.subf %926, %1571 : vector<8x512xf32>
    %cst_196 = arith.constant 0.000000e+00 : f32
    %1573 = vector.broadcast %cst_196 : f32 to vector<8x512xf32>
    %1574 = arith.maximumf %1572, %1573 : vector<8x512xf32>
    %1575 = vector.broadcast %192 : f32 to vector<8x512xf32>
    %1576 = arith.mulf %1575, %1574 : vector<8x512xf32>
    %1577 = arith.addf %1563, %1576 : vector<8x512xf32>
    %1578 = vector.broadcast %92 : f32 to vector<8x512xf32>
    %1579 = arith.subf %926, %1578 : vector<8x512xf32>
    %cst_197 = arith.constant 0.000000e+00 : f32
    %1580 = vector.broadcast %cst_197 : f32 to vector<8x512xf32>
    %1581 = arith.maximumf %1579, %1580 : vector<8x512xf32>
    %1582 = vector.broadcast %193 : f32 to vector<8x512xf32>
    %1583 = arith.mulf %1582, %1581 : vector<8x512xf32>
    %1584 = arith.addf %1570, %1583 : vector<8x512xf32>
    %1585 = vector.broadcast %93 : f32 to vector<8x512xf32>
    %1586 = arith.subf %926, %1585 : vector<8x512xf32>
    %cst_198 = arith.constant 0.000000e+00 : f32
    %1587 = vector.broadcast %cst_198 : f32 to vector<8x512xf32>
    %1588 = arith.maximumf %1586, %1587 : vector<8x512xf32>
    %1589 = vector.broadcast %194 : f32 to vector<8x512xf32>
    %1590 = arith.mulf %1589, %1588 : vector<8x512xf32>
    %1591 = arith.addf %1577, %1590 : vector<8x512xf32>
    %1592 = vector.broadcast %94 : f32 to vector<8x512xf32>
    %1593 = arith.subf %926, %1592 : vector<8x512xf32>
    %cst_199 = arith.constant 0.000000e+00 : f32
    %1594 = vector.broadcast %cst_199 : f32 to vector<8x512xf32>
    %1595 = arith.maximumf %1593, %1594 : vector<8x512xf32>
    %1596 = vector.broadcast %195 : f32 to vector<8x512xf32>
    %1597 = arith.mulf %1596, %1595 : vector<8x512xf32>
    %1598 = arith.addf %1584, %1597 : vector<8x512xf32>
    %1599 = vector.broadcast %95 : f32 to vector<8x512xf32>
    %1600 = arith.subf %926, %1599 : vector<8x512xf32>
    %cst_200 = arith.constant 0.000000e+00 : f32
    %1601 = vector.broadcast %cst_200 : f32 to vector<8x512xf32>
    %1602 = arith.maximumf %1600, %1601 : vector<8x512xf32>
    %1603 = vector.broadcast %196 : f32 to vector<8x512xf32>
    %1604 = arith.mulf %1603, %1602 : vector<8x512xf32>
    %1605 = arith.addf %1591, %1604 : vector<8x512xf32>
    %1606 = vector.broadcast %96 : f32 to vector<8x512xf32>
    %1607 = arith.subf %926, %1606 : vector<8x512xf32>
    %cst_201 = arith.constant 0.000000e+00 : f32
    %1608 = vector.broadcast %cst_201 : f32 to vector<8x512xf32>
    %1609 = arith.maximumf %1607, %1608 : vector<8x512xf32>
    %1610 = vector.broadcast %197 : f32 to vector<8x512xf32>
    %1611 = arith.mulf %1610, %1609 : vector<8x512xf32>
    %1612 = arith.addf %1598, %1611 : vector<8x512xf32>
    %1613 = vector.broadcast %97 : f32 to vector<8x512xf32>
    %1614 = arith.subf %926, %1613 : vector<8x512xf32>
    %cst_202 = arith.constant 0.000000e+00 : f32
    %1615 = vector.broadcast %cst_202 : f32 to vector<8x512xf32>
    %1616 = arith.maximumf %1614, %1615 : vector<8x512xf32>
    %1617 = vector.broadcast %198 : f32 to vector<8x512xf32>
    %1618 = arith.mulf %1617, %1616 : vector<8x512xf32>
    %1619 = arith.addf %1605, %1618 : vector<8x512xf32>
    %1620 = vector.broadcast %98 : f32 to vector<8x512xf32>
    %1621 = arith.subf %926, %1620 : vector<8x512xf32>
    %cst_203 = arith.constant 0.000000e+00 : f32
    %1622 = vector.broadcast %cst_203 : f32 to vector<8x512xf32>
    %1623 = arith.maximumf %1621, %1622 : vector<8x512xf32>
    %1624 = vector.broadcast %199 : f32 to vector<8x512xf32>
    %1625 = arith.mulf %1624, %1623 : vector<8x512xf32>
    %1626 = arith.addf %1612, %1625 : vector<8x512xf32>
    %1627 = vector.broadcast %99 : f32 to vector<8x512xf32>
    %1628 = arith.subf %926, %1627 : vector<8x512xf32>
    %cst_204 = arith.constant 0.000000e+00 : f32
    %1629 = vector.broadcast %cst_204 : f32 to vector<8x512xf32>
    %1630 = arith.maximumf %1628, %1629 : vector<8x512xf32>
    %1631 = vector.broadcast %200 : f32 to vector<8x512xf32>
    %1632 = arith.mulf %1631, %1630 : vector<8x512xf32>
    %1633 = arith.addf %1619, %1632 : vector<8x512xf32>
    %1634 = vector.broadcast %100 : f32 to vector<8x512xf32>
    %1635 = arith.subf %926, %1634 : vector<8x512xf32>
    %cst_205 = arith.constant 0.000000e+00 : f32
    %1636 = vector.broadcast %cst_205 : f32 to vector<8x512xf32>
    %1637 = arith.maximumf %1635, %1636 : vector<8x512xf32>
    %1638 = vector.broadcast %201 : f32 to vector<8x512xf32>
    %1639 = arith.mulf %1638, %1637 : vector<8x512xf32>
    %1640 = arith.addf %1626, %1639 : vector<8x512xf32>
    %1641 = arith.addf %1640, %1633 : vector<8x512xf32>
    %1642 = arith.index_cast %205 : i32 to index
    %c0_206 = arith.constant 0 : index
    %1643 = vector.load %arg5[%1642, %c0_206] : memref<8x512xf32, #tpu.memory_space<vmem>>, vector<8x512xf32>
    tpu.vector_store %arg5[%1642, %c0_206], %1641 {strides = array<i32>} : memref<8x512xf32, #tpu.memory_space<vmem>>, vector<8x512xf32>,
    %c1_i32 = arith.constant 1 : i32
    return
  }
  func.func @transform_0(%arg0: i32) -> i32 {
    %c0_i32 = arith.constant 0 : i32
    %c0_i32_0 = arith.constant 0 : i32
    return %c0_i32 : i32
  }
  func.func @transform_1(%arg0: i32) -> (i32, i32) {
    %c0_i32 = arith.constant 0 : i32
    %c0_i32_0 = arith.constant 0 : i32
    return %arg0, %c0_i32 : i32, i32
  }
  func.func @transform_2(%arg0: i32) -> (i32, i32) {
    %c0_i32 = arith.constant 0 : i32
    %c0_i32_0 = arith.constant 0 : i32
    return %arg0, %c0_i32 : i32, i32
  }
  func.func @transform_3(%arg0: i32) -> (i32, i32) {
    %c0_i32 = arith.constant 0 : i32
    %c0_i32_0 = arith.constant 0 : i32
    return %arg0, %c0_i32 : i32, i32
  }
  func.func @transform_4(%arg0: i32) -> (i32, i32) {
    %c0_i32 = arith.constant 0 : i32
    %c0_i32_0 = arith.constant 0 : i32
    return %arg0, %c0_i32 : i32, i32
  }
}

</mosaic_0001>

<bundles_post_ra>
// kernel: _pwl_apply_2d.1
= control target key start
LH: loop header
LB: loop body
LE: loop exit
PB: predicated region body
PF: predicated region fallthrough
CT: control target
= control target key end

     0   :  { %10 = vsyncpa [#allocation5], 0  ;;  %s8168_s0 = inlined_call_operand.hbm [shape: f32[204], index: 0, kind: input, shape index: {}]   ;;  %s8169_s1 = inlined_call_operand.hbm [shape: f32[8,512], index: 1, kind: input, shape index: {}]   ;;  %s8170_s2 = inlined_call_operand.hbm [shape: f32[8,512], index: 2, kind: input, shape index: {}]   ;;  %s8171_s3 = inlined_call_operand.hbm [shape: f32[8,512], index: 3, kind: output, shape index: {0}]   ;;  %s8172_s4 = inlined_call_operand.hbm [shape: f32[8,512], index: 4, kind: output, shape index: {1}]  }
   0x1   :  { %11 = vsyncpa [#allocation3], 0 }
   0x2   :  { %12 = vsyncpa [#allocation8], 0 }
   0x3   :  { %13 = vsyncpa [#allocation4], 0 }
   0x4   :  { %14 = vsyncpa [#allocation11], 0  ;;  %s4005_s17 = scalar_lea.hbm %s8168_s0, 32 }
   0x5   :  { %p4006_p0 = scmp.ne.s32.totalorder %s8168_s0, %s4005_s17  ;;  %p4009_p1 = scmp.lt.u32.totalorder %s4005_s17, %s8168_s0 }
   0x7   :  { %p4011_p2 = pnand %p4009_p1, %p4006_p0 }
   0x9   :  { %4014 = shalt.err (!%p4011_p2)
}
   0xa   :  { %s4113_s22 = smov [#allocation2]   ;;  %s4114_s25 = smov [#allocation6]  }
   0xb   :  { %22 = dma.hbm_to_smem %s8168_s0, 32, %s4113_s22, [#allocation5]  }
   0xc   :  { %s29_s26 = sshll.u32 %s4114_s25, 4  ;;  %s4115_s27 = smov [#allocation7]   ;;  %s30_s26 = int_to_ptr.vmem [resolvable:$true] %s29_s26 }
   0xd   :  { %s39_s28 = sshll.u32 %s4115_s27, 4  ;;  %s4015_s5 = scalar_lea.hbm %s8169_s1, 512  ;;  %s40_s28 = int_to_ptr.vmem [resolvable:$true] %s39_s28 }
   0xe   :  { %p4016_p3 = scmp.ne.s32.totalorder %s8169_s1, %s4015_s5  ;;  %p4019_p4 = scmp.lt.u32.totalorder %s4015_s5, %s8169_s1 }
  0x10   :  { %p4021_p5 = pnand %p4019_p4, %p4016_p3 }
  0x12   :  { %4024 = shalt.err (!%p4021_p5)
}
  0x13   :  { %s4025_s0 = scalar_lea.vmem %s30_s26, 512  ;;  %p4030_p7 = scmp.lt.s32.totalorder %s30_s26, %s30_s26 }
  0x14   :  { %p4026_p6 = scmp.ne.s32.totalorder %s30_s26, %s4025_s0  ;;  %p4031_p8 = scmp.lt.s32.totalorder %s4025_s0, %s4025_s0 }
  0x16   :  { %p4032_p9 = por %p4031_p8, %p4030_p7 }
  0x18   :  { %p4033_p10 = pnand %p4032_p9, %p4026_p6 }
  0x1a   :  { %4036 = shalt.err (!%p4033_p10)
}
  0x1b   :  { %32 = dma.hbm_to_vmem [thread:$0]  %s8169_s1, 512, %s30_s26, [#allocation3]  }
  0x1c   :  { %s4037_s14 = scalar_lea.hbm %s8170_s2, 512 }
  0x1d   :  { %p4038_p11 = scmp.ne.s32.totalorder %s8170_s2, %s4037_s14  ;;  %p4041_p12 = scmp.lt.u32.totalorder %s4037_s14, %s8170_s2 }
  0x1f   :  { %p4043_p13 = pnand %p4041_p12, %p4038_p11 }
  0x21   :  { %4046 = shalt.err (!%p4043_p13)
}
  0x22   :  { %s4047_s19 = scalar_lea.vmem %s40_s28, 512  ;;  %p4052_p1 = scmp.lt.s32.totalorder %s40_s28, %s40_s28 }
  0x23   :  { %p4048_p0 = scmp.ne.s32.totalorder %s40_s28, %s4047_s19  ;;  %p4053_p2 = scmp.lt.s32.totalorder %s4047_s19, %s4047_s19 }
  0x25   :  { %p4054_p3 = por %p4053_p2, %p4052_p1 }
  0x27   :  { %p4055_p4 = pnand %p4054_p3, %p4048_p0 }
  0x29   :  { %4058 = shalt.err (!%p4055_p4)
}
  0x2a   :  { %42 = dma.hbm_to_vmem [thread:$0]  %s8170_s2, 512, %s40_s28, [#allocation8]  }
  0x2b   :  { %4103 = dma.done.wait [#allocation5], 32  }
  0x2c   :  { %4104 = vsyncadd [#allocation5], 4294967264 }
  0x2d   :  { %4105 = dma.done.wait [#allocation3], 512  }
  0x2e   :  { %4106 = vsyncadd [#allocation3], 4294966784 }
  0x2f   :  { %4107 = dma.done.wait [#allocation8], 512  }
  0x30   :  { %4108 = vsyncadd [#allocation8], 4294966784 }
  0x31   :  { %52 = sfence }
  0x32   :  { %s53_s21 = sld [smem:[#allocation2]]  ;;  %s3773_s22 = sld [smem:[#allocation2 + $0x1]]  ;;  %v4179_v0 = vld [vmem:[#allocation6] sm:$0xff]  ;;  %v4181_v1 = vld [vmem:[#allocation6 + $0x8] sm:$0xff]  ;;  %v4183_v2 = vld [vmem:[#allocation6 + $0x10] sm:$0xff] }
  0x33   :  { %s3774_s23 = sld [smem:[#allocation2 + $0x2]]  ;;  %s3775_s24 = sld [smem:[#allocation2 + $0x3]]  ;;  %8545 = vst [vmem:[#allocation17_spill] sm:$0xff] %v4179_v0  ;;  %8546 = vst [vmem:[#allocation18_spill] sm:$0xff] %v4181_v1  ;;  %v4185_v3 = vld [vmem:[#allocation6 + $0x18] sm:$0xff] }
  0x34   :  { %8547 = vst [vmem:[#allocation19_spill] sm:$0xff] %v4185_v3  ;;  %s4187_s2 = sld [smem:[#allocation2 + $0x4]]  ;;  %s4189_s25 = sld [smem:[#allocation2 + $0x5]] }
  0x35   :  { %s4229_s26 = sld [smem:[#allocation2 + $0x6]]  ;;  %s4231_s27 = sld [smem:[#allocation2 + $0x7]] }
  0x36   :  { %s4265_s28 = sld [smem:[#allocation2 + $0x8]]  ;;  %s4267_s29 = sld [smem:[#allocation2 + $0x9]] }
  0x37   :  { %s4311_s30 = sld [smem:[#allocation2 + $0xa]]  ;;  %s4313_s5 = sld [smem:[#allocation2 + $0xb]] }
  0x38   :  { %v4191_v4 = vstv %s53_s21  ;;  %v4193_v5 = vstv %s3773_s22  ;;  %s4349_s6 = sld [smem:[#allocation2 + $0xc]]  ;;  %s4351_s7 = sld [smem:[#allocation2 + $0xd]] }
  0x39   :  { %8548 = vst [vmem:[#allocation20_spill] sm:$0xff] %v4191_v4  ;;  %8549 = vst [vmem:[#allocation21_spill] sm:$0xff] %v4193_v5  ;;  %v4197_v6 = vsub.f32 %v4179_v0, %v4191_v4  ;;  %v4201_v7 = vsub.f32 %v4181_v1, %v4191_v4  ;;  %v4205_v8 = vsub.f32 %v4183_v2, %v4191_v4  ;;  %v4219_v14 = vstv %s3774_s23  ;;  %s4395_s8 = sld [smem:[#allocation2 + $0xe]]  ;;  %s4397_s9 = sld [smem:[#allocation2 + $0xf]] }
  0x3a   :  { %v4209_v9 = vsub.f32 %v4185_v3, %v4191_v4  ;;  %v293_v10 = vsub.f32 %v4179_v0, %v4193_v5  ;;  %v294_v11 = vsub.f32 %v4181_v1, %v4193_v5  ;;  %v295_v12 = vsub.f32 %v4183_v2, %v4193_v5  ;;  %8552 = vst [vmem:[#allocation24_spill] sm:$0xff] %v4219_v14  ;;  %s4433_s0 = sld [smem:[#allocation2 + $0x10]]  ;;  %s4435_s10 = sld [smem:[#allocation2 + $0x11]] }
  0x3b   :  { %8550 = vst [vmem:[#allocation22_spill] sm:$0xff] %v4197_v6  ;;  %8551 = vst [vmem:[#allocation23_spill] sm:$0xff] %v4201_v7  ;;  %v296_v13 = vsub.f32 %v4185_v3, %v4193_v5  ;;  %v4221_v15 = vstv %s3775_s24  ;;  %v311_v18 = vsub.f32 %v4179_v0, %v4219_v14  ;;  %v312_v19 = vsub.f32 %v4181_v1, %v4219_v14  ;;  %s4479_s11 = sld [smem:[#allocation2 + $0x12]]  ;;  %s4481_s12 = sld [smem:[#allocation2 + $0x13]] }
  0x3c   :  { %8553 = vst [vmem:[#allocation25_spill] sm:$0xff] %v4221_v15  ;;  %v313_v22 = vsub.f32 %v4183_v2, %v4219_v14  ;;  %v314_v23 = vsub.f32 %v4185_v3, %v4219_v14  ;;  %v4239_v24 = vmax.f32 %v293_v10, 0.0  ;;  %v4241_v25 = vmax.f32 %v294_v11, 0.0  ;;  %s4517_s13 = sld [smem:[#allocation2 + $0x14]]  ;;  %s4519_s14 = sld [smem:[#allocation2 + $0x15]] }
  0x3d   :  { %v329_v26 = vsub.f32 %v4179_v0, %v4221_v15  ;;  %v330_v27 = vsub.f32 %v4181_v1, %v4221_v15  ;;  %v4247_v28 = vmax.f32 %v295_v12, 0.0  ;;  %v4249_v29 = vmax.f32 %v296_v13, 0.0  ;;  %s4563_s15 = sld [smem:[#allocation2 + $0x16]]  ;;  %s4573_s16 = sld [smem:[#allocation2 + $0x17]] }
  0x3e   :  { %v331_v30 = vsub.f32 %v4183_v2, %v4221_v15  ;;  %v332_v31 = vsub.f32 %v4185_v3, %v4221_v15  ;;  %v4255_v32 = vmax.f32 %v311_v18, 0.0  ;;  %v4257_v33 = vmax.f32 %v312_v19, 0.0  ;;  %s4591_s17 = sld [smem:[#allocation2 + $0x65]]  ;;  %s4603_s18 = sld [smem:[#allocation2 + $0x66]] }
  0x3f   :  { %v4260_v34 = vstv %s4187_s2  ;;  %v4263_v35 = vstv %s4189_s25  ;;  %v4269_v36 = vmax.f32 %v313_v22, 0.0  ;;  %v4271_v37 = vmax.f32 %v314_v23, 0.0  ;;  %s4605_s19 = sld [smem:[#allocation2 + $0x67]]  ;;  %s4615_s1 = sld [smem:[#allocation2 + $0x68]] }
  0x40   :  { %8554 = vst [vmem:[#allocation26_spill] sm:$0xff] %v4260_v34  ;;  %8555 = vst [vmem:[#allocation27_spill] sm:$0xff] %v4263_v35  ;;  %v347_v38 = vsub.f32 %v4179_v0, %v4260_v34  ;;  %v348_v39 = vsub.f32 %v4181_v1, %v4260_v34  ;;  %v4277_v40 = vmax.f32 %v329_v26, 0.0  ;;  %v4279_v41 = vmax.f32 %v330_v27, 0.0  ;;  %s4617_s20 = sld [smem:[#allocation2 + $0x69]]  ;;  %s4643_s21 = sld [smem:[#allocation2 + $0x6a]] }
  0x41   :  { %v349_v42 = vsub.f32 %v4183_v2, %v4260_v34  ;;  %v350_v43 = vsub.f32 %v4185_v3, %v4260_v34  ;;  %v4285_v44 = vmax.f32 %v331_v30, 0.0  ;;  %v4287_v45 = vmax.f32 %v332_v31, 0.0  ;;  %s4654_s22 = sld [smem:[#allocation2 + $0x6b]]  ;;  %s4656_s23 = sld [smem:[#allocation2 + $0x6c]] }
  0x42   :  { %v365_v46 = vsub.f32 %v4179_v0, %v4263_v35  ;;  %v366_v47 = vsub.f32 %v4181_v1, %v4263_v35  ;;  %v4293_v48 = vmax.f32 %v347_v38, 0.0  ;;  %v4295_v49 = vmax.f32 %v348_v39, 0.0  ;;  %s4682_s24 = sld [smem:[#allocation2 + $0x6d]]  ;;  %s4730_s2 = sld [smem:[#allocation2 + $0x6e]] }
  0x43   :  { %v367_v50 = vsub.f32 %v4183_v2, %v4263_v35  ;;  %v368_v51 = vsub.f32 %v4185_v3, %v4263_v35  ;;  %v4301_v52 = vmax.f32 %v349_v42, 0.0  ;;  %v4303_v53 = vmax.f32 %v350_v43, 0.0  ;;  %s4748_s25 = sld [smem:[#allocation2 + $0x6f]] }
  0x44   :  { %v4306_v54 = vstv %s4229_s26  ;;  %v4309_v55 = vstv %s4231_s27  ;;  %v4315_v56 = vmax.f32 %v365_v46, 0.0  ;;  %v4317_v57 = vmax.f32 %v366_v47, 0.0  ;;  %s4750_s26 = sld [smem:[#allocation2 + $0x70]]  ;;  %s4765_s27 = sld [smem:[#allocation2 + $0x71]] }
  0x45   :  { %8556 = vst [vmem:[#allocation28_spill] sm:$0xff] %v4306_v54  ;;  %8557 = vst [vmem:[#allocation29_spill] sm:$0xff] %v4309_v55  ;;  %v383_v58 = vsub.f32 %v4179_v0, %v4306_v54  ;;  %v384_v59 = vsub.f32 %v4181_v1, %v4306_v54  ;;  %v385_v60 = vsub.f32 %v4183_v2, %v4306_v54  ;;  %v4331_v10 = vmax.f32 %v367_v50, 0.0 }
  0x46   :  { %v386_v61 = vsub.f32 %v4185_v3, %v4306_v54  ;;  %v401_v62 = vsub.f32 %v4179_v0, %v4309_v55  ;;  %v402_v63 = vsub.f32 %v4181_v1, %v4309_v55  ;;  %v4333_v11 = vmax.f32 %v368_v51, 0.0 }
  0x47   :  { %v403_v12 = vsub.f32 %v4183_v2, %v4309_v55  ;;  %v404_v13 = vsub.f32 %v4185_v3, %v4309_v55  ;;  %v4339_v18 = vmax.f32 %v383_v58, 0.0  ;;  %v4341_v19 = vmax.f32 %v384_v59, 0.0 }
  0x48   :  { %v4344_v22 = vstv %s4265_s28  ;;  %v4347_v23 = vstv %s4267_s29  ;;  %v4353_v26 = vmax.f32 %v385_v60, 0.0  ;;  %v4355_v27 = vmax.f32 %v386_v61, 0.0  ;;  %s4798_s28 = sld [smem:[#allocation2 + $0x72]]  ;;  %s4816_s29 = sld [smem:[#allocation2 + $0x73]] }
  0x49   :  { %8558 = vst [vmem:[#allocation30_spill] sm:$0xff] %v4344_v22  ;;  %8559 = vst [vmem:[#allocation31_spill] sm:$0xff] %v4347_v23  ;;  %v419_v30 = vsub.f32 %v4179_v0, %v4344_v22  ;;  %v420_v31 = vsub.f32 %v4181_v1, %v4344_v22  ;;  %v4361_v38 = vmax.f32 %v401_v62, 0.0  ;;  %v4363_v39 = vmax.f32 %v402_v63, 0.0 }
  0x4a   :  { %v421_v42 = vsub.f32 %v4183_v2, %v4344_v22  ;;  %v422_v43 = vsub.f32 %v4185_v3, %v4344_v22  ;;  %v4369_v46 = vmax.f32 %v403_v12, 0.0  ;;  %v4371_v47 = vmax.f32 %v404_v13, 0.0 }
  0x4b   :  { %v437_v50 = vsub.f32 %v4179_v0, %v4347_v23  ;;  %v438_v51 = vsub.f32 %v4181_v1, %v4347_v23  ;;  %v4377_v58 = vmax.f32 %v419_v30, 0.0  ;;  %v4379_v59 = vmax.f32 %v420_v31, 0.0 }
  0x4c   :  { %v439_v60 = vsub.f32 %v4183_v2, %v4347_v23  ;;  %v440_v61 = vsub.f32 %v4185_v3, %v4347_v23  ;;  %v4385_v62 = vmax.f32 %v421_v42, 0.0  ;;  %v4387_v63 = vmax.f32 %v422_v43, 0.0 }
  0x4d   :  { %v4390_v12 = vstv %s4311_s30  ;;  %v4393_v13 = vstv %s4313_s5  ;;  %v4399_v30 = vmax.f32 %v437_v50, 0.0  ;;  %v4401_v31 = vmax.f32 %v438_v51, 0.0  ;;  %s4818_s30 = sld [smem:[#allocation2 + $0x74]]  ;;  %s4833_s5 = sld [smem:[#allocation2 + $0x75]] }
  0x4e   :  { %8560 = vst [vmem:[#allocation32_spill] sm:$0xff] %v4390_v12  ;;  %8561 = vst [vmem:[#allocation33_spill] sm:$0xff] %v4393_v13  ;;  %v455_v42 = vsub.f32 %v4179_v0, %v4390_v12  ;;  %v456_v43 = vsub.f32 %v4181_v1, %v4390_v12  ;;  %v457_v21 = vsub.f32 %v4183_v2, %v4390_v12  ;;  %v4415_v51 = vmax.f32 %v439_v60, 0.0 }
  0x4f   :  { %v458_v20 = vsub.f32 %v4185_v3, %v4390_v12  ;;  %v473_v17 = vsub.f32 %v4179_v0, %v4393_v13  ;;  %v474_v50 = vsub.f32 %v4181_v1, %v4393_v13  ;;  %v4417_v16 = vmax.f32 %v440_v61, 0.0 }
  0x50   :  { %v475_v23 = vsub.f32 %v4183_v2, %v4393_v13  ;;  %v476_v22 = vsub.f32 %v4185_v3, %v4393_v13  ;;  %v4423_v55 = vmax.f32 %v455_v42, 0.0  ;;  %v4425_v54 = vmax.f32 %v456_v43, 0.0 }
  0x51   :  { %v4428_v12 = vstv %s4349_s6  ;;  %v4431_v35 = vstv %s4351_s7  ;;  %v4437_v60 = vmax.f32 %v457_v21, 0.0  ;;  %v4439_v61 = vmax.f32 %v458_v20, 0.0  ;;  %s4866_s6 = sld [smem:[#allocation2 + $0x76]]  ;;  %s4884_s7 = sld [smem:[#allocation2 + $0x77]] }
  0x52   :  { %8562 = vst [vmem:[#allocation34_spill] sm:$0xff] %v4428_v12  ;;  %8563 = vst [vmem:[#allocation35_spill] sm:$0xff] %v4431_v35  ;;  %v491_v34 = vsub.f32 %v4179_v0, %v4428_v12  ;;  %v492_v42 = vsub.f32 %v4181_v1, %v4428_v12  ;;  %v4445_v43 = vmax.f32 %v473_v17, 0.0  ;;  %v4447_v13 = vmax.f32 %v474_v50, 0.0 }
  0x53   :  { %8564 = vst [vmem:[#allocation36_spill] sm:$0xff] %v4437_v60  ;;  %8565 = vst [vmem:[#allocation37_spill] sm:$0xff] %v4439_v61  ;;  %v493_v15 = vsub.f32 %v4183_v2, %v4428_v12  ;;  %v494_v21 = vsub.f32 %v4185_v3, %v4428_v12  ;;  %v4453_v20 = vmax.f32 %v475_v23, 0.0  ;;  %v4455_v14 = vmax.f32 %v476_v22, 0.0 }
  0x54   :  { %8566 = vst [vmem:[#allocation38_spill] sm:$0xff] %v4447_v13  ;;  %v509_v5 = vsub.f32 %v4179_v0, %v4431_v35  ;;  %v510_v4 = vsub.f32 %v4181_v1, %v4431_v35  ;;  %v4461_v17 = vmax.f32 %v491_v34, 0.0  ;;  %v4463_v50 = vmax.f32 %v492_v42, 0.0 }
  0x55   :  { %8567 = vst [vmem:[#allocation39_spill] sm:$0xff] %v4453_v20  ;;  %8568 = vst [vmem:[#allocation40_spill] sm:$0xff] %v4455_v14  ;;  %v511_v61 = vsub.f32 %v4183_v2, %v4431_v35  ;;  %v512_v12 = vsub.f32 %v4185_v3, %v4431_v35  ;;  %v4469_v23 = vmax.f32 %v493_v15, 0.0  ;;  %v4471_v22 = vmax.f32 %v494_v21, 0.0 }
  0x56   :  { %8569 = vst [vmem:[#allocation41_spill] sm:$0xff] %v4461_v17  ;;  %8570 = vst [vmem:[#allocation42_spill] sm:$0xff] %v4463_v50  ;;  %v4474_v60 = vstv %s4395_s8  ;;  %v4477_v14 = vstv %s4397_s9  ;;  %v4483_v34 = vmax.f32 %v509_v5, 0.0  ;;  %v4485_v42 = vmax.f32 %v510_v4, 0.0  ;;  %s4886_s8 = sld [smem:[#allocation2 + $0x78]]  ;;  %s4901_s9 = sld [smem:[#allocation2 + $0x79]] }
  0x57   :  { %8571 = vst [vmem:[#allocation43_spill] sm:$0xff] %v4469_v23  ;;  %8572 = vst [vmem:[#allocation44_spill] sm:$0xff] %v4471_v22  ;;  %v527_v15 = vsub.f32 %v4179_v0, %v4474_v60  ;;  %v528_v21 = vsub.f32 %v4181_v1, %v4474_v60  ;;  %v529_v35 = vsub.f32 %v4183_v2, %v4474_v60  ;;  %v4499_v4 = vmax.f32 %v511_v61, 0.0 }
  0x58   :  { %8573 = vst [vmem:[#allocation45_spill] sm:$0xff] %v4474_v60  ;;  %8574 = vst [vmem:[#allocation46_spill] sm:$0xff] %v4477_v14  ;;  %v530_v22 = vsub.f32 %v4185_v3, %v4474_v60  ;;  %v545_v23 = vsub.f32 %v4179_v0, %v4477_v14  ;;  %v546_v5 = vsub.f32 %v4181_v1, %v4477_v14  ;;  %v4512_v60 = vstv %s4433_s0  ;;  %s4950_s0 = sld [smem:[#allocation2 + $0x7a]] }
  0x59   :  { %8575 = vst [vmem:[#allocation47_spill] sm:$0xff] %v4483_v34  ;;  %8576 = vst [vmem:[#allocation48_spill] sm:$0xff] %v4485_v42  ;;  %v4501_v42 = vmax.f32 %v512_v12, 0.0  ;;  %v547_v34 = vsub.f32 %v4183_v2, %v4477_v14  ;;  %v548_v50 = vsub.f32 %v4185_v3, %v4477_v14  ;;  %v4507_v17 = vmax.f32 %v527_v15, 0.0 }
  0x5a   :  { %8577 = vst [vmem:[#allocation49_spill] sm:$0xff] %v4499_v4  ;;  %v4509_v20 = vmax.f32 %v528_v21, 0.0  ;;  %8581 = vst [vmem:[#allocation53_spill] sm:$0xff] %v4512_v60  ;;  %v4515_v13 = vstv %s4435_s10  ;;  %v4521_v12 = vmax.f32 %v529_v35, 0.0  ;;  %v4523_v61 = vmax.f32 %v530_v22, 0.0  ;;  %s4973_s10 = sld [smem:[#allocation2 + $0x7b]] }
  0x5b   :  { %8578 = vst [vmem:[#allocation50_spill] sm:$0xff] %v4501_v42  ;;  %8579 = vst [vmem:[#allocation51_spill] sm:$0xff] %v4507_v17  ;;  %v563_v42 = vsub.f32 %v4179_v0, %v4512_v60  ;;  %v564_v15 = vsub.f32 %v4181_v1, %v4512_v60  ;;  %v4529_v21 = vmax.f32 %v545_v23, 0.0  ;;  %v4531_v14 = vmax.f32 %v546_v5, 0.0 }
  0x5c   :  { %8580 = vst [vmem:[#allocation52_spill] sm:$0xff] %v4509_v20  ;;  %8582 = vst [vmem:[#allocation54_spill] sm:$0xff] %v4515_v13  ;;  %v565_v20 = vsub.f32 %v4183_v2, %v4512_v60  ;;  %v566_v35 = vsub.f32 %v4185_v3, %v4512_v60  ;;  %v4537_v22 = vmax.f32 %v547_v34, 0.0  ;;  %v582_v17 = vsub.f32 %v4181_v1, %v4515_v13 }
  0x5d   :  { %8583 = vst [vmem:[#allocation55_spill] sm:$0xff] %v4521_v12  ;;  %8584 = vst [vmem:[#allocation56_spill] sm:$0xff] %v4523_v61  ;;  %v4539_v61 = vmax.f32 %v548_v50, 0.0  ;;  %v581_v12 = vsub.f32 %v4179_v0, %v4515_v13  ;;  %v4545_v23 = vmax.f32 %v563_v42, 0.0  ;;  %v4547_v5 = vmax.f32 %v564_v15, 0.0 }
  0x5e   :  { %8585 = vst [vmem:[#allocation57_spill] sm:$0xff] %v4529_v21  ;;  %8586 = vst [vmem:[#allocation58_spill] sm:$0xff] %v4531_v14  ;;  %v583_v14 = vsub.f32 %v4183_v2, %v4515_v13  ;;  %v584_v60 = vsub.f32 %v4185_v3, %v4515_v13  ;;  %v4553_v34 = vmax.f32 %v565_v20, 0.0  ;;  %v4555_v50 = vmax.f32 %v566_v35, 0.0 }
  0x5f   :  { %8587 = vst [vmem:[#allocation59_spill] sm:$0xff] %v4537_v22  ;;  %8588 = vst [vmem:[#allocation60_spill] sm:$0xff] %v4539_v61  ;;  %v4558_v61 = vstv %s4479_s11  ;;  %v4561_v22 = vstv %s4481_s12  ;;  %v4565_v42 = vmax.f32 %v581_v12, 0.0  ;;  %v4567_v15 = vmax.f32 %v582_v17, 0.0  ;;  %s4998_s11 = sld [smem:[#allocation2 + $0x18]]  ;;  %s5000_s12 = sld [smem:[#allocation2 + $0x7c]] }
  0x60   :  { %8589 = vst [vmem:[#allocation61_spill] sm:$0xff] %v4545_v23  ;;  %8590 = vst [vmem:[#allocation62_spill] sm:$0xff] %v4547_v5  ;;  %v599_v5 = vsub.f32 %v4179_v0, %v4558_v61  ;;  %v600_v20 = vsub.f32 %v4181_v1, %v4558_v61  ;;  %v601_v35 = vsub.f32 %v4183_v2, %v4558_v61  ;;  %v4598_v21 = vstv %s4517_s13  ;;  %s5044_s13 = sld [smem:[#allocation2 + $0x19]] }
  0x61   :  { %8591 = vst [vmem:[#allocation63_spill] sm:$0xff] %v4553_v34  ;;  %8592 = vst [vmem:[#allocation64_spill] sm:$0xff] %v4555_v50  ;;  %v602_v13 = vsub.f32 %v4185_v3, %v4558_v61  ;;  %v617_v12 = vsub.f32 %v4179_v0, %v4561_v22  ;;  %v618_v17 = vsub.f32 %v4181_v1, %v4561_v22  ;;  %v4583_v50 = vmax.f32 %v583_v14, 0.0 }
  0x62   :  { %8593 = vst [vmem:[#allocation65_spill] sm:$0xff] %v4558_v61  ;;  %8594 = vst [vmem:[#allocation66_spill] sm:$0xff] %v4561_v22  ;;  %v620_v34 = vsub.f32 %v4185_v3, %v4561_v22  ;;  %v4593_v23 = vmax.f32 %v599_v5, 0.0  ;;  %v4595_v61 = vmax.f32 %v600_v20, 0.0  ;;  %v4601_v4 = vstv %s4519_s14  ;;  %s5046_s14 = sld [smem:[#allocation2 + $0x7d]] }
  0x63   :  { %8595 = vst [vmem:[#allocation67_spill] sm:$0xff] %v4565_v42  ;;  %8596 = vst [vmem:[#allocation68_spill] sm:$0xff] %v4567_v15  ;;  %v4585_v15 = vmax.f32 %v584_v60, 0.0  ;;  %v619_v42 = vsub.f32 %v4183_v2, %v4561_v22  ;;  %v4607_v14 = vmax.f32 %v601_v35, 0.0  ;;  %v4609_v60 = vmax.f32 %v602_v13, 0.0 }
  0x64   :  { %8597 = vst [vmem:[#allocation69_spill] sm:$0xff] %v4593_v23  ;;  %8598 = vst [vmem:[#allocation70_spill] sm:$0xff] %v4595_v61  ;;  %v635_v22 = vsub.f32 %v4179_v0, %v4598_v21  ;;  %v636_v5 = vsub.f32 %v4181_v1, %v4598_v21  ;;  %v4619_v20 = vmax.f32 %v617_v12, 0.0  ;;  %v4621_v61 = vmax.f32 %v618_v17, 0.0 }
  0x65   :  { %8599 = vst [vmem:[#allocation71_spill] sm:$0xff] %v4598_v21  ;;  %8600 = vst [vmem:[#allocation72_spill] sm:$0xff] %v4601_v4  ;;  %v637_v35 = vsub.f32 %v4183_v2, %v4598_v21  ;;  %v638_v13 = vsub.f32 %v4185_v3, %v4598_v21  ;;  %v653_v23 = vsub.f32 %v4179_v0, %v4601_v4  ;;  %v8621_v0 = vmax.f32 %v4209_v9, 0.0 }
  0x66   :  { %8601 = vst [vmem:[#allocation73_spill] sm:$0xff] %v4607_v14  ;;  %8602 = vst [vmem:[#allocation74_spill] sm:$0xff] %v4609_v60  ;;  %v4627_v60 = vmax.f32 %v619_v42, 0.0  ;;  %v4629_v14 = vmax.f32 %v620_v34, 0.0  ;;  %v654_v12 = vsub.f32 %v4181_v1, %v4601_v4  ;;  %v4635_v17 = vmax.f32 %v635_v22, 0.0 }
  0x67   :  { %8603 = vst [vmem:[#allocation75_spill] sm:$0xff] %v4619_v20  ;;  %8604 = vst [vmem:[#allocation76_spill] sm:$0xff] %v4621_v61  ;;  %v4637_v61 = vmax.f32 %v636_v5, 0.0  ;;  %v655_v20 = vsub.f32 %v4183_v2, %v4601_v4  ;;  %v656_v42 = vsub.f32 %v4185_v3, %v4601_v4  ;;  %v4645_v34 = vmax.f32 %v637_v35, 0.0 }
  0x68   :  { %v4647_v21 = vmax.f32 %v638_v13, 0.0  ;;  %v4649_v1 = vmax.f32 %v653_v23, 0.0  ;;  %v4652_v22 = vstv %s4563_s15  ;;  %v4659_v5 = vstv %s4591_s17  ;;  %s5061_s15 = sld [smem:[#allocation2 + $0x1a]] }
  0x69   :  { %8605 = vst [vmem:[#allocation77_spill] sm:$0xff] %v4645_v34  ;;  %8608 = vst [vmem:[#allocation80_spill] sm:$0xff] %v4652_v22  ;;  %v4661_v4 = vmax.f32 %v654_v12, 0.0  ;;  %v4663_v3 = vmax.f32 %v655_v20, 0.0  ;;  %v4666_v35 = vstv %s4573_s16  ;;  %v8611_v13 = vmax.f32 %v4197_v6, 0.0  ;;  %s5063_s16 = sld [smem:[#allocation2 + $0x7e]] }
  0x6a   :  { %8606 = vst [vmem:[#allocation78_spill] sm:$0xff] %v4647_v21  ;;  %8607 = vst [vmem:[#allocation79_spill] sm:$0xff] %v4649_v1  ;;  %v8613_v21 = vmax.f32 %v4201_v7, 0.0  ;;  %v4678_v1 = vmax.f32 %v656_v42, 0.0  ;;  %v4685_v20 = vstv %s4603_s18  ;;  %v4691_v6 = vstv %s4615_s1  ;;  %s3974_s17 = sld [smem:[#allocation2 + $0xca]]  ;;  %s3975_s18 = sld [smem:[#allocation2 + $0xcb]] }
  0x6b   :  { %8609 = vst [vmem:[#allocation81_spill] sm:$0xff] %v4659_v5  ;;  %8610 = vst [vmem:[#allocation82_spill] sm:$0xff] %v4666_v35  ;;  %v4671_v23 = vmul.f32 %v4659_v5, %v8611_v13  ;;  %v4688_v35 = vstv %s4605_s19  ;;  %v4694_v13 = vstv %s4617_s20  ;;  %v304_v42 = vmul.f32 %v4685_v20, %v4247_v28  ;;  %s5095_s19 = sld [smem:[#allocation2 + $0x7f]]  ;;  %s5144_s1 = sld [smem:[#allocation2 + $0x1b]] }
  0x6c   :  { %v4676_v34 = vmul.f32 %v4659_v5, %v8613_v21  ;;  %8615 = vst [vmem:[#allocation85_spill] sm:$0xff] %v4678_v1  ;;  %8616 = vst [vmem:[#allocation86_spill] sm:$0xff] %v4685_v20  ;;  %v303_v21 = vmul.f32 %v4685_v20, %v4241_v25  ;;  %v305_v12 = vmul.f32 %v4685_v20, %v4249_v29  ;;  %s5146_s20 = sld [smem:[#allocation2 + $0x80]] }
  0x6d   :  { %8612 = vst [vmem:[#allocation83_spill] sm:$0xff] %v4671_v23  ;;  %8617 = vst [vmem:[#allocation87_spill] sm:$0xff] %v4688_v35  ;;  %v302_v23 = vmul.f32 %v4685_v20, %v4239_v24  ;;  %v4712_v1 = vmul.f32 %v4659_v5, %v8621_v0  ;;  %v4716_v24 = vmul.f32 %v4688_v35, %v4255_v32  ;;  %v4763_v20 = vstv %s4656_s23  ;;  %s5208_s23 = sld [smem:[#allocation2 + $0x81]] }
  0x6e   :  { %8614 = vst [vmem:[#allocation84_spill] sm:$0xff] %v4676_v34  ;;  %8618 = vst [vmem:[#allocation88_spill] sm:$0xff] %v4691_v6  ;;  %v8620_v34 = vmax.f32 %v4205_v8, 0.0  ;;  %v4720_v25 = vmul.f32 %v4688_v35, %v4257_v33  ;;  %v338_v28 = vmul.f32 %v4691_v6, %v4277_v40  ;;  %v339_v29 = vmul.f32 %v4691_v6, %v4279_v41 }
  0x6f   :  { %8619 = vst [vmem:[#allocation89_spill] sm:$0xff] %v4694_v13  ;;  %v340_v0 = vmul.f32 %v4691_v6, %v4285_v44  ;;  %v341_v32 = vmul.f32 %v4691_v6, %v4287_v45  ;;  %v4734_v33 = vmul.f32 %v4688_v35, %v4269_v36  ;;  %v4738_v40 = vmul.f32 %v4688_v35, %v4271_v37 }
  0x70   :  { %v4707_v7 = vmul.f32 %v4659_v5, %v8620_v34  ;;  %v4742_v41 = vmul.f32 %v4694_v13, %v4293_v48  ;;  %v4746_v44 = vmul.f32 %v4694_v13, %v4295_v49  ;;  %v342_v45 = vadd.f32 %v338_v28, %v302_v23  ;;  %8624 = vst [vmem:[#allocation92_spill] sm:$0xff] %v4763_v20  ;;  %v8653_v5 = vld [vmem:[#allocation55_spill] sm:$0xff] }
  0x71   :  { %v343_v36 = vadd.f32 %v339_v29, %v303_v21  ;;  %v344_v34 = vadd.f32 %v340_v0, %v304_v42  ;;  %v345_v6 = vadd.f32 %v341_v32, %v305_v12  ;;  %v4754_v37 = vmul.f32 %v4694_v13, %v4301_v52 }
  0x72   :  { %v4757_v35 = vstv %s4643_s21  ;;  %v4760_v48 = vstv %s4654_s22  ;;  %v4777_v21 = vmul.f32 %v4694_v13, %v4303_v53  ;;  %v4788_v28 = vstv %s4682_s24  ;;  %s5200_s21 = sld [smem:[#allocation2 + $0x1c]]  ;;  %s5202_s22 = sld [smem:[#allocation2 + $0x1d]] }
  0x73   :  { %8622 = vst [vmem:[#allocation90_spill] sm:$0xff] %v4757_v35  ;;  %8623 = vst [vmem:[#allocation91_spill] sm:$0xff] %v4760_v48  ;;  %v374_v49 = vmul.f32 %v4757_v35, %v4315_v56  ;;  %v375_v23 = vmul.f32 %v4757_v35, %v4317_v57  ;;  %v376_v12 = vmul.f32 %v4757_v35, %v4331_v10  ;;  %s5210_s24 = sld [smem:[#allocation2 + $0x82]] }
  0x74   :  { %v377_v52 = vmul.f32 %v4757_v35, %v4333_v11  ;;  %v4781_v42 = vmul.f32 %v4760_v48, %v4339_v18  ;;  %v4785_v56 = vmul.f32 %v4760_v48, %v4341_v19  ;;  %8625 = vst [vmem:[#allocation93_spill] sm:$0xff] %v4788_v28  ;;  %v410_v11 = vmul.f32 %v4763_v20, %v4361_v38 }
  0x75   :  { %v378_v57 = vadd.f32 %v374_v49, %v342_v45  ;;  %v379_v29 = vadd.f32 %v375_v23, %v343_v36  ;;  %v380_v10 = vadd.f32 %v376_v12, %v344_v34  ;;  %v411_v53 = vmul.f32 %v4763_v20, %v4363_v39 }
  0x76   :  { %v381_v0 = vadd.f32 %v377_v52, %v345_v6  ;;  %v412_v18 = vmul.f32 %v4763_v20, %v4369_v46  ;;  %v413_v19 = vmul.f32 %v4763_v20, %v4371_v47  ;;  %v4802_v6 = vmul.f32 %v4760_v48, %v4353_v26 }
  0x77   :  { %v4806_v38 = vmul.f32 %v4760_v48, %v4355_v27  ;;  %v4810_v39 = vmul.f32 %v4788_v28, %v4377_v58  ;;  %v4814_v46 = vmul.f32 %v4788_v28, %v4379_v59  ;;  %v414_v47 = vadd.f32 %v410_v11, %v378_v57  ;;  %v8631_v11 = vld [vmem:[#allocation39_spill] sm:$0xff] }
  0x78   :  { %v415_v26 = vadd.f32 %v411_v53, %v379_v29  ;;  %v416_v32 = vadd.f32 %v412_v18, %v380_v10  ;;  %v417_v45 = vadd.f32 %v413_v19, %v381_v0  ;;  %v4822_v27 = vmul.f32 %v4788_v28, %v4385_v62  ;;  %v8630_v0 = vld [vmem:[#allocation38_spill] sm:$0xff]  ;;  %v8632_v53 = vld [vmem:[#allocation40_spill] sm:$0xff] }
  0x79   :  { %v4825_v36 = vstv %s4730_s2  ;;  %v4828_v58 = vstv %s4748_s25  ;;  %v4831_v34 = vstv %s4750_s26  ;;  %v4845_v12 = vmul.f32 %v4788_v28, %v4387_v63  ;;  %v8633_v18 = vld [vmem:[#allocation36_spill] sm:$0xff]  ;;  %s5284_s2 = sld [smem:[#allocation2 + $0x1e]]  ;;  %s5286_s25 = sld [smem:[#allocation2 + $0x1f]] }
  0x7a   :  { %8626 = vst [vmem:[#allocation94_spill] sm:$0xff] %v4825_v36  ;;  %8627 = vst [vmem:[#allocation95_spill] sm:$0xff] %v4828_v58  ;;  %v446_v59 = vmul.f32 %v4825_v36, %v4399_v30  ;;  %v447_v49 = vmul.f32 %v4825_v36, %v4401_v31  ;;  %v448_v23 = vmul.f32 %v4825_v36, %v4415_v51  ;;  %v4856_v57 = vstv %s4765_s27  ;;  %s5292_s26 = sld [smem:[#allocation2 + $0x83]]  ;;  %s5294_s27 = sld [smem:[#allocation2 + $0x84]] }
  0x7b   :  { %8628 = vst [vmem:[#allocation96_spill] sm:$0xff] %v4831_v34  ;;  %v449_v62 = vmul.f32 %v4825_v36, %v4417_v16  ;;  %v4849_v52 = vmul.f32 %v4828_v58, %v4423_v55  ;;  %v4853_v30 = vmul.f32 %v4828_v58, %v4425_v54  ;;  %8629 = vst [vmem:[#allocation97_spill] sm:$0xff] %v4856_v57  ;;  %v8647_v36 = vld [vmem:[#allocation52_spill] sm:$0xff]  ;;  %v4924_v28 = vstv %s4833_s5  ;;  %s5340_s5 = sld [smem:[#allocation2 + $0x86]] }
  0x7c   :  { %v450_v31 = vadd.f32 %v446_v59, %v414_v47  ;;  %v451_v29 = vadd.f32 %v447_v49, %v415_v26  ;;  %v452_v51 = vadd.f32 %v448_v23, %v416_v32  ;;  %v482_v16 = vmul.f32 %v4831_v34, %v4445_v43  ;;  %v8634_v47 = vld [vmem:[#allocation37_spill] sm:$0xff]  ;;  %8648 = vst [vmem:[#allocation36_spill] sm:$0xff] %v4924_v28 }
  0x7d   :  { %v453_v10 = vadd.f32 %v449_v62, %v417_v45  ;;  %v483_v63 = vmul.f32 %v4831_v34, %v8630_v0  ;;  %v484_v55 = vmul.f32 %v4831_v34, %v8631_v11  ;;  %v485_v54 = vmul.f32 %v4831_v34, %v8632_v53  ;;  %v8635_v26 = vld [vmem:[#allocation41_spill] sm:$0xff]  ;;  %v8636_v45 = vld [vmem:[#allocation42_spill] sm:$0xff]  ;;  %v8637_v11 = vld [vmem:[#allocation43_spill] sm:$0xff] }
  0x7e   :  { %v4870_v19 = vmul.f32 %v4828_v58, %v8633_v18  ;;  %v4874_v43 = vmul.f32 %v4828_v58, %v8634_v47  ;;  %v4878_v32 = vmul.f32 %v4856_v57, %v8635_v26  ;;  %v4882_v59 = vmul.f32 %v4856_v57, %v8636_v45  ;;  %v8641_v45 = vld [vmem:[#allocation47_spill] sm:$0xff] }
  0x7f   :  { %v486_v49 = vadd.f32 %v482_v16, %v450_v31  ;;  %v487_v23 = vadd.f32 %v483_v63, %v451_v29  ;;  %v488_v62 = vadd.f32 %v484_v55, %v452_v51  ;;  %v489_v0 = vadd.f32 %v485_v54, %v453_v10  ;;  %v8642_v31 = vld [vmem:[#allocation48_spill] sm:$0xff]  ;;  %v8643_v51 = vld [vmem:[#allocation49_spill] sm:$0xff]  ;;  %v8644_v16 = vld [vmem:[#allocation50_spill] sm:$0xff] }
  0x80   :  { %v4890_v53 = vmul.f32 %v4856_v57, %v8637_v11  ;;  %v4893_v18 = vstv %s4798_s28  ;;  %v4896_v47 = vstv %s4816_s29  ;;  %v4899_v26 = vstv %s4818_s30  ;;  %v8645_v55 = vld [vmem:[#allocation44_spill] sm:$0xff]  ;;  %v8646_v11 = vld [vmem:[#allocation51_spill] sm:$0xff]  ;;  %s5326_s28 = sld [smem:[#allocation2 + $0x20]]  ;;  %s5328_s29 = sld [smem:[#allocation2 + $0x21]] }
  0x81   :  { %8638 = vst [vmem:[#allocation38_spill] sm:$0xff] %v4893_v18  ;;  %8639 = vst [vmem:[#allocation39_spill] sm:$0xff] %v4896_v47  ;;  %v518_v34 = vmul.f32 %v4893_v18, %v8641_v45  ;;  %v519_v29 = vmul.f32 %v4893_v18, %v8642_v31  ;;  %v520_v10 = vmul.f32 %v4893_v18, %v8643_v51  ;;  %s5338_s30 = sld [smem:[#allocation2 + $0x85]] }
  0x82   :  { %8640 = vst [vmem:[#allocation40_spill] sm:$0xff] %v4899_v26  ;;  %v521_v63 = vmul.f32 %v4893_v18, %v8644_v16  ;;  %v4913_v54 = vmul.f32 %v4856_v57, %v8645_v55  ;;  %v4917_v58 = vmul.f32 %v4896_v47, %v8646_v11  ;;  %v4921_v45 = vmul.f32 %v4896_v47, %v8647_v36  ;;  %v8649_v16 = vld [vmem:[#allocation57_spill] sm:$0xff]  ;;  %v8650_v18 = vld [vmem:[#allocation58_spill] sm:$0xff]  ;;  %v8651_v57 = vld [vmem:[#allocation59_spill] sm:$0xff] }
  0x83   :  { %v522_v31 = vadd.f32 %v518_v34, %v486_v49  ;;  %v523_v20 = vadd.f32 %v519_v29, %v487_v23  ;;  %v524_v51 = vadd.f32 %v520_v10, %v488_v62  ;;  %v554_v55 = vmul.f32 %v4899_v26, %v8649_v16  ;;  %v8652_v36 = vld [vmem:[#allocation60_spill] sm:$0xff]  ;;  %v8655_v62 = vld [vmem:[#allocation61_spill] sm:$0xff]  ;;  %v8657_v29 = vld [vmem:[#allocation62_spill] sm:$0xff] }
  0x84   :  { %v525_v48 = vadd.f32 %v521_v63, %v489_v0  ;;  %v555_v11 = vmul.f32 %v4899_v26, %v8650_v18  ;;  %v556_v35 = vmul.f32 %v4899_v26, %v8651_v57  ;;  %v557_v13 = vmul.f32 %v4899_v26, %v8652_v36  ;;  %v8654_v49 = vld [vmem:[#allocation56_spill] sm:$0xff]  ;;  %v8659_v16 = vld [vmem:[#allocation63_spill] sm:$0xff] }
  0x85   :  { %v4936_v34 = vmul.f32 %v4896_v47, %v8653_v5  ;;  %v4940_v23 = vmul.f32 %v4896_v47, %v8654_v49  ;;  %v4944_v0 = vmul.f32 %v4924_v28, %v8655_v62  ;;  %v4948_v18 = vmul.f32 %v4924_v28, %v8657_v29  ;;  %v8664_v47 = vld [vmem:[#allocation67_spill] sm:$0xff] }
  0x86   :  { %v558_v57 = vadd.f32 %v554_v55, %v522_v31  ;;  %v559_v10 = vadd.f32 %v555_v11, %v523_v20  ;;  %v560_v63 = vadd.f32 %v556_v35, %v524_v51  ;;  %v561_v5 = vadd.f32 %v557_v13, %v525_v48  ;;  %v8666_v13 = vld [vmem:[#allocation64_spill] sm:$0xff]  ;;  %v8667_v51 = vld [vmem:[#allocation69_spill] sm:$0xff] }
  0x87   :  { %8656 = vst [vmem:[#allocation37_spill] sm:$0xff] %v4944_v0  ;;  %8658 = vst [vmem:[#allocation41_spill] sm:$0xff] %v4948_v18  ;;  %v4954_v36 = vmul.f32 %v4924_v28, %v8659_v16  ;;  %v4957_v49 = vstv %s4866_s6  ;;  %v4960_v26 = vstv %s4884_s7  ;;  %v4963_v62 = vstv %s4886_s8  ;;  %v8665_v18 = vld [vmem:[#allocation68_spill] sm:$0xff]  ;;  %s5366_s6 = sld [smem:[#allocation2 + $0x22]]  ;;  %s5368_s7 = sld [smem:[#allocation2 + $0x23]] }
  0x88   :  { %8661 = vst [vmem:[#allocation43_spill] sm:$0xff] %v4957_v49  ;;  %8662 = vst [vmem:[#allocation47_spill] sm:$0xff] %v4960_v26  ;;  %v590_v29 = vmul.f32 %v4957_v49, %v8664_v47  ;;  %v591_v31 = vmul.f32 %v4957_v49, %v8665_v18  ;;  %v592_v35 = vmul.f32 %v4957_v49, %v4583_v50  ;;  %v8668_v47 = vld [vmem:[#allocation70_spill] sm:$0xff]  ;;  %v4988_v18 = vstv %s4901_s9  ;;  %s5382_s8 = sld [smem:[#allocation2 + $0x87]]  ;;  %s5384_s9 = sld [smem:[#allocation2 + $0x88]] }
  0x89   :  { %8660 = vst [vmem:[#allocation42_spill] sm:$0xff] %v4954_v36  ;;  %8663 = vst [vmem:[#allocation48_spill] sm:$0xff] %v4963_v62  ;;  %v593_v20 = vmul.f32 %v4957_v49, %v4585_v15  ;;  %v4977_v48 = vmul.f32 %v4924_v28, %v8666_v13  ;;  %v4981_v55 = vmul.f32 %v4960_v26, %v8667_v51  ;;  %v8671_v49 = vld [vmem:[#allocation75_spill] sm:$0xff]  ;;  %v8672_v13 = vld [vmem:[#allocation76_spill] sm:$0xff] }
  0x8a   :  { %v4985_v11 = vmul.f32 %v4960_v26, %v8668_v47  ;;  %8670 = vst [vmem:[#allocation50_spill] sm:$0xff] %v4988_v18  ;;  %v594_v50 = vadd.f32 %v590_v29, %v558_v57  ;;  %v595_v16 = vadd.f32 %v591_v31, %v559_v10  ;;  %v596_v36 = vadd.f32 %v592_v35, %v560_v63  ;;  %v8673_v57 = vld [vmem:[#allocation73_spill] sm:$0xff]  ;;  %v8675_v63 = vld [vmem:[#allocation74_spill] sm:$0xff] }
  0x8b   :  { %v597_v15 = vadd.f32 %v593_v20, %v561_v5  ;;  %v626_v0 = vmul.f32 %v4963_v62, %v8671_v49  ;;  %v627_v28 = vmul.f32 %v4963_v62, %v8672_v13  ;;  %v628_v51 = vmul.f32 %v4963_v62, %v4627_v60  ;;  %v8680_v13 = vld [vmem:[#allocation18_spill] sm:$0xff] }
  0x8c   :  { %8669 = vst [vmem:[#allocation49_spill] sm:$0xff] %v4985_v11  ;;  %v629_v47 = vmul.f32 %v4963_v62, %v4629_v14  ;;  %v5004_v10 = vmul.f32 %v4960_v26, %v8673_v57  ;;  %v5008_v5 = vmul.f32 %v4960_v26, %v8675_v63  ;;  %v5012_v49 = vmul.f32 %v4988_v18, %v4635_v17  ;;  %v8681_v17 = vld [vmem:[#allocation19_spill] sm:$0xff] }
  0x8d   :  { %v5016_v60 = vmul.f32 %v4988_v18, %v4637_v61  ;;  %v630_v14 = vadd.f32 %v626_v0, %v594_v50  ;;  %v631_v29 = vadd.f32 %v627_v28, %v595_v16  ;;  %v632_v31 = vadd.f32 %v628_v51, %v596_v36  ;;  %v8682_v26 = vld [vmem:[#allocation79_spill] sm:$0xff]  ;;  %v8683_v36 = vld [vmem:[#allocation85_spill] sm:$0xff] }
  0x8e   :  { %8674 = vst [vmem:[#allocation44_spill] sm:$0xff] %v5004_v10  ;;  %8676 = vst [vmem:[#allocation51_spill] sm:$0xff] %v5008_v5  ;;  %v633_v35 = vadd.f32 %v629_v47, %v597_v15  ;;  %v5019_v20 = vstv %s4950_s0  ;;  %v672_v57 = vsub.f32 %v8680_v13, %v4652_v22  ;;  %v673_v63 = vsub.f32 %v4183_v2, %v4652_v22  ;;  %v8684_v16 = vld [vmem:[#allocation77_spill] sm:$0xff]  ;;  %v8688_v5 = vld [vmem:[#allocation82_spill] sm:$0xff]  ;;  %s5410_s0 = sld [smem:[#allocation2 + $0x24]] }
  0x8f   :  { %8677 = vst [vmem:[#allocation52_spill] sm:$0xff] %v5012_v49  ;;  %8678 = vst [vmem:[#allocation57_spill] sm:$0xff] %v5016_v60  ;;  %v674_v62 = vsub.f32 %v8681_v17, %v4652_v22  ;;  %v662_v61 = vmul.f32 %v5019_v20, %v8682_v26  ;;  %v663_v28 = vmul.f32 %v5019_v20, %v4661_v4  ;;  %v8686_v51 = vld [vmem:[#allocation17_spill] sm:$0xff] }
  0x90   :  { %8679 = vst [vmem:[#allocation58_spill] sm:$0xff] %v5019_v20  ;;  %v664_v0 = vmul.f32 %v5019_v20, %v4663_v3  ;;  %v665_v50 = vmul.f32 %v5019_v20, %v8683_v36  ;;  %v5037_v15 = vmul.f32 %v4988_v18, %v8684_v16  ;;  %v8687_v47 = vsub.f32 %v8686_v51, %v4652_v22  ;;  %v8689_v3 = vld [vmem:[#allocation78_spill] sm:$0xff] }
  0x91   :  { %v676_v49 = vmax.f32 %v672_v57, 0.0  ;;  %v689_v26 = vsub.f32 %v8686_v51, %v8688_v5  ;;  %v5050_v4 = vmul.f32 %v4988_v18, %v8689_v3  ;;  %v666_v36 = vadd.f32 %v662_v61, %v630_v14 }
  0x92   :  { %8685 = vst [vmem:[#allocation59_spill] sm:$0xff] %v5037_v15  ;;  %v675_v60 = vmax.f32 %v8687_v47, 0.0  ;;  %v667_v16 = vadd.f32 %v663_v28, %v631_v29  ;;  %v5053_v20 = vstv %s4973_s10  ;;  %v668_v22 = vadd.f32 %v664_v0, %v632_v31  ;;  %s5412_s10 = sld [smem:[#allocation2 + $0x25]] }
  0x93   :  { %8690 = vst [vmem:[#allocation60_spill] sm:$0xff] %v5050_v4  ;;  %8691 = vst [vmem:[#allocation55_spill] sm:$0xff] %v5053_v20  ;;  %v669_v47 = vadd.f32 %v665_v50, %v633_v35  ;;  %v677_v57 = vmax.f32 %v673_v63, 0.0  ;;  %v678_v15 = vmax.f32 %v674_v62, 0.0  ;;  %v690_v10 = vsub.f32 %v8680_v13, %v8688_v5 }
  0x94   :  { %v691_v11 = vsub.f32 %v4183_v2, %v8688_v5  ;;  %v692_v3 = vsub.f32 %v8681_v17, %v8688_v5  ;;  %v693_v18 = vmax.f32 %v689_v26, 0.0  ;;  %v5066_v14 = vmul.f32 %v5053_v20, %v675_v60 }
  0x95   :  { %v5069_v29 = vmul.f32 %v5053_v20, %v676_v49  ;;  %v5072_v62 = vstv %s5000_s12  ;;  %v5075_v31 = vstv %s4998_s11  ;;  %v694_v35 = vmax.f32 %v690_v10, 0.0  ;;  %s5426_s11 = sld [smem:[#allocation2 + $0x89]]  ;;  %s5428_s12 = sld [smem:[#allocation2 + $0x8a]] }
  0x96   :  { %8692 = vst [vmem:[#allocation56_spill] sm:$0xff] %v5066_v14  ;;  %8694 = vst [vmem:[#allocation62_spill] sm:$0xff] %v5072_v62  ;;  %v695_v63 = vmax.f32 %v691_v11, 0.0  ;;  %v698_v61 = vmul.f32 %v5072_v62, %v693_v18  ;;  %v707_v28 = vsub.f32 %v8686_v51, %v5075_v31  ;;  %v696_v0 = vmax.f32 %v692_v3, 0.0 }
  0x97   :  { %8693 = vst [vmem:[#allocation61_spill] sm:$0xff] %v5069_v29  ;;  %8695 = vst [vmem:[#allocation63_spill] sm:$0xff] %v5075_v31  ;;  %v708_v50 = vsub.f32 %v8680_v13, %v5075_v31  ;;  %v709_v49 = vsub.f32 %v4183_v2, %v5075_v31  ;;  %v710_v60 = vsub.f32 %v8681_v17, %v5075_v31 }
  0x98   :  { %v5087_v11 = vmul.f32 %v5053_v20, %v677_v57  ;;  %v699_v18 = vmul.f32 %v5072_v62, %v694_v35  ;;  %v700_v10 = vmul.f32 %v5072_v62, %v695_v63  ;;  %v711_v26 = vmax.f32 %v707_v28, 0.0 }
  0x99   :  { %v5092_v3 = vmul.f32 %v5053_v20, %v678_v15  ;;  %v701_v5 = vmul.f32 %v5072_v62, %v696_v0  ;;  %v712_v29 = vmax.f32 %v708_v50, 0.0  ;;  %v713_v14 = vmax.f32 %v709_v49, 0.0  ;;  %v8705_v62 = vld [vmem:[#allocation23_spill] sm:$0xff] }
  0x9a   :  { %8696 = vst [vmem:[#allocation67_spill] sm:$0xff] %v5087_v11  ;;  %v702_v31 = vadd.f32 %v698_v61, %v666_v36  ;;  %v714_v4 = vmax.f32 %v710_v60, 0.0  ;;  %v5098_v57 = vstv %s5046_s14  ;;  %v5101_v11 = vstv %s5044_s13  ;;  %s5454_s13 = sld [smem:[#allocation2 + $0x26]]  ;;  %s5456_s14 = sld [smem:[#allocation2 + $0x27]] }
  0x9b   :  { %8697 = vst [vmem:[#allocation68_spill] sm:$0xff] %v5092_v3  ;;  %8698 = vst [vmem:[#allocation64_spill] sm:$0xff] %v5101_v11  ;;  %v703_v35 = vadd.f32 %v699_v18, %v667_v16  ;;  %v704_v63 = vadd.f32 %v700_v10, %v668_v22  ;;  %v705_v28 = vadd.f32 %v701_v5, %v669_v47  ;;  %v5121_v5 = vstv %s5063_s16  ;;  %v8704_v10 = vld [vmem:[#allocation22_spill] sm:$0xff]  ;;  %s5472_s16 = sld [smem:[#allocation2 + $0x8c]] }
  0x9c   :  { %v5104_v15 = vmul.f32 %v5098_v57, %v711_v26  ;;  %v5107_v0 = vmul.f32 %v5098_v57, %v712_v29  ;;  %v725_v50 = vsub.f32 %v8686_v51, %v5101_v11  ;;  %v726_v36 = vsub.f32 %v8680_v13, %v5101_v11 }
  0x9d   :  { %v727_v61 = vsub.f32 %v4183_v2, %v5101_v11  ;;  %v5116_v49 = vmul.f32 %v5098_v57, %v713_v14  ;;  %v728_v22 = vsub.f32 %v8681_v17, %v5101_v11  ;;  %v5124_v16 = vstv %s5061_s15  ;;  %s5470_s15 = sld [smem:[#allocation2 + $0x8b]] }
  0x9e   :  { %8699 = vst [vmem:[#allocation69_spill] sm:$0xff] %v5104_v15  ;;  %8700 = vst [vmem:[#allocation70_spill] sm:$0xff] %v5107_v0  ;;  %v5126_v47 = vstv %s3975_s18  ;;  %v5128_v29 = vstv %s3974_s17  ;;  %v729_v60 = vmax.f32 %v725_v50, 0.0  ;;  %v730_v18 = vmax.f32 %v726_v36, 0.0  ;;  %s5498_s17 = sld [smem:[#allocation2 + $0x28]]  ;;  %s5500_s18 = sld [smem:[#allocation2 + $0x29]] }
  0x9f   :  { %8701 = vst [vmem:[#allocation75_spill] sm:$0xff] %v5116_v49  ;;  %8702 = vst [vmem:[#allocation76_spill] sm:$0xff] %v5126_v47  ;;  %v270_v26 = vmul.f32 %v5126_v47, %v8704_v10  ;;  %v271_v14 = vmul.f32 %v5126_v47, %v8705_v62  ;;  %v272_v11 = vmul.f32 %v5126_v47, %v4205_v8  ;;  %v731_v49 = vmax.f32 %v727_v61, 0.0 }
  0xa0   :  { %8703 = vst [vmem:[#allocation73_spill] sm:$0xff] %v5128_v29  ;;  %v273_v20 = vmul.f32 %v5126_v47, %v4209_v9  ;;  %v732_v0 = vmax.f32 %v728_v22, 0.0  ;;  %v734_v15 = vmul.f32 %v5121_v5, %v729_v60  ;;  %v735_v50 = vmul.f32 %v5121_v5, %v730_v18  ;;  %v8706_v60 = vld [vmem:[#allocation83_spill] sm:$0xff] }
  0xa1   :  { %v275_v36 = vadd.f32 %v5128_v29, %v270_v26  ;;  %v276_v10 = vadd.f32 %v5128_v29, %v271_v14  ;;  %v277_v3 = vadd.f32 %v5128_v29, %v272_v11  ;;  %v5149_v8 = vmul.f32 %v5098_v57, %v714_v4  ;;  %v8707_v26 = vld [vmem:[#allocation84_spill] sm:$0xff] }
  0xa2   :  { %v278_v62 = vadd.f32 %v5128_v29, %v273_v20  ;;  %v736_v9 = vmul.f32 %v5121_v5, %v731_v49  ;;  %v737_v61 = vmul.f32 %v5121_v5, %v732_v0  ;;  %v5154_v22 = vstv %s5095_s19  ;;  %s5514_s19 = sld [smem:[#allocation2 + $0x8d]] }
  0xa3   :  { %v288_v18 = vadd.f32 %v8706_v60, %v275_v36  ;;  %v289_v14 = vadd.f32 %v8707_v26, %v276_v10  ;;  %v290_v11 = vadd.f32 %v4707_v7, %v277_v3  ;;  %v5160_v29 = vadd.f32 %v734_v15, %v702_v31  ;;  %v5220_v60 = vld [vmem:[#allocation6 + $0x10] sm:$0xff] }
  0xa4   :  { %v291_v20 = vadd.f32 %v4712_v1, %v278_v62  ;;  %v5162_v47 = vadd.f32 %v735_v50, %v703_v35  ;;  %v743_v4 = vsub.f32 %v8686_v51, %v5124_v16  ;;  %v744_v0 = vsub.f32 %v8680_v13, %v5124_v16 }
  0xa5   :  { %v324_v49 = vadd.f32 %v4716_v24, %v288_v18  ;;  %v325_v36 = vadd.f32 %v4720_v25, %v289_v14  ;;  %v326_v10 = vadd.f32 %v4734_v33, %v290_v11  ;;  %v745_v1 = vsub.f32 %v4183_v2, %v5124_v16 }
  0xa6   :  { %v327_v7 = vadd.f32 %v4738_v40, %v291_v20  ;;  %v746_v31 = vsub.f32 %v8681_v17, %v5124_v16  ;;  %v747_v3 = vmax.f32 %v743_v4, 0.0  ;;  %v748_v51 = vmax.f32 %v744_v0, 0.0 }
  0xa7   :  { %v360_v13 = vadd.f32 %v4742_v41, %v324_v49  ;;  %v361_v24 = vadd.f32 %v4746_v44, %v325_v36  ;;  %v362_v25 = vadd.f32 %v4754_v37, %v326_v10  ;;  %v5180_v35 = vadd.f32 %v736_v9, %v704_v63 }
  0xa8   :  { %v363_v33 = vadd.f32 %v4777_v21, %v327_v7  ;;  %v5182_v40 = vadd.f32 %v737_v61, %v705_v28  ;;  %v749_v2 = vmax.f32 %v745_v1, 0.0  ;;  %v750_v15 = vmax.f32 %v746_v31, 0.0  ;;  %v5212_v28 = vld [vmem:[#allocation6] sm:$0xff]  ;;  %v5216_v61 = vld [vmem:[#allocation6 + $0x8] sm:$0xff] }
  0xa9   :  { %v396_v17 = vadd.f32 %v4781_v42, %v360_v13  ;;  %v397_v50 = vadd.f32 %v4785_v56, %v361_v24  ;;  %v398_v62 = vadd.f32 %v4802_v6, %v362_v25  ;;  %v5189_v44 = vmul.f32 %v5154_v22, %v747_v3  ;;  %v8708_v24 = vld [vmem:[#allocation37_spill] sm:$0xff] }
  0xaa   :  { %v399_v41 = vadd.f32 %v4806_v38, %v363_v33  ;;  %v5192_v37 = vmul.f32 %v5154_v22, %v748_v51  ;;  %v5195_v21 = vstv %s5144_s1  ;;  %v5198_v63 = vstv %s5146_s20  ;;  %v8709_v33 = vld [vmem:[#allocation41_spill] sm:$0xff]  ;;  %s5516_s1 = sld [smem:[#allocation2 + $0x8e]]  ;;  %s5542_s20 = sld [smem:[#allocation2 + $0x2a]] }
  0xab   :  { %v432_v42 = vadd.f32 %v4810_v39, %v396_v17  ;;  %v433_v56 = vadd.f32 %v4814_v46, %v397_v50  ;;  %v434_v6 = vadd.f32 %v4822_v27, %v398_v62  ;;  %v761_v9 = vsub.f32 %v5212_v28, %v5195_v21  ;;  %v5224_v27 = vld [vmem:[#allocation6 + $0x18] sm:$0xff] }
  0xac   :  { %v435_v38 = vadd.f32 %v4845_v12, %v399_v41  ;;  %v762_v39 = vsub.f32 %v5216_v61, %v5195_v21  ;;  %v763_v46 = vsub.f32 %v5220_v60, %v5195_v21  ;;  %v764_v12 = vsub.f32 %v5224_v27, %v5195_v21  ;;  %v8712_v41 = vld [vmem:[#allocation44_spill] sm:$0xff] }
  0xad   :  { %v468_v18 = vadd.f32 %v4849_v52, %v432_v42  ;;  %v469_v26 = vadd.f32 %v4853_v30, %v433_v56  ;;  %v470_v14 = vadd.f32 %v4870_v19, %v434_v6  ;;  %v765_v20 = vmax.f32 %v761_v9, 0.0  ;;  %v8713_v56 = vld [vmem:[#allocation51_spill] sm:$0xff] }
  0xae   :  { %v471_v11 = vadd.f32 %v4874_v43, %v435_v38  ;;  %v766_v4 = vmax.f32 %v762_v39, 0.0  ;;  %v767_v0 = vmax.f32 %v763_v46, 0.0  ;;  %v768_v49 = vmax.f32 %v764_v12, 0.0  ;;  %v8714_v46 = vld [vmem:[#allocation52_spill] sm:$0xff]  ;;  %v8715_v12 = vld [vmem:[#allocation57_spill] sm:$0xff] }
  0xaf   :  { %v504_v36 = vadd.f32 %v4878_v32, %v468_v18  ;;  %v505_v10 = vadd.f32 %v4882_v59, %v469_v26  ;;  %v506_v7 = vadd.f32 %v4890_v53, %v470_v14  ;;  %v754_v52 = vmul.f32 %v5154_v22, %v749_v2  ;;  %v8710_v2 = vld [vmem:[#allocation42_spill] sm:$0xff]  ;;  %v8716_v26 = vld [vmem:[#allocation59_spill] sm:$0xff] }
  0xb0   :  { %v507_v1 = vadd.f32 %v4913_v54, %v471_v11  ;;  %v755_v30 = vmul.f32 %v5154_v22, %v750_v15  ;;  %v770_v19 = vmul.f32 %v5198_v63, %v765_v20  ;;  %v771_v43 = vmul.f32 %v5198_v63, %v766_v4  ;;  %v8717_v11 = vld [vmem:[#allocation60_spill] sm:$0xff] }
  0xb1   :  { %v540_v32 = vadd.f32 %v4917_v58, %v504_v36  ;;  %v541_v59 = vadd.f32 %v4921_v45, %v505_v10  ;;  %v542_v53 = vadd.f32 %v4936_v34, %v506_v7  ;;  %v772_v31 = vmul.f32 %v5198_v63, %v767_v0  ;;  %v8718_v10 = vld [vmem:[#allocation56_spill] sm:$0xff] }
  0xb2   :  { %v543_v54 = vadd.f32 %v4940_v23, %v507_v1  ;;  %v773_v3 = vmul.f32 %v5198_v63, %v768_v49  ;;  %v5247_v51 = vadd.f32 %v770_v19, %v5160_v29  ;;  %v5250_v13 = vadd.f32 %v771_v43, %v5162_v47  ;;  %v8711_v47 = vld [vmem:[#allocation49_spill] sm:$0xff]  ;;  %v8720_v43 = vld [vmem:[#allocation67_spill] sm:$0xff] }
  0xb3   :  { %v576_v25 = vadd.f32 %v8708_v24, %v540_v32  ;;  %v577_v58 = vadd.f32 %v8709_v33, %v541_v59  ;;  %v578_v45 = vadd.f32 %v8710_v2, %v542_v53  ;;  %v5257_v15 = vstv %s5200_s21  ;;  %v8719_v1 = vld [vmem:[#allocation61_spill] sm:$0xff]  ;;  %v8721_v59 = vld [vmem:[#allocation68_spill] sm:$0xff]  ;;  %s5544_s21 = sld [smem:[#allocation2 + $0x2b]] }
  0xb4   :  { %v579_v34 = vadd.f32 %v4977_v48, %v543_v54  ;;  %v5260_v23 = vstv %s5208_s23  ;;  %v5263_v17 = vstv %s5202_s22  ;;  %v5266_v50 = vstv %s5210_s24  ;;  %s5558_s22 = sld [smem:[#allocation2 + $0x8f]]  ;;  %s5560_s23 = sld [smem:[#allocation2 + $0x90]] }
  0xb5   :  { %v612_v29 = vadd.f32 %v4981_v55, %v576_v25  ;;  %v613_v62 = vadd.f32 %v8711_v47, %v577_v58  ;;  %v614_v42 = vadd.f32 %v8712_v41, %v578_v45  ;;  %v779_v38 = vsub.f32 %v5212_v28, %v5257_v15  ;;  %v8722_v58 = vld [vmem:[#allocation69_spill] sm:$0xff]  ;;  %v8723_v45 = vld [vmem:[#allocation70_spill] sm:$0xff]  ;;  %s5586_s24 = sld [smem:[#allocation2 + $0x2c]] }
  0xb6   :  { %v615_v6 = vadd.f32 %v8713_v56, %v579_v34  ;;  %v780_v48 = vsub.f32 %v5216_v61, %v5257_v15  ;;  %v781_v9 = vsub.f32 %v5220_v60, %v5257_v15  ;;  %v782_v39 = vsub.f32 %v5224_v27, %v5257_v15 }
  0xb7   :  { %v648_v55 = vadd.f32 %v8714_v46, %v612_v29  ;;  %v649_v18 = vadd.f32 %v8715_v12, %v613_v62  ;;  %v650_v14 = vadd.f32 %v8716_v26, %v614_v42  ;;  %v783_v4 = vmax.f32 %v779_v38, 0.0  ;;  %v8724_v29 = vld [vmem:[#allocation75_spill] sm:$0xff] }
  0xb8   :  { %v651_v20 = vadd.f32 %v8717_v11, %v615_v6  ;;  %v784_v0 = vmax.f32 %v780_v48, 0.0  ;;  %v785_v49 = vmax.f32 %v781_v9, 0.0  ;;  %v786_v36 = vmax.f32 %v782_v39, 0.0 }
  0xb9   :  { %v684_v7 = vadd.f32 %v8718_v10, %v648_v55  ;;  %v685_v19 = vadd.f32 %v8719_v1, %v649_v18  ;;  %v686_v32 = vadd.f32 %v8720_v43, %v650_v14  ;;  %v788_v54 = vmul.f32 %v5260_v23, %v783_v4 }
  0xba   :  { %v687_v53 = vadd.f32 %v8721_v59, %v651_v20  ;;  %v789_v24 = vmul.f32 %v5260_v23, %v784_v0  ;;  %v790_v25 = vmul.f32 %v5260_v23, %v785_v49  ;;  %v791_v33 = vmul.f32 %v5260_v23, %v786_v36 }
  0xbb   :  { %v720_v2 = vadd.f32 %v8722_v58, %v684_v7  ;;  %v721_v34 = vadd.f32 %v8723_v45, %v685_v19  ;;  %v722_v47 = vadd.f32 %v8724_v29, %v686_v32  ;;  %v797_v41 = vsub.f32 %v5212_v28, %v5263_v17 }
  0xbc   :  { %v723_v62 = vadd.f32 %v5149_v8, %v687_v53  ;;  %v798_v42 = vsub.f32 %v5216_v61, %v5263_v17  ;;  %v799_v56 = vsub.f32 %v5220_v60, %v5263_v17  ;;  %v800_v6 = vsub.f32 %v5224_v27, %v5263_v17 }
  0xbd   :  { %v756_v38 = vadd.f32 %v5189_v44, %v720_v2  ;;  %v757_v48 = vadd.f32 %v5192_v37, %v721_v34  ;;  %v758_v9 = vadd.f32 %v754_v52, %v722_v47  ;;  %v801_v8 = vmax.f32 %v797_v41, 0.0 }
  0xbe   :  { %v759_v39 = vadd.f32 %v755_v30, %v723_v62  ;;  %v802_v46 = vmax.f32 %v798_v42, 0.0  ;;  %v803_v55 = vmax.f32 %v799_v56, 0.0  ;;  %v804_v12 = vmax.f32 %v800_v6, 0.0 }
  0xbf   :  { %v776_v18 = vadd.f32 %v772_v31, %v5180_v35  ;;  %v777_v26 = vadd.f32 %v773_v3, %v5182_v40  ;;  %v792_v14 = vadd.f32 %v788_v54, %v756_v38  ;;  %v793_v11 = vadd.f32 %v789_v24, %v757_v48 }
  0xc0   :  { %v794_v20 = vadd.f32 %v790_v25, %v758_v9  ;;  %v795_v44 = vadd.f32 %v791_v33, %v759_v39  ;;  %v806_v37 = vmul.f32 %v5266_v50, %v801_v8  ;;  %v807_v52 = vmul.f32 %v5266_v50, %v802_v46 }
  0xc1   :  { %v808_v30 = vmul.f32 %v5266_v50, %v803_v55  ;;  %v809_v4 = vmul.f32 %v5266_v50, %v804_v12  ;;  %v5321_v0 = vstv %s5284_s2  ;;  %v5324_v49 = vstv %s5286_s25  ;;  %s5588_s2 = sld [smem:[#allocation2 + $0x2d]]  ;;  %s5602_s25 = sld [smem:[#allocation2 + $0x91]] }
  0xc2   :  { %v810_v35 = vadd.f32 %v806_v37, %v5247_v51  ;;  %v811_v40 = vadd.f32 %v807_v52, %v5250_v13  ;;  %v5333_v31 = vstv %s5292_s26  ;;  %v5336_v3 = vstv %s5294_s27  ;;  %s5604_s26 = sld [smem:[#allocation2 + $0x92]]  ;;  %s5630_s27 = sld [smem:[#allocation2 + $0x2e]] }
  0xc3   :  { %v815_v36 = vsub.f32 %v5212_v28, %v5321_v0  ;;  %v816_v10 = vsub.f32 %v5216_v61, %v5321_v0  ;;  %v817_v7 = vsub.f32 %v5220_v60, %v5321_v0  ;;  %v818_v51 = vsub.f32 %v5224_v27, %v5321_v0 }
  0xc4   :  { %v833_v13 = vsub.f32 %v5212_v28, %v5324_v49  ;;  %v834_v1 = vsub.f32 %v5216_v61, %v5324_v49  ;;  %v835_v19 = vsub.f32 %v5220_v60, %v5324_v49  ;;  %v836_v43 = vsub.f32 %v5224_v27, %v5324_v49 }
  0xc5   :  { %v819_v32 = vmax.f32 %v815_v36, 0.0  ;;  %v820_v59 = vmax.f32 %v816_v10, 0.0  ;;  %v821_v53 = vmax.f32 %v817_v7, 0.0  ;;  %v822_v54 = vmax.f32 %v818_v51, 0.0 }
  0xc6   :  { %v837_v24 = vmax.f32 %v833_v13, 0.0  ;;  %v838_v25 = vmax.f32 %v834_v1, 0.0  ;;  %v839_v33 = vmax.f32 %v835_v19, 0.0  ;;  %v840_v58 = vmax.f32 %v836_v43, 0.0 }
  0xc7   :  { %v824_v2 = vmul.f32 %v5333_v31, %v819_v32  ;;  %v825_v45 = vmul.f32 %v5333_v31, %v820_v59  ;;  %v826_v34 = vmul.f32 %v5333_v31, %v821_v53  ;;  %v827_v29 = vmul.f32 %v5333_v31, %v822_v54 }
  0xc8   :  { %v812_v47 = vadd.f32 %v808_v30, %v776_v18  ;;  %v813_v62 = vadd.f32 %v809_v4, %v777_v26  ;;  %v842_v41 = vmul.f32 %v5336_v3, %v837_v24  ;;  %v843_v42 = vmul.f32 %v5336_v3, %v838_v25 }
  0xc9   :  { %v828_v56 = vadd.f32 %v824_v2, %v792_v14  ;;  %v829_v6 = vadd.f32 %v825_v45, %v793_v11  ;;  %v844_v38 = vmul.f32 %v5336_v3, %v839_v33  ;;  %v845_v48 = vmul.f32 %v5336_v3, %v840_v58 }
  0xca   :  { %v830_v9 = vadd.f32 %v826_v34, %v794_v20  ;;  %v831_v39 = vadd.f32 %v827_v29, %v795_v44  ;;  %v846_v8 = vadd.f32 %v842_v41, %v810_v35  ;;  %v847_v46 = vadd.f32 %v843_v42, %v811_v40 }
  0xcb   :  { %v5371_v55 = vstv %s5326_s28  ;;  %v5374_v12 = vstv %s5338_s30  ;;  %v5377_v18 = vstv %s5328_s29  ;;  %v5380_v26 = vstv %s5340_s5  ;;  %s5632_s28 = sld [smem:[#allocation2 + $0x2f]]  ;;  %s5646_s29 = sld [smem:[#allocation2 + $0x93]] }
  0xcc   :  { %v851_v14 = vsub.f32 %v5212_v28, %v5371_v55  ;;  %v852_v11 = vsub.f32 %v5216_v61, %v5371_v55  ;;  %v853_v20 = vsub.f32 %v5220_v60, %v5371_v55  ;;  %v854_v44 = vsub.f32 %v5224_v27, %v5371_v55  ;;  %s5648_s30 = sld [smem:[#allocation2 + $0x94]]  ;;  %s5674_s5 = sld [smem:[#allocation2 + $0x30]] }
  0xcd   :  { %v869_v37 = vsub.f32 %v5212_v28, %v5377_v18  ;;  %v870_v52 = vsub.f32 %v5216_v61, %v5377_v18  ;;  %v871_v30 = vsub.f32 %v5220_v60, %v5377_v18  ;;  %v872_v4 = vsub.f32 %v5224_v27, %v5377_v18 }
  0xce   :  { %v855_v35 = vmax.f32 %v851_v14, 0.0  ;;  %v856_v40 = vmax.f32 %v852_v11, 0.0  ;;  %v857_v36 = vmax.f32 %v853_v20, 0.0  ;;  %v858_v10 = vmax.f32 %v854_v44, 0.0 }
  0xcf   :  { %v873_v7 = vmax.f32 %v869_v37, 0.0  ;;  %v874_v51 = vmax.f32 %v870_v52, 0.0  ;;  %v875_v13 = vmax.f32 %v871_v30, 0.0  ;;  %v876_v1 = vmax.f32 %v872_v4, 0.0 }
  0xd0   :  { %v860_v19 = vmul.f32 %v5374_v12, %v855_v35  ;;  %v861_v43 = vmul.f32 %v5374_v12, %v856_v40  ;;  %v862_v32 = vmul.f32 %v5374_v12, %v857_v36  ;;  %v863_v59 = vmul.f32 %v5374_v12, %v858_v10 }
  0xd1   :  { %v848_v53 = vadd.f32 %v844_v38, %v812_v47  ;;  %v849_v54 = vadd.f32 %v845_v48, %v813_v62  ;;  %v878_v24 = vmul.f32 %v5380_v26, %v873_v7  ;;  %v879_v25 = vmul.f32 %v5380_v26, %v874_v51 }
  0xd2   :  { %v864_v33 = vadd.f32 %v860_v19, %v828_v56  ;;  %v865_v58 = vadd.f32 %v861_v43, %v829_v6  ;;  %v880_v2 = vmul.f32 %v5380_v26, %v875_v13  ;;  %v881_v45 = vmul.f32 %v5380_v26, %v876_v1 }
  0xd3   :  { %v866_v34 = vadd.f32 %v862_v32, %v830_v9  ;;  %v867_v29 = vadd.f32 %v863_v59, %v831_v39  ;;  %v882_v41 = vadd.f32 %v878_v24, %v846_v8  ;;  %v883_v42 = vadd.f32 %v879_v25, %v847_v46 }
  0xd4   :  { %v5415_v47 = vstv %s5366_s6  ;;  %v5418_v62 = vstv %s5382_s8  ;;  %v5421_v38 = vstv %s5368_s7  ;;  %v5424_v56 = vstv %s5384_s9  ;;  %s5676_s6 = sld [smem:[#allocation2 + $0x31]]  ;;  %s5690_s7 = sld [smem:[#allocation2 + $0x95]] }
  0xd5   :  { %8725 = vst [vmem:[#allocation74_spill] sm:$0xff] %v5424_v56  ;;  %v887_v6 = vsub.f32 %v5212_v28, %v5415_v47  ;;  %v888_v48 = vsub.f32 %v5216_v61, %v5415_v47  ;;  %v889_v9 = vsub.f32 %v5220_v60, %v5415_v47  ;;  %v890_v39 = vsub.f32 %v5224_v27, %v5415_v47  ;;  %s5692_s8 = sld [smem:[#allocation2 + $0x96]]  ;;  %s5718_s9 = sld [smem:[#allocation2 + $0x32]] }
  0xd6   :  { %v905_v8 = vsub.f32 %v5212_v28, %v5421_v38  ;;  %v906_v46 = vsub.f32 %v5216_v61, %v5421_v38  ;;  %v907_v14 = vsub.f32 %v5220_v60, %v5421_v38  ;;  %v908_v11 = vsub.f32 %v5224_v27, %v5421_v38 }
  0xd7   :  { %v891_v20 = vmax.f32 %v887_v6, 0.0  ;;  %v892_v44 = vmax.f32 %v888_v48, 0.0  ;;  %v893_v37 = vmax.f32 %v889_v9, 0.0  ;;  %v894_v52 = vmax.f32 %v890_v39, 0.0 }
  0xd8   :  { %v909_v30 = vmax.f32 %v905_v8, 0.0  ;;  %v910_v4 = vmax.f32 %v906_v46, 0.0  ;;  %v911_v35 = vmax.f32 %v907_v14, 0.0  ;;  %v912_v40 = vmax.f32 %v908_v11, 0.0 }
  0xd9   :  { %v896_v36 = vmul.f32 %v5418_v62, %v891_v20  ;;  %v897_v10 = vmul.f32 %v5418_v62, %v892_v44  ;;  %v898_v7 = vmul.f32 %v5418_v62, %v893_v37  ;;  %v899_v51 = vmul.f32 %v5418_v62, %v894_v52 }
  0xda   :  { %v884_v13 = vadd.f32 %v880_v2, %v848_v53  ;;  %v885_v1 = vadd.f32 %v881_v45, %v849_v54  ;;  %v914_v19 = vmul.f32 %v5424_v56, %v909_v30  ;;  %v915_v43 = vmul.f32 %v5424_v56, %v910_v4 }
  0xdb   :  { %v900_v32 = vadd.f32 %v896_v36, %v864_v33  ;;  %v901_v59 = vadd.f32 %v897_v10, %v865_v58  ;;  %v916_v24 = vmul.f32 %v5424_v56, %v911_v35  ;;  %v917_v25 = vmul.f32 %v5424_v56, %v912_v40 }
  0xdc   :  { %v902_v6 = vadd.f32 %v898_v7, %v866_v34  ;;  %v903_v48 = vadd.f32 %v899_v51, %v867_v29  ;;  %v918_v9 = vadd.f32 %v914_v19, %v882_v41  ;;  %v919_v39 = vadd.f32 %v915_v43, %v883_v42 }
  0xdd   :  { %v5459_v53 = vstv %s5410_s0  ;;  %v5462_v54 = vstv %s5426_s11  ;;  %v5465_v2 = vstv %s5412_s10  ;;  %v5468_v33 = vstv %s5428_s12  ;;  %s5720_s0 = sld [smem:[#allocation2 + $0x33]]  ;;  %s5734_s10 = sld [smem:[#allocation2 + $0x97]] }
  0xde   :  { %8726 = vst [vmem:[#allocation18_spill] sm:$0xff] %v5459_v53  ;;  %8727 = vst [vmem:[#allocation19_spill] sm:$0xff] %v5462_v54  ;;  %v923_v58 = vsub.f32 %v5212_v28, %v5459_v53  ;;  %v924_v45 = vsub.f32 %v5216_v61, %v5459_v53  ;;  %v925_v34 = vsub.f32 %v5220_v60, %v5459_v53  ;;  %s5736_s11 = sld [smem:[#allocation2 + $0x98]]  ;;  %s5762_s12 = sld [smem:[#allocation2 + $0x34]] }
  0xdf   :  { %8728 = vst [vmem:[#allocation79_spill] sm:$0xff] %v5465_v2  ;;  %8729 = vst [vmem:[#allocation85_spill] sm:$0xff] %v5468_v33  ;;  %v926_v29 = vsub.f32 %v5224_v27, %v5459_v53  ;;  %v941_v41 = vsub.f32 %v5212_v28, %v5465_v2  ;;  %v942_v42 = vsub.f32 %v5216_v61, %v5465_v2 }
  0xe0   :  { %v943_v8 = vsub.f32 %v5220_v60, %v5465_v2  ;;  %v944_v46 = vsub.f32 %v5224_v27, %v5465_v2  ;;  %v927_v14 = vmax.f32 %v923_v58, 0.0  ;;  %v928_v11 = vmax.f32 %v924_v45, 0.0 }
  0xe1   :  { %v929_v20 = vmax.f32 %v925_v34, 0.0  ;;  %v930_v44 = vmax.f32 %v926_v29, 0.0  ;;  %v945_v37 = vmax.f32 %v941_v41, 0.0  ;;  %v946_v52 = vmax.f32 %v942_v42, 0.0 }
  0xe2   :  { %v947_v30 = vmax.f32 %v943_v8, 0.0  ;;  %v948_v4 = vmax.f32 %v944_v46, 0.0  ;;  %v932_v35 = vmul.f32 %v5462_v54, %v927_v14  ;;  %v933_v40 = vmul.f32 %v5462_v54, %v928_v11 }
  0xe3   :  { %v934_v36 = vmul.f32 %v5462_v54, %v929_v20  ;;  %v935_v10 = vmul.f32 %v5462_v54, %v930_v44  ;;  %v920_v7 = vadd.f32 %v916_v24, %v884_v13  ;;  %v921_v51 = vadd.f32 %v917_v25, %v885_v1  ;;  %v8858_v54 = vld [vmem:[#allocation81_spill] sm:$0xff] }
  0xe4   :  { %v950_v19 = vmul.f32 %v5468_v33, %v945_v37  ;;  %v951_v43 = vmul.f32 %v5468_v33, %v946_v52  ;;  %v936_v58 = vadd.f32 %v932_v35, %v900_v32  ;;  %v937_v45 = vadd.f32 %v933_v40, %v901_v59 }
  0xe5   :  { %v952_v34 = vmul.f32 %v5468_v33, %v947_v30  ;;  %v953_v29 = vmul.f32 %v5468_v33, %v948_v4  ;;  %v938_v41 = vadd.f32 %v934_v36, %v902_v6  ;;  %v939_v42 = vadd.f32 %v935_v10, %v903_v48 }
  0xe6   :  { %v954_v8 = vadd.f32 %v950_v19, %v918_v9  ;;  %v955_v46 = vadd.f32 %v951_v43, %v919_v39  ;;  %v5503_v13 = vstv %s5454_s13  ;;  %v5506_v1 = vstv %s5470_s15  ;;  %s5764_s13 = sld [smem:[#allocation2 + $0x35]]  ;;  %s5780_s15 = sld [smem:[#allocation2 + $0x9a]] }
  0xe7   :  { %8730 = vst [vmem:[#allocation77_spill] sm:$0xff] %v5503_v13  ;;  %8731 = vst [vmem:[#allocation17_spill] sm:$0xff] %v5506_v1  ;;  %v5509_v24 = vstv %s5456_s14  ;;  %v5512_v32 = vstv %s5472_s16  ;;  %v959_v59 = vsub.f32 %v5212_v28, %v5503_v13  ;;  %v960_v25 = vsub.f32 %v5216_v61, %v5503_v13  ;;  %s5778_s14 = sld [smem:[#allocation2 + $0x99]]  ;;  %s5806_s16 = sld [smem:[#allocation2 + $0x36]] }
  0xe8   :  { %8732 = vst [vmem:[#allocation78_spill] sm:$0xff] %v5509_v24  ;;  %8733 = vst [vmem:[#allocation22_spill] sm:$0xff] %v5512_v32  ;;  %v961_v6 = vsub.f32 %v5220_v60, %v5503_v13  ;;  %v962_v48 = vsub.f32 %v5224_v27, %v5503_v13  ;;  %v977_v9 = vsub.f32 %v5212_v28, %v5509_v24 }
  0xe9   :  { %v978_v39 = vsub.f32 %v5216_v61, %v5509_v24  ;;  %v979_v14 = vsub.f32 %v5220_v60, %v5509_v24  ;;  %v980_v11 = vsub.f32 %v5224_v27, %v5509_v24  ;;  %v963_v20 = vmax.f32 %v959_v59, 0.0 }
  0xea   :  { %v964_v44 = vmax.f32 %v960_v25, 0.0  ;;  %v965_v37 = vmax.f32 %v961_v6, 0.0  ;;  %v966_v52 = vmax.f32 %v962_v48, 0.0  ;;  %v981_v30 = vmax.f32 %v977_v9, 0.0 }
  0xeb   :  { %v982_v4 = vmax.f32 %v978_v39, 0.0  ;;  %v983_v35 = vmax.f32 %v979_v14, 0.0  ;;  %v984_v40 = vmax.f32 %v980_v11, 0.0  ;;  %v968_v36 = vmul.f32 %v5506_v1, %v963_v20 }
  0xec   :  { %v969_v10 = vmul.f32 %v5506_v1, %v964_v44  ;;  %v970_v19 = vmul.f32 %v5506_v1, %v965_v37  ;;  %v971_v43 = vmul.f32 %v5506_v1, %v966_v52  ;;  %v956_v33 = vadd.f32 %v952_v34, %v920_v7 }
  0xed   :  { %v957_v59 = vadd.f32 %v953_v29, %v921_v51  ;;  %v986_v25 = vmul.f32 %v5512_v32, %v981_v30  ;;  %v987_v6 = vmul.f32 %v5512_v32, %v982_v4  ;;  %v972_v48 = vadd.f32 %v968_v36, %v936_v58 }
  0xee   :  { %v973_v9 = vadd.f32 %v969_v10, %v937_v45  ;;  %v988_v39 = vmul.f32 %v5512_v32, %v983_v35  ;;  %v989_v14 = vmul.f32 %v5512_v32, %v984_v40  ;;  %v974_v11 = vadd.f32 %v970_v19, %v938_v41 }
  0xef   :  { %v975_v20 = vadd.f32 %v971_v43, %v939_v42  ;;  %v990_v44 = vadd.f32 %v986_v25, %v954_v8  ;;  %v991_v37 = vadd.f32 %v987_v6, %v955_v46  ;;  %v5547_v7 = vstv %s5498_s17  ;;  %s5808_s17 = sld [smem:[#allocation2 + $0x37]] }
  0xf0   :  { %8734 = vst [vmem:[#allocation23_spill] sm:$0xff] %v5547_v7  ;;  %v5550_v51 = vstv %s5514_s19  ;;  %v5553_v34 = vstv %s5500_s18  ;;  %v5556_v58 = vstv %s5516_s1  ;;  %v995_v45 = vsub.f32 %v5212_v28, %v5547_v7  ;;  %s5822_s18 = sld [smem:[#allocation2 + $0x9b]]  ;;  %s5824_s19 = sld [smem:[#allocation2 + $0x9c]] }
  0xf1   :  { %8735 = vst [vmem:[#allocation83_spill] sm:$0xff] %v5550_v51  ;;  %8736 = vst [vmem:[#allocation84_spill] sm:$0xff] %v5553_v34  ;;  %v996_v29 = vsub.f32 %v5216_v61, %v5547_v7  ;;  %v997_v41 = vsub.f32 %v5220_v60, %v5547_v7  ;;  %v998_v42 = vsub.f32 %v5224_v27, %v5547_v7  ;;  %s5858_s1 = sld [smem:[#allocation2 + $0x38]] }
  0xf2   :  { %8737 = vst [vmem:[#allocation37_spill] sm:$0xff] %v5556_v58  ;;  %v1013_v8 = vsub.f32 %v5212_v28, %v5553_v34  ;;  %v1014_v46 = vsub.f32 %v5216_v61, %v5553_v34  ;;  %v1015_v52 = vsub.f32 %v5220_v60, %v5553_v34  ;;  %v1016_v30 = vsub.f32 %v5224_v27, %v5553_v34 }
  0xf3   :  { %v999_v4 = vmax.f32 %v995_v45, 0.0  ;;  %v1000_v35 = vmax.f32 %v996_v29, 0.0  ;;  %v1001_v40 = vmax.f32 %v997_v41, 0.0  ;;  %v1002_v36 = vmax.f32 %v998_v42, 0.0 }
  0xf4   :  { %v1017_v10 = vmax.f32 %v1013_v8, 0.0  ;;  %v1018_v19 = vmax.f32 %v1014_v46, 0.0  ;;  %v1019_v43 = vmax.f32 %v1015_v52, 0.0  ;;  %v1020_v25 = vmax.f32 %v1016_v30, 0.0 }
  0xf5   :  { %v1004_v6 = vmul.f32 %v5550_v51, %v999_v4  ;;  %v1005_v32 = vmul.f32 %v5550_v51, %v1000_v35  ;;  %v1006_v7 = vmul.f32 %v5550_v51, %v1001_v40  ;;  %v1007_v24 = vmul.f32 %v5550_v51, %v1002_v36 }
  0xf6   :  { %v992_v1 = vadd.f32 %v988_v39, %v956_v33  ;;  %v993_v45 = vadd.f32 %v989_v14, %v957_v59  ;;  %v1022_v29 = vmul.f32 %v5556_v58, %v1017_v10  ;;  %v1023_v41 = vmul.f32 %v5556_v58, %v1018_v19 }
  0xf7   :  { %v1008_v42 = vadd.f32 %v1004_v6, %v972_v48  ;;  %v1009_v8 = vadd.f32 %v1005_v32, %v973_v9  ;;  %v1024_v46 = vmul.f32 %v5556_v58, %v1019_v43  ;;  %v1025_v52 = vmul.f32 %v5556_v58, %v1020_v25 }
  0xf8   :  { %v1010_v30 = vadd.f32 %v1006_v7, %v974_v11  ;;  %v1011_v4 = vadd.f32 %v1007_v24, %v975_v20  ;;  %v1026_v35 = vadd.f32 %v1022_v29, %v990_v44  ;;  %v1027_v40 = vadd.f32 %v1023_v41, %v991_v37 }
  0xf9   :  { %v5591_v33 = vstv %s5542_s20  ;;  %v5594_v59 = vstv %s5558_s22  ;;  %v5597_v39 = vstv %s5544_s21  ;;  %v5600_v48 = vstv %s5560_s23  ;;  %s5860_s20 = sld [smem:[#allocation2 + $0x39]]  ;;  %s5874_s21 = sld [smem:[#allocation2 + $0x9d]] }
  0xfa   :  { %8738 = vst [vmem:[#allocation41_spill] sm:$0xff] %v5591_v33  ;;  %8739 = vst [vmem:[#allocation42_spill] sm:$0xff] %v5594_v59  ;;  %v1031_v24 = vsub.f32 %v5212_v28, %v5591_v33  ;;  %v1032_v32 = vsub.f32 %v5216_v61, %v5591_v33  ;;  %v1033_v9 = vsub.f32 %v5220_v60, %v5591_v33  ;;  %s5876_s22 = sld [smem:[#allocation2 + $0x9e]]  ;;  %s5902_s23 = sld [smem:[#allocation2 + $0x3a]] }
  0xfb   :  { %8740 = vst [vmem:[#allocation49_spill] sm:$0xff] %v5597_v39  ;;  %8741 = vst [vmem:[#allocation44_spill] sm:$0xff] %v5600_v48  ;;  %v1034_v14 = vsub.f32 %v5224_v27, %v5591_v33  ;;  %v1049_v11 = vsub.f32 %v5212_v28, %v5597_v39  ;;  %v1050_v20 = vsub.f32 %v5216_v61, %v5597_v39 }
  0xfc   :  { %v1051_v44 = vsub.f32 %v5220_v60, %v5597_v39  ;;  %v1052_v37 = vsub.f32 %v5224_v27, %v5597_v39  ;;  %v1035_v7 = vmax.f32 %v1031_v24, 0.0  ;;  %v1036_v36 = vmax.f32 %v1032_v32, 0.0 }
  0xfd   :  { %v1037_v10 = vmax.f32 %v1033_v9, 0.0  ;;  %v1038_v19 = vmax.f32 %v1034_v14, 0.0  ;;  %v1053_v43 = vmax.f32 %v1049_v11, 0.0  ;;  %v1054_v25 = vmax.f32 %v1050_v20, 0.0 }
  0xfe   :  { %v1055_v6 = vmax.f32 %v1051_v44, 0.0  ;;  %v1056_v29 = vmax.f32 %v1052_v37, 0.0  ;;  %v1040_v41 = vmul.f32 %v5594_v59, %v1035_v7  ;;  %v1041_v58 = vmul.f32 %v5594_v59, %v1036_v36 }
  0xff   :  { %v1042_v33 = vmul.f32 %v5594_v59, %v1037_v10  ;;  %v1043_v34 = vmul.f32 %v5594_v59, %v1038_v19  ;;  %v1028_v51 = vadd.f32 %v1024_v46, %v992_v1  ;;  %v1029_v24 = vadd.f32 %v1025_v52, %v993_v45 }
 0x100   :  { %v1058_v32 = vmul.f32 %v5600_v48, %v1053_v43  ;;  %v1059_v9 = vmul.f32 %v5600_v48, %v1054_v25  ;;  %v1044_v14 = vadd.f32 %v1040_v41, %v1008_v42  ;;  %v1045_v11 = vadd.f32 %v1041_v58, %v1009_v8 }
 0x101   :  { %v1060_v20 = vmul.f32 %v5600_v48, %v1055_v6  ;;  %v1061_v44 = vmul.f32 %v5600_v48, %v1056_v29  ;;  %v1046_v37 = vadd.f32 %v1042_v33, %v1010_v30  ;;  %v1047_v7 = vadd.f32 %v1043_v34, %v1011_v4 }
 0x102   :  { %v1062_v36 = vadd.f32 %v1058_v32, %v1026_v35  ;;  %v1063_v10 = vadd.f32 %v1059_v9, %v1027_v40  ;;  %v5635_v1 = vstv %s5586_s24  ;;  %v5638_v45 = vstv %s5602_s25  ;;  %s5904_s24 = sld [smem:[#allocation2 + $0x3b]]  ;;  %s5920_s25 = sld [smem:[#allocation2 + $0xa0]] }
 0x103   :  { %8742 = vst [vmem:[#allocation51_spill] sm:$0xff] %v5635_v1  ;;  %8743 = vst [vmem:[#allocation52_spill] sm:$0xff] %v5638_v45  ;;  %v5641_v46 = vstv %s5588_s2  ;;  %v5644_v42 = vstv %s5604_s26  ;;  %v1067_v34 = vsub.f32 %v5212_v28, %v5635_v1  ;;  %v1068_v58 = vsub.f32 %v5216_v61, %v5635_v1  ;;  %s5918_s2 = sld [smem:[#allocation2 + $0x9f]]  ;;  %s5946_s26 = sld [smem:[#allocation2 + $0x3c]] }
 0x104   :  { %8744 = vst [vmem:[#allocation57_spill] sm:$0xff] %v5641_v46  ;;  %8745 = vst [vmem:[#allocation59_spill] sm:$0xff] %v5644_v42  ;;  %v1069_v8 = vsub.f32 %v5220_v60, %v5635_v1  ;;  %v1070_v52 = vsub.f32 %v5224_v27, %v5635_v1  ;;  %v1085_v30 = vsub.f32 %v5212_v28, %v5641_v46 }
 0x105   :  { %v1086_v4 = vsub.f32 %v5216_v61, %v5641_v46  ;;  %v1087_v35 = vsub.f32 %v5220_v60, %v5641_v46  ;;  %v1088_v40 = vsub.f32 %v5224_v27, %v5641_v46  ;;  %v1071_v33 = vmax.f32 %v1067_v34, 0.0 }
 0x106   :  { %v1072_v19 = vmax.f32 %v1068_v58, 0.0  ;;  %v1073_v43 = vmax.f32 %v1069_v8, 0.0  ;;  %v1074_v25 = vmax.f32 %v1070_v52, 0.0  ;;  %v1089_v6 = vmax.f32 %v1085_v30, 0.0 }
 0x107   :  { %v1090_v29 = vmax.f32 %v1086_v4, 0.0  ;;  %v1091_v41 = vmax.f32 %v1087_v35, 0.0  ;;  %v1092_v32 = vmax.f32 %v1088_v40, 0.0  ;;  %v1076_v9 = vmul.f32 %v5638_v45, %v1071_v33 }
 0x108   :  { %v1077_v48 = vmul.f32 %v5638_v45, %v1072_v19  ;;  %v1078_v1 = vmul.f32 %v5638_v45, %v1073_v43  ;;  %v1079_v39 = vmul.f32 %v5638_v45, %v1074_v25  ;;  %v1064_v59 = vadd.f32 %v1060_v20, %v1028_v51 }
 0x109   :  { %v1065_v34 = vadd.f32 %v1061_v44, %v1029_v24  ;;  %v1094_v58 = vmul.f32 %v5644_v42, %v1089_v6  ;;  %v1095_v8 = vmul.f32 %v5644_v42, %v1090_v29  ;;  %v1080_v52 = vadd.f32 %v1076_v9, %v1044_v14 }
 0x10a   :  { %v1081_v30 = vadd.f32 %v1077_v48, %v1045_v11  ;;  %v1096_v4 = vmul.f32 %v5644_v42, %v1091_v41  ;;  %v1097_v35 = vmul.f32 %v5644_v42, %v1092_v32  ;;  %v1082_v40 = vadd.f32 %v1078_v1, %v1046_v37 }
 0x10b   :  { %v1083_v33 = vadd.f32 %v1079_v39, %v1047_v7  ;;  %v1098_v19 = vadd.f32 %v1094_v58, %v1062_v36  ;;  %v1099_v43 = vadd.f32 %v1095_v8, %v1063_v10  ;;  %v5679_v51 = vstv %s5630_s27  ;;  %s5948_s27 = sld [smem:[#allocation2 + $0x3d]] }
 0x10c   :  { %8746 = vst [vmem:[#allocation60_spill] sm:$0xff] %v5679_v51  ;;  %v5682_v24 = vstv %s5646_s29  ;;  %v5685_v20 = vstv %s5632_s28  ;;  %v5688_v14 = vstv %s5648_s30  ;;  %v1103_v39 = vsub.f32 %v5212_v28, %v5679_v51  ;;  %s5962_s28 = sld [smem:[#allocation2 + $0xa1]]  ;;  %s5964_s29 = sld [smem:[#allocation2 + $0xa2]] }
 0x10d   :  { %8747 = vst [vmem:[#allocation56_spill] sm:$0xff] %v5682_v24  ;;  %8748 = vst [vmem:[#allocation61_spill] sm:$0xff] %v5685_v20  ;;  %v1104_v48 = vsub.f32 %v5216_v61, %v5679_v51  ;;  %v1105_v11 = vsub.f32 %v5220_v60, %v5679_v51  ;;  %v1106_v44 = vsub.f32 %v5224_v27, %v5679_v51  ;;  %s5990_s30 = sld [smem:[#allocation2 + $0x3e]] }
 0x10e   :  { %8749 = vst [vmem:[#allocation67_spill] sm:$0xff] %v5688_v14  ;;  %v1121_v37 = vsub.f32 %v5212_v28, %v5685_v20  ;;  %v1122_v7 = vsub.f32 %v5216_v61, %v5685_v20  ;;  %v1123_v36 = vsub.f32 %v5220_v60, %v5685_v20  ;;  %v1124_v10 = vsub.f32 %v5224_v27, %v5685_v20 }
 0x10f   :  { %v1107_v1 = vmax.f32 %v1103_v39, 0.0  ;;  %v1108_v25 = vmax.f32 %v1104_v48, 0.0  ;;  %v1109_v6 = vmax.f32 %v1105_v11, 0.0  ;;  %v1110_v29 = vmax.f32 %v1106_v44, 0.0 }
 0x110   :  { %v1125_v41 = vmax.f32 %v1121_v37, 0.0  ;;  %v1126_v32 = vmax.f32 %v1122_v7, 0.0  ;;  %v1127_v9 = vmax.f32 %v1123_v36, 0.0  ;;  %v1128_v58 = vmax.f32 %v1124_v10, 0.0 }
 0x111   :  { %v1112_v8 = vmul.f32 %v5682_v24, %v1107_v1  ;;  %v1113_v42 = vmul.f32 %v5682_v24, %v1108_v25  ;;  %v1114_v51 = vmul.f32 %v5682_v24, %v1109_v6  ;;  %v1115_v46 = vmul.f32 %v5682_v24, %v1110_v29 }
 0x112   :  { %v1100_v45 = vadd.f32 %v1096_v4, %v1064_v59  ;;  %v1101_v39 = vadd.f32 %v1097_v35, %v1065_v34  ;;  %v1130_v48 = vmul.f32 %v5688_v14, %v1125_v41  ;;  %v1131_v11 = vmul.f32 %v5688_v14, %v1126_v32 }
 0x113   :  { %v1116_v44 = vadd.f32 %v1112_v8, %v1080_v52  ;;  %v1117_v37 = vadd.f32 %v1113_v42, %v1081_v30  ;;  %v1132_v7 = vmul.f32 %v5688_v14, %v1127_v9  ;;  %v1133_v36 = vmul.f32 %v5688_v14, %v1128_v58 }
 0x114   :  { %v1118_v10 = vadd.f32 %v1114_v51, %v1082_v40  ;;  %v1119_v1 = vadd.f32 %v1115_v46, %v1083_v33  ;;  %v1134_v25 = vadd.f32 %v1130_v48, %v1098_v19  ;;  %v1135_v6 = vadd.f32 %v1131_v11, %v1099_v43 }
 0x115   :  { %v5723_v59 = vstv %s5674_s5  ;;  %v5726_v34 = vstv %s5690_s7  ;;  %v5729_v4 = vstv %s5676_s6  ;;  %v5732_v52 = vstv %s5692_s8  ;;  %s5992_s5 = sld [smem:[#allocation2 + $0x3f]]  ;;  %s6006_s6 = sld [smem:[#allocation2 + $0xa3]] }
 0x116   :  { %8750 = vst [vmem:[#allocation68_spill] sm:$0xff] %v5723_v59  ;;  %8751 = vst [vmem:[#allocation69_spill] sm:$0xff] %v5726_v34  ;;  %v1139_v46 = vsub.f32 %v5212_v28, %v5723_v59  ;;  %v1140_v42 = vsub.f32 %v5216_v61, %v5723_v59  ;;  %v1141_v30 = vsub.f32 %v5220_v60, %v5723_v59  ;;  %s6008_s7 = sld [smem:[#allocation2 + $0xa4]]  ;;  %s6034_s8 = sld [smem:[#allocation2 + $0x40]] }
 0x117   :  { %8752 = vst [vmem:[#allocation70_spill] sm:$0xff] %v5729_v4  ;;  %8753 = vst [vmem:[#allocation75_spill] sm:$0xff] %v5732_v52  ;;  %v1142_v35 = vsub.f32 %v5224_v27, %v5723_v59  ;;  %v1157_v40 = vsub.f32 %v5212_v28, %v5729_v4  ;;  %v1158_v33 = vsub.f32 %v5216_v61, %v5729_v4 }
 0x118   :  { %v1159_v19 = vsub.f32 %v5220_v60, %v5729_v4  ;;  %v1160_v43 = vsub.f32 %v5224_v27, %v5729_v4  ;;  %v1143_v51 = vmax.f32 %v1139_v46, 0.0  ;;  %v1144_v29 = vmax.f32 %v1140_v42, 0.0 }
 0x119   :  { %v1145_v41 = vmax.f32 %v1141_v30, 0.0  ;;  %v1146_v32 = vmax.f32 %v1142_v35, 0.0  ;;  %v1161_v9 = vmax.f32 %v1157_v40, 0.0  ;;  %v1162_v58 = vmax.f32 %v1158_v33, 0.0 }
 0x11a   :  { %v1163_v8 = vmax.f32 %v1159_v19, 0.0  ;;  %v1164_v48 = vmax.f32 %v1160_v43, 0.0  ;;  %v1148_v11 = vmul.f32 %v5726_v34, %v1143_v51  ;;  %v1149_v14 = vmul.f32 %v5726_v34, %v1144_v29 }
 0x11b   :  { %v1150_v59 = vmul.f32 %v5726_v34, %v1145_v41  ;;  %v1151_v20 = vmul.f32 %v5726_v34, %v1146_v32  ;;  %v1136_v24 = vadd.f32 %v1132_v7, %v1100_v45  ;;  %v1137_v46 = vadd.f32 %v1133_v36, %v1101_v39 }
 0x11c   :  { %v1166_v42 = vmul.f32 %v5732_v52, %v1161_v9  ;;  %v1167_v30 = vmul.f32 %v5732_v52, %v1162_v58  ;;  %v1152_v35 = vadd.f32 %v1148_v11, %v1116_v44  ;;  %v1153_v40 = vadd.f32 %v1149_v14, %v1117_v37 }
 0x11d   :  { %v1168_v33 = vmul.f32 %v5732_v52, %v1163_v8  ;;  %v1169_v19 = vmul.f32 %v5732_v52, %v1164_v48  ;;  %v1154_v43 = vadd.f32 %v1150_v59, %v1118_v10  ;;  %v1155_v51 = vadd.f32 %v1151_v20, %v1119_v1 }
 0x11e   :  { %v1170_v29 = vadd.f32 %v1166_v42, %v1134_v25  ;;  %v1171_v41 = vadd.f32 %v1167_v30, %v1135_v6  ;;  %v5767_v45 = vstv %s5718_s9  ;;  %v5770_v39 = vstv %s5734_s10  ;;  %s6036_s9 = sld [smem:[#allocation2 + $0x41]]  ;;  %s6052_s10 = sld [smem:[#allocation2 + $0xa6]] }
 0x11f   :  { %8754 = vst [vmem:[#allocation98_spill] sm:$0xff] %v5767_v45  ;;  %8755 = vst [vmem:[#allocation99_spill] sm:$0xff] %v5770_v39  ;;  %v5773_v7 = vstv %s5720_s0  ;;  %v5776_v44 = vstv %s5736_s11  ;;  %v1175_v20 = vsub.f32 %v5212_v28, %v5767_v45  ;;  %v1176_v14 = vsub.f32 %v5216_v61, %v5767_v45  ;;  %s6050_s0 = sld [smem:[#allocation2 + $0xa5]]  ;;  %s6078_s11 = sld [smem:[#allocation2 + $0x42]] }
 0x120   :  { %8756 = vst [vmem:[#allocation100_spill] sm:$0xff] %v5773_v7  ;;  %8757 = vst [vmem:[#allocation101_spill] sm:$0xff] %v5776_v44  ;;  %v1177_v37 = vsub.f32 %v5220_v60, %v5767_v45  ;;  %v1178_v36 = vsub.f32 %v5224_v27, %v5767_v45  ;;  %v1193_v10 = vsub.f32 %v5212_v28, %v5773_v7 }
 0x121   :  { %v1194_v1 = vsub.f32 %v5216_v61, %v5773_v7  ;;  %v1195_v25 = vsub.f32 %v5220_v60, %v5773_v7  ;;  %v1196_v6 = vsub.f32 %v5224_v27, %v5773_v7  ;;  %v1179_v59 = vmax.f32 %v1175_v20, 0.0 }
 0x122   :  { %v1180_v32 = vmax.f32 %v1176_v14, 0.0  ;;  %v1181_v9 = vmax.f32 %v1177_v37, 0.0  ;;  %v1182_v58 = vmax.f32 %v1178_v36, 0.0  ;;  %v1197_v8 = vmax.f32 %v1193_v10, 0.0 }
 0x123   :  { %v1198_v48 = vmax.f32 %v1194_v1, 0.0  ;;  %v1199_v11 = vmax.f32 %v1195_v25, 0.0  ;;  %v1200_v42 = vmax.f32 %v1196_v6, 0.0  ;;  %v1184_v30 = vmul.f32 %v5770_v39, %v1179_v59 }
 0x124   :  { %v1185_v28 = vmul.f32 %v5770_v39, %v1180_v32  ;;  %v1186_v61 = vmul.f32 %v5770_v39, %v1181_v9  ;;  %v1187_v60 = vmul.f32 %v5770_v39, %v1182_v58  ;;  %v1172_v52 = vadd.f32 %v1168_v33, %v1136_v24  ;;  %v5838_v9 = vld [vmem:[#allocation6 + $0x18] sm:$0xff] }
 0x125   :  { %v1173_v27 = vadd.f32 %v1169_v19, %v1137_v46  ;;  %v1202_v20 = vmul.f32 %v5776_v44, %v1197_v8  ;;  %v1203_v14 = vmul.f32 %v5776_v44, %v1198_v48  ;;  %v1188_v37 = vadd.f32 %v1184_v30, %v1152_v35 }
 0x126   :  { %v1189_v36 = vadd.f32 %v1185_v28, %v1153_v40  ;;  %v1204_v10 = vmul.f32 %v5776_v44, %v1199_v11  ;;  %v1205_v1 = vmul.f32 %v5776_v44, %v1200_v42  ;;  %v1190_v25 = vadd.f32 %v1186_v61, %v1154_v43  ;;  %v5826_v40 = vld [vmem:[#allocation6] sm:$0xff]  ;;  %v5830_v43 = vld [vmem:[#allocation6 + $0x8] sm:$0xff] }
 0x127   :  { %v1191_v6 = vadd.f32 %v1187_v60, %v1155_v51  ;;  %v1206_v59 = vadd.f32 %v1202_v20, %v1170_v29  ;;  %v1207_v32 = vadd.f32 %v1203_v14, %v1171_v41  ;;  %v5811_v24 = vstv %s5762_s12  ;;  %v5834_v29 = vld [vmem:[#allocation6 + $0x10] sm:$0xff]  ;;  %s6080_s12 = sld [smem:[#allocation2 + $0x43]] }
 0x128   :  { %8758 = vst [vmem:[#allocation102_spill] sm:$0xff] %v5811_v24  ;;  %v5814_v46 = vstv %s5778_s14  ;;  %v5817_v33 = vstv %s5764_s13  ;;  %v5820_v35 = vstv %s5780_s15  ;;  %v1211_v19 = vsub.f32 %v5826_v40, %v5811_v24  ;;  %s6094_s13 = sld [smem:[#allocation2 + $0xa7]]  ;;  %s6096_s14 = sld [smem:[#allocation2 + $0xa8]] }
 0x129   :  { %8759 = vst [vmem:[#allocation103_spill] sm:$0xff] %v5814_v46  ;;  %8760 = vst [vmem:[#allocation104_spill] sm:$0xff] %v5817_v33  ;;  %v1212_v51 = vsub.f32 %v5830_v43, %v5811_v24  ;;  %v1213_v41 = vsub.f32 %v5834_v29, %v5811_v24  ;;  %v1214_v58 = vsub.f32 %v5838_v9, %v5811_v24  ;;  %s6122_s15 = sld [smem:[#allocation2 + $0x44]] }
 0x12a   :  { %8761 = vst [vmem:[#allocation105_spill] sm:$0xff] %v5820_v35  ;;  %v1229_v8 = vsub.f32 %v5826_v40, %v5817_v33  ;;  %v1230_v48 = vsub.f32 %v5830_v43, %v5817_v33  ;;  %v1231_v11 = vsub.f32 %v5834_v29, %v5817_v33  ;;  %v1232_v42 = vsub.f32 %v5838_v9, %v5817_v33 }
 0x12b   :  { %v1215_v30 = vmax.f32 %v1211_v19, 0.0  ;;  %v1216_v28 = vmax.f32 %v1212_v51, 0.0  ;;  %v1217_v61 = vmax.f32 %v1213_v41, 0.0  ;;  %v1218_v60 = vmax.f32 %v1214_v58, 0.0 }
 0x12c   :  { %v1233_v20 = vmax.f32 %v1229_v8, 0.0  ;;  %v1234_v14 = vmax.f32 %v1230_v48, 0.0  ;;  %v1235_v44 = vmax.f32 %v1231_v11, 0.0  ;;  %v1236_v24 = vmax.f32 %v1232_v42, 0.0 }
 0x12d   :  { %v1220_v7 = vmul.f32 %v5814_v46, %v1215_v30  ;;  %v1221_v39 = vmul.f32 %v5814_v46, %v1216_v28  ;;  %v1222_v45 = vmul.f32 %v5814_v46, %v1217_v61  ;;  %v1223_v4 = vmul.f32 %v5814_v46, %v1218_v60 }
 0x12e   :  { %v1208_v34 = vadd.f32 %v1204_v10, %v1172_v52  ;;  %v1209_v19 = vadd.f32 %v1205_v1, %v1173_v27  ;;  %v1238_v51 = vmul.f32 %v5820_v35, %v1233_v20  ;;  %v1239_v41 = vmul.f32 %v5820_v35, %v1234_v14 }
 0x12f   :  { %v1224_v58 = vadd.f32 %v1220_v7, %v1188_v37  ;;  %v1225_v8 = vadd.f32 %v1221_v39, %v1189_v36  ;;  %v1240_v48 = vmul.f32 %v5820_v35, %v1235_v44  ;;  %v1241_v11 = vmul.f32 %v5820_v35, %v1236_v24 }
 0x130   :  { %v1226_v42 = vadd.f32 %v1222_v45, %v1190_v25  ;;  %v1227_v30 = vadd.f32 %v1223_v4, %v1191_v6  ;;  %v1242_v28 = vadd.f32 %v1238_v51, %v1206_v59  ;;  %v1243_v61 = vadd.f32 %v1239_v41, %v1207_v32 }
 0x131   :  { %v5863_v52 = vstv %s5806_s16  ;;  %v5866_v27 = vstv %s5822_s18  ;;  %v5869_v10 = vstv %s5808_s17  ;;  %v5872_v7 = vstv %s5824_s19  ;;  %s6124_s16 = sld [smem:[#allocation2 + $0x45]]  ;;  %s6138_s17 = sld [smem:[#allocation2 + $0xa9]] }
 0x132   :  { %8762 = vst [vmem:[#allocation106_spill] sm:$0xff] %v5863_v52  ;;  %8763 = vst [vmem:[#allocation107_spill] sm:$0xff] %v5866_v27  ;;  %v1247_v4 = vsub.f32 %v5826_v40, %v5863_v52  ;;  %v1248_v45 = vsub.f32 %v5830_v43, %v5863_v52  ;;  %v1249_v39 = vsub.f32 %v5834_v29, %v5863_v52  ;;  %s6140_s18 = sld [smem:[#allocation2 + $0xaa]]  ;;  %s6166_s19 = sld [smem:[#allocation2 + $0x46]] }
 0x133   :  { %8764 = vst [vmem:[#allocation108_spill] sm:$0xff] %v5869_v10  ;;  %8765 = vst [vmem:[#allocation109_spill] sm:$0xff] %v5872_v7  ;;  %v1250_v44 = vsub.f32 %v5838_v9, %v5863_v52  ;;  %v1265_v37 = vsub.f32 %v5826_v40, %v5869_v10  ;;  %v1266_v36 = vsub.f32 %v5830_v43, %v5869_v10 }
 0x134   :  { %v1267_v1 = vsub.f32 %v5834_v29, %v5869_v10  ;;  %v1268_v25 = vsub.f32 %v5838_v9, %v5869_v10  ;;  %v1251_v6 = vmax.f32 %v1247_v4, 0.0  ;;  %v1252_v59 = vmax.f32 %v1248_v45, 0.0 }
 0x135   :  { %v1253_v32 = vmax.f32 %v1249_v39, 0.0  ;;  %v1254_v24 = vmax.f32 %v1250_v44, 0.0  ;;  %v1269_v60 = vmax.f32 %v1265_v37, 0.0  ;;  %v1270_v20 = vmax.f32 %v1266_v36, 0.0 }
 0x136   :  { %v1271_v14 = vmax.f32 %v1267_v1, 0.0  ;;  %v1272_v51 = vmax.f32 %v1268_v25, 0.0  ;;  %v1256_v41 = vmul.f32 %v5866_v27, %v1251_v6  ;;  %v1257_v35 = vmul.f32 %v5866_v27, %v1252_v59 }
 0x137   :  { %v1258_v52 = vmul.f32 %v5866_v27, %v1253_v32  ;;  %v1259_v33 = vmul.f32 %v5866_v27, %v1254_v24  ;;  %v1244_v46 = vadd.f32 %v1240_v48, %v1208_v34  ;;  %v1245_v4 = vadd.f32 %v1241_v11, %v1209_v19 }
 0x138   :  { %v1274_v45 = vmul.f32 %v5872_v7, %v1269_v60  ;;  %v1275_v39 = vmul.f32 %v5872_v7, %v1270_v20  ;;  %v1260_v44 = vadd.f32 %v1256_v41, %v1224_v58  ;;  %v1261_v37 = vadd.f32 %v1257_v35, %v1225_v8 }
 0x139   :  { %v1276_v36 = vmul.f32 %v5872_v7, %v1271_v14  ;;  %v1277_v1 = vmul.f32 %v5872_v7, %v1272_v51  ;;  %v1262_v25 = vadd.f32 %v1258_v52, %v1226_v42  ;;  %v1263_v6 = vadd.f32 %v1259_v33, %v1227_v30 }
 0x13a   :  { %v1278_v59 = vadd.f32 %v1274_v45, %v1242_v28  ;;  %v1279_v32 = vadd.f32 %v1275_v39, %v1243_v61  ;;  %v5907_v34 = vstv %s5858_s1  ;;  %v5910_v19 = vstv %s5874_s21  ;;  %s6168_s1 = sld [smem:[#allocation2 + $0x47]]  ;;  %s6184_s21 = sld [smem:[#allocation2 + $0xac]] }
 0x13b   :  { %8766 = vst [vmem:[#allocation110_spill] sm:$0xff] %v5907_v34  ;;  %8767 = vst [vmem:[#allocation111_spill] sm:$0xff] %v5910_v19  ;;  %v5913_v48 = vstv %s5860_s20  ;;  %v5916_v58 = vstv %s5876_s22  ;;  %v1283_v33 = vsub.f32 %v5826_v40, %v5907_v34  ;;  %v1284_v35 = vsub.f32 %v5830_v43, %v5907_v34  ;;  %s6182_s20 = sld [smem:[#allocation2 + $0xab]]  ;;  %s6210_s22 = sld [smem:[#allocation2 + $0x48]] }
 0x13c   :  { %8768 = vst [vmem:[#allocation112_spill] sm:$0xff] %v5913_v48  ;;  %8769 = vst [vmem:[#allocation113_spill] sm:$0xff] %v5916_v58  ;;  %v1285_v8 = vsub.f32 %v5834_v29, %v5907_v34  ;;  %v1286_v11 = vsub.f32 %v5838_v9, %v5907_v34  ;;  %v1301_v42 = vsub.f32 %v5826_v40, %v5913_v48 }
 0x13d   :  { %v1302_v30 = vsub.f32 %v5830_v43, %v5913_v48  ;;  %v1303_v28 = vsub.f32 %v5834_v29, %v5913_v48  ;;  %v1304_v61 = vsub.f32 %v5838_v9, %v5913_v48  ;;  %v1287_v52 = vmax.f32 %v1283_v33, 0.0 }
 0x13e   :  { %v1288_v24 = vmax.f32 %v1284_v35, 0.0  ;;  %v1289_v60 = vmax.f32 %v1285_v8, 0.0  ;;  %v1290_v20 = vmax.f32 %v1286_v11, 0.0  ;;  %v1305_v14 = vmax.f32 %v1301_v42, 0.0 }
 0x13f   :  { %v1306_v51 = vmax.f32 %v1302_v30, 0.0  ;;  %v1307_v41 = vmax.f32 %v1303_v28, 0.0  ;;  %v1308_v45 = vmax.f32 %v1304_v61, 0.0  ;;  %v1292_v39 = vmul.f32 %v5910_v19, %v1287_v52 }
 0x140   :  { %v1293_v7 = vmul.f32 %v5910_v19, %v1288_v24  ;;  %v1294_v34 = vmul.f32 %v5910_v19, %v1289_v60  ;;  %v1295_v10 = vmul.f32 %v5910_v19, %v1290_v20  ;;  %v1280_v27 = vadd.f32 %v1276_v36, %v1244_v46 }
 0x141   :  { %v1281_v33 = vadd.f32 %v1277_v1, %v1245_v4  ;;  %v1310_v35 = vmul.f32 %v5916_v58, %v1305_v14  ;;  %v1311_v8 = vmul.f32 %v5916_v58, %v1306_v51  ;;  %v1296_v11 = vadd.f32 %v1292_v39, %v1260_v44 }
 0x142   :  { %v1297_v42 = vadd.f32 %v1293_v7, %v1261_v37  ;;  %v1312_v30 = vmul.f32 %v5916_v58, %v1307_v41  ;;  %v1313_v28 = vmul.f32 %v5916_v58, %v1308_v45  ;;  %v1298_v61 = vadd.f32 %v1294_v34, %v1262_v25 }
 0x143   :  { %v1299_v52 = vadd.f32 %v1295_v10, %v1263_v6  ;;  %v1314_v24 = vadd.f32 %v1310_v35, %v1278_v59  ;;  %v1315_v60 = vadd.f32 %v1311_v8, %v1279_v32  ;;  %v5951_v46 = vstv %s5902_s23  ;;  %s6212_s23 = sld [smem:[#allocation2 + $0x49]] }
 0x144   :  { %8770 = vst [vmem:[#allocation114_spill] sm:$0xff] %v5951_v46  ;;  %v5954_v4 = vstv %s5918_s2  ;;  %v5957_v36 = vstv %s5904_s24  ;;  %v5960_v44 = vstv %s5920_s25  ;;  %v1319_v10 = vsub.f32 %v5826_v40, %v5951_v46  ;;  %s6226_s24 = sld [smem:[#allocation2 + $0xad]]  ;;  %s6228_s2 = sld [smem:[#allocation2 + $0xae]] }
 0x145   :  { %8771 = vst [vmem:[#allocation115_spill] sm:$0xff] %v5954_v4  ;;  %8772 = vst [vmem:[#allocation116_spill] sm:$0xff] %v5957_v36  ;;  %v1320_v7 = vsub.f32 %v5830_v43, %v5951_v46  ;;  %v1321_v37 = vsub.f32 %v5834_v29, %v5951_v46  ;;  %v1322_v1 = vsub.f32 %v5838_v9, %v5951_v46  ;;  %s6254_s25 = sld [smem:[#allocation2 + $0x4a]] }
 0x146   :  { %8773 = vst [vmem:[#allocation117_spill] sm:$0xff] %v5960_v44  ;;  %v1337_v25 = vsub.f32 %v5826_v40, %v5957_v36  ;;  %v1338_v6 = vsub.f32 %v5830_v43, %v5957_v36  ;;  %v1339_v59 = vsub.f32 %v5834_v29, %v5957_v36  ;;  %v1340_v32 = vsub.f32 %v5838_v9, %v5957_v36 }
 0x147   :  { %v1323_v34 = vmax.f32 %v1319_v10, 0.0  ;;  %v1324_v20 = vmax.f32 %v1320_v7, 0.0  ;;  %v1325_v14 = vmax.f32 %v1321_v37, 0.0  ;;  %v1326_v51 = vmax.f32 %v1322_v1, 0.0 }
 0x148   :  { %v1341_v41 = vmax.f32 %v1337_v25, 0.0  ;;  %v1342_v45 = vmax.f32 %v1338_v6, 0.0  ;;  %v1343_v39 = vmax.f32 %v1339_v59, 0.0  ;;  %v1344_v35 = vmax.f32 %v1340_v32, 0.0 }
 0x149   :  { %v1328_v8 = vmul.f32 %v5954_v4, %v1323_v34  ;;  %v1329_v58 = vmul.f32 %v5954_v4, %v1324_v20  ;;  %v1330_v46 = vmul.f32 %v5954_v4, %v1325_v14  ;;  %v1331_v48 = vmul.f32 %v5954_v4, %v1326_v51 }
 0x14a   :  { %v1316_v19 = vadd.f32 %v1312_v30, %v1280_v27  ;;  %v1317_v10 = vadd.f32 %v1313_v28, %v1281_v33  ;;  %v1346_v7 = vmul.f32 %v5960_v44, %v1341_v41  ;;  %v1347_v37 = vmul.f32 %v5960_v44, %v1342_v45 }
 0x14b   :  { %v1332_v1 = vadd.f32 %v1328_v8, %v1296_v11  ;;  %v1333_v25 = vadd.f32 %v1329_v58, %v1297_v42  ;;  %v1348_v6 = vmul.f32 %v5960_v44, %v1343_v39  ;;  %v1349_v59 = vmul.f32 %v5960_v44, %v1344_v35 }
 0x14c   :  { %v1334_v32 = vadd.f32 %v1330_v46, %v1298_v61  ;;  %v1335_v34 = vadd.f32 %v1331_v48, %v1299_v52  ;;  %v1350_v20 = vadd.f32 %v1346_v7, %v1314_v24  ;;  %v1351_v14 = vadd.f32 %v1347_v37, %v1315_v60 }
 0x14d   :  { %v5995_v27 = vstv %s5946_s26  ;;  %v5998_v33 = vstv %s5962_s28  ;;  %v6001_v30 = vstv %s5948_s27  ;;  %v6004_v11 = vstv %s5964_s29  ;;  %s6256_s26 = sld [smem:[#allocation2 + $0x4b]]  ;;  %s6270_s27 = sld [smem:[#allocation2 + $0xaf]] }
 0x14e   :  { %8774 = vst [vmem:[#allocation118_spill] sm:$0xff] %v5995_v27  ;;  %8775 = vst [vmem:[#allocation119_spill] sm:$0xff] %v5998_v33  ;;  %v1355_v48 = vsub.f32 %v5826_v40, %v5995_v27  ;;  %v1356_v58 = vsub.f32 %v5830_v43, %v5995_v27  ;;  %v1357_v42 = vsub.f32 %v5834_v29, %v5995_v27  ;;  %s6272_s28 = sld [smem:[#allocation2 + $0xb0]]  ;;  %s6298_s29 = sld [smem:[#allocation2 + $0x4c]] }
 0x14f   :  { %8776 = vst [vmem:[#allocation120_spill] sm:$0xff] %v6001_v30  ;;  %8777 = vst [vmem:[#allocation121_spill] sm:$0xff] %v6004_v11  ;;  %v1358_v28 = vsub.f32 %v5838_v9, %v5995_v27  ;;  %v1373_v61 = vsub.f32 %v5826_v40, %v6001_v30  ;;  %v1374_v52 = vsub.f32 %v5830_v43, %v6001_v30 }
 0x150   :  { %v1375_v24 = vsub.f32 %v5834_v29, %v6001_v30  ;;  %v1376_v60 = vsub.f32 %v5838_v9, %v6001_v30  ;;  %v1359_v46 = vmax.f32 %v1355_v48, 0.0  ;;  %v1360_v51 = vmax.f32 %v1356_v58, 0.0 }
 0x151   :  { %v1361_v41 = vmax.f32 %v1357_v42, 0.0  ;;  %v1362_v45 = vmax.f32 %v1358_v28, 0.0  ;;  %v1377_v39 = vmax.f32 %v1373_v61, 0.0  ;;  %v1378_v35 = vmax.f32 %v1374_v52, 0.0 }
 0x152   :  { %v1379_v8 = vmax.f32 %v1375_v24, 0.0  ;;  %v1380_v7 = vmax.f32 %v1376_v60, 0.0  ;;  %v1364_v37 = vmul.f32 %v5998_v33, %v1359_v46  ;;  %v1365_v44 = vmul.f32 %v5998_v33, %v1360_v51 }
 0x153   :  { %v1366_v27 = vmul.f32 %v5998_v33, %v1361_v41  ;;  %v1367_v36 = vmul.f32 %v5998_v33, %v1362_v45  ;;  %v1352_v4 = vadd.f32 %v1348_v6, %v1316_v19  ;;  %v1353_v48 = vadd.f32 %v1349_v59, %v1317_v10 }
 0x154   :  { %v1382_v58 = vmul.f32 %v6004_v11, %v1377_v39  ;;  %v1383_v42 = vmul.f32 %v6004_v11, %v1378_v35  ;;  %v1368_v28 = vadd.f32 %v1364_v37, %v1332_v1  ;;  %v1369_v61 = vadd.f32 %v1365_v44, %v1333_v25 }
 0x155   :  { %v1384_v52 = vmul.f32 %v6004_v11, %v1379_v8  ;;  %v1385_v24 = vmul.f32 %v6004_v11, %v1380_v7  ;;  %v1370_v60 = vadd.f32 %v1366_v27, %v1334_v32  ;;  %v1371_v46 = vadd.f32 %v1367_v36, %v1335_v34 }
 0x156   :  { %v1386_v51 = vadd.f32 %v1382_v58, %v1350_v20  ;;  %v1387_v41 = vadd.f32 %v1383_v42, %v1351_v14  ;;  %v6039_v19 = vstv %s5990_s30  ;;  %v6042_v10 = vstv %s6006_s6  ;;  %s6300_s30 = sld [smem:[#allocation2 + $0x4d]]  ;;  %s6316_s6 = sld [smem:[#allocation2 + $0xb2]] }
 0x157   :  { %8778 = vst [vmem:[#allocation122_spill] sm:$0xff] %v6039_v19  ;;  %8779 = vst [vmem:[#allocation123_spill] sm:$0xff] %v6042_v10  ;;  %v6045_v6 = vstv %s5992_s5  ;;  %v6048_v1 = vstv %s6008_s7  ;;  %v1391_v36 = vsub.f32 %v5826_v40, %v6039_v19  ;;  %v1392_v44 = vsub.f32 %v5830_v43, %v6039_v19  ;;  %s6314_s5 = sld [smem:[#allocation2 + $0xb1]]  ;;  %s6342_s7 = sld [smem:[#allocation2 + $0x4e]] }
 0x158   :  { %8780 = vst [vmem:[#allocation124_spill] sm:$0xff] %v6045_v6  ;;  %8781 = vst [vmem:[#allocation125_spill] sm:$0xff] %v6048_v1  ;;  %v1393_v25 = vsub.f32 %v5834_v29, %v6039_v19  ;;  %v1394_v59 = vsub.f32 %v5838_v9, %v6039_v19  ;;  %v1409_v32 = vsub.f32 %v5826_v40, %v6045_v6 }
 0x159   :  { %v1410_v34 = vsub.f32 %v5830_v43, %v6045_v6  ;;  %v1411_v20 = vsub.f32 %v5834_v29, %v6045_v6  ;;  %v1412_v14 = vsub.f32 %v5838_v9, %v6045_v6  ;;  %v1395_v27 = vmax.f32 %v1391_v36, 0.0 }
 0x15a   :  { %v1396_v45 = vmax.f32 %v1392_v44, 0.0  ;;  %v1397_v39 = vmax.f32 %v1393_v25, 0.0  ;;  %v1398_v35 = vmax.f32 %v1394_v59, 0.0  ;;  %v1413_v8 = vmax.f32 %v1409_v32, 0.0 }
 0x15b   :  { %v1414_v7 = vmax.f32 %v1410_v34, 0.0  ;;  %v1415_v37 = vmax.f32 %v1411_v20, 0.0  ;;  %v1416_v58 = vmax.f32 %v1412_v14, 0.0  ;;  %v1400_v42 = vmul.f32 %v6042_v10, %v1395_v27 }
 0x15c   :  { %v1401_v11 = vmul.f32 %v6042_v10, %v1396_v45  ;;  %v1402_v19 = vmul.f32 %v6042_v10, %v1397_v39  ;;  %v1403_v30 = vmul.f32 %v6042_v10, %v1398_v35  ;;  %v1388_v33 = vadd.f32 %v1384_v52, %v1352_v4 }
 0x15d   :  { %v1389_v36 = vadd.f32 %v1385_v24, %v1353_v48  ;;  %v1418_v44 = vmul.f32 %v6048_v1, %v1413_v8  ;;  %v1419_v25 = vmul.f32 %v6048_v1, %v1414_v7  ;;  %v1404_v59 = vadd.f32 %v1400_v42, %v1368_v28 }
 0x15e   :  { %v1405_v32 = vadd.f32 %v1401_v11, %v1369_v61  ;;  %v1420_v34 = vmul.f32 %v6048_v1, %v1415_v37  ;;  %v1421_v20 = vmul.f32 %v6048_v1, %v1416_v58  ;;  %v1406_v14 = vadd.f32 %v1402_v19, %v1370_v60 }
 0x15f   :  { %v1407_v27 = vadd.f32 %v1403_v30, %v1371_v46  ;;  %v1422_v45 = vadd.f32 %v1418_v44, %v1386_v51  ;;  %v1423_v39 = vadd.f32 %v1419_v25, %v1387_v41  ;;  %v6083_v4 = vstv %s6034_s8  ;;  %s6344_s8 = sld [smem:[#allocation2 + $0x4f]] }
 0x160   :  { %8782 = vst [vmem:[#allocation126_spill] sm:$0xff] %v6083_v4  ;;  %v6086_v48 = vstv %s6050_s0  ;;  %v6089_v52 = vstv %s6036_s9  ;;  %v6092_v28 = vstv %s6052_s10  ;;  %v1427_v30 = vsub.f32 %v5826_v40, %v6083_v4  ;;  %s6358_s9 = sld [smem:[#allocation2 + $0xb3]]  ;;  %s6360_s0 = sld [smem:[#allocation2 + $0xb4]] }
 0x161   :  { %8783 = vst [vmem:[#allocation127_spill] sm:$0xff] %v6086_v48  ;;  %8784 = vst [vmem:[#allocation128_spill] sm:$0xff] %v6089_v52  ;;  %v1428_v11 = vsub.f32 %v5830_v43, %v6083_v4  ;;  %v1429_v61 = vsub.f32 %v5834_v29, %v6083_v4  ;;  %v1430_v24 = vsub.f32 %v5838_v9, %v6083_v4  ;;  %s6386_s10 = sld [smem:[#allocation2 + $0x50]] }
 0x162   :  { %8785 = vst [vmem:[#allocation129_spill] sm:$0xff] %v6092_v28  ;;  %v1445_v60 = vsub.f32 %v5826_v40, %v6089_v52  ;;  %v1446_v46 = vsub.f32 %v5830_v43, %v6089_v52  ;;  %v1447_v51 = vsub.f32 %v5834_v29, %v6089_v52  ;;  %v1448_v41 = vsub.f32 %v5838_v9, %v6089_v52 }
 0x163   :  { %v1431_v19 = vmax.f32 %v1427_v30, 0.0  ;;  %v1432_v35 = vmax.f32 %v1428_v11, 0.0  ;;  %v1433_v8 = vmax.f32 %v1429_v61, 0.0  ;;  %v1434_v7 = vmax.f32 %v1430_v24, 0.0 }
 0x164   :  { %v1449_v37 = vmax.f32 %v1445_v60, 0.0  ;;  %v1450_v58 = vmax.f32 %v1446_v46, 0.0  ;;  %v1451_v42 = vmax.f32 %v1447_v51, 0.0  ;;  %v1452_v44 = vmax.f32 %v1448_v41, 0.0 }
 0x165   :  { %v1436_v25 = vmul.f32 %v6086_v48, %v1431_v19  ;;  %v1437_v1 = vmul.f32 %v6086_v48, %v1432_v35  ;;  %v1438_v4 = vmul.f32 %v6086_v48, %v1433_v8  ;;  %v1439_v6 = vmul.f32 %v6086_v48, %v1434_v7 }
 0x166   :  { %v1424_v10 = vadd.f32 %v1420_v34, %v1388_v33  ;;  %v1425_v30 = vadd.f32 %v1421_v20, %v1389_v36  ;;  %v1454_v11 = vmul.f32 %v6092_v28, %v1449_v37  ;;  %v1455_v61 = vmul.f32 %v6092_v28, %v1450_v58 }
 0x167   :  { %v1440_v24 = vadd.f32 %v1436_v25, %v1404_v59  ;;  %v1441_v60 = vadd.f32 %v1437_v1, %v1405_v32  ;;  %v1456_v46 = vmul.f32 %v6092_v28, %v1451_v42  ;;  %v1457_v51 = vmul.f32 %v6092_v28, %v1452_v44 }
 0x168   :  { %v1442_v41 = vadd.f32 %v1438_v4, %v1406_v14  ;;  %v1443_v19 = vadd.f32 %v1439_v6, %v1407_v27  ;;  %v1458_v35 = vadd.f32 %v1454_v11, %v1422_v45  ;;  %v1459_v8 = vadd.f32 %v1455_v61, %v1423_v39 }
 0x169   :  { %v6127_v33 = vstv %s6078_s11  ;;  %v6130_v36 = vstv %s6094_s13  ;;  %v6133_v34 = vstv %s6080_s12  ;;  %v6136_v59 = vstv %s6096_s14  ;;  %s6388_s11 = sld [smem:[#allocation2 + $0x51]]  ;;  %s6402_s12 = sld [smem:[#allocation2 + $0xb5]] }
 0x16a   :  { %8786 = vst [vmem:[#allocation130_spill] sm:$0xff] %v6127_v33  ;;  %8787 = vst [vmem:[#allocation131_spill] sm:$0xff] %v6130_v36  ;;  %v1463_v6 = vsub.f32 %v5826_v40, %v6127_v33  ;;  %v1464_v1 = vsub.f32 %v5830_v43, %v6127_v33  ;;  %v1465_v32 = vsub.f32 %v5834_v29, %v6127_v33  ;;  %s6404_s13 = sld [smem:[#allocation2 + $0xb6]]  ;;  %s6438_s14 = sld [smem:[#allocation2 + $0x52]] }
 0x16b   :  { %8788 = vst [vmem:[#allocation132_spill] sm:$0xff] %v6133_v34  ;;  %8789 = vst [vmem:[#allocation133_spill] sm:$0xff] %v6136_v59  ;;  %v1466_v20 = vsub.f32 %v5838_v9, %v6127_v33  ;;  %v1481_v14 = vsub.f32 %v5826_v40, %v6133_v34  ;;  %v1482_v27 = vsub.f32 %v5830_v43, %v6133_v34 }
 0x16c   :  { %v1483_v45 = vsub.f32 %v5834_v29, %v6133_v34  ;;  %v1484_v39 = vsub.f32 %v5838_v9, %v6133_v34  ;;  %v1467_v4 = vmax.f32 %v1463_v6, 0.0  ;;  %v1468_v7 = vmax.f32 %v1464_v1, 0.0 }
 0x16d   :  { %v1469_v37 = vmax.f32 %v1465_v32, 0.0  ;;  %v1470_v58 = vmax.f32 %v1466_v20, 0.0  ;;  %v1485_v42 = vmax.f32 %v1481_v14, 0.0  ;;  %v1486_v44 = vmax.f32 %v1482_v27, 0.0 }
 0x16e   :  { %v1487_v25 = vmax.f32 %v1483_v45, 0.0  ;;  %v1488_v11 = vmax.f32 %v1484_v39, 0.0  ;;  %v1472_v61 = vmul.f32 %v6130_v36, %v1467_v4  ;;  %v1473_v28 = vmul.f32 %v6130_v36, %v1468_v7 }
 0x16f   :  { %v1474_v33 = vmul.f32 %v6130_v36, %v1469_v37  ;;  %v1475_v52 = vmul.f32 %v6130_v36, %v1470_v58  ;;  %v1460_v48 = vadd.f32 %v1456_v46, %v1424_v10  ;;  %v1461_v6 = vadd.f32 %v1457_v51, %v1425_v30 }
 0x170   :  { %v1490_v1 = vmul.f32 %v6136_v59, %v1485_v42  ;;  %v1491_v32 = vmul.f32 %v6136_v59, %v1486_v44  ;;  %v1476_v20 = vadd.f32 %v1472_v61, %v1440_v24  ;;  %v1477_v14 = vadd.f32 %v1473_v28, %v1441_v60 }
 0x171   :  { %v1492_v27 = vmul.f32 %v6136_v59, %v1487_v25  ;;  %v1493_v45 = vmul.f32 %v6136_v59, %v1488_v11  ;;  %v1478_v39 = vadd.f32 %v1474_v33, %v1442_v41  ;;  %v1479_v4 = vadd.f32 %v1475_v52, %v1443_v19 }
 0x172   :  { %v1494_v7 = vadd.f32 %v1490_v1, %v1458_v35  ;;  %v1495_v37 = vadd.f32 %v1491_v32, %v1459_v8  ;;  %v6171_v10 = vstv %s6122_s15  ;;  %v6174_v30 = vstv %s6138_s17  ;;  %s6440_s15 = sld [smem:[#allocation2 + $0x53]]  ;;  %s6456_s17 = sld [smem:[#allocation2 + $0xb8]] }
 0x173   :  { %8790 = vst [vmem:[#allocation134_spill] sm:$0xff] %v6171_v10  ;;  %8791 = vst [vmem:[#allocation135_spill] sm:$0xff] %v6174_v30  ;;  %v6177_v46 = vstv %s6124_s16  ;;  %v6180_v24 = vstv %s6140_s18  ;;  %v1499_v52 = vsub.f32 %v5826_v40, %v6171_v10  ;;  %v1500_v28 = vsub.f32 %v5830_v43, %v6171_v10  ;;  %s6454_s16 = sld [smem:[#allocation2 + $0xb7]]  ;;  %s6482_s18 = sld [smem:[#allocation2 + $0x54]] }
 0x174   :  { %8792 = vst [vmem:[#allocation136_spill] sm:$0xff] %v6177_v46  ;;  %8793 = vst [vmem:[#allocation137_spill] sm:$0xff] %v6180_v24  ;;  %v1501_v60 = vsub.f32 %v5834_v29, %v6171_v10  ;;  %v1502_v51 = vsub.f32 %v5838_v9, %v6171_v10  ;;  %v1517_v41 = vsub.f32 %v5826_v40, %v6177_v46 }
 0x175   :  { %v1518_v19 = vsub.f32 %v5830_v43, %v6177_v46  ;;  %v1519_v35 = vsub.f32 %v5834_v29, %v6177_v46  ;;  %v1520_v8 = vsub.f32 %v5838_v9, %v6177_v46  ;;  %v1503_v33 = vmax.f32 %v1499_v52, 0.0 }
 0x176   :  { %v1504_v58 = vmax.f32 %v1500_v28, 0.0  ;;  %v1505_v42 = vmax.f32 %v1501_v60, 0.0  ;;  %v1506_v44 = vmax.f32 %v1502_v51, 0.0  ;;  %v1521_v25 = vmax.f32 %v1517_v41, 0.0 }
 0x177   :  { %v1522_v11 = vmax.f32 %v1518_v19, 0.0  ;;  %v1523_v61 = vmax.f32 %v1519_v35, 0.0  ;;  %v1524_v1 = vmax.f32 %v1520_v8, 0.0  ;;  %v1508_v32 = vmul.f32 %v6174_v30, %v1503_v33 }
 0x178   :  { %v1509_v59 = vmul.f32 %v6174_v30, %v1504_v58  ;;  %v1510_v10 = vmul.f32 %v6174_v30, %v1505_v42  ;;  %v1511_v34 = vmul.f32 %v6174_v30, %v1506_v44  ;;  %v1496_v36 = vadd.f32 %v1492_v27, %v1460_v48 }
 0x179   :  { %v1497_v52 = vadd.f32 %v1493_v45, %v1461_v6  ;;  %v1526_v28 = vmul.f32 %v6180_v24, %v1521_v25  ;;  %v1527_v60 = vmul.f32 %v6180_v24, %v1522_v11  ;;  %v1512_v51 = vadd.f32 %v1508_v32, %v1476_v20 }
 0x17a   :  { %v1513_v41 = vadd.f32 %v1509_v59, %v1477_v14  ;;  %v1528_v19 = vmul.f32 %v6180_v24, %v1523_v61  ;;  %v1529_v35 = vmul.f32 %v6180_v24, %v1524_v1  ;;  %v1514_v8 = vadd.f32 %v1510_v10, %v1478_v39 }
 0x17b   :  { %v1515_v33 = vadd.f32 %v1511_v34, %v1479_v4  ;;  %v1530_v58 = vadd.f32 %v1526_v28, %v1494_v7  ;;  %v1531_v42 = vadd.f32 %v1527_v60, %v1495_v37  ;;  %v6215_v48 = vstv %s6166_s19  ;;  %s6484_s19 = sld [smem:[#allocation2 + $0x55]] }
 0x17c   :  { %8794 = vst [vmem:[#allocation138_spill] sm:$0xff] %v6215_v48  ;;  %v6218_v6 = vstv %s6182_s20  ;;  %v6221_v27 = vstv %s6168_s1  ;;  %v6224_v20 = vstv %s6184_s21  ;;  %v1535_v34 = vsub.f32 %v5826_v40, %v6215_v48  ;;  %s6498_s1 = sld [smem:[#allocation2 + $0xb9]]  ;;  %s6500_s20 = sld [smem:[#allocation2 + $0xba]] }
 0x17d   :  { %8795 = vst [vmem:[#allocation139_spill] sm:$0xff] %v6218_v6  ;;  %8796 = vst [vmem:[#allocation140_spill] sm:$0xff] %v6221_v27  ;;  %v1536_v59 = vsub.f32 %v5830_v43, %v6215_v48  ;;  %v1537_v14 = vsub.f32 %v5834_v29, %v6215_v48  ;;  %v1538_v45 = vsub.f32 %v5838_v9, %v6215_v48  ;;  %s6526_s21 = sld [smem:[#allocation2 + $0x56]] }
 0x17e   :  { %8797 = vst [vmem:[#allocation141_spill] sm:$0xff] %v6224_v20  ;;  %v1553_v39 = vsub.f32 %v5826_v40, %v6221_v27  ;;  %v1554_v4 = vsub.f32 %v5830_v43, %v6221_v27  ;;  %v1555_v7 = vsub.f32 %v5834_v29, %v6221_v27  ;;  %v1556_v37 = vsub.f32 %v5838_v9, %v6221_v27 }
 0x17f   :  { %v1539_v10 = vmax.f32 %v1535_v34, 0.0  ;;  %v1540_v44 = vmax.f32 %v1536_v59, 0.0  ;;  %v1541_v25 = vmax.f32 %v1537_v14, 0.0  ;;  %v1542_v11 = vmax.f32 %v1538_v45, 0.0 }
 0x180   :  { %v1557_v61 = vmax.f32 %v1553_v39, 0.0  ;;  %v1558_v1 = vmax.f32 %v1554_v4, 0.0  ;;  %v1559_v32 = vmax.f32 %v1555_v7, 0.0  ;;  %v1560_v28 = vmax.f32 %v1556_v37, 0.0 }
 0x181   :  { %v1544_v60 = vmul.f32 %v6218_v6, %v1539_v10  ;;  %v1545_v24 = vmul.f32 %v6218_v6, %v1540_v44  ;;  %v1546_v48 = vmul.f32 %v6218_v6, %v1541_v25  ;;  %v1547_v46 = vmul.f32 %v6218_v6, %v1542_v11 }
 0x182   :  { %v1532_v30 = vadd.f32 %v1528_v19, %v1496_v36  ;;  %v1533_v34 = vadd.f32 %v1529_v35, %v1497_v52  ;;  %v1562_v59 = vmul.f32 %v6224_v20, %v1557_v61  ;;  %v1563_v14 = vmul.f32 %v6224_v20, %v1558_v1 }
 0x183   :  { %v1548_v45 = vadd.f32 %v1544_v60, %v1512_v51  ;;  %v1549_v39 = vadd.f32 %v1545_v24, %v1513_v41  ;;  %v1564_v4 = vmul.f32 %v6224_v20, %v1559_v32  ;;  %v1565_v7 = vmul.f32 %v6224_v20, %v1560_v28 }
 0x184   :  { %v1550_v37 = vadd.f32 %v1546_v48, %v1514_v8  ;;  %v1551_v10 = vadd.f32 %v1547_v46, %v1515_v33  ;;  %v1566_v44 = vadd.f32 %v1562_v59, %v1530_v58  ;;  %v1567_v25 = vadd.f32 %v1563_v14, %v1531_v42 }
 0x185   :  { %v6259_v36 = vstv %s6210_s22  ;;  %v6262_v52 = vstv %s6226_s24  ;;  %v6265_v19 = vstv %s6212_s23  ;;  %v6268_v51 = vstv %s6228_s2  ;;  %s6528_s22 = sld [smem:[#allocation2 + $0x57]]  ;;  %s6542_s23 = sld [smem:[#allocation2 + $0xbb]] }
 0x186   :  { %8798 = vst [vmem:[#allocation142_spill] sm:$0xff] %v6259_v36  ;;  %8799 = vst [vmem:[#allocation143_spill] sm:$0xff] %v6262_v52  ;;  %v1571_v46 = vsub.f32 %v5826_v40, %v6259_v36  ;;  %v1572_v24 = vsub.f32 %v5830_v43, %v6259_v36  ;;  %v1573_v41 = vsub.f32 %v5834_v29, %v6259_v36  ;;  %s6544_s24 = sld [smem:[#allocation2 + $0xbc]]  ;;  %s6570_s2 = sld [smem:[#allocation2 + $0x58]] }
 0x187   :  { %8800 = vst [vmem:[#allocation144_spill] sm:$0xff] %v6265_v19  ;;  %8801 = vst [vmem:[#allocation145_spill] sm:$0xff] %v6268_v51  ;;  %v1574_v35 = vsub.f32 %v5838_v9, %v6259_v36  ;;  %v1589_v8 = vsub.f32 %v5826_v40, %v6265_v19  ;;  %v1590_v33 = vsub.f32 %v5830_v43, %v6265_v19 }
 0x188   :  { %v1591_v58 = vsub.f32 %v5834_v29, %v6265_v19  ;;  %v1592_v42 = vsub.f32 %v5838_v9, %v6265_v19  ;;  %v1575_v48 = vmax.f32 %v1571_v46, 0.0  ;;  %v1576_v11 = vmax.f32 %v1572_v24, 0.0 }
 0x189   :  { %v1577_v61 = vmax.f32 %v1573_v41, 0.0  ;;  %v1578_v1 = vmax.f32 %v1574_v35, 0.0  ;;  %v1593_v32 = vmax.f32 %v1589_v8, 0.0  ;;  %v1594_v28 = vmax.f32 %v1590_v33, 0.0 }
 0x18a   :  { %v1595_v60 = vmax.f32 %v1591_v58, 0.0  ;;  %v1596_v59 = vmax.f32 %v1592_v42, 0.0  ;;  %v1580_v14 = vmul.f32 %v6262_v52, %v1575_v48  ;;  %v1581_v20 = vmul.f32 %v6262_v52, %v1576_v11 }
 0x18b   :  { %v1582_v36 = vmul.f32 %v6262_v52, %v1577_v61  ;;  %v1583_v27 = vmul.f32 %v6262_v52, %v1578_v1  ;;  %v1568_v6 = vadd.f32 %v1564_v4, %v1532_v30  ;;  %v1569_v46 = vadd.f32 %v1565_v7, %v1533_v34 }
 0x18c   :  { %v1598_v24 = vmul.f32 %v6268_v51, %v1593_v32  ;;  %v1599_v41 = vmul.f32 %v6268_v51, %v1594_v28  ;;  %v1584_v35 = vadd.f32 %v1580_v14, %v1548_v45  ;;  %v1585_v8 = vadd.f32 %v1581_v20, %v1549_v39 }
 0x18d   :  { %v1600_v33 = vmul.f32 %v6268_v51, %v1595_v60  ;;  %v1601_v58 = vmul.f32 %v6268_v51, %v1596_v59  ;;  %v1586_v42 = vadd.f32 %v1582_v36, %v1550_v37  ;;  %v1587_v48 = vadd.f32 %v1583_v27, %v1551_v10 }
 0x18e   :  { %v1602_v11 = vadd.f32 %v1598_v24, %v1566_v44  ;;  %v1603_v61 = vadd.f32 %v1599_v41, %v1567_v25  ;;  %v6303_v30 = vstv %s6254_s25  ;;  %v6306_v34 = vstv %s6270_s27  ;;  %s6572_s25 = sld [smem:[#allocation2 + $0x59]]  ;;  %s6588_s27 = sld [smem:[#allocation2 + $0xbe]] }
 0x18f   :  { %8802 = vst [vmem:[#allocation146_spill] sm:$0xff] %v6303_v30  ;;  %8803 = vst [vmem:[#allocation147_spill] sm:$0xff] %v6306_v34  ;;  %v6309_v4 = vstv %s6256_s26  ;;  %v6312_v45 = vstv %s6272_s28  ;;  %v1607_v27 = vsub.f32 %v5826_v40, %v6303_v30  ;;  %v1608_v20 = vsub.f32 %v5830_v43, %v6303_v30  ;;  %s6586_s26 = sld [smem:[#allocation2 + $0xbd]]  ;;  %s6614_s28 = sld [smem:[#allocation2 + $0x5a]] }
 0x190   :  { %8804 = vst [vmem:[#allocation148_spill] sm:$0xff] %v6309_v4  ;;  %8805 = vst [vmem:[#allocation149_spill] sm:$0xff] %v6312_v45  ;;  %v1609_v39 = vsub.f32 %v5834_v29, %v6303_v30  ;;  %v1610_v7 = vsub.f32 %v5838_v9, %v6303_v30  ;;  %v1625_v37 = vsub.f32 %v5826_v40, %v6309_v4 }
 0x191   :  { %v1626_v10 = vsub.f32 %v5830_v43, %v6309_v4  ;;  %v1627_v44 = vsub.f32 %v5834_v29, %v6309_v4  ;;  %v1628_v25 = vsub.f32 %v5838_v9, %v6309_v4  ;;  %v1611_v36 = vmax.f32 %v1607_v27, 0.0 }
 0x192   :  { %v1612_v1 = vmax.f32 %v1608_v20, 0.0  ;;  %v1613_v32 = vmax.f32 %v1609_v39, 0.0  ;;  %v1614_v28 = vmax.f32 %v1610_v7, 0.0  ;;  %v1629_v60 = vmax.f32 %v1625_v37, 0.0 }
 0x193   :  { %v1630_v59 = vmax.f32 %v1626_v10, 0.0  ;;  %v1631_v14 = vmax.f32 %v1627_v44, 0.0  ;;  %v1632_v24 = vmax.f32 %v1628_v25, 0.0  ;;  %v1616_v41 = vmul.f32 %v6306_v34, %v1611_v36 }
 0x194   :  { %v1617_v51 = vmul.f32 %v6306_v34, %v1612_v1  ;;  %v1618_v30 = vmul.f32 %v6306_v34, %v1613_v32  ;;  %v1619_v19 = vmul.f32 %v6306_v34, %v1614_v28  ;;  %v1604_v52 = vadd.f32 %v1600_v33, %v1568_v6 }
 0x195   :  { %v1605_v27 = vadd.f32 %v1601_v58, %v1569_v46  ;;  %v1634_v20 = vmul.f32 %v6312_v45, %v1629_v60  ;;  %v1635_v39 = vmul.f32 %v6312_v45, %v1630_v59  ;;  %v1620_v7 = vadd.f32 %v1616_v41, %v1584_v35 }
 0x196   :  { %v1621_v37 = vadd.f32 %v1617_v51, %v1585_v8  ;;  %v1636_v10 = vmul.f32 %v6312_v45, %v1631_v14  ;;  %v1637_v44 = vmul.f32 %v6312_v45, %v1632_v24  ;;  %v1622_v25 = vadd.f32 %v1618_v30, %v1586_v42 }
 0x197   :  { %v1623_v36 = vadd.f32 %v1619_v19, %v1587_v48  ;;  %v1638_v1 = vadd.f32 %v1634_v20, %v1602_v11  ;;  %v1639_v32 = vadd.f32 %v1635_v39, %v1603_v61  ;;  %v6347_v6 = vstv %s6298_s29  ;;  %s6616_s29 = sld [smem:[#allocation2 + $0x5b]] }
 0x198   :  { %8806 = vst [vmem:[#allocation150_spill] sm:$0xff] %v6347_v6  ;;  %v6350_v46 = vstv %s6314_s5  ;;  %v6353_v33 = vstv %s6300_s30  ;;  %v6356_v35 = vstv %s6316_s6  ;;  %v1643_v19 = vsub.f32 %v5826_v40, %v6347_v6  ;;  %s6630_s30 = sld [smem:[#allocation2 + $0xbf]]  ;;  %s6632_s5 = sld [smem:[#allocation2 + $0xc0]] }
 0x199   :  { %8807 = vst [vmem:[#allocation151_spill] sm:$0xff] %v6350_v46  ;;  %8808 = vst [vmem:[#allocation152_spill] sm:$0xff] %v6353_v33  ;;  %v1644_v51 = vsub.f32 %v5830_v43, %v6347_v6  ;;  %v1645_v8 = vsub.f32 %v5834_v29, %v6347_v6  ;;  %v1646_v58 = vsub.f32 %v5838_v9, %v6347_v6  ;;  %s6658_s6 = sld [smem:[#allocation2 + $0x5c]] }
 0x19a   :  { %8809 = vst [vmem:[#allocation153_spill] sm:$0xff] %v6356_v35  ;;  %v1661_v42 = vsub.f32 %v5826_v40, %v6353_v33  ;;  %v1662_v48 = vsub.f32 %v5830_v43, %v6353_v33  ;;  %v1663_v11 = vsub.f32 %v5834_v29, %v6353_v33  ;;  %v1664_v61 = vsub.f32 %v5838_v9, %v6353_v33 }
 0x19b   :  { %v1647_v30 = vmax.f32 %v1643_v19, 0.0  ;;  %v1648_v28 = vmax.f32 %v1644_v51, 0.0  ;;  %v1649_v60 = vmax.f32 %v1645_v8, 0.0  ;;  %v1650_v59 = vmax.f32 %v1646_v58, 0.0 }
 0x19c   :  { %v1665_v14 = vmax.f32 %v1661_v42, 0.0  ;;  %v1666_v24 = vmax.f32 %v1662_v48, 0.0  ;;  %v1667_v41 = vmax.f32 %v1663_v11, 0.0  ;;  %v1668_v20 = vmax.f32 %v1664_v61, 0.0 }
 0x19d   :  { %v1652_v39 = vmul.f32 %v6350_v46, %v1647_v30  ;;  %v1653_v40 = vmul.f32 %v6350_v46, %v1648_v28  ;;  %v1654_v43 = vmul.f32 %v6350_v46, %v1649_v60  ;;  %v1655_v29 = vmul.f32 %v6350_v46, %v1650_v59  ;;  %v6418_v60 = vld [vmem:[#allocation6 + $0x18] sm:$0xff] }
 0x19e   :  { %v1640_v45 = vadd.f32 %v1636_v10, %v1604_v52  ;;  %v1641_v9 = vadd.f32 %v1637_v44, %v1605_v27  ;;  %v1670_v19 = vmul.f32 %v6356_v35, %v1665_v14  ;;  %v1671_v51 = vmul.f32 %v6356_v35, %v1666_v24 }
 0x19f   :  { %v1656_v8 = vadd.f32 %v1652_v39, %v1620_v7  ;;  %v1657_v58 = vadd.f32 %v1653_v40, %v1621_v37  ;;  %v1672_v42 = vmul.f32 %v6356_v35, %v1667_v41  ;;  %v1673_v48 = vmul.f32 %v6356_v35, %v1668_v20  ;;  %v6406_v37 = vld [vmem:[#allocation6] sm:$0xff] }
 0x1a0   :  { %v1658_v11 = vadd.f32 %v1654_v43, %v1622_v25  ;;  %v1659_v61 = vadd.f32 %v1655_v29, %v1623_v36  ;;  %v1674_v30 = vadd.f32 %v1670_v19, %v1638_v1  ;;  %v1675_v28 = vadd.f32 %v1671_v51, %v1639_v32  ;;  %v6410_v25 = vld [vmem:[#allocation6 + $0x8] sm:$0xff]  ;;  %v6414_v1 = vld [vmem:[#allocation6 + $0x10] sm:$0xff] }
 0x1a1   :  { %v6391_v52 = vstv %s6342_s7  ;;  %v6394_v27 = vstv %s6358_s9  ;;  %v6397_v10 = vstv %s6344_s8  ;;  %v6400_v7 = vstv %s6360_s0  ;;  %s6660_s7 = sld [smem:[#allocation2 + $0x5d]]  ;;  %s6674_s8 = sld [smem:[#allocation2 + $0xc1]] }
 0x1a2   :  { %8810 = vst [vmem:[#allocation154_spill] sm:$0xff] %v6391_v52  ;;  %8811 = vst [vmem:[#allocation155_spill] sm:$0xff] %v6394_v27  ;;  %v1679_v44 = vsub.f32 %v6406_v37, %v6391_v52  ;;  %v1680_v36 = vsub.f32 %v6410_v25, %v6391_v52  ;;  %v1681_v32 = vsub.f32 %v6414_v1, %v6391_v52  ;;  %s6676_s9 = sld [smem:[#allocation2 + $0xc2]]  ;;  %s6702_s0 = sld [smem:[#allocation2 + $0x5e]] }
 0x1a3   :  { %8812 = vst [vmem:[#allocation156_spill] sm:$0xff] %v6397_v10  ;;  %8813 = vst [vmem:[#allocation157_spill] sm:$0xff] %v6400_v7  ;;  %v1682_v59 = vsub.f32 %v6418_v60, %v6391_v52  ;;  %v1697_v14 = vsub.f32 %v6406_v37, %v6397_v10  ;;  %v1698_v24 = vsub.f32 %v6410_v25, %v6397_v10 }
 0x1a4   :  { %v1699_v41 = vsub.f32 %v6414_v1, %v6397_v10  ;;  %v1700_v20 = vsub.f32 %v6418_v60, %v6397_v10  ;;  %v1683_v39 = vmax.f32 %v1679_v44, 0.0  ;;  %v1684_v40 = vmax.f32 %v1680_v36, 0.0 }
 0x1a5   :  { %v1685_v43 = vmax.f32 %v1681_v32, 0.0  ;;  %v1686_v29 = vmax.f32 %v1682_v59, 0.0  ;;  %v1701_v19 = vmax.f32 %v1697_v14, 0.0  ;;  %v1702_v51 = vmax.f32 %v1698_v24, 0.0 }
 0x1a6   :  { %v1703_v35 = vmax.f32 %v1699_v41, 0.0  ;;  %v1704_v52 = vmax.f32 %v1700_v20, 0.0  ;;  %v1688_v33 = vmul.f32 %v6394_v27, %v1683_v39  ;;  %v1689_v46 = vmul.f32 %v6394_v27, %v1684_v40 }
 0x1a7   :  { %v1690_v6 = vmul.f32 %v6394_v27, %v1685_v43  ;;  %v1691_v4 = vmul.f32 %v6394_v27, %v1686_v29  ;;  %v1676_v34 = vadd.f32 %v1672_v42, %v1640_v45  ;;  %v1677_v44 = vadd.f32 %v1673_v48, %v1641_v9 }
 0x1a8   :  { %v1706_v36 = vmul.f32 %v6400_v7, %v1701_v19  ;;  %v1707_v32 = vmul.f32 %v6400_v7, %v1702_v51  ;;  %v1692_v59 = vadd.f32 %v1688_v33, %v1656_v8  ;;  %v1693_v14 = vadd.f32 %v1689_v46, %v1657_v58 }
 0x1a9   :  { %v1708_v24 = vmul.f32 %v6400_v7, %v1703_v35  ;;  %v1709_v41 = vmul.f32 %v6400_v7, %v1704_v52  ;;  %v1694_v20 = vadd.f32 %v1690_v6, %v1658_v11  ;;  %v1695_v39 = vadd.f32 %v1691_v4, %v1659_v61 }
 0x1aa   :  { %v1710_v40 = vadd.f32 %v1706_v36, %v1674_v30  ;;  %v1711_v43 = vadd.f32 %v1707_v32, %v1675_v28  ;;  %v6443_v45 = vstv %s6386_s10  ;;  %v6446_v9 = vstv %s6402_s12  ;;  %s6704_s10 = sld [smem:[#allocation2 + $0x5f]]  ;;  %s6720_s12 = sld [smem:[#allocation2 + $0xc4]] }
 0x1ab   :  { %8814 = vst [vmem:[#allocation158_spill] sm:$0xff] %v6443_v45  ;;  %8815 = vst [vmem:[#allocation159_spill] sm:$0xff] %v6446_v9  ;;  %v6449_v42 = vstv %s6388_s11  ;;  %v6452_v33 = vstv %s6404_s13  ;;  %v1715_v4 = vsub.f32 %v6406_v37, %v6443_v45  ;;  %v1716_v6 = vsub.f32 %v6410_v25, %v6443_v45  ;;  %s6718_s11 = sld [smem:[#allocation2 + $0xc3]]  ;;  %s6746_s13 = sld [smem:[#allocation2 + $0x60]] }
 0x1ac   :  { %8816 = vst [vmem:[#allocation160_spill] sm:$0xff] %v6449_v42  ;;  %8817 = vst [vmem:[#allocation161_spill] sm:$0xff] %v6452_v33  ;;  %v1717_v46 = vsub.f32 %v6414_v1, %v6443_v45  ;;  %v1718_v35 = vsub.f32 %v6418_v60, %v6443_v45  ;;  %v1733_v8 = vsub.f32 %v6406_v37, %v6449_v42 }
 0x1ad   :  { %v1734_v58 = vsub.f32 %v6410_v25, %v6449_v42  ;;  %v1735_v48 = vsub.f32 %v6414_v1, %v6449_v42  ;;  %v1736_v11 = vsub.f32 %v6418_v60, %v6449_v42  ;;  %v1719_v61 = vmax.f32 %v1715_v4, 0.0 }
 0x1ae   :  { %v1720_v30 = vmax.f32 %v1716_v6, 0.0  ;;  %v1721_v28 = vmax.f32 %v1717_v46, 0.0  ;;  %v1722_v52 = vmax.f32 %v1718_v35, 0.0  ;;  %v1737_v29 = vmax.f32 %v1733_v8, 0.0 }
 0x1af   :  { %v1738_v19 = vmax.f32 %v1734_v58, 0.0  ;;  %v1739_v51 = vmax.f32 %v1735_v48, 0.0  ;;  %v1740_v36 = vmax.f32 %v1736_v11, 0.0  ;;  %v1724_v32 = vmul.f32 %v6446_v9, %v1719_v61 }
 0x1b0   :  { %v1725_v7 = vmul.f32 %v6446_v9, %v1720_v30  ;;  %v1726_v45 = vmul.f32 %v6446_v9, %v1721_v28  ;;  %v1727_v10 = vmul.f32 %v6446_v9, %v1722_v52  ;;  %v1712_v27 = vadd.f32 %v1708_v24, %v1676_v34 }
 0x1b1   :  { %v1713_v4 = vadd.f32 %v1709_v41, %v1677_v44  ;;  %v1742_v6 = vmul.f32 %v6452_v33, %v1737_v29  ;;  %v1743_v46 = vmul.f32 %v6452_v33, %v1738_v19  ;;  %v1728_v35 = vadd.f32 %v1724_v32, %v1692_v59 }
 0x1b2   :  { %v1729_v8 = vadd.f32 %v1725_v7, %v1693_v14  ;;  %v1744_v58 = vmul.f32 %v6452_v33, %v1739_v51  ;;  %v1745_v48 = vmul.f32 %v6452_v33, %v1740_v36  ;;  %v1730_v11 = vadd.f32 %v1726_v45, %v1694_v20 }
 0x1b3   :  { %v1731_v61 = vadd.f32 %v1727_v10, %v1695_v39  ;;  %v1746_v30 = vadd.f32 %v1742_v6, %v1710_v40  ;;  %v1747_v28 = vadd.f32 %v1743_v46, %v1711_v43  ;;  %v6487_v34 = vstv %s6438_s14  ;;  %s6748_s14 = sld [smem:[#allocation2 + $0x61]] }
 0x1b4   :  { %8818 = vst [vmem:[#allocation162_spill] sm:$0xff] %v6487_v34  ;;  %v6490_v44 = vstv %s6454_s16  ;;  %v6493_v24 = vstv %s6440_s15  ;;  %v6496_v59 = vstv %s6456_s17  ;;  %v1751_v10 = vsub.f32 %v6406_v37, %v6487_v34  ;;  %s6762_s15 = sld [smem:[#allocation2 + $0xc5]]  ;;  %s6764_s16 = sld [smem:[#allocation2 + $0xc6]] }
 0x1b5   :  { %8819 = vst [vmem:[#allocation163_spill] sm:$0xff] %v6490_v44  ;;  %8820 = vst [vmem:[#allocation164_spill] sm:$0xff] %v6493_v24  ;;  %v1752_v7 = vsub.f32 %v6410_v25, %v6487_v34  ;;  %v1753_v14 = vsub.f32 %v6414_v1, %v6487_v34  ;;  %v1754_v41 = vsub.f32 %v6418_v60, %v6487_v34  ;;  %s6790_s17 = sld [smem:[#allocation2 + $0x62]] }
 0x1b6   :  { %8821 = vst [vmem:[#allocation165_spill] sm:$0xff] %v6496_v59  ;;  %v1769_v20 = vsub.f32 %v6406_v37, %v6493_v24  ;;  %v1770_v39 = vsub.f32 %v6410_v25, %v6493_v24  ;;  %v1771_v40 = vsub.f32 %v6414_v1, %v6493_v24  ;;  %v1772_v43 = vsub.f32 %v6418_v60, %v6493_v24 }
 0x1b7   :  { %v1755_v45 = vmax.f32 %v1751_v10, 0.0  ;;  %v1756_v52 = vmax.f32 %v1752_v7, 0.0  ;;  %v1757_v29 = vmax.f32 %v1753_v14, 0.0  ;;  %v1758_v19 = vmax.f32 %v1754_v41, 0.0 }
 0x1b8   :  { %v1773_v51 = vmax.f32 %v1769_v20, 0.0  ;;  %v1774_v36 = vmax.f32 %v1770_v39, 0.0  ;;  %v1775_v32 = vmax.f32 %v1771_v40, 0.0  ;;  %v1776_v6 = vmax.f32 %v1772_v43, 0.0 }
 0x1b9   :  { %v1760_v46 = vmul.f32 %v6490_v44, %v1755_v45  ;;  %v1761_v33 = vmul.f32 %v6490_v44, %v1756_v52  ;;  %v1762_v34 = vmul.f32 %v6490_v44, %v1757_v29  ;;  %v1763_v42 = vmul.f32 %v6490_v44, %v1758_v19 }
 0x1ba   :  { %v1748_v9 = vadd.f32 %v1744_v58, %v1712_v27  ;;  %v1749_v10 = vadd.f32 %v1745_v48, %v1713_v4  ;;  %v1778_v7 = vmul.f32 %v6496_v59, %v1773_v51  ;;  %v1779_v14 = vmul.f32 %v6496_v59, %v1774_v36 }
 0x1bb   :  { %v1764_v41 = vadd.f32 %v1760_v46, %v1728_v35  ;;  %v1765_v20 = vadd.f32 %v1761_v33, %v1729_v8  ;;  %v1780_v39 = vmul.f32 %v6496_v59, %v1775_v32  ;;  %v1781_v40 = vmul.f32 %v6496_v59, %v1776_v6 }
 0x1bc   :  { %v1766_v43 = vadd.f32 %v1762_v34, %v1730_v11  ;;  %v1767_v45 = vadd.f32 %v1763_v42, %v1731_v61  ;;  %v1782_v52 = vadd.f32 %v1778_v7, %v1746_v30  ;;  %v1783_v29 = vadd.f32 %v1779_v14, %v1747_v28 }
 0x1bd   :  { %v6531_v27 = vstv %s6482_s18  ;;  %v6534_v4 = vstv %s6498_s1  ;;  %v6537_v58 = vstv %s6484_s19  ;;  %v6540_v35 = vstv %s6500_s20  ;;  %s6792_s18 = sld [smem:[#allocation2 + $0x63]]  ;;  %s6806_s19 = sld [smem:[#allocation2 + $0xc7]] }
 0x1be   :  { %8822 = vst [vmem:[#allocation166_spill] sm:$0xff] %v6531_v27  ;;  %8823 = vst [vmem:[#allocation167_spill] sm:$0xff] %v6534_v4  ;;  %v1787_v42 = vsub.f32 %v6406_v37, %v6531_v27  ;;  %v1788_v33 = vsub.f32 %v6410_v25, %v6531_v27  ;;  %v1789_v8 = vsub.f32 %v6414_v1, %v6531_v27  ;;  %s6808_s1 = sld [smem:[#allocation2 + $0xc8]]  ;;  %s6846_s20 = sld [smem:[#allocation2 + $0x64]] }
 0x1bf   :  { %8824 = vst [vmem:[#allocation168_spill] sm:$0xff] %v6537_v58  ;;  %8825 = vst [vmem:[#allocation169_spill] sm:$0xff] %v6540_v35  ;;  %v1790_v48 = vsub.f32 %v6418_v60, %v6531_v27  ;;  %v1805_v11 = vsub.f32 %v6406_v37, %v6537_v58  ;;  %v1806_v61 = vsub.f32 %v6410_v25, %v6537_v58 }
 0x1c0   :  { %v1807_v30 = vsub.f32 %v6414_v1, %v6537_v58  ;;  %v1808_v28 = vsub.f32 %v6418_v60, %v6537_v58  ;;  %v1791_v34 = vmax.f32 %v1787_v42, 0.0  ;;  %v1792_v19 = vmax.f32 %v1788_v33, 0.0 }
 0x1c1   :  { %v1793_v51 = vmax.f32 %v1789_v8, 0.0  ;;  %v1794_v36 = vmax.f32 %v1790_v48, 0.0  ;;  %v1809_v32 = vmax.f32 %v1805_v11, 0.0  ;;  %v1810_v6 = vmax.f32 %v1806_v61, 0.0 }
 0x1c2   :  { %v1811_v46 = vmax.f32 %v1807_v30, 0.0  ;;  %v1812_v7 = vmax.f32 %v1808_v28, 0.0  ;;  %v1796_v14 = vmul.f32 %v6534_v4, %v1791_v34  ;;  %v1797_v59 = vmul.f32 %v6534_v4, %v1792_v19 }
 0x1c3   :  { %v1798_v27 = vmul.f32 %v6534_v4, %v1793_v51  ;;  %v1799_v24 = vmul.f32 %v6534_v4, %v1794_v36  ;;  %v1784_v44 = vadd.f32 %v1780_v39, %v1748_v9  ;;  %v1785_v42 = vadd.f32 %v1781_v40, %v1749_v10 }
 0x1c4   :  { %v1814_v33 = vmul.f32 %v6540_v35, %v1809_v32  ;;  %v1815_v8 = vmul.f32 %v6540_v35, %v1810_v6  ;;  %v1800_v48 = vadd.f32 %v1796_v14, %v1764_v41  ;;  %v1801_v11 = vadd.f32 %v1797_v59, %v1765_v20 }
 0x1c5   :  { %v1816_v61 = vmul.f32 %v6540_v35, %v1811_v46  ;;  %v1817_v30 = vmul.f32 %v6540_v35, %v1812_v7  ;;  %v1802_v28 = vadd.f32 %v1798_v27, %v1766_v43  ;;  %v1803_v34 = vadd.f32 %v1799_v24, %v1767_v45 }
 0x1c6   :  { %v1818_v19 = vadd.f32 %v1814_v33, %v1782_v52  ;;  %v1819_v51 = vadd.f32 %v1815_v8, %v1783_v29  ;;  %v6575_v9 = vstv %s6526_s21  ;;  %v6578_v10 = vstv %s6542_s23  ;;  %s6848_s21 = sld [smem:[#allocation2 + $0xc9]] }
 0x1c7   :  { %8826 = vst [vmem:[#allocation170_spill] sm:$0xff] %v6575_v9  ;;  %8827 = vst [vmem:[#allocation171_spill] sm:$0xff] %v6578_v10  ;;  %v6581_v39 = vstv %s6528_s22  ;;  %v6584_v41 = vstv %s6544_s24  ;;  %v1823_v24 = vsub.f32 %v6406_v37, %v6575_v9  ;;  %v1824_v59 = vsub.f32 %v6410_v25, %v6575_v9  ;;  %s4116_s22 = smov [#allocation9]  }
 0x1c8   :  { %8828 = vst [vmem:[#allocation172_spill] sm:$0xff] %v6581_v39  ;;  %8829 = vst [vmem:[#allocation173_spill] sm:$0xff] %v6584_v41  ;;  %v1825_v20 = vsub.f32 %v6414_v1, %v6575_v9  ;;  %v1826_v40 = vsub.f32 %v6418_v60, %v6575_v9  ;;  %v1841_v43 = vsub.f32 %v6406_v37, %v6581_v39  ;;  %s3748_s23 = sshll.u32 %s4116_s22, 4  ;;  %s3749_s23 = int_to_ptr.vmem [resolvable:$true] %s3748_s23 }
 0x1c9   :  { %v1842_v45 = vsub.f32 %v6410_v25, %v6581_v39  ;;  %v1843_v52 = vsub.f32 %v6414_v1, %v6581_v39  ;;  %v1844_v29 = vsub.f32 %v6418_v60, %v6581_v39  ;;  %v1827_v27 = vmax.f32 %v1823_v24, 0.0  ;;  %s4059_s24 = scalar_lea.vmem %s3749_s23, 512  ;;  %p4064_p6 = scmp.lt.s32.totalorder %s3749_s23, %s3749_s23 }
 0x1ca   :  { %v1828_v36 = vmax.f32 %v1824_v59, 0.0  ;;  %v1829_v32 = vmax.f32 %v1825_v20, 0.0  ;;  %v1830_v6 = vmax.f32 %v1826_v40, 0.0  ;;  %v1845_v46 = vmax.f32 %v1841_v43, 0.0  ;;  %p4060_p5 = scmp.ne.s32.totalorder %s3749_s23, %s4059_s24  ;;  %p4065_p7 = scmp.lt.s32.totalorder %s4059_s24, %s4059_s24 }
 0x1cb   :  { %v1846_v7 = vmax.f32 %v1842_v45, 0.0  ;;  %v1847_v14 = vmax.f32 %v1843_v52, 0.0  ;;  %v1848_v33 = vmax.f32 %v1844_v29, 0.0  ;;  %v1832_v8 = vmul.f32 %v6578_v10, %v1827_v27 }
 0x1cc   :  { %v1833_v35 = vmul.f32 %v6578_v10, %v1828_v36  ;;  %v1834_v9 = vmul.f32 %v6578_v10, %v1829_v32  ;;  %v1835_v58 = vmul.f32 %v6578_v10, %v1830_v6  ;;  %v1820_v4 = vadd.f32 %v1816_v61, %v1784_v44  ;;  %p4066_p8 = por %p4065_p7, %p4064_p6 }
 0x1cd   :  { %v1821_v24 = vadd.f32 %v1817_v30, %v1785_v42  ;;  %v1850_v59 = vmul.f32 %v6584_v41, %v1845_v46  ;;  %v1851_v20 = vmul.f32 %v6584_v41, %v1846_v7  ;;  %v1836_v40 = vadd.f32 %v1832_v8, %v1800_v48 }
 0x1ce   :  { %v1837_v43 = vadd.f32 %v1833_v35, %v1801_v11  ;;  %v1852_v45 = vmul.f32 %v6584_v41, %v1847_v14  ;;  %v1853_v52 = vmul.f32 %v6584_v41, %v1848_v33  ;;  %v1838_v29 = vadd.f32 %v1834_v9, %v1802_v28  ;;  %p4067_p9 = pnand %p4066_p8, %p4060_p5 }
 0x1cf   :  { %v1839_v27 = vadd.f32 %v1835_v58, %v1803_v34  ;;  %v1854_v36 = vadd.f32 %v1850_v59, %v1818_v19  ;;  %v1855_v32 = vadd.f32 %v1851_v20, %v1819_v51  ;;  %v6619_v44 = vstv %s6570_s2 }
 0x1d0   :  { %8830 = vst [vmem:[#allocation174_spill] sm:$0xff] %v6619_v44  ;;  %v6622_v42 = vstv %s6586_s26  ;;  %v6625_v61 = vstv %s6572_s25  ;;  %v6628_v48 = vstv %s6588_s27  ;;  %v1859_v58 = vsub.f32 %v6406_v37, %v6619_v44 }
 0x1d1   :  { %8831 = vst [vmem:[#allocation175_spill] sm:$0xff] %v6622_v42  ;;  %8832 = vst [vmem:[#allocation176_spill] sm:$0xff] %v6625_v61  ;;  %v1860_v35 = vsub.f32 %v6410_v25, %v6619_v44  ;;  %v1861_v11 = vsub.f32 %v6414_v1, %v6619_v44  ;;  %v1862_v30 = vsub.f32 %v6418_v60, %v6619_v44 }
 0x1d2   :  { %8833 = vst [vmem:[#allocation177_spill] sm:$0xff] %v6628_v48  ;;  %v1877_v28 = vsub.f32 %v6406_v37, %v6625_v61  ;;  %v1878_v34 = vsub.f32 %v6410_v25, %v6625_v61  ;;  %v1879_v19 = vsub.f32 %v6414_v1, %v6625_v61  ;;  %v1880_v51 = vsub.f32 %v6418_v60, %v6625_v61 }
 0x1d3   :  { %v1863_v9 = vmax.f32 %v1859_v58, 0.0  ;;  %v1864_v6 = vmax.f32 %v1860_v35, 0.0  ;;  %v1865_v46 = vmax.f32 %v1861_v11, 0.0  ;;  %v1866_v7 = vmax.f32 %v1862_v30, 0.0 }
 0x1d4   :  { %v1881_v14 = vmax.f32 %v1877_v28, 0.0  ;;  %v1882_v33 = vmax.f32 %v1878_v34, 0.0  ;;  %v1883_v8 = vmax.f32 %v1879_v19, 0.0  ;;  %v1884_v59 = vmax.f32 %v1880_v51, 0.0 }
 0x1d5   :  { %v1868_v20 = vmul.f32 %v6622_v42, %v1863_v9  ;;  %v1869_v41 = vmul.f32 %v6622_v42, %v1864_v6  ;;  %v1870_v44 = vmul.f32 %v6622_v42, %v1865_v46  ;;  %v1871_v39 = vmul.f32 %v6622_v42, %v1866_v7 }
 0x1d6   :  { %v1856_v10 = vadd.f32 %v1852_v45, %v1820_v4  ;;  %v1857_v58 = vadd.f32 %v1853_v52, %v1821_v24  ;;  %v1886_v35 = vmul.f32 %v6628_v48, %v1881_v14  ;;  %v1887_v11 = vmul.f32 %v6628_v48, %v1882_v33 }
 0x1d7   :  { %v1872_v30 = vadd.f32 %v1868_v20, %v1836_v40  ;;  %v1873_v28 = vadd.f32 %v1869_v41, %v1837_v43  ;;  %v1888_v34 = vmul.f32 %v6628_v48, %v1883_v8  ;;  %v1889_v19 = vmul.f32 %v6628_v48, %v1884_v59 }
 0x1d8   :  { %v1874_v51 = vadd.f32 %v1870_v44, %v1838_v29  ;;  %v1875_v9 = vadd.f32 %v1871_v39, %v1839_v27  ;;  %v1890_v6 = vadd.f32 %v1886_v35, %v1854_v36  ;;  %v1891_v46 = vadd.f32 %v1887_v11, %v1855_v32 }
 0x1d9   :  { %v6663_v4 = vstv %s6614_s28  ;;  %v6666_v24 = vstv %s6630_s30  ;;  %v6669_v45 = vstv %s6616_s29  ;;  %v6672_v40 = vstv %s6632_s5 }
 0x1da   :  { %8834 = vst [vmem:[#allocation178_spill] sm:$0xff] %v6663_v4  ;;  %8835 = vst [vmem:[#allocation179_spill] sm:$0xff] %v6666_v24  ;;  %v1895_v39 = vsub.f32 %v6406_v37, %v6663_v4  ;;  %v1896_v41 = vsub.f32 %v6410_v25, %v6663_v4  ;;  %v1897_v43 = vsub.f32 %v6414_v1, %v6663_v4 }
 0x1db   :  { %8836 = vst [vmem:[#allocation180_spill] sm:$0xff] %v6669_v45  ;;  %8837 = vst [vmem:[#allocation181_spill] sm:$0xff] %v6672_v40  ;;  %v1898_v52 = vsub.f32 %v6418_v60, %v6663_v4  ;;  %v1913_v29 = vsub.f32 %v6406_v37, %v6669_v45  ;;  %v1914_v27 = vsub.f32 %v6410_v25, %v6669_v45 }
 0x1dc   :  { %v1915_v36 = vsub.f32 %v6414_v1, %v6669_v45  ;;  %v1916_v32 = vsub.f32 %v6418_v60, %v6669_v45  ;;  %v1899_v44 = vmax.f32 %v1895_v39, 0.0  ;;  %v1900_v7 = vmax.f32 %v1896_v41, 0.0 }
 0x1dd   :  { %v1901_v14 = vmax.f32 %v1897_v43, 0.0  ;;  %v1902_v33 = vmax.f32 %v1898_v52, 0.0  ;;  %v1917_v8 = vmax.f32 %v1913_v29, 0.0  ;;  %v1918_v59 = vmax.f32 %v1914_v27, 0.0 }
 0x1de   :  { %v1919_v20 = vmax.f32 %v1915_v36, 0.0  ;;  %v1920_v35 = vmax.f32 %v1916_v32, 0.0  ;;  %v1904_v11 = vmul.f32 %v6666_v24, %v1899_v44  ;;  %v1905_v48 = vmul.f32 %v6666_v24, %v1900_v7 }
 0x1df   :  { %v1906_v4 = vmul.f32 %v6666_v24, %v1901_v14  ;;  %v1907_v61 = vmul.f32 %v6666_v24, %v1902_v33  ;;  %v1892_v42 = vadd.f32 %v1888_v34, %v1856_v10  ;;  %v1893_v39 = vadd.f32 %v1889_v19, %v1857_v58 }
 0x1e0   :  { %v1922_v41 = vmul.f32 %v6672_v40, %v1917_v8  ;;  %v1923_v43 = vmul.f32 %v6672_v40, %v1918_v59  ;;  %v1908_v52 = vadd.f32 %v1904_v11, %v1872_v30  ;;  %v1909_v29 = vadd.f32 %v1905_v48, %v1873_v28 }
 0x1e1   :  { %v1924_v27 = vmul.f32 %v6672_v40, %v1919_v20  ;;  %v1925_v36 = vmul.f32 %v6672_v40, %v1920_v35  ;;  %v1910_v32 = vadd.f32 %v1906_v4, %v1874_v51  ;;  %v1911_v44 = vadd.f32 %v1907_v61, %v1875_v9 }
 0x1e2   :  { %v1926_v7 = vadd.f32 %v1922_v41, %v1890_v6  ;;  %v1927_v14 = vadd.f32 %v1923_v43, %v1891_v46  ;;  %v6707_v10 = vstv %s6658_s6  ;;  %v6710_v58 = vstv %s6674_s8 }
 0x1e3   :  { %8838 = vst [vmem:[#allocation182_spill] sm:$0xff] %v6707_v10  ;;  %8839 = vst [vmem:[#allocation183_spill] sm:$0xff] %v6710_v58  ;;  %v6713_v34 = vstv %s6660_s7  ;;  %v6716_v30 = vstv %s6676_s9  ;;  %v1931_v61 = vsub.f32 %v6406_v37, %v6707_v10  ;;  %v1932_v48 = vsub.f32 %v6410_v25, %v6707_v10 }
 0x1e4   :  { %8840 = vst [vmem:[#allocation184_spill] sm:$0xff] %v6713_v34  ;;  %8841 = vst [vmem:[#allocation185_spill] sm:$0xff] %v6716_v30  ;;  %v1933_v28 = vsub.f32 %v6414_v1, %v6707_v10  ;;  %v1934_v19 = vsub.f32 %v6418_v60, %v6707_v10  ;;  %v1949_v51 = vsub.f32 %v6406_v37, %v6713_v34 }
 0x1e5   :  { %v1950_v9 = vsub.f32 %v6410_v25, %v6713_v34  ;;  %v1951_v6 = vsub.f32 %v6414_v1, %v6713_v34  ;;  %v1952_v46 = vsub.f32 %v6418_v60, %v6713_v34  ;;  %v1935_v4 = vmax.f32 %v1931_v61, 0.0 }
 0x1e6   :  { %v1936_v33 = vmax.f32 %v1932_v48, 0.0  ;;  %v1937_v8 = vmax.f32 %v1933_v28, 0.0  ;;  %v1938_v59 = vmax.f32 %v1934_v19, 0.0  ;;  %v1953_v20 = vmax.f32 %v1949_v51, 0.0 }
 0x1e7   :  { %v1954_v35 = vmax.f32 %v1950_v9, 0.0  ;;  %v1955_v11 = vmax.f32 %v1951_v6, 0.0  ;;  %v1956_v41 = vmax.f32 %v1952_v46, 0.0  ;;  %v1940_v43 = vmul.f32 %v6710_v58, %v1935_v4 }
 0x1e8   :  { %v1941_v40 = vmul.f32 %v6710_v58, %v1936_v33  ;;  %v1942_v10 = vmul.f32 %v6710_v58, %v1937_v8  ;;  %v1943_v45 = vmul.f32 %v6710_v58, %v1938_v59  ;;  %v1928_v24 = vadd.f32 %v1924_v27, %v1892_v42 }
 0x1e9   :  { %v1929_v61 = vadd.f32 %v1925_v36, %v1893_v39  ;;  %v1958_v48 = vmul.f32 %v6716_v30, %v1953_v20  ;;  %v1959_v28 = vmul.f32 %v6716_v30, %v1954_v35  ;;  %v1944_v19 = vadd.f32 %v1940_v43, %v1908_v52 }
 0x1ea   :  { %v1945_v51 = vadd.f32 %v1941_v40, %v1909_v29  ;;  %v1960_v9 = vmul.f32 %v6716_v30, %v1955_v11  ;;  %v1961_v6 = vmul.f32 %v6716_v30, %v1956_v41  ;;  %v1946_v46 = vadd.f32 %v1942_v10, %v1910_v32 }
 0x1eb   :  { %v1947_v4 = vadd.f32 %v1943_v45, %v1911_v44  ;;  %v1962_v33 = vadd.f32 %v1958_v48, %v1926_v7  ;;  %v1963_v8 = vadd.f32 %v1959_v28, %v1927_v14  ;;  %v6751_v42 = vstv %s6702_s0 }
 0x1ec   :  { %8842 = vst [vmem:[#allocation186_spill] sm:$0xff] %v6751_v42  ;;  %v6754_v39 = vstv %s6718_s11  ;;  %v6757_v27 = vstv %s6704_s10  ;;  %v6760_v52 = vstv %s6720_s12  ;;  %v1967_v45 = vsub.f32 %v6406_v37, %v6751_v42 }
 0x1ed   :  { %8843 = vst [vmem:[#allocation187_spill] sm:$0xff] %v6754_v39  ;;  %8844 = vst [vmem:[#allocation188_spill] sm:$0xff] %v6757_v27  ;;  %v1968_v40 = vsub.f32 %v6410_v25, %v6751_v42  ;;  %v1969_v29 = vsub.f32 %v6414_v1, %v6751_v42  ;;  %v1970_v36 = vsub.f32 %v6418_v60, %v6751_v42 }
 0x1ee   :  { %8845 = vst [vmem:[#allocation189_spill] sm:$0xff] %v6760_v52  ;;  %v1985_v32 = vsub.f32 %v6406_v37, %v6757_v27  ;;  %v1986_v44 = vsub.f32 %v6410_v25, %v6757_v27  ;;  %v1987_v7 = vsub.f32 %v6414_v1, %v6757_v27  ;;  %v1988_v14 = vsub.f32 %v6418_v60, %v6757_v27 }
 0x1ef   :  { %v1971_v10 = vmax.f32 %v1967_v45, 0.0  ;;  %v1972_v59 = vmax.f32 %v1968_v40, 0.0  ;;  %v1973_v20 = vmax.f32 %v1969_v29, 0.0  ;;  %v1974_v35 = vmax.f32 %v1970_v36, 0.0 }
 0x1f0   :  { %v1989_v11 = vmax.f32 %v1985_v32, 0.0  ;;  %v1990_v41 = vmax.f32 %v1986_v44, 0.0  ;;  %v1991_v43 = vmax.f32 %v1987_v7, 0.0  ;;  %v1992_v48 = vmax.f32 %v1988_v14, 0.0 }
 0x1f1   :  { %v1976_v28 = vmul.f32 %v6754_v39, %v1971_v10  ;;  %v1977_v30 = vmul.f32 %v6754_v39, %v1972_v59  ;;  %v1978_v42 = vmul.f32 %v6754_v39, %v1973_v20  ;;  %v1979_v34 = vmul.f32 %v6754_v39, %v1974_v35 }
 0x1f2   :  { %v1964_v58 = vadd.f32 %v1960_v9, %v1928_v24  ;;  %v1965_v45 = vadd.f32 %v1961_v6, %v1929_v61  ;;  %v1994_v40 = vmul.f32 %v6760_v52, %v1989_v11  ;;  %v1995_v29 = vmul.f32 %v6760_v52, %v1990_v41 }
 0x1f3   :  { %v1980_v36 = vadd.f32 %v1976_v28, %v1944_v19  ;;  %v1981_v32 = vadd.f32 %v1977_v30, %v1945_v51  ;;  %v1996_v44 = vmul.f32 %v6760_v52, %v1991_v43  ;;  %v1997_v7 = vmul.f32 %v6760_v52, %v1992_v48 }
 0x1f4   :  { %v1982_v14 = vadd.f32 %v1978_v42, %v1946_v46  ;;  %v1983_v10 = vadd.f32 %v1979_v34, %v1947_v4  ;;  %v1998_v59 = vadd.f32 %v1994_v40, %v1962_v33  ;;  %v1999_v20 = vadd.f32 %v1995_v29, %v1963_v8 }
 0x1f5   :  { %v6795_v24 = vstv %s6746_s13  ;;  %v6798_v61 = vstv %s6762_s15  ;;  %v6801_v9 = vstv %s6748_s14  ;;  %v6804_v19 = vstv %s6764_s16 }
 0x1f6   :  { %8846 = vst [vmem:[#allocation190_spill] sm:$0xff] %v6795_v24  ;;  %8847 = vst [vmem:[#allocation191_spill] sm:$0xff] %v6798_v61  ;;  %v2003_v34 = vsub.f32 %v6406_v37, %v6795_v24  ;;  %v2004_v30 = vsub.f32 %v6410_v25, %v6795_v24  ;;  %v2005_v51 = vsub.f32 %v6414_v1, %v6795_v24  ;;  %v6835_v39 = vstv %s6790_s17 }
 0x1f7   :  { %8848 = vst [vmem:[#allocation192_spill] sm:$0xff] %v6801_v9  ;;  %8849 = vst [vmem:[#allocation193_spill] sm:$0xff] %v6804_v19  ;;  %v2006_v6 = vsub.f32 %v6418_v60, %v6795_v24  ;;  %v2021_v46 = vsub.f32 %v6406_v37, %v6801_v9  ;;  %v2022_v4 = vsub.f32 %v6410_v25, %v6801_v9 }
 0x1f8   :  { %v2023_v33 = vsub.f32 %v6414_v1, %v6801_v9  ;;  %v2024_v8 = vsub.f32 %v6418_v60, %v6801_v9  ;;  %v2007_v42 = vmax.f32 %v2003_v34, 0.0  ;;  %v2008_v35 = vmax.f32 %v2004_v30, 0.0  ;;  %8850 = vst [vmem:[#allocation194_spill] sm:$0xff] %v6835_v39 }
 0x1f9   :  { %v2009_v11 = vmax.f32 %v2005_v51, 0.0  ;;  %v2010_v41 = vmax.f32 %v2006_v6, 0.0  ;;  %v2025_v43 = vmax.f32 %v2021_v46, 0.0  ;;  %v2026_v48 = vmax.f32 %v2022_v4, 0.0 }
 0x1fa   :  { %v2027_v28 = vmax.f32 %v2023_v33, 0.0  ;;  %v2028_v40 = vmax.f32 %v2024_v8, 0.0  ;;  %v2012_v29 = vmul.f32 %v6798_v61, %v2007_v42  ;;  %v2013_v52 = vmul.f32 %v6798_v61, %v2008_v35 }
 0x1fb   :  { %v2014_v24 = vmul.f32 %v6798_v61, %v2009_v11  ;;  %v2015_v27 = vmul.f32 %v6798_v61, %v2010_v41  ;;  %v2000_v34 = vadd.f32 %v1996_v44, %v1964_v58  ;;  %v2001_v30 = vadd.f32 %v1997_v7, %v1965_v45 }
 0x1fc   :  { %v2030_v51 = vmul.f32 %v6804_v19, %v2025_v43  ;;  %v2031_v6 = vmul.f32 %v6804_v19, %v2026_v48  ;;  %v2016_v46 = vadd.f32 %v2012_v29, %v1980_v36  ;;  %v2017_v4 = vadd.f32 %v2013_v52, %v1981_v32 }
 0x1fd   :  { %v2032_v33 = vmul.f32 %v6804_v19, %v2027_v28  ;;  %v2033_v8 = vmul.f32 %v6804_v19, %v2028_v40  ;;  %v2018_v42 = vadd.f32 %v2014_v24, %v1982_v14  ;;  %v2019_v35 = vadd.f32 %v2015_v27, %v1983_v10 }
 0x1fe   :  { %v2034_v9 = vadd.f32 %v2030_v51, %v1998_v59  ;;  %v2035_v11 = vadd.f32 %v2031_v6, %v1999_v20  ;;  %v6838_v41 = vstv %s6806_s19  ;;  %v6841_v58 = vstv %s6792_s18 }
 0x1ff   :  { %8851 = vst [vmem:[#allocation195_spill] sm:$0xff] %v6838_v41  ;;  %8852 = vst [vmem:[#allocation196_spill] sm:$0xff] %v6841_v58  ;;  %v6844_v45 = vstv %s6808_s1  ;;  %v2039_v52 = vsub.f32 %v6406_v37, %v6835_v39  ;;  %v2040_v27 = vsub.f32 %v6410_v25, %v6835_v39  ;;  %v2041_v36 = vsub.f32 %v6414_v1, %v6835_v39 }
 0x200   :  { %8853 = vst [vmem:[#allocation197_spill] sm:$0xff] %v6844_v45  ;;  %v2042_v32 = vsub.f32 %v6418_v60, %v6835_v39  ;;  %v2057_v44 = vsub.f32 %v6406_v37, %v6841_v58  ;;  %v2058_v7 = vsub.f32 %v6410_v25, %v6841_v58  ;;  %v2059_v14 = vsub.f32 %v6414_v1, %v6841_v58 }
 0x201   :  { %v2060_v10 = vsub.f32 %v6418_v60, %v6841_v58  ;;  %v2043_v59 = vmax.f32 %v2039_v52, 0.0  ;;  %v2044_v20 = vmax.f32 %v2040_v27, 0.0  ;;  %v2045_v24 = vmax.f32 %v2041_v36, 0.0  ;;  %v6872_v36 = vld [vmem:[#allocation7] sm:$0xff] }
 0x202   :  { %v2046_v43 = vmax.f32 %v2042_v32, 0.0  ;;  %v2061_v48 = vmax.f32 %v2057_v44, 0.0  ;;  %v2062_v28 = vmax.f32 %v2058_v7, 0.0  ;;  %v2063_v40 = vmax.f32 %v2059_v14, 0.0  ;;  %v6874_v32 = vld [vmem:[#allocation7 + $0x8] sm:$0xff] }
 0x203   :  { %v2064_v29 = vmax.f32 %v2060_v10, 0.0  ;;  %v2048_v51 = vmul.f32 %v6838_v41, %v2043_v59  ;;  %v2049_v6 = vmul.f32 %v6838_v41, %v2044_v20  ;;  %v2050_v19 = vmul.f32 %v6838_v41, %v2045_v24 }
 0x204   :  { %v2051_v39 = vmul.f32 %v6838_v41, %v2046_v43  ;;  %v2036_v61 = vadd.f32 %v2032_v33, %v2000_v34  ;;  %v2037_v13 = vadd.f32 %v2033_v8, %v2001_v30  ;;  %v2066_v52 = vmul.f32 %v6844_v45, %v2061_v48  ;;  %v6878_v30 = vld [vmem:[#allocation7 + $0x10] sm:$0xff]  ;;  %v6880_v8 = vld [vmem:[#allocation7 + $0x18] sm:$0xff]  ;;  %v8857_v41 = vld [vmem:[#allocation73_spill] sm:$0xff] }
 0x205   :  { %v2067_v27 = vmul.f32 %v6844_v45, %v2062_v28  ;;  %v2052_v44 = vadd.f32 %v2048_v51, %v2016_v46  ;;  %v2053_v7 = vadd.f32 %v2049_v6, %v2017_v4  ;;  %v2068_v14 = vmul.f32 %v6844_v45, %v2063_v40  ;;  %v8855_v48 = vld [vmem:[#allocation20_spill] sm:$0xff] }
 0x206   :  { %v2069_v10 = vmul.f32 %v6844_v45, %v2064_v29  ;;  %v2054_v59 = vadd.f32 %v2050_v19, %v2018_v42  ;;  %v2055_v20 = vadd.f32 %v2051_v39, %v2019_v35  ;;  %v2070_v34 = vadd.f32 %v2066_v52, %v2034_v9  ;;  %v8856_v28 = vld [vmem:[#allocation76_spill] sm:$0xff] }
 0x207   :  { %v2071_v33 = vadd.f32 %v2067_v27, %v2035_v11  ;;  %v6883_v24 = vstv %s6846_s20  ;;  %v6886_v43 = vstv %s6848_s21  ;;  %v2108_v46 = vsub.f32 %v6872_v36, %v8855_v48 }
 0x208   :  { %8854 = vst [vmem:[#allocation198_spill] sm:$0xff] %v6883_v24  ;;  %v2109_v4 = vsub.f32 %v6874_v32, %v8855_v48  ;;  %v2075_v19 = vsub.f32 %v6406_v37, %v6883_v24  ;;  %v2076_v39 = vsub.f32 %v6410_v25, %v6883_v24  ;;  %v2077_v9 = vsub.f32 %v6414_v1, %v6883_v24 }
 0x209   :  { %v2078_v42 = vsub.f32 %v6418_v60, %v6883_v24  ;;  %v2110_v35 = vsub.f32 %v6878_v30, %v8855_v48  ;;  %v2111_v11 = vsub.f32 %v6880_v8, %v8855_v48  ;;  %v2112_v40 = vmul.f32 %v2108_v46, %v8856_v28 }
 0x20a   :  { %v2113_v29 = vmul.f32 %v2109_v4, %v8856_v28  ;;  %v2079_v37 = vmax.f32 %v2075_v19, 0.0  ;;  %v2080_v51 = vmax.f32 %v2076_v39, 0.0  ;;  %v2081_v6 = vmax.f32 %v2077_v9, 0.0 }
 0x20b   :  { %v2082_v25 = vmax.f32 %v2078_v42, 0.0  ;;  %v2072_v52 = vadd.f32 %v2068_v14, %v2036_v61  ;;  %v2073_v27 = vadd.f32 %v2069_v10, %v2037_v13  ;;  %v2114_v1 = vmul.f32 %v2110_v35, %v8856_v28 }
 0x20c   :  { %v2115_v60 = vmul.f32 %v2111_v11, %v8856_v28  ;;  %v2084_v45 = vmul.f32 %v6886_v43, %v2079_v37  ;;  %v2085_v24 = vmul.f32 %v6886_v43, %v2080_v51  ;;  %v2086_v48 = vmul.f32 %v6886_v43, %v2081_v6 }
 0x20d   :  { %v2087_v58 = vmul.f32 %v6886_v43, %v2082_v25  ;;  %v2116_v2 = vadd.f32 %v2112_v40, %v8857_v41  ;;  %v2117_v19 = vadd.f32 %v2113_v29, %v8857_v41  ;;  %v2120_v39 = vmax.f32 %v2108_v46, 0.0 }
 0x20e   :  { %v2121_v9 = vmax.f32 %v2109_v4, 0.0  ;;  %v2088_v61 = vadd.f32 %v2084_v45, %v2052_v44  ;;  %v2089_v13 = vadd.f32 %v2085_v24, %v2053_v7  ;;  %v2090_v14 = vadd.f32 %v2086_v48, %v2054_v59  ;;  %v8861_v48 = vld [vmem:[#allocation86_spill] sm:$0xff] }
 0x20f   :  { %v2091_v10 = vadd.f32 %v2087_v58, %v2055_v20  ;;  %v2122_v42 = vmax.f32 %v2110_v35, 0.0  ;;  %v2123_v28 = vmax.f32 %v2111_v11, 0.0  ;;  %v2124_v37 = vmul.f32 %v2120_v39, %v8858_v54  ;;  %v8859_v58 = vld [vmem:[#allocation21_spill] sm:$0xff] }
 0x210   :  { %v2125_v51 = vmul.f32 %v2121_v9, %v8858_v54  ;;  %v2092_v56 = vadd.f32 %v2088_v61, %v2070_v34  ;;  %v2093_v6 = vadd.f32 %v2089_v13, %v2071_v33  ;;  %v2094_v53 = vadd.f32 %v2090_v14, %v2072_v52  ;;  %v8860_v33 = vld [vmem:[#allocation24_spill] sm:$0xff]  ;;  %v8862_v13 = vld [vmem:[#allocation87_spill] sm:$0xff] }
 0x211   :  { %v2095_v25 = vadd.f32 %v2091_v10, %v2073_v27  ;;  %v2118_v40 = vadd.f32 %v2114_v1, %v8857_v41  ;;  %v2119_v29 = vadd.f32 %v2115_v60, %v8857_v41  ;;  %v2126_v46 = vmul.f32 %v2122_v42, %v8858_v54  ;;  %v8863_v42 = vld [vmem:[#allocation25_spill] sm:$0xff] }
 0x212   :  { %v2127_v45 = vmul.f32 %v2123_v28, %v8858_v54  ;;  %2098 = vst [vmem:[#allocation9] sm:$0xff] %v2092_v56  ;;  %2099 = vst [vmem:[#allocation9 + $0x8] sm:$0xff] %v2093_v6  ;;  %v2132_v44 = vsub.f32 %v6872_v36, %v8859_v58  ;;  %v2133_v7 = vsub.f32 %v6874_v32, %v8859_v58 }
 0x213   :  { %2100 = vst [vmem:[#allocation9 + $0x10] sm:$0xff] %v2094_v53  ;;  %2101 = vst [vmem:[#allocation9 + $0x18] sm:$0xff] %v2095_v25  ;;  %v2134_v59 = vsub.f32 %v6878_v30, %v8859_v58  ;;  %v2135_v41 = vsub.f32 %v6880_v8, %v8859_v58  ;;  %v2128_v20 = vadd.f32 %v2124_v37, %v2116_v2 }
 0x214   :  { %v2129_v34 = vadd.f32 %v2125_v51, %v2117_v19  ;;  %v2148_v56 = vsub.f32 %v6872_v36, %v8860_v33  ;;  %v2149_v53 = vsub.f32 %v6874_v32, %v8860_v33  ;;  %v2136_v54 = vmax.f32 %v2132_v44, 0.0 }
 0x215   :  { %v2137_v24 = vmax.f32 %v2133_v7, 0.0  ;;  %v2138_v4 = vmax.f32 %v2134_v59, 0.0  ;;  %v2139_v35 = vmax.f32 %v2135_v41, 0.0  ;;  %v2150_v11 = vsub.f32 %v6878_v30, %v8860_v33 }
 0x216   :  { %v2151_v52 = vsub.f32 %v6880_v8, %v8860_v33  ;;  %v2152_v27 = vmax.f32 %v2148_v56, 0.0  ;;  %v2153_v1 = vmax.f32 %v2149_v53, 0.0  ;;  %v2130_v2 = vadd.f32 %v2126_v46, %v2118_v40  ;;  %v8864_v33 = vld [vmem:[#allocation26_spill] sm:$0xff] }
 0x217   :  { %v2131_v60 = vadd.f32 %v2127_v45, %v2119_v29  ;;  %v2140_v19 = vmul.f32 %v2136_v54, %v8861_v48  ;;  %v2141_v39 = vmul.f32 %v2137_v24, %v8861_v48  ;;  %v2154_v9 = vmax.f32 %v2150_v11, 0.0  ;;  %v8865_v54 = vld [vmem:[#allocation88_spill] sm:$0xff] }
 0x218   :  { %v2155_v61 = vmax.f32 %v2151_v52, 0.0  ;;  %v2156_v14 = vmul.f32 %v2152_v27, %v8862_v13  ;;  %v2157_v10 = vmul.f32 %v2153_v1, %v8862_v13  ;;  %v2164_v28 = vsub.f32 %v6872_v36, %v8863_v42 }
 0x219   :  { %v2165_v37 = vsub.f32 %v6874_v32, %v8863_v42  ;;  %v2166_v51 = vsub.f32 %v6878_v30, %v8863_v42  ;;  %v2167_v6 = vsub.f32 %v6880_v8, %v8863_v42  ;;  %v2142_v25 = vmul.f32 %v2138_v4, %v8861_v48 }
 0x21a   :  { %v2143_v40 = vmul.f32 %v2139_v35, %v8861_v48  ;;  %v2158_v29 = vmul.f32 %v2154_v9, %v8862_v13  ;;  %v2159_v46 = vmul.f32 %v2155_v61, %v8862_v13  ;;  %v2168_v45 = vmax.f32 %v2164_v28, 0.0 }
 0x21b   :  { %v2169_v58 = vmax.f32 %v2165_v37, 0.0  ;;  %v2170_v44 = vmax.f32 %v2166_v51, 0.0  ;;  %v2171_v7 = vmax.f32 %v2167_v6, 0.0  ;;  %v2160_v59 = vadd.f32 %v2156_v14, %v2128_v20  ;;  %v8867_v37 = vld [vmem:[#allocation27_spill] sm:$0xff] }
 0x21c   :  { %v2161_v41 = vadd.f32 %v2157_v10, %v2129_v34  ;;  %v2180_v56 = vsub.f32 %v6872_v36, %v8864_v33  ;;  %v2181_v53 = vsub.f32 %v6874_v32, %v8864_v33  ;;  %v2172_v24 = vmul.f32 %v2168_v45, %v8865_v54  ;;  %v8866_v10 = vld [vmem:[#allocation89_spill] sm:$0xff] }
 0x21d   :  { %v2173_v4 = vmul.f32 %v2169_v58, %v8865_v54  ;;  %v2174_v35 = vmul.f32 %v2170_v44, %v8865_v54  ;;  %v2175_v11 = vmul.f32 %v2171_v7, %v8865_v54  ;;  %v2182_v52 = vsub.f32 %v6878_v30, %v8864_v33 }
 0x21e   :  { %v2183_v20 = vsub.f32 %v6880_v8, %v8864_v33  ;;  %v2184_v34 = vmax.f32 %v2180_v56, 0.0  ;;  %v2185_v27 = vmax.f32 %v2181_v53, 0.0  ;;  %v2162_v1 = vadd.f32 %v2158_v29, %v2130_v2  ;;  %v8868_v53 = vld [vmem:[#allocation28_spill] sm:$0xff] }
 0x21f   :  { %v2163_v48 = vadd.f32 %v2159_v46, %v2131_v60  ;;  %v2176_v9 = vadd.f32 %v2172_v24, %v2140_v19  ;;  %v2177_v61 = vadd.f32 %v2173_v4, %v2141_v39  ;;  %v2186_v13 = vmax.f32 %v2182_v52, 0.0  ;;  %v8869_v4 = vld [vmem:[#allocation90_spill] sm:$0xff] }
 0x220   :  { %v2187_v14 = vmax.f32 %v2183_v20, 0.0  ;;  %v2188_v42 = vmul.f32 %v2184_v34, %v8866_v10  ;;  %v2189_v28 = vmul.f32 %v2185_v27, %v8866_v10  ;;  %v2196_v51 = vsub.f32 %v6872_v36, %v8867_v37 }
 0x221   :  { %v2197_v6 = vsub.f32 %v6874_v32, %v8867_v37  ;;  %v2198_v45 = vsub.f32 %v6878_v30, %v8867_v37  ;;  %v2199_v2 = vsub.f32 %v6880_v8, %v8867_v37  ;;  %v2178_v60 = vadd.f32 %v2174_v35, %v2142_v25 }
 0x222   :  { %v2179_v19 = vadd.f32 %v2175_v11, %v2143_v40  ;;  %v2190_v39 = vmul.f32 %v2186_v13, %v8866_v10  ;;  %v2191_v29 = vmul.f32 %v2187_v14, %v8866_v10  ;;  %v2200_v46 = vmax.f32 %v2196_v51, 0.0 }
 0x223   :  { %v2201_v58 = vmax.f32 %v2197_v6, 0.0  ;;  %v2202_v44 = vmax.f32 %v2198_v45, 0.0  ;;  %v2203_v7 = vmax.f32 %v2199_v2, 0.0  ;;  %v2192_v33 = vadd.f32 %v2188_v42, %v2160_v59  ;;  %v8871_v6 = vld [vmem:[#allocation29_spill] sm:$0xff] }
 0x224   :  { %v2193_v56 = vadd.f32 %v2189_v28, %v2161_v41  ;;  %v2212_v54 = vsub.f32 %v6872_v36, %v8868_v53  ;;  %v2213_v24 = vsub.f32 %v6874_v32, %v8868_v53  ;;  %v2204_v52 = vmul.f32 %v2200_v46, %v8869_v4  ;;  %v8870_v28 = vld [vmem:[#allocation91_spill] sm:$0xff] }
 0x225   :  { %v2205_v25 = vmul.f32 %v2201_v58, %v8869_v4  ;;  %v2206_v40 = vmul.f32 %v2202_v44, %v8869_v4  ;;  %v2207_v35 = vmul.f32 %v2203_v7, %v8869_v4  ;;  %v2214_v11 = vsub.f32 %v6878_v30, %v8868_v53 }
 0x226   :  { %v2215_v59 = vsub.f32 %v6880_v8, %v8868_v53  ;;  %v2216_v41 = vmax.f32 %v2212_v54, 0.0  ;;  %v2217_v20 = vmax.f32 %v2213_v24, 0.0  ;;  %v2194_v34 = vadd.f32 %v2190_v39, %v2162_v1  ;;  %v8872_v24 = vld [vmem:[#allocation30_spill] sm:$0xff] }
 0x227   :  { %v2195_v27 = vadd.f32 %v2191_v29, %v2163_v48  ;;  %v2208_v13 = vadd.f32 %v2204_v52, %v2176_v9  ;;  %v2209_v14 = vadd.f32 %v2205_v25, %v2177_v61  ;;  %v2218_v10 = vmax.f32 %v2214_v11, 0.0  ;;  %v8873_v25 = vld [vmem:[#allocation92_spill] sm:$0xff] }
 0x228   :  { %v2219_v42 = vmax.f32 %v2215_v59, 0.0  ;;  %v2220_v37 = vmul.f32 %v2216_v41, %v8870_v28  ;;  %v2221_v51 = vmul.f32 %v2217_v20, %v8870_v28  ;;  %v2228_v45 = vsub.f32 %v6872_v36, %v8871_v6 }
 0x229   :  { %v2229_v2 = vsub.f32 %v6874_v32, %v8871_v6  ;;  %v2230_v46 = vsub.f32 %v6878_v30, %v8871_v6  ;;  %v2231_v1 = vsub.f32 %v6880_v8, %v8871_v6  ;;  %v2210_v48 = vadd.f32 %v2206_v40, %v2178_v60 }
 0x22a   :  { %v2211_v9 = vadd.f32 %v2207_v35, %v2179_v19  ;;  %v2222_v61 = vmul.f32 %v2218_v10, %v8870_v28  ;;  %v2223_v39 = vmul.f32 %v2219_v42, %v8870_v28  ;;  %v2232_v29 = vmax.f32 %v2228_v45, 0.0 }
 0x22b   :  { %v2233_v58 = vmax.f32 %v2229_v2, 0.0  ;;  %v2234_v44 = vmax.f32 %v2230_v46, 0.0  ;;  %v2235_v7 = vmax.f32 %v2231_v1, 0.0  ;;  %v2224_v53 = vadd.f32 %v2220_v37, %v2192_v33  ;;  %v8875_v2 = vld [vmem:[#allocation31_spill] sm:$0xff] }
 0x22c   :  { %v2225_v54 = vadd.f32 %v2221_v51, %v2193_v56  ;;  %v2244_v4 = vsub.f32 %v6872_v36, %v8872_v24  ;;  %v2245_v52 = vsub.f32 %v6874_v32, %v8872_v24  ;;  %v2236_v11 = vmul.f32 %v2232_v29, %v8873_v25  ;;  %v8874_v51 = vld [vmem:[#allocation93_spill] sm:$0xff] }
 0x22d   :  { %v2237_v60 = vmul.f32 %v2233_v58, %v8873_v25  ;;  %v2238_v19 = vmul.f32 %v2234_v44, %v8873_v25  ;;  %v2239_v40 = vmul.f32 %v2235_v7, %v8873_v25  ;;  %v2246_v35 = vsub.f32 %v6878_v30, %v8872_v24 }
 0x22e   :  { %v2247_v33 = vsub.f32 %v6880_v8, %v8872_v24  ;;  %v2248_v56 = vmax.f32 %v2244_v4, 0.0  ;;  %v2249_v59 = vmax.f32 %v2245_v52, 0.0  ;;  %v2226_v41 = vadd.f32 %v2222_v61, %v2194_v34  ;;  %v8876_v52 = vld [vmem:[#allocation32_spill] sm:$0xff] }
 0x22f   :  { %v2227_v20 = vadd.f32 %v2223_v39, %v2195_v27  ;;  %v2240_v10 = vadd.f32 %v2236_v11, %v2208_v13  ;;  %v2241_v42 = vadd.f32 %v2237_v60, %v2209_v14  ;;  %v2250_v28 = vmax.f32 %v2246_v35, 0.0  ;;  %v8877_v60 = vld [vmem:[#allocation94_spill] sm:$0xff] }
 0x230   :  { %v2251_v37 = vmax.f32 %v2247_v33, 0.0  ;;  %v2252_v6 = vmul.f32 %v2248_v56, %v8874_v51  ;;  %v2253_v45 = vmul.f32 %v2249_v59, %v8874_v51  ;;  %v2260_v46 = vsub.f32 %v6872_v36, %v8875_v2 }
 0x231   :  { %v2261_v1 = vsub.f32 %v6874_v32, %v8875_v2  ;;  %v2262_v29 = vsub.f32 %v6878_v30, %v8875_v2  ;;  %v2263_v34 = vsub.f32 %v6880_v8, %v8875_v2  ;;  %v2242_v27 = vadd.f32 %v2238_v19, %v2210_v48 }
 0x232   :  { %v2243_v13 = vadd.f32 %v2239_v40, %v2211_v9  ;;  %v2254_v14 = vmul.f32 %v2250_v28, %v8874_v51  ;;  %v2255_v61 = vmul.f32 %v2251_v37, %v8874_v51  ;;  %v2264_v39 = vmax.f32 %v2260_v46, 0.0 }
 0x233   :  { %v2265_v58 = vmax.f32 %v2261_v1, 0.0  ;;  %v2266_v44 = vmax.f32 %v2262_v29, 0.0  ;;  %v2267_v7 = vmax.f32 %v2263_v34, 0.0  ;;  %v2256_v24 = vadd.f32 %v2252_v6, %v2224_v53  ;;  %v8879_v1 = vld [vmem:[#allocation33_spill] sm:$0xff] }
 0x234   :  { %v2257_v4 = vadd.f32 %v2253_v45, %v2225_v54  ;;  %v2276_v25 = vsub.f32 %v6872_v36, %v8876_v52  ;;  %v2277_v11 = vsub.f32 %v6874_v32, %v8876_v52  ;;  %v2268_v35 = vmul.f32 %v2264_v39, %v8877_v60  ;;  %v8878_v45 = vld [vmem:[#allocation95_spill] sm:$0xff] }
 0x235   :  { %v2269_v48 = vmul.f32 %v2265_v58, %v8877_v60  ;;  %v2270_v9 = vmul.f32 %v2266_v44, %v8877_v60  ;;  %v2271_v19 = vmul.f32 %v2267_v7, %v8877_v60  ;;  %v2278_v40 = vsub.f32 %v6878_v30, %v8876_v52 }
 0x236   :  { %v2279_v53 = vsub.f32 %v6880_v8, %v8876_v52  ;;  %v2280_v54 = vmax.f32 %v2276_v25, 0.0  ;;  %v2281_v33 = vmax.f32 %v2277_v11, 0.0  ;;  %v2258_v56 = vadd.f32 %v2254_v14, %v2226_v41  ;;  %v8880_v11 = vld [vmem:[#allocation34_spill] sm:$0xff] }
 0x237   :  { %v2259_v59 = vadd.f32 %v2255_v61, %v2227_v20  ;;  %v2272_v28 = vadd.f32 %v2268_v35, %v2240_v10  ;;  %v2273_v37 = vadd.f32 %v2269_v48, %v2241_v42  ;;  %v2282_v51 = vmax.f32 %v2278_v40, 0.0  ;;  %v8881_v48 = vld [vmem:[#allocation96_spill] sm:$0xff] }
 0x238   :  { %v2283_v6 = vmax.f32 %v2279_v53, 0.0  ;;  %v2284_v2 = vmul.f32 %v2280_v54, %v8878_v45  ;;  %v2285_v46 = vmul.f32 %v2281_v33, %v8878_v45  ;;  %v2292_v29 = vsub.f32 %v6872_v36, %v8879_v1 }
 0x239   :  { %v2293_v34 = vsub.f32 %v6874_v32, %v8879_v1  ;;  %v2294_v39 = vsub.f32 %v6878_v30, %v8879_v1  ;;  %v2295_v41 = vsub.f32 %v6880_v8, %v8879_v1  ;;  %v2274_v20 = vadd.f32 %v2270_v9, %v2242_v27 }
 0x23a   :  { %v2275_v10 = vadd.f32 %v2271_v19, %v2243_v13  ;;  %v2286_v42 = vmul.f32 %v2282_v51, %v8878_v45  ;;  %v2287_v14 = vmul.f32 %v2283_v6, %v8878_v45  ;;  %v2296_v61 = vmax.f32 %v2292_v29, 0.0 }
 0x23b   :  { %v2297_v58 = vmax.f32 %v2293_v34, 0.0  ;;  %v2298_v44 = vmax.f32 %v2294_v39, 0.0  ;;  %v2299_v7 = vmax.f32 %v2295_v41, 0.0  ;;  %v2288_v52 = vadd.f32 %v2284_v2, %v2256_v24  ;;  %v8883_v34 = vld [vmem:[#allocation35_spill] sm:$0xff] }
 0x23c   :  { %v2289_v25 = vadd.f32 %v2285_v46, %v2257_v4  ;;  %v2308_v60 = vsub.f32 %v6872_v36, %v8880_v11  ;;  %v2309_v35 = vsub.f32 %v6874_v32, %v8880_v11  ;;  %v2300_v40 = vmul.f32 %v2296_v61, %v8881_v48  ;;  %v8882_v46 = vld [vmem:[#allocation97_spill] sm:$0xff] }
 0x23d   :  { %v2301_v27 = vmul.f32 %v2297_v58, %v8881_v48  ;;  %v2302_v13 = vmul.f32 %v2298_v44, %v8881_v48  ;;  %v2303_v9 = vmul.f32 %v2299_v7, %v8881_v48  ;;  %v2310_v19 = vsub.f32 %v6878_v30, %v8880_v11 }
 0x23e   :  { %v2311_v24 = vsub.f32 %v6880_v8, %v8880_v11  ;;  %v2312_v4 = vmax.f32 %v2308_v60, 0.0  ;;  %v2313_v53 = vmax.f32 %v2309_v35, 0.0  ;;  %v2290_v54 = vadd.f32 %v2286_v42, %v2258_v56  ;;  %v8884_v35 = vld [vmem:[#allocation45_spill] sm:$0xff] }
 0x23f   :  { %v2291_v33 = vadd.f32 %v2287_v14, %v2259_v59  ;;  %v2304_v51 = vadd.f32 %v2300_v40, %v2272_v28  ;;  %v2305_v6 = vadd.f32 %v2301_v27, %v2273_v37  ;;  %v2314_v45 = vmax.f32 %v2310_v19, 0.0  ;;  %v8885_v27 = vld [vmem:[#allocation38_spill] sm:$0xff] }
 0x240   :  { %v2315_v2 = vmax.f32 %v2311_v24, 0.0  ;;  %v2316_v1 = vmul.f32 %v2312_v4, %v8882_v46  ;;  %v2317_v29 = vmul.f32 %v2313_v53, %v8882_v46  ;;  %v2324_v39 = vsub.f32 %v6872_v36, %v8883_v34 }
 0x241   :  { %v2325_v41 = vsub.f32 %v6874_v32, %v8883_v34  ;;  %v2326_v61 = vsub.f32 %v6878_v30, %v8883_v34  ;;  %v2327_v56 = vsub.f32 %v6880_v8, %v8883_v34  ;;  %v2306_v59 = vadd.f32 %v2302_v13, %v2274_v20 }
 0x242   :  { %v2307_v28 = vadd.f32 %v2303_v9, %v2275_v10  ;;  %v2318_v37 = vmul.f32 %v2314_v45, %v8882_v46  ;;  %v2319_v42 = vmul.f32 %v2315_v2, %v8882_v46  ;;  %v2328_v14 = vmax.f32 %v2324_v39, 0.0 }
 0x243   :  { %v2329_v58 = vmax.f32 %v2325_v41, 0.0  ;;  %v2330_v44 = vmax.f32 %v2326_v61, 0.0  ;;  %v2331_v7 = vmax.f32 %v2327_v56, 0.0  ;;  %v2320_v11 = vadd.f32 %v2316_v1, %v2288_v52  ;;  %v8887_v41 = vld [vmem:[#allocation46_spill] sm:$0xff] }
 0x244   :  { %v2321_v60 = vadd.f32 %v2317_v29, %v2289_v25  ;;  %v2340_v48 = vsub.f32 %v6872_v36, %v8884_v35  ;;  %v2341_v40 = vsub.f32 %v6874_v32, %v8884_v35  ;;  %v2332_v19 = vmul.f32 %v2328_v14, %v8885_v27  ;;  %v8886_v29 = vld [vmem:[#allocation39_spill] sm:$0xff] }
 0x245   :  { %v2333_v20 = vmul.f32 %v2329_v58, %v8885_v27  ;;  %v2334_v10 = vmul.f32 %v2330_v44, %v8885_v27  ;;  %v2335_v13 = vmul.f32 %v2331_v7, %v8885_v27  ;;  %v2342_v9 = vsub.f32 %v6878_v30, %v8884_v35 }
 0x246   :  { %v2343_v52 = vsub.f32 %v6880_v8, %v8884_v35  ;;  %v2344_v25 = vmax.f32 %v2340_v48, 0.0  ;;  %v2345_v24 = vmax.f32 %v2341_v40, 0.0  ;;  %v2322_v4 = vadd.f32 %v2318_v37, %v2290_v54  ;;  %v8888_v40 = vld [vmem:[#allocation53_spill] sm:$0xff] }
 0x247   :  { %v2323_v53 = vadd.f32 %v2319_v42, %v2291_v33  ;;  %v2336_v45 = vadd.f32 %v2332_v19, %v2304_v51  ;;  %v2337_v2 = vadd.f32 %v2333_v20, %v2305_v6  ;;  %v2346_v46 = vmax.f32 %v2342_v9, 0.0  ;;  %v8889_v20 = vld [vmem:[#allocation40_spill] sm:$0xff] }
 0x248   :  { %v2347_v1 = vmax.f32 %v2343_v52, 0.0  ;;  %v2348_v34 = vmul.f32 %v2344_v25, %v8886_v29  ;;  %v2349_v39 = vmul.f32 %v2345_v24, %v8886_v29  ;;  %v2356_v61 = vsub.f32 %v6872_v36, %v8887_v41 }
 0x249   :  { %v2357_v56 = vsub.f32 %v6874_v32, %v8887_v41  ;;  %v2358_v14 = vsub.f32 %v6878_v30, %v8887_v41  ;;  %v2359_v54 = vsub.f32 %v6880_v8, %v8887_v41  ;;  %v2338_v33 = vadd.f32 %v2334_v10, %v2306_v59 }
 0x24a   :  { %v2339_v51 = vadd.f32 %v2335_v13, %v2307_v28  ;;  %v2350_v6 = vmul.f32 %v2346_v46, %v8886_v29  ;;  %v2351_v37 = vmul.f32 %v2347_v1, %v8886_v29  ;;  %v2360_v42 = vmax.f32 %v2356_v61, 0.0 }
 0x24b   :  { %v2361_v58 = vmax.f32 %v2357_v56, 0.0  ;;  %v2362_v44 = vmax.f32 %v2358_v14, 0.0  ;;  %v2363_v7 = vmax.f32 %v2359_v54, 0.0  ;;  %v2352_v35 = vadd.f32 %v2348_v34, %v2320_v11  ;;  %v8891_v56 = vld [vmem:[#allocation54_spill] sm:$0xff] }
 0x24c   :  { %v2353_v48 = vadd.f32 %v2349_v39, %v2321_v60  ;;  %v2372_v27 = vsub.f32 %v6872_v36, %v8888_v40  ;;  %v2373_v19 = vsub.f32 %v6874_v32, %v8888_v40  ;;  %v2364_v9 = vmul.f32 %v2360_v42, %v8889_v20  ;;  %v8890_v39 = vld [vmem:[#allocation36_spill] sm:$0xff] }
 0x24d   :  { %v2365_v59 = vmul.f32 %v2361_v58, %v8889_v20  ;;  %v2366_v28 = vmul.f32 %v2362_v44, %v8889_v20  ;;  %v2367_v10 = vmul.f32 %v2363_v7, %v8889_v20  ;;  %v2374_v13 = vsub.f32 %v6878_v30, %v8888_v40 }
 0x24e   :  { %v2375_v11 = vsub.f32 %v6880_v8, %v8888_v40  ;;  %v2376_v60 = vmax.f32 %v2372_v27, 0.0  ;;  %v2377_v52 = vmax.f32 %v2373_v19, 0.0  ;;  %v2354_v25 = vadd.f32 %v2350_v6, %v2322_v4  ;;  %v8892_v19 = vld [vmem:[#allocation65_spill] sm:$0xff] }
 0x24f   :  { %v2355_v24 = vadd.f32 %v2351_v37, %v2323_v53  ;;  %v2368_v46 = vadd.f32 %v2364_v9, %v2336_v45  ;;  %v2369_v1 = vadd.f32 %v2365_v59, %v2337_v2  ;;  %v2378_v29 = vmax.f32 %v2374_v13, 0.0  ;;  %v8893_v59 = vld [vmem:[#allocation43_spill] sm:$0xff] }
 0x250   :  { %v2379_v34 = vmax.f32 %v2375_v11, 0.0  ;;  %v2380_v41 = vmul.f32 %v2376_v60, %v8890_v39  ;;  %v2381_v61 = vmul.f32 %v2377_v52, %v8890_v39  ;;  %v2388_v14 = vsub.f32 %v6872_v36, %v8891_v56 }
 0x251   :  { %v2389_v54 = vsub.f32 %v6874_v32, %v8891_v56  ;;  %v2390_v42 = vsub.f32 %v6878_v30, %v8891_v56  ;;  %v2391_v4 = vsub.f32 %v6880_v8, %v8891_v56  ;;  %v2370_v53 = vadd.f32 %v2366_v28, %v2338_v33 }
 0x252   :  { %v2371_v45 = vadd.f32 %v2367_v10, %v2339_v51  ;;  %v2382_v2 = vmul.f32 %v2378_v29, %v8890_v39  ;;  %v2383_v6 = vmul.f32 %v2379_v34, %v8890_v39  ;;  %v2392_v37 = vmax.f32 %v2388_v14, 0.0 }
 0x253   :  { %v2393_v58 = vmax.f32 %v2389_v54, 0.0  ;;  %v2394_v44 = vmax.f32 %v2390_v42, 0.0  ;;  %v2395_v7 = vmax.f32 %v2391_v4, 0.0  ;;  %v2384_v40 = vadd.f32 %v2380_v41, %v2352_v35  ;;  %v8895_v54 = vld [vmem:[#allocation66_spill] sm:$0xff] }
 0x254   :  { %v2385_v27 = vadd.f32 %v2381_v61, %v2353_v48  ;;  %v2404_v20 = vsub.f32 %v6872_v36, %v8892_v19  ;;  %v2405_v9 = vsub.f32 %v6874_v32, %v8892_v19  ;;  %v2396_v13 = vmul.f32 %v2392_v37, %v8893_v59  ;;  %v8894_v61 = vld [vmem:[#allocation47_spill] sm:$0xff] }
 0x255   :  { %v2397_v33 = vmul.f32 %v2393_v58, %v8893_v59  ;;  %v2398_v51 = vmul.f32 %v2394_v44, %v8893_v59  ;;  %v2399_v28 = vmul.f32 %v2395_v7, %v8893_v59  ;;  %v2406_v10 = vsub.f32 %v6878_v30, %v8892_v19 }
 0x256   :  { %v2407_v35 = vsub.f32 %v6880_v8, %v8892_v19  ;;  %v2408_v48 = vmax.f32 %v2404_v20, 0.0  ;;  %v2409_v11 = vmax.f32 %v2405_v9, 0.0  ;;  %v2386_v60 = vadd.f32 %v2382_v2, %v2354_v25  ;;  %v8896_v9 = vld [vmem:[#allocation71_spill] sm:$0xff] }
 0x257   :  { %v2387_v52 = vadd.f32 %v2383_v6, %v2355_v24  ;;  %v2400_v29 = vadd.f32 %v2396_v13, %v2368_v46  ;;  %v2401_v34 = vadd.f32 %v2397_v33, %v2369_v1  ;;  %v2410_v39 = vmax.f32 %v2406_v10, 0.0  ;;  %v8897_v33 = vld [vmem:[#allocation48_spill] sm:$0xff] }
 0x258   :  { %v2411_v41 = vmax.f32 %v2407_v35, 0.0  ;;  %v2412_v56 = vmul.f32 %v2408_v48, %v8894_v61  ;;  %v2413_v14 = vmul.f32 %v2409_v11, %v8894_v61  ;;  %v2420_v42 = vsub.f32 %v6872_v36, %v8895_v54 }
 0x259   :  { %v2421_v4 = vsub.f32 %v6874_v32, %v8895_v54  ;;  %v2422_v37 = vsub.f32 %v6878_v30, %v8895_v54  ;;  %v2423_v25 = vsub.f32 %v6880_v8, %v8895_v54  ;;  %v2402_v24 = vadd.f32 %v2398_v51, %v2370_v53 }
 0x25a   :  { %v2403_v46 = vadd.f32 %v2399_v28, %v2371_v45  ;;  %v2414_v1 = vmul.f32 %v2410_v39, %v8894_v61  ;;  %v2415_v2 = vmul.f32 %v2411_v41, %v8894_v61  ;;  %v2424_v6 = vmax.f32 %v2420_v42, 0.0 }
 0x25b   :  { %v2425_v58 = vmax.f32 %v2421_v4, 0.0  ;;  %v2426_v44 = vmax.f32 %v2422_v37, 0.0  ;;  %v2427_v7 = vmax.f32 %v2423_v25, 0.0  ;;  %v2416_v19 = vadd.f32 %v2412_v56, %v2384_v40  ;;  %v8899_v4 = vld [vmem:[#allocation72_spill] sm:$0xff] }
 0x25c   :  { %v2417_v20 = vadd.f32 %v2413_v14, %v2385_v27  ;;  %v2436_v59 = vsub.f32 %v6872_v36, %v8896_v9  ;;  %v2437_v13 = vsub.f32 %v6874_v32, %v8896_v9  ;;  %v2428_v10 = vmul.f32 %v2424_v6, %v8897_v33  ;;  %v8898_v14 = vld [vmem:[#allocation50_spill] sm:$0xff] }
 0x25d   :  { %v2429_v53 = vmul.f32 %v2425_v58, %v8897_v33  ;;  %v2430_v45 = vmul.f32 %v2426_v44, %v8897_v33  ;;  %v2431_v51 = vmul.f32 %v2427_v7, %v8897_v33  ;;  %v2438_v28 = vsub.f32 %v6878_v30, %v8896_v9 }
 0x25e   :  { %v2439_v40 = vsub.f32 %v6880_v8, %v8896_v9  ;;  %v2440_v27 = vmax.f32 %v2436_v59, 0.0  ;;  %v2441_v35 = vmax.f32 %v2437_v13, 0.0  ;;  %v2418_v48 = vadd.f32 %v2414_v1, %v2386_v60  ;;  %v8900_v13 = vld [vmem:[#allocation80_spill] sm:$0xff] }
 0x25f   :  { %v2419_v11 = vadd.f32 %v2415_v2, %v2387_v52  ;;  %v2432_v39 = vadd.f32 %v2428_v10, %v2400_v29  ;;  %v2433_v41 = vadd.f32 %v2429_v53, %v2401_v34  ;;  %v2442_v61 = vmax.f32 %v2438_v28, 0.0  ;;  %v8901_v53 = vld [vmem:[#allocation58_spill] sm:$0xff] }
 0x260   :  { %v2443_v56 = vmax.f32 %v2439_v40, 0.0  ;;  %v2444_v54 = vmul.f32 %v2440_v27, %v8898_v14  ;;  %v2445_v42 = vmul.f32 %v2441_v35, %v8898_v14  ;;  %v2452_v37 = vsub.f32 %v6872_v36, %v8899_v4 }
 0x261   :  { %v2453_v25 = vsub.f32 %v6874_v32, %v8899_v4  ;;  %v2454_v6 = vsub.f32 %v6878_v30, %v8899_v4  ;;  %v2455_v60 = vsub.f32 %v6880_v8, %v8899_v4  ;;  %v2434_v52 = vadd.f32 %v2430_v45, %v2402_v24 }
 0x262   :  { %v2435_v29 = vadd.f32 %v2431_v51, %v2403_v46  ;;  %v2446_v34 = vmul.f32 %v2442_v61, %v8898_v14  ;;  %v2447_v1 = vmul.f32 %v2443_v56, %v8898_v14  ;;  %v2456_v2 = vmax.f32 %v2452_v37, 0.0 }
 0x263   :  { %v2457_v58 = vmax.f32 %v2453_v25, 0.0  ;;  %v2458_v44 = vmax.f32 %v2454_v6, 0.0  ;;  %v2459_v7 = vmax.f32 %v2455_v60, 0.0  ;;  %v2448_v9 = vadd.f32 %v2444_v54, %v2416_v19  ;;  %v8903_v25 = vld [vmem:[#allocation82_spill] sm:$0xff] }
 0x264   :  { %v2449_v59 = vadd.f32 %v2445_v42, %v2417_v20  ;;  %v2468_v33 = vsub.f32 %v6872_v36, %v8900_v13  ;;  %v2469_v10 = vsub.f32 %v6874_v32, %v8900_v13  ;;  %v2460_v28 = vmul.f32 %v2456_v2, %v8901_v53  ;;  %v8902_v42 = vld [vmem:[#allocation55_spill] sm:$0xff] }
 0x265   :  { %v2461_v24 = vmul.f32 %v2457_v58, %v8901_v53  ;;  %v2462_v46 = vmul.f32 %v2458_v44, %v8901_v53  ;;  %v2463_v45 = vmul.f32 %v2459_v7, %v8901_v53  ;;  %v2470_v51 = vsub.f32 %v6878_v30, %v8900_v13 }
 0x266   :  { %v2471_v19 = vsub.f32 %v6880_v8, %v8900_v13  ;;  %v2472_v20 = vmax.f32 %v2468_v33, 0.0  ;;  %v2473_v40 = vmax.f32 %v2469_v10, 0.0  ;;  %v2450_v27 = vadd.f32 %v2446_v34, %v2418_v48  ;;  %v8904_v10 = vld [vmem:[#allocation63_spill] sm:$0xff] }
 0x267   :  { %v2451_v35 = vadd.f32 %v2447_v1, %v2419_v11  ;;  %v2464_v61 = vadd.f32 %v2460_v28, %v2432_v39  ;;  %v2465_v56 = vadd.f32 %v2461_v24, %v2433_v41  ;;  %v2474_v14 = vmax.f32 %v2470_v51, 0.0  ;;  %v8905_v24 = vld [vmem:[#allocation62_spill] sm:$0xff] }
 0x268   :  { %v2475_v54 = vmax.f32 %v2471_v19, 0.0  ;;  %v2476_v4 = vmul.f32 %v2472_v20, %v8902_v42  ;;  %v2477_v37 = vmul.f32 %v2473_v40, %v8902_v42  ;;  %v2484_v6 = vsub.f32 %v6872_v36, %v8903_v25 }
 0x269   :  { %v2485_v60 = vsub.f32 %v6874_v32, %v8903_v25  ;;  %v2486_v2 = vsub.f32 %v6878_v30, %v8903_v25  ;;  %v2487_v48 = vsub.f32 %v6880_v8, %v8903_v25  ;;  %v2466_v11 = vadd.f32 %v2462_v46, %v2434_v52 }
 0x26a   :  { %v2467_v39 = vadd.f32 %v2463_v45, %v2435_v29  ;;  %v2478_v41 = vmul.f32 %v2474_v14, %v8902_v42  ;;  %v2479_v34 = vmul.f32 %v2475_v54, %v8902_v42  ;;  %v2488_v1 = vmax.f32 %v2484_v6, 0.0  ;;  %v8906_v6 = vld [vmem:[#allocation64_spill] sm:$0xff] }
 0x26b   :  { %v2489_v58 = vmax.f32 %v2485_v60, 0.0  ;;  %v2490_v44 = vmax.f32 %v2486_v2, 0.0  ;;  %v2491_v7 = vmax.f32 %v2487_v48, 0.0  ;;  %v2480_v13 = vadd.f32 %v2476_v4, %v2448_v9 }
 0x26c   :  { %v2481_v33 = vadd.f32 %v2477_v37, %v2449_v59  ;;  %v2500_v53 = vsub.f32 %v6872_v36, %v8904_v10  ;;  %v2501_v28 = vsub.f32 %v6874_v32, %v8904_v10  ;;  %v2492_v51 = vmul.f32 %v2488_v1, %v8905_v24 }
 0x26d   :  { %v2493_v52 = vmul.f32 %v2489_v58, %v8905_v24  ;;  %v2494_v29 = vmul.f32 %v2490_v44, %v8905_v24  ;;  %v2495_v46 = vmul.f32 %v2491_v7, %v8905_v24  ;;  %v2502_v45 = vsub.f32 %v6878_v30, %v8904_v10 }
 0x26e   :  { %v2503_v9 = vsub.f32 %v6880_v8, %v8904_v10  ;;  %v2504_v59 = vmax.f32 %v2500_v53, 0.0  ;;  %v2505_v19 = vmax.f32 %v2501_v28, 0.0  ;;  %v2482_v20 = vadd.f32 %v2478_v41, %v2450_v27 }
 0x26f   :  { %v2483_v40 = vadd.f32 %v2479_v34, %v2451_v35  ;;  %v2496_v14 = vadd.f32 %v2492_v51, %v2464_v61  ;;  %v2497_v54 = vadd.f32 %v2493_v52, %v2465_v56  ;;  %v2506_v42 = vmax.f32 %v2502_v45, 0.0 }
 0x270   :  { %v2507_v4 = vmax.f32 %v2503_v9, 0.0  ;;  %v2508_v37 = vmul.f32 %v2504_v59, %v5098_v57  ;;  %v2509_v25 = vmul.f32 %v2505_v19, %v5098_v57  ;;  %v2516_v60 = vsub.f32 %v6872_v36, %v8906_v6 }
 0x271   :  { %v2517_v2 = vsub.f32 %v6874_v32, %v8906_v6  ;;  %v2518_v48 = vsub.f32 %v6878_v30, %v8906_v6  ;;  %v2519_v27 = vsub.f32 %v6880_v8, %v8906_v6  ;;  %v2498_v35 = vadd.f32 %v2494_v29, %v2466_v11 }
 0x272   :  { %v2499_v61 = vadd.f32 %v2495_v46, %v2467_v39  ;;  %v2510_v56 = vmul.f32 %v2506_v42, %v5098_v57  ;;  %v2511_v41 = vmul.f32 %v2507_v4, %v5098_v57  ;;  %v2520_v34 = vmax.f32 %v2516_v60, 0.0 }
 0x273   :  { %v2521_v1 = vmax.f32 %v2517_v2, 0.0  ;;  %v2522_v58 = vmax.f32 %v2518_v48, 0.0  ;;  %v2523_v44 = vmax.f32 %v2519_v27, 0.0  ;;  %v2512_v7 = vadd.f32 %v2508_v37, %v2480_v13 }
 0x274   :  { %v2513_v10 = vadd.f32 %v2509_v25, %v2481_v33  ;;  %v2532_v53 = vsub.f32 %v6872_v36, %v5124_v16  ;;  %v2533_v28 = vsub.f32 %v6874_v32, %v5124_v16  ;;  %v2524_v24 = vmul.f32 %v2520_v34, %v5121_v5 }
 0x275   :  { %v2525_v11 = vmul.f32 %v2521_v1, %v5121_v5  ;;  %v2526_v39 = vmul.f32 %v2522_v58, %v5121_v5  ;;  %v2527_v57 = vmul.f32 %v2523_v44, %v5121_v5  ;;  %v2534_v51 = vsub.f32 %v6878_v30, %v5124_v16 }
 0x276   :  { %v2535_v13 = vsub.f32 %v6880_v8, %v5124_v16  ;;  %v2536_v33 = vmax.f32 %v2532_v53, 0.0  ;;  %v2537_v52 = vmax.f32 %v2533_v28, 0.0  ;;  %v2514_v29 = vadd.f32 %v2510_v56, %v2482_v20 }
 0x277   :  { %v2515_v46 = vadd.f32 %v2511_v41, %v2483_v40  ;;  %v2528_v45 = vadd.f32 %v2524_v24, %v2496_v14  ;;  %v2529_v9 = vadd.f32 %v2525_v11, %v2497_v54  ;;  %v2538_v59 = vmax.f32 %v2534_v51, 0.0 }
 0x278   :  { %v2539_v19 = vmax.f32 %v2535_v13, 0.0  ;;  %v2540_v42 = vmul.f32 %v2536_v33, %v5154_v22  ;;  %v2541_v4 = vmul.f32 %v2537_v52, %v5154_v22  ;;  %v2548_v5 = vsub.f32 %v6872_v36, %v5195_v21 }
 0x279   :  { %v2549_v37 = vsub.f32 %v6874_v32, %v5195_v21  ;;  %v2550_v16 = vsub.f32 %v6878_v30, %v5195_v21  ;;  %v2551_v20 = vsub.f32 %v6880_v8, %v5195_v21  ;;  %v2530_v40 = vadd.f32 %v2526_v39, %v2498_v35 }
 0x27a   :  { %v2531_v14 = vadd.f32 %v2527_v57, %v2499_v61  ;;  %v2542_v54 = vmul.f32 %v2538_v59, %v5154_v22  ;;  %v2543_v25 = vmul.f32 %v2539_v19, %v5154_v22  ;;  %v2552_v6 = vmax.f32 %v2548_v5, 0.0  ;;  %v7264_v5 = vld [vmem:[#allocation7] sm:$0xff] }
 0x27b   :  { %v2553_v60 = vmax.f32 %v2549_v37, 0.0  ;;  %v2554_v2 = vmax.f32 %v2550_v16, 0.0  ;;  %v2555_v48 = vmax.f32 %v2551_v20, 0.0  ;;  %v2544_v27 = vadd.f32 %v2540_v42, %v2512_v7  ;;  %v7268_v37 = vld [vmem:[#allocation7 + $0x8] sm:$0xff] }
 0x27c   :  { %v2545_v56 = vadd.f32 %v2541_v4, %v2513_v10  ;;  %v2564_v41 = vsub.f32 %v6872_v36, %v5257_v15  ;;  %v2565_v34 = vsub.f32 %v6874_v32, %v5257_v15  ;;  %v2556_v21 = vmul.f32 %v2552_v6, %v5198_v63 }
 0x27d   :  { %v2557_v35 = vmul.f32 %v2553_v60, %v5198_v63  ;;  %v2558_v61 = vmul.f32 %v2554_v2, %v5198_v63  ;;  %v2559_v22 = vmul.f32 %v2555_v48, %v5198_v63  ;;  %v2566_v1 = vsub.f32 %v6878_v30, %v5257_v15 }
 0x27e   :  { %v2567_v58 = vsub.f32 %v6880_v8, %v5257_v15  ;;  %v2568_v44 = vmax.f32 %v2564_v41, 0.0  ;;  %v2569_v7 = vmax.f32 %v2565_v34, 0.0  ;;  %v2546_v10 = vadd.f32 %v2542_v54, %v2514_v29 }
 0x27f   :  { %v2547_v53 = vadd.f32 %v2543_v25, %v2515_v46  ;;  %v2560_v28 = vadd.f32 %v2556_v21, %v2528_v45  ;;  %v2561_v24 = vadd.f32 %v2557_v35, %v2529_v9  ;;  %v2570_v11 = vmax.f32 %v2566_v1, 0.0  ;;  %v7286_v35 = vld [vmem:[#allocation7 + $0x10] sm:$0xff] }
 0x280   :  { %v2571_v39 = vmax.f32 %v2567_v58, 0.0  ;;  %v2572_v57 = vmul.f32 %v2568_v44, %v5260_v23  ;;  %v2573_v51 = vmul.f32 %v2569_v7, %v5260_v23  ;;  %v2580_v63 = vsub.f32 %v6872_v36, %v5263_v17 }
 0x281   :  { %v2581_v13 = vsub.f32 %v6874_v32, %v5263_v17  ;;  %v2582_v15 = vsub.f32 %v6878_v30, %v5263_v17  ;;  %v2583_v33 = vsub.f32 %v6880_v8, %v5263_v17  ;;  %v2562_v52 = vadd.f32 %v2558_v61, %v2530_v40 }
 0x282   :  { %v2563_v29 = vadd.f32 %v2559_v22, %v2531_v14  ;;  %v2574_v46 = vmul.f32 %v2570_v11, %v5260_v23  ;;  %v2575_v45 = vmul.f32 %v2571_v39, %v5260_v23  ;;  %v2584_v9 = vmax.f32 %v2580_v63, 0.0 }
 0x283   :  { %v2585_v59 = vmax.f32 %v2581_v13, 0.0  ;;  %v2586_v19 = vmax.f32 %v2582_v15, 0.0  ;;  %v2587_v42 = vmax.f32 %v2583_v33, 0.0  ;;  %v2576_v36 = vadd.f32 %v2572_v57, %v2544_v27 }
 0x284   :  { %v2577_v4 = vadd.f32 %v2573_v51, %v2545_v56  ;;  %v2596_v32 = vsub.f32 %v7264_v5, %v5321_v0  ;;  %v2597_v17 = vsub.f32 %v7268_v37, %v5321_v0  ;;  %v2588_v16 = vmul.f32 %v2584_v9, %v5266_v50 }
 0x285   :  { %v2589_v23 = vmul.f32 %v2585_v59, %v5266_v50  ;;  %v2590_v20 = vmul.f32 %v2586_v19, %v5266_v50  ;;  %v2591_v40 = vmul.f32 %v2587_v42, %v5266_v50  ;;  %v2598_v14 = vsub.f32 %v6878_v30, %v5321_v0 }
 0x286   :  { %v2599_v54 = vsub.f32 %v6880_v8, %v5321_v0  ;;  %v2600_v25 = vmax.f32 %v2596_v32, 0.0  ;;  %v2601_v6 = vmax.f32 %v2597_v17, 0.0  ;;  %v2578_v60 = vadd.f32 %v2574_v46, %v2546_v10  ;;  %v7290_v8 = vld [vmem:[#allocation7 + $0x18] sm:$0xff] }
 0x287   :  { %v2579_v2 = vadd.f32 %v2575_v45, %v2547_v53  ;;  %v2592_v48 = vadd.f32 %v2588_v16, %v2560_v28  ;;  %v2593_v27 = vadd.f32 %v2589_v23, %v2561_v24  ;;  %v2602_v56 = vmax.f32 %v2598_v14, 0.0 }
 0x288   :  { %v2603_v41 = vmax.f32 %v2599_v54, 0.0  ;;  %v2604_v34 = vmul.f32 %v2600_v25, %v5333_v31  ;;  %v2605_v21 = vmul.f32 %v2601_v6, %v5333_v31  ;;  %v2612_v50 = vsub.f32 %v7264_v5, %v5324_v49 }
 0x289   :  { %v2613_v30 = vsub.f32 %v7268_v37, %v5324_v49  ;;  %v2614_v0 = vsub.f32 %v7286_v35, %v5324_v49  ;;  %v2615_v61 = vsub.f32 %v7290_v8, %v5324_v49  ;;  %v2594_v22 = vadd.f32 %v2590_v20, %v2562_v52 }
 0x28a   :  { %v2595_v1 = vadd.f32 %v2591_v40, %v2563_v29  ;;  %v2606_v58 = vmul.f32 %v2602_v56, %v5333_v31  ;;  %v2607_v44 = vmul.f32 %v2603_v41, %v5333_v31  ;;  %v2616_v7 = vmax.f32 %v2612_v50, 0.0 }
 0x28b   :  { %v2617_v10 = vmax.f32 %v2613_v30, 0.0  ;;  %v2618_v53 = vmax.f32 %v2614_v0, 0.0  ;;  %v2619_v28 = vmax.f32 %v2615_v61, 0.0  ;;  %v2608_v24 = vadd.f32 %v2604_v34, %v2576_v36 }
 0x28c   :  { %v2609_v11 = vadd.f32 %v2605_v21, %v2577_v4  ;;  %v2628_v39 = vsub.f32 %v7264_v5, %v5371_v55  ;;  %v2629_v57 = vsub.f32 %v7268_v37, %v5371_v55  ;;  %v2620_v49 = vmul.f32 %v2616_v7, %v5336_v3 }
 0x28d   :  { %v2621_v51 = vmul.f32 %v2617_v10, %v5336_v3  ;;  %v2622_v63 = vmul.f32 %v2618_v53, %v5336_v3  ;;  %v2623_v31 = vmul.f32 %v2619_v28, %v5336_v3  ;;  %v2630_v13 = vsub.f32 %v7286_v35, %v5371_v55 }
 0x28e   :  { %v2631_v15 = vsub.f32 %v7290_v8, %v5371_v55  ;;  %v2632_v33 = vmax.f32 %v2628_v39, 0.0  ;;  %v2633_v52 = vmax.f32 %v2629_v57, 0.0  ;;  %v2610_v29 = vadd.f32 %v2606_v58, %v2578_v60 }
 0x28f   :  { %v2611_v46 = vadd.f32 %v2607_v44, %v2579_v2  ;;  %v2624_v45 = vadd.f32 %v2620_v49, %v2592_v48  ;;  %v2625_v9 = vadd.f32 %v2621_v51, %v2593_v27  ;;  %v2634_v59 = vmax.f32 %v2630_v13, 0.0 }
 0x290   :  { %v2635_v19 = vmax.f32 %v2631_v15, 0.0  ;;  %v2636_v42 = vmul.f32 %v2632_v33, %v5374_v12  ;;  %v2637_v36 = vmul.f32 %v2633_v52, %v5374_v12  ;;  %v2644_v3 = vsub.f32 %v7264_v5, %v5377_v18  ;;  %v8907_v15 = vld [vmem:[#allocation18_spill] sm:$0xff] }
 0x291   :  { %v2645_v4 = vsub.f32 %v7268_v37, %v5377_v18  ;;  %v2646_v55 = vsub.f32 %v7286_v35, %v5377_v18  ;;  %v2647_v32 = vsub.f32 %v7290_v8, %v5377_v18  ;;  %v2626_v17 = vadd.f32 %v2622_v63, %v2594_v22 }
 0x292   :  { %v2627_v16 = vadd.f32 %v2623_v31, %v2595_v1  ;;  %v2638_v23 = vmul.f32 %v2634_v59, %v5374_v12  ;;  %v2639_v20 = vmul.f32 %v2635_v19, %v5374_v12  ;;  %v2648_v40 = vmax.f32 %v2644_v3, 0.0 }
 0x293   :  { %v2649_v14 = vmax.f32 %v2645_v4, 0.0  ;;  %v2650_v54 = vmax.f32 %v2646_v55, 0.0  ;;  %v2651_v25 = vmax.f32 %v2647_v32, 0.0  ;;  %v2640_v6 = vadd.f32 %v2636_v42, %v2608_v24 }
 0x294   :  { %v2641_v60 = vadd.f32 %v2637_v36, %v2609_v11  ;;  %v2660_v2 = vsub.f32 %v7264_v5, %v5415_v47  ;;  %v2661_v48 = vsub.f32 %v7268_v37, %v5415_v47  ;;  %v2652_v18 = vmul.f32 %v2648_v40, %v5380_v26  ;;  %v8910_v40 = vld [vmem:[#allocation79_spill] sm:$0xff] }
 0x295   :  { %v2653_v27 = vmul.f32 %v2649_v14, %v5380_v26  ;;  %v2654_v56 = vmul.f32 %v2650_v54, %v5380_v26  ;;  %v2655_v12 = vmul.f32 %v2651_v25, %v5380_v26  ;;  %v2662_v41 = vsub.f32 %v7286_v35, %v5415_v47 }
 0x296   :  { %v2663_v34 = vsub.f32 %v7290_v8, %v5415_v47  ;;  %v2664_v21 = vmax.f32 %v2660_v2, 0.0  ;;  %v2665_v50 = vmax.f32 %v2661_v48, 0.0  ;;  %v2642_v30 = vadd.f32 %v2638_v23, %v2610_v29  ;;  %v8908_v29 = vld [vmem:[#allocation74_spill] sm:$0xff] }
 0x297   :  { %v2643_v0 = vadd.f32 %v2639_v20, %v2611_v46  ;;  %v2656_v61 = vadd.f32 %v2652_v18, %v2624_v45  ;;  %v2657_v22 = vadd.f32 %v2653_v27, %v2625_v9  ;;  %v2666_v1 = vmax.f32 %v2662_v41, 0.0 }
 0x298   :  { %v2667_v58 = vmax.f32 %v2663_v34, 0.0  ;;  %v2668_v44 = vmul.f32 %v2664_v21, %v5418_v62  ;;  %v2669_v7 = vmul.f32 %v2665_v50, %v5418_v62  ;;  %v2676_v26 = vsub.f32 %v7264_v5, %v5421_v38  ;;  %v8911_v50 = vld [vmem:[#allocation77_spill] sm:$0xff] }
 0x299   :  { %v2677_v10 = vsub.f32 %v7268_v37, %v5421_v38  ;;  %v2678_v47 = vsub.f32 %v7286_v35, %v5421_v38  ;;  %v2679_v53 = vsub.f32 %v7290_v8, %v5421_v38  ;;  %v2658_v28 = vadd.f32 %v2654_v56, %v2626_v17 }
 0x29a   :  { %v2659_v24 = vadd.f32 %v2655_v12, %v2627_v16  ;;  %v2670_v11 = vmul.f32 %v2666_v1, %v5418_v62  ;;  %v2671_v39 = vmul.f32 %v2667_v58, %v5418_v62  ;;  %v2680_v57 = vmax.f32 %v2676_v26, 0.0  ;;  %v8909_v16 = vld [vmem:[#allocation19_spill] sm:$0xff] }
 0x29b   :  { %v2681_v49 = vmax.f32 %v2677_v10, 0.0  ;;  %v2682_v51 = vmax.f32 %v2678_v47, 0.0  ;;  %v2683_v63 = vmax.f32 %v2679_v53, 0.0  ;;  %v2672_v31 = vadd.f32 %v2668_v44, %v2640_v6 }
 0x29c   :  { %v2673_v13 = vadd.f32 %v2669_v7, %v2641_v60  ;;  %v2692_v33 = vsub.f32 %v7264_v5, %v8907_v15  ;;  %v2693_v52 = vsub.f32 %v7268_v37, %v8907_v15  ;;  %v2684_v38 = vmul.f32 %v2680_v57, %v8908_v29 }
 0x29d   :  { %v2685_v46 = vmul.f32 %v2681_v49, %v8908_v29  ;;  %v2686_v45 = vmul.f32 %v2682_v51, %v8908_v29  ;;  %v2687_v62 = vmul.f32 %v2683_v63, %v8908_v29  ;;  %v2694_v9 = vsub.f32 %v7286_v35, %v8907_v15  ;;  %v8913_v49 = vld [vmem:[#allocation17_spill] sm:$0xff] }
 0x29e   :  { %v2695_v59 = vsub.f32 %v7290_v8, %v8907_v15  ;;  %v2696_v19 = vmax.f32 %v2692_v33, 0.0  ;;  %v2697_v42 = vmax.f32 %v2693_v52, 0.0  ;;  %v2674_v36 = vadd.f32 %v2670_v11, %v2642_v30 }
 0x29f   :  { %v2675_v3 = vadd.f32 %v2671_v39, %v2643_v0  ;;  %v2688_v4 = vadd.f32 %v2684_v38, %v2656_v61  ;;  %v2689_v55 = vadd.f32 %v2685_v46, %v2657_v22  ;;  %v2698_v32 = vmax.f32 %v2694_v9, 0.0  ;;  %v8912_v61 = vld [vmem:[#allocation85_spill] sm:$0xff] }
 0x2a0   :  { %v2699_v17 = vmax.f32 %v2695_v59, 0.0  ;;  %v2700_v23 = vmul.f32 %v2696_v19, %v8909_v16  ;;  %v2701_v20 = vmul.f32 %v2697_v42, %v8909_v16  ;;  %v2708_v14 = vsub.f32 %v7264_v5, %v8910_v40 }
 0x2a1   :  { %v2709_v54 = vsub.f32 %v7268_v37, %v8910_v40  ;;  %v2710_v25 = vsub.f32 %v7286_v35, %v8910_v40  ;;  %v2711_v6 = vsub.f32 %v7290_v8, %v8910_v40  ;;  %v2690_v60 = vadd.f32 %v2686_v45, %v2658_v28 }
 0x2a2   :  { %v2691_v2 = vadd.f32 %v2687_v62, %v2659_v24  ;;  %v2702_v48 = vmul.f32 %v2698_v32, %v8909_v16  ;;  %v2703_v18 = vmul.f32 %v2699_v17, %v8909_v16  ;;  %v2712_v27 = vmax.f32 %v2708_v14, 0.0  ;;  %v8916_v32 = vld [vmem:[#allocation22_spill] sm:$0xff] }
 0x2a3   :  { %v2713_v56 = vmax.f32 %v2709_v54, 0.0  ;;  %v2714_v12 = vmax.f32 %v2710_v25, 0.0  ;;  %v2715_v41 = vmax.f32 %v2711_v6, 0.0  ;;  %v2704_v34 = vadd.f32 %v2700_v23, %v2672_v31  ;;  %v8914_v31 = vld [vmem:[#allocation78_spill] sm:$0xff] }
 0x2a4   :  { %v2705_v21 = vadd.f32 %v2701_v20, %v2673_v13  ;;  %v2724_v30 = vsub.f32 %v7264_v5, %v8911_v50  ;;  %v2725_v0 = vsub.f32 %v7268_v37, %v8911_v50  ;;  %v2716_v22 = vmul.f32 %v2712_v27, %v8912_v61 }
 0x2a5   :  { %v2717_v1 = vmul.f32 %v2713_v56, %v8912_v61  ;;  %v2718_v58 = vmul.f32 %v2714_v12, %v8912_v61  ;;  %v2719_v44 = vmul.f32 %v2715_v41, %v8912_v61  ;;  %v2726_v7 = vsub.f32 %v7286_v35, %v8911_v50  ;;  %v8917_v56 = vld [vmem:[#allocation83_spill] sm:$0xff] }
 0x2a6   :  { %v2727_v26 = vsub.f32 %v7290_v8, %v8911_v50  ;;  %v2728_v10 = vmax.f32 %v2724_v30, 0.0  ;;  %v2729_v47 = vmax.f32 %v2725_v0, 0.0  ;;  %v2706_v53 = vadd.f32 %v2702_v48, %v2674_v36 }
 0x2a7   :  { %v2707_v28 = vadd.f32 %v2703_v18, %v2675_v3  ;;  %v2720_v24 = vadd.f32 %v2716_v22, %v2688_v4  ;;  %v2721_v11 = vadd.f32 %v2717_v1, %v2689_v55  ;;  %v2730_v39 = vmax.f32 %v2726_v7, 0.0  ;;  %v8915_v3 = vld [vmem:[#allocation23_spill] sm:$0xff] }
 0x2a8   :  { %v2731_v57 = vmax.f32 %v2727_v26, 0.0  ;;  %v2732_v51 = vmul.f32 %v2728_v10, %v8913_v49  ;;  %v2733_v63 = vmul.f32 %v2729_v47, %v8913_v49  ;;  %v2740_v13 = vsub.f32 %v7264_v5, %v8914_v31 }
 0x2a9   :  { %v2741_v15 = vsub.f32 %v7268_v37, %v8914_v31  ;;  %v2742_v33 = vsub.f32 %v7286_v35, %v8914_v31  ;;  %v2743_v52 = vsub.f32 %v7290_v8, %v8914_v31  ;;  %v2722_v29 = vadd.f32 %v2718_v58, %v2690_v60 }
 0x2aa   :  { %v2723_v38 = vadd.f32 %v2719_v44, %v2691_v2  ;;  %v2734_v46 = vmul.f32 %v2730_v39, %v8913_v49  ;;  %v2735_v45 = vmul.f32 %v2731_v57, %v8913_v49  ;;  %v2744_v62 = vmax.f32 %v2740_v13, 0.0  ;;  %v8920_v39 = vld [vmem:[#allocation37_spill] sm:$0xff] }
 0x2ab   :  { %v2745_v9 = vmax.f32 %v2741_v15, 0.0  ;;  %v2746_v59 = vmax.f32 %v2742_v33, 0.0  ;;  %v2747_v19 = vmax.f32 %v2743_v52, 0.0  ;;  %v2736_v42 = vadd.f32 %v2732_v51, %v2704_v34  ;;  %v8918_v34 = vld [vmem:[#allocation84_spill] sm:$0xff] }
 0x2ac   :  { %v2737_v36 = vadd.f32 %v2733_v63, %v2705_v21  ;;  %v2756_v4 = vsub.f32 %v7264_v5, %v8915_v3  ;;  %v2757_v55 = vsub.f32 %v7268_v37, %v8915_v3  ;;  %v2748_v17 = vmul.f32 %v2744_v62, %v8916_v32 }
 0x2ad   :  { %v2749_v16 = vmul.f32 %v2745_v9, %v8916_v32  ;;  %v2750_v23 = vmul.f32 %v2746_v59, %v8916_v32  ;;  %v2751_v20 = vmul.f32 %v2747_v19, %v8916_v32  ;;  %v2758_v40 = vsub.f32 %v7286_v35, %v8915_v3  ;;  %v8921_v9 = vld [vmem:[#allocation42_spill] sm:$0xff] }
 0x2ae   :  { %v2759_v14 = vsub.f32 %v7290_v8, %v8915_v3  ;;  %v2760_v54 = vmax.f32 %v2756_v4, 0.0  ;;  %v2761_v25 = vmax.f32 %v2757_v55, 0.0  ;;  %v2738_v6 = vadd.f32 %v2734_v46, %v2706_v53 }
 0x2af   :  { %v2739_v60 = vadd.f32 %v2735_v45, %v2707_v28  ;;  %v2752_v2 = vadd.f32 %v2748_v17, %v2720_v24  ;;  %v2753_v48 = vadd.f32 %v2749_v16, %v2721_v11  ;;  %v2762_v18 = vmax.f32 %v2758_v40, 0.0  ;;  %v8919_v28 = vld [vmem:[#allocation41_spill] sm:$0xff] }
 0x2b0   :  { %v2763_v27 = vmax.f32 %v2759_v14, 0.0  ;;  %v2764_v12 = vmul.f32 %v2760_v54, %v8917_v56  ;;  %v2765_v41 = vmul.f32 %v2761_v25, %v8917_v56  ;;  %v2772_v21 = vsub.f32 %v7264_v5, %v8918_v34 }
 0x2b1   :  { %v2773_v50 = vsub.f32 %v7268_v37, %v8918_v34  ;;  %v2774_v30 = vsub.f32 %v7286_v35, %v8918_v34  ;;  %v2775_v0 = vsub.f32 %v7290_v8, %v8918_v34  ;;  %v2754_v61 = vadd.f32 %v2750_v23, %v2722_v29 }
 0x2b2   :  { %v2755_v22 = vadd.f32 %v2751_v20, %v2723_v38  ;;  %v2766_v1 = vmul.f32 %v2762_v18, %v8917_v56  ;;  %v2767_v58 = vmul.f32 %v2763_v27, %v8917_v56  ;;  %v2776_v44 = vmax.f32 %v2772_v21, 0.0  ;;  %v8924_v18 = vld [vmem:[#allocation44_spill] sm:$0xff] }
 0x2b3   :  { %v2777_v7 = vmax.f32 %v2773_v50, 0.0  ;;  %v2778_v26 = vmax.f32 %v2774_v30, 0.0  ;;  %v2779_v10 = vmax.f32 %v2775_v0, 0.0  ;;  %v2768_v47 = vadd.f32 %v2764_v12, %v2736_v42  ;;  %v8922_v42 = vld [vmem:[#allocation49_spill] sm:$0xff] }
 0x2b4   :  { %v2769_v53 = vadd.f32 %v2765_v41, %v2737_v36  ;;  %v2788_v24 = vsub.f32 %v7264_v5, %v8919_v28  ;;  %v2789_v11 = vsub.f32 %v7268_v37, %v8919_v28  ;;  %v2780_v57 = vmul.f32 %v2776_v44, %v8920_v39 }
 0x2b5   :  { %v2781_v49 = vmul.f32 %v2777_v7, %v8920_v39  ;;  %v2782_v51 = vmul.f32 %v2778_v26, %v8920_v39  ;;  %v2783_v63 = vmul.f32 %v2779_v10, %v8920_v39  ;;  %v2790_v31 = vsub.f32 %v7286_v35, %v8919_v28  ;;  %v8925_v7 = vld [vmem:[#allocation52_spill] sm:$0xff] }
 0x2b6   :  { %v2791_v13 = vsub.f32 %v7290_v8, %v8919_v28  ;;  %v2792_v15 = vmax.f32 %v2788_v24, 0.0  ;;  %v2793_v33 = vmax.f32 %v2789_v11, 0.0  ;;  %v2770_v52 = vadd.f32 %v2766_v1, %v2738_v6 }
 0x2b7   :  { %v2771_v29 = vadd.f32 %v2767_v58, %v2739_v60  ;;  %v2784_v38 = vadd.f32 %v2780_v57, %v2752_v2  ;;  %v2785_v46 = vadd.f32 %v2781_v49, %v2753_v48  ;;  %v2794_v45 = vmax.f32 %v2790_v31, 0.0  ;;  %v8923_v60 = vld [vmem:[#allocation51_spill] sm:$0xff] }
 0x2b8   :  { %v2795_v62 = vmax.f32 %v2791_v13, 0.0  ;;  %v2796_v59 = vmul.f32 %v2792_v15, %v8921_v9  ;;  %v2797_v19 = vmul.f32 %v2793_v33, %v8921_v9  ;;  %v2804_v36 = vsub.f32 %v7264_v5, %v8922_v42 }
 0x2b9   :  { %v2805_v3 = vsub.f32 %v7268_v37, %v8922_v42  ;;  %v2806_v4 = vsub.f32 %v7286_v35, %v8922_v42  ;;  %v2807_v55 = vsub.f32 %v7290_v8, %v8922_v42  ;;  %v2786_v32 = vadd.f32 %v2782_v51, %v2754_v61 }
 0x2ba   :  { %v2787_v17 = vadd.f32 %v2783_v63, %v2755_v22  ;;  %v2798_v16 = vmul.f32 %v2794_v45, %v8921_v9  ;;  %v2799_v23 = vmul.f32 %v2795_v62, %v8921_v9  ;;  %v2808_v20 = vmax.f32 %v2804_v36, 0.0  ;;  %v8928_v45 = vld [vmem:[#allocation59_spill] sm:$0xff] }
 0x2bb   :  { %v2809_v40 = vmax.f32 %v2805_v3, 0.0  ;;  %v2810_v14 = vmax.f32 %v2806_v4, 0.0  ;;  %v2811_v54 = vmax.f32 %v2807_v55, 0.0  ;;  %v2800_v25 = vadd.f32 %v2796_v59, %v2768_v47  ;;  %v8926_v47 = vld [vmem:[#allocation57_spill] sm:$0xff] }
 0x2bc   :  { %v2801_v6 = vadd.f32 %v2797_v19, %v2769_v53  ;;  %v2820_v2 = vsub.f32 %v7264_v5, %v8923_v60  ;;  %v2821_v48 = vsub.f32 %v7268_v37, %v8923_v60  ;;  %v2812_v27 = vmul.f32 %v2808_v20, %v8924_v18 }
 0x2bd   :  { %v2813_v56 = vmul.f32 %v2809_v40, %v8924_v18  ;;  %v2814_v12 = vmul.f32 %v2810_v14, %v8924_v18  ;;  %v2815_v41 = vmul.f32 %v2811_v54, %v8924_v18  ;;  %v2822_v34 = vsub.f32 %v7286_v35, %v8923_v60  ;;  %v8929_v40 = vld [vmem:[#allocation56_spill] sm:$0xff] }
 0x2be   :  { %v2823_v21 = vsub.f32 %v7290_v8, %v8923_v60  ;;  %v2824_v50 = vmax.f32 %v2820_v2, 0.0  ;;  %v2825_v30 = vmax.f32 %v2821_v48, 0.0  ;;  %v2802_v0 = vadd.f32 %v2798_v16, %v2770_v52 }
 0x2bf   :  { %v2803_v61 = vadd.f32 %v2799_v23, %v2771_v29  ;;  %v2816_v22 = vadd.f32 %v2812_v27, %v2784_v38  ;;  %v2817_v1 = vadd.f32 %v2813_v56, %v2785_v46  ;;  %v2826_v58 = vmax.f32 %v2822_v34, 0.0  ;;  %v8927_v29 = vld [vmem:[#allocation60_spill] sm:$0xff] }
 0x2c0   :  { %v2827_v44 = vmax.f32 %v2823_v21, 0.0  ;;  %v2828_v26 = vmul.f32 %v2824_v50, %v8925_v7  ;;  %v2829_v10 = vmul.f32 %v2825_v30, %v8925_v7  ;;  %v2836_v53 = vsub.f32 %v7264_v5, %v8926_v47 }
 0x2c1   :  { %v2837_v28 = vsub.f32 %v7268_v37, %v8926_v47  ;;  %v2838_v24 = vsub.f32 %v7286_v35, %v8926_v47  ;;  %v2839_v11 = vsub.f32 %v7290_v8, %v8926_v47  ;;  %v2818_v39 = vadd.f32 %v2814_v12, %v2786_v32 }
 0x2c2   :  { %v2819_v57 = vadd.f32 %v2815_v41, %v2787_v17  ;;  %v2830_v49 = vmul.f32 %v2826_v58, %v8925_v7  ;;  %v2831_v51 = vmul.f32 %v2827_v44, %v8925_v7  ;;  %v2840_v63 = vmax.f32 %v2836_v53, 0.0  ;;  %v8932_v58 = vld [vmem:[#allocation67_spill] sm:$0xff] }
 0x2c3   :  { %v2841_v31 = vmax.f32 %v2837_v28, 0.0  ;;  %v2842_v13 = vmax.f32 %v2838_v24, 0.0  ;;  %v2843_v15 = vmax.f32 %v2839_v11, 0.0  ;;  %v2832_v33 = vadd.f32 %v2828_v26, %v2800_v25  ;;  %v8930_v25 = vld [vmem:[#allocation61_spill] sm:$0xff] }
 0x2c4   :  { %v2833_v52 = vadd.f32 %v2829_v10, %v2801_v6  ;;  %v2852_v38 = vsub.f32 %v7264_v5, %v8927_v29  ;;  %v2853_v46 = vsub.f32 %v7268_v37, %v8927_v29  ;;  %v2844_v62 = vmul.f32 %v2840_v63, %v8928_v45 }
 0x2c5   :  { %v2845_v9 = vmul.f32 %v2841_v31, %v8928_v45  ;;  %v2846_v59 = vmul.f32 %v2842_v13, %v8928_v45  ;;  %v2847_v19 = vmul.f32 %v2843_v15, %v8928_v45  ;;  %v2854_v42 = vsub.f32 %v7286_v35, %v8927_v29  ;;  %v8933_v31 = vld [vmem:[#allocation69_spill] sm:$0xff] }
 0x2c6   :  { %v2855_v36 = vsub.f32 %v7290_v8, %v8927_v29  ;;  %v2856_v3 = vmax.f32 %v2852_v38, 0.0  ;;  %v2857_v4 = vmax.f32 %v2853_v46, 0.0  ;;  %v2834_v55 = vadd.f32 %v2830_v49, %v2802_v0 }
 0x2c7   :  { %v2835_v32 = vadd.f32 %v2831_v51, %v2803_v61  ;;  %v2848_v17 = vadd.f32 %v2844_v62, %v2816_v22  ;;  %v2849_v16 = vadd.f32 %v2845_v9, %v2817_v1  ;;  %v2858_v23 = vmax.f32 %v2854_v42, 0.0  ;;  %v8931_v61 = vld [vmem:[#allocation68_spill] sm:$0xff] }
 0x2c8   :  { %v2859_v20 = vmax.f32 %v2855_v36, 0.0  ;;  %v2860_v14 = vmul.f32 %v2856_v3, %v8929_v40  ;;  %v2861_v54 = vmul.f32 %v2857_v4, %v8929_v40  ;;  %v2868_v6 = vsub.f32 %v7264_v5, %v8930_v25 }
 0x2c9   :  { %v2869_v60 = vsub.f32 %v7268_v37, %v8930_v25  ;;  %v2870_v2 = vsub.f32 %v7286_v35, %v8930_v25  ;;  %v2871_v48 = vsub.f32 %v7290_v8, %v8930_v25  ;;  %v2850_v18 = vadd.f32 %v2846_v59, %v2818_v39 }
 0x2ca   :  { %v2851_v27 = vadd.f32 %v2847_v19, %v2819_v57  ;;  %v2862_v56 = vmul.f32 %v2858_v23, %v8929_v40  ;;  %v2863_v12 = vmul.f32 %v2859_v20, %v8929_v40  ;;  %v2872_v41 = vmax.f32 %v2868_v6, 0.0  ;;  %v8936_v23 = vld [vmem:[#allocation75_spill] sm:$0xff] }
 0x2cb   :  { %v2873_v34 = vmax.f32 %v2869_v60, 0.0  ;;  %v2874_v21 = vmax.f32 %v2870_v2, 0.0  ;;  %v2875_v50 = vmax.f32 %v2871_v48, 0.0  ;;  %v2864_v30 = vadd.f32 %v2860_v14, %v2832_v33  ;;  %v8934_v33 = vld [vmem:[#allocation70_spill] sm:$0xff] }
 0x2cc   :  { %v2865_v0 = vadd.f32 %v2861_v54, %v2833_v52  ;;  %v2884_v22 = vsub.f32 %v7264_v5, %v8931_v61  ;;  %v2885_v1 = vsub.f32 %v7268_v37, %v8931_v61  ;;  %v2876_v44 = vmul.f32 %v2872_v41, %v8932_v58 }
 0x2cd   :  { %v2877_v7 = vmul.f32 %v2873_v34, %v8932_v58  ;;  %v2878_v26 = vmul.f32 %v2874_v21, %v8932_v58  ;;  %v2879_v10 = vmul.f32 %v2875_v50, %v8932_v58  ;;  %v2886_v47 = vsub.f32 %v7286_v35, %v8931_v61  ;;  %v8937_v34 = vld [vmem:[#allocation99_spill] sm:$0xff] }
 0x2ce   :  { %v2887_v53 = vsub.f32 %v7290_v8, %v8931_v61  ;;  %v2888_v28 = vmax.f32 %v2884_v22, 0.0  ;;  %v2889_v24 = vmax.f32 %v2885_v1, 0.0  ;;  %v2866_v11 = vadd.f32 %v2862_v56, %v2834_v55 }
 0x2cf   :  { %v2867_v39 = vadd.f32 %v2863_v12, %v2835_v32  ;;  %v2880_v57 = vadd.f32 %v2876_v44, %v2848_v17  ;;  %v2881_v49 = vadd.f32 %v2877_v7, %v2849_v16  ;;  %v2890_v51 = vmax.f32 %v2886_v47, 0.0  ;;  %v8935_v32 = vld [vmem:[#allocation98_spill] sm:$0xff] }
 0x2d0   :  { %v2891_v63 = vmax.f32 %v2887_v53, 0.0  ;;  %v2892_v13 = vmul.f32 %v2888_v28, %v8933_v31  ;;  %v2893_v15 = vmul.f32 %v2889_v24, %v8933_v31  ;;  %v2900_v52 = vsub.f32 %v7264_v5, %v8934_v33 }
 0x2d1   :  { %v2901_v29 = vsub.f32 %v7268_v37, %v8934_v33  ;;  %v2902_v38 = vsub.f32 %v7286_v35, %v8934_v33  ;;  %v2903_v46 = vsub.f32 %v7290_v8, %v8934_v33  ;;  %v2882_v45 = vadd.f32 %v2878_v26, %v2850_v18 }
 0x2d2   :  { %v2883_v62 = vadd.f32 %v2879_v10, %v2851_v27  ;;  %v2894_v9 = vmul.f32 %v2890_v51, %v8933_v31  ;;  %v2895_v59 = vmul.f32 %v2891_v63, %v8933_v31  ;;  %v2904_v19 = vmax.f32 %v2900_v52, 0.0  ;;  %v8940_v51 = vld [vmem:[#allocation101_spill] sm:$0xff] }
 0x2d3   :  { %v2905_v42 = vmax.f32 %v2901_v29, 0.0  ;;  %v2906_v36 = vmax.f32 %v2902_v38, 0.0  ;;  %v2907_v3 = vmax.f32 %v2903_v46, 0.0  ;;  %v2896_v4 = vadd.f32 %v2892_v13, %v2864_v30  ;;  %v8938_v30 = vld [vmem:[#allocation100_spill] sm:$0xff] }
 0x2d4   :  { %v2897_v55 = vadd.f32 %v2893_v15, %v2865_v0  ;;  %v2916_v17 = vsub.f32 %v7264_v5, %v8935_v32  ;;  %v2917_v16 = vsub.f32 %v7268_v37, %v8935_v32  ;;  %v2908_v20 = vmul.f32 %v2904_v19, %v8936_v23 }
 0x2d5   :  { %v2909_v40 = vmul.f32 %v2905_v42, %v8936_v23  ;;  %v2910_v14 = vmul.f32 %v2906_v36, %v8936_v23  ;;  %v2911_v54 = vmul.f32 %v2907_v3, %v8936_v23  ;;  %v2918_v25 = vsub.f32 %v7286_v35, %v8935_v32  ;;  %v8941_v42 = vld [vmem:[#allocation103_spill] sm:$0xff] }
 0x2d6   :  { %v2919_v6 = vsub.f32 %v7290_v8, %v8935_v32  ;;  %v2920_v60 = vmax.f32 %v2916_v17, 0.0  ;;  %v2921_v2 = vmax.f32 %v2917_v16, 0.0  ;;  %v2898_v48 = vadd.f32 %v2894_v9, %v2866_v11 }
 0x2d7   :  { %v2899_v18 = vadd.f32 %v2895_v59, %v2867_v39  ;;  %v2912_v27 = vadd.f32 %v2908_v20, %v2880_v57  ;;  %v2913_v56 = vadd.f32 %v2909_v40, %v2881_v49  ;;  %v2922_v12 = vmax.f32 %v2918_v25, 0.0  ;;  %v8939_v39 = vld [vmem:[#allocation102_spill] sm:$0xff] }
 0x2d8   :  { %v2923_v41 = vmax.f32 %v2919_v6, 0.0  ;;  %v2924_v21 = vmul.f32 %v2920_v60, %v8937_v34  ;;  %v2925_v50 = vmul.f32 %v2921_v2, %v8937_v34  ;;  %v2932_v0 = vsub.f32 %v7264_v5, %v8938_v30 }
 0x2d9   :  { %v2933_v61 = vsub.f32 %v7268_v37, %v8938_v30  ;;  %v2934_v22 = vsub.f32 %v7286_v35, %v8938_v30  ;;  %v2935_v1 = vsub.f32 %v7290_v8, %v8938_v30  ;;  %v2914_v58 = vadd.f32 %v2910_v14, %v2882_v45 }
 0x2da   :  { %v2915_v44 = vadd.f32 %v2911_v54, %v2883_v62  ;;  %v2926_v7 = vmul.f32 %v2922_v12, %v8937_v34  ;;  %v2927_v26 = vmul.f32 %v2923_v41, %v8937_v34  ;;  %v2936_v10 = vmax.f32 %v2932_v0, 0.0  ;;  %v8944_v12 = vld [vmem:[#allocation105_spill] sm:$0xff] }
 0x2db   :  { %v2937_v47 = vmax.f32 %v2933_v61, 0.0  ;;  %v2938_v53 = vmax.f32 %v2934_v22, 0.0  ;;  %v2939_v28 = vmax.f32 %v2935_v1, 0.0  ;;  %v2928_v24 = vadd.f32 %v2924_v21, %v2896_v4  ;;  %v8942_v4 = vld [vmem:[#allocation104_spill] sm:$0xff] }
 0x2dc   :  { %v2929_v11 = vadd.f32 %v2925_v50, %v2897_v55  ;;  %v2948_v57 = vsub.f32 %v7264_v5, %v8939_v39  ;;  %v2949_v49 = vsub.f32 %v7268_v37, %v8939_v39  ;;  %v2940_v63 = vmul.f32 %v2936_v10, %v8940_v51 }
 0x2dd   :  { %v2941_v31 = vmul.f32 %v2937_v47, %v8940_v51  ;;  %v2942_v13 = vmul.f32 %v2938_v53, %v8940_v51  ;;  %v2943_v15 = vmul.f32 %v2939_v28, %v8940_v51  ;;  %v2950_v33 = vsub.f32 %v7286_v35, %v8939_v39  ;;  %v8945_v47 = vld [vmem:[#allocation107_spill] sm:$0xff] }
 0x2de   :  { %v2951_v52 = vsub.f32 %v7290_v8, %v8939_v39  ;;  %v2952_v29 = vmax.f32 %v2948_v57, 0.0  ;;  %v2953_v38 = vmax.f32 %v2949_v49, 0.0  ;;  %v2930_v46 = vadd.f32 %v2926_v7, %v2898_v48 }
 0x2df   :  { %v2931_v45 = vadd.f32 %v2927_v26, %v2899_v18  ;;  %v2944_v62 = vadd.f32 %v2940_v63, %v2912_v27  ;;  %v2945_v9 = vadd.f32 %v2941_v31, %v2913_v56  ;;  %v2954_v59 = vmax.f32 %v2950_v33, 0.0  ;;  %v8943_v18 = vld [vmem:[#allocation106_spill] sm:$0xff] }
 0x2e0   :  { %v2955_v19 = vmax.f32 %v2951_v52, 0.0  ;;  %v2956_v36 = vmul.f32 %v2952_v29, %v8941_v42  ;;  %v2957_v3 = vmul.f32 %v2953_v38, %v8941_v42  ;;  %v2964_v55 = vsub.f32 %v7264_v5, %v8942_v4 }
 0x2e1   :  { %v2965_v32 = vsub.f32 %v7268_v37, %v8942_v4  ;;  %v2966_v17 = vsub.f32 %v7286_v35, %v8942_v4  ;;  %v2967_v16 = vsub.f32 %v7290_v8, %v8942_v4  ;;  %v2946_v23 = vadd.f32 %v2942_v13, %v2914_v58 }
 0x2e2   :  { %v2947_v20 = vadd.f32 %v2943_v15, %v2915_v44  ;;  %v2958_v40 = vmul.f32 %v2954_v59, %v8941_v42  ;;  %v2959_v14 = vmul.f32 %v2955_v19, %v8941_v42  ;;  %v2968_v54 = vmax.f32 %v2964_v55, 0.0  ;;  %v8948_v59 = vld [vmem:[#allocation109_spill] sm:$0xff] }
 0x2e3   :  { %v2969_v25 = vmax.f32 %v2965_v32, 0.0  ;;  %v2970_v6 = vmax.f32 %v2966_v17, 0.0  ;;  %v2971_v60 = vmax.f32 %v2967_v16, 0.0  ;;  %v2960_v2 = vadd.f32 %v2956_v36, %v2928_v24  ;;  %v8946_v24 = vld [vmem:[#allocation108_spill] sm:$0xff] }
 0x2e4   :  { %v2961_v48 = vadd.f32 %v2957_v3, %v2929_v11  ;;  %v2980_v27 = vsub.f32 %v7264_v5, %v8943_v18  ;;  %v2981_v56 = vsub.f32 %v7268_v37, %v8943_v18  ;;  %v2972_v41 = vmul.f32 %v2968_v54, %v8944_v12 }
 0x2e5   :  { %v2973_v34 = vmul.f32 %v2969_v25, %v8944_v12  ;;  %v2974_v21 = vmul.f32 %v2970_v6, %v8944_v12  ;;  %v2975_v50 = vmul.f32 %v2971_v60, %v8944_v12  ;;  %v2982_v30 = vsub.f32 %v7286_v35, %v8943_v18  ;;  %v8949_v25 = vld [vmem:[#allocation111_spill] sm:$0xff] }
 0x2e6   :  { %v2983_v0 = vsub.f32 %v7290_v8, %v8943_v18  ;;  %v2984_v61 = vmax.f32 %v2980_v27, 0.0  ;;  %v2985_v22 = vmax.f32 %v2981_v56, 0.0  ;;  %v2962_v1 = vadd.f32 %v2958_v40, %v2930_v46 }
 0x2e7   :  { %v2963_v58 = vadd.f32 %v2959_v14, %v2931_v45  ;;  %v2976_v44 = vadd.f32 %v2972_v41, %v2944_v62  ;;  %v2977_v7 = vadd.f32 %v2973_v34, %v2945_v9  ;;  %v2986_v26 = vmax.f32 %v2982_v30, 0.0  ;;  %v8947_v45 = vld [vmem:[#allocation110_spill] sm:$0xff] }
 0x2e8   :  { %v2987_v10 = vmax.f32 %v2983_v0, 0.0  ;;  %v2988_v53 = vmul.f32 %v2984_v61, %v8945_v47  ;;  %v2989_v28 = vmul.f32 %v2985_v22, %v8945_v47  ;;  %v2996_v11 = vsub.f32 %v7264_v5, %v8946_v24 }
 0x2e9   :  { %v2997_v39 = vsub.f32 %v7268_v37, %v8946_v24  ;;  %v2998_v57 = vsub.f32 %v7286_v35, %v8946_v24  ;;  %v2999_v49 = vsub.f32 %v7290_v8, %v8946_v24  ;;  %v2978_v51 = vadd.f32 %v2974_v21, %v2946_v23 }
 0x2ea   :  { %v2979_v63 = vadd.f32 %v2975_v50, %v2947_v20  ;;  %v2990_v31 = vmul.f32 %v2986_v26, %v8945_v47  ;;  %v2991_v13 = vmul.f32 %v2987_v10, %v8945_v47  ;;  %v3000_v15 = vmax.f32 %v2996_v11, 0.0  ;;  %v8952_v26 = vld [vmem:[#allocation113_spill] sm:$0xff] }
 0x2eb   :  { %v3001_v33 = vmax.f32 %v2997_v39, 0.0  ;;  %v3002_v52 = vmax.f32 %v2998_v57, 0.0  ;;  %v3003_v29 = vmax.f32 %v2999_v49, 0.0  ;;  %v2992_v38 = vadd.f32 %v2988_v53, %v2960_v2  ;;  %v8950_v2 = vld [vmem:[#allocation112_spill] sm:$0xff] }
 0x2ec   :  { %v2993_v46 = vadd.f32 %v2989_v28, %v2961_v48  ;;  %v3012_v62 = vsub.f32 %v7264_v5, %v8947_v45  ;;  %v3013_v9 = vsub.f32 %v7268_v37, %v8947_v45  ;;  %v3004_v19 = vmul.f32 %v3000_v15, %v8948_v59 }
 0x2ed   :  { %v3005_v42 = vmul.f32 %v3001_v33, %v8948_v59  ;;  %v3006_v36 = vmul.f32 %v3002_v52, %v8948_v59  ;;  %v3007_v3 = vmul.f32 %v3003_v29, %v8948_v59  ;;  %v3014_v4 = vsub.f32 %v7286_v35, %v8947_v45  ;;  %v8953_v33 = vld [vmem:[#allocation115_spill] sm:$0xff] }
 0x2ee   :  { %v3015_v55 = vsub.f32 %v7290_v8, %v8947_v45  ;;  %v3016_v32 = vmax.f32 %v3012_v62, 0.0  ;;  %v3017_v17 = vmax.f32 %v3013_v9, 0.0  ;;  %v2994_v16 = vadd.f32 %v2990_v31, %v2962_v1 }
 0x2ef   :  { %v2995_v23 = vadd.f32 %v2991_v13, %v2963_v58  ;;  %v3008_v20 = vadd.f32 %v3004_v19, %v2976_v44  ;;  %v3009_v40 = vadd.f32 %v3005_v42, %v2977_v7  ;;  %v3018_v14 = vmax.f32 %v3014_v4, 0.0  ;;  %v8951_v58 = vld [vmem:[#allocation114_spill] sm:$0xff] }
 0x2f0   :  { %v3019_v54 = vmax.f32 %v3015_v55, 0.0  ;;  %v3020_v6 = vmul.f32 %v3016_v32, %v8949_v25  ;;  %v3021_v60 = vmul.f32 %v3017_v17, %v8949_v25  ;;  %v3028_v48 = vsub.f32 %v7264_v5, %v8950_v2 }
 0x2f1   :  { %v3029_v18 = vsub.f32 %v7268_v37, %v8950_v2  ;;  %v3030_v27 = vsub.f32 %v7286_v35, %v8950_v2  ;;  %v3031_v56 = vsub.f32 %v7290_v8, %v8950_v2  ;;  %v3010_v12 = vadd.f32 %v3006_v36, %v2978_v51 }
 0x2f2   :  { %v3011_v41 = vadd.f32 %v3007_v3, %v2979_v63  ;;  %v3022_v34 = vmul.f32 %v3018_v14, %v8949_v25  ;;  %v3023_v21 = vmul.f32 %v3019_v54, %v8949_v25  ;;  %v3032_v50 = vmax.f32 %v3028_v48, 0.0  ;;  %v8956_v14 = vld [vmem:[#allocation117_spill] sm:$0xff] }
 0x2f3   :  { %v3033_v30 = vmax.f32 %v3029_v18, 0.0  ;;  %v3034_v0 = vmax.f32 %v3030_v27, 0.0  ;;  %v3035_v61 = vmax.f32 %v3031_v56, 0.0  ;;  %v3024_v22 = vadd.f32 %v3020_v6, %v2992_v38  ;;  %v8954_v38 = vld [vmem:[#allocation116_spill] sm:$0xff] }
 0x2f4   :  { %v3025_v1 = vadd.f32 %v3021_v60, %v2993_v46  ;;  %v3044_v44 = vsub.f32 %v7264_v5, %v8951_v58  ;;  %v3045_v7 = vsub.f32 %v7268_v37, %v8951_v58  ;;  %v3036_v10 = vmul.f32 %v3032_v50, %v8952_v26 }
 0x2f5   :  { %v3037_v47 = vmul.f32 %v3033_v30, %v8952_v26  ;;  %v3038_v53 = vmul.f32 %v3034_v0, %v8952_v26  ;;  %v3039_v28 = vmul.f32 %v3035_v61, %v8952_v26  ;;  %v3046_v24 = vsub.f32 %v7286_v35, %v8951_v58  ;;  %v8957_v30 = vld [vmem:[#allocation119_spill] sm:$0xff] }
 0x2f6   :  { %v3047_v11 = vsub.f32 %v7290_v8, %v8951_v58  ;;  %v3048_v39 = vmax.f32 %v3044_v44, 0.0  ;;  %v3049_v57 = vmax.f32 %v3045_v7, 0.0  ;;  %v3026_v49 = vadd.f32 %v3022_v34, %v2994_v16 }
 0x2f7   :  { %v3027_v51 = vadd.f32 %v3023_v21, %v2995_v23  ;;  %v3040_v63 = vadd.f32 %v3036_v10, %v3008_v20  ;;  %v3041_v31 = vadd.f32 %v3037_v47, %v3009_v40  ;;  %v3050_v13 = vmax.f32 %v3046_v24, 0.0  ;;  %v8955_v23 = vld [vmem:[#allocation118_spill] sm:$0xff] }
 0x2f8   :  { %v3051_v15 = vmax.f32 %v3047_v11, 0.0  ;;  %v3052_v52 = vmul.f32 %v3048_v39, %v8953_v33  ;;  %v3053_v29 = vmul.f32 %v3049_v57, %v8953_v33  ;;  %v3060_v46 = vsub.f32 %v7264_v5, %v8954_v38 }
 0x2f9   :  { %v3061_v45 = vsub.f32 %v7268_v37, %v8954_v38  ;;  %v3062_v62 = vsub.f32 %v7286_v35, %v8954_v38  ;;  %v3063_v9 = vsub.f32 %v7290_v8, %v8954_v38  ;;  %v3042_v59 = vadd.f32 %v3038_v53, %v3010_v12 }
 0x2fa   :  { %v3043_v19 = vadd.f32 %v3039_v28, %v3011_v41  ;;  %v3054_v42 = vmul.f32 %v3050_v13, %v8953_v33  ;;  %v3055_v36 = vmul.f32 %v3051_v15, %v8953_v33  ;;  %v3064_v3 = vmax.f32 %v3060_v46, 0.0  ;;  %v8960_v13 = vld [vmem:[#allocation121_spill] sm:$0xff] }
 0x2fb   :  { %v3065_v4 = vmax.f32 %v3061_v45, 0.0  ;;  %v3066_v55 = vmax.f32 %v3062_v62, 0.0  ;;  %v3067_v32 = vmax.f32 %v3063_v9, 0.0  ;;  %v3056_v17 = vadd.f32 %v3052_v52, %v3024_v22  ;;  %v8958_v22 = vld [vmem:[#allocation120_spill] sm:$0xff] }
 0x2fc   :  { %v3057_v16 = vadd.f32 %v3053_v29, %v3025_v1  ;;  %v3076_v20 = vsub.f32 %v7264_v5, %v8955_v23  ;;  %v3077_v40 = vsub.f32 %v7268_v37, %v8955_v23  ;;  %v3068_v54 = vmul.f32 %v3064_v3, %v8956_v14 }
 0x2fd   :  { %v3069_v25 = vmul.f32 %v3065_v4, %v8956_v14  ;;  %v3070_v6 = vmul.f32 %v3066_v55, %v8956_v14  ;;  %v3071_v60 = vmul.f32 %v3067_v32, %v8956_v14  ;;  %v3078_v2 = vsub.f32 %v7286_v35, %v8955_v23  ;;  %v8961_v4 = vld [vmem:[#allocation123_spill] sm:$0xff] }
 0x2fe   :  { %v3079_v48 = vsub.f32 %v7290_v8, %v8955_v23  ;;  %v3080_v18 = vmax.f32 %v3076_v20, 0.0  ;;  %v3081_v27 = vmax.f32 %v3077_v40, 0.0  ;;  %v3058_v56 = vadd.f32 %v3054_v42, %v3026_v49  ;;  %v7656_v49 = vld [vmem:[#allocation7] sm:$0xff]  ;;  %v7678_v23 = vld [vmem:[#allocation7 + $0x10] sm:$0xff]  ;;  %v7682_v20 = vld [vmem:[#allocation7 + $0x18] sm:$0xff] }
 0x2ff   :  { %v3059_v12 = vadd.f32 %v3055_v36, %v3027_v51  ;;  %v3072_v41 = vadd.f32 %v3068_v54, %v3040_v63  ;;  %v3073_v34 = vadd.f32 %v3069_v25, %v3041_v31  ;;  %v3082_v21 = vmax.f32 %v3078_v2, 0.0  ;;  %v7660_v63 = vld [vmem:[#allocation7 + $0x8] sm:$0xff] }
 0x300   :  { %v3083_v50 = vmax.f32 %v3079_v48, 0.0  ;;  %v3084_v0 = vmul.f32 %v3080_v18, %v8957_v30  ;;  %v3085_v61 = vmul.f32 %v3081_v27, %v8957_v30  ;;  %v3092_v1 = vsub.f32 %v7264_v5, %v8958_v22 }
 0x301   :  { %v3093_v58 = vsub.f32 %v7268_v37, %v8958_v22  ;;  %v3094_v44 = vsub.f32 %v7286_v35, %v8958_v22  ;;  %v3095_v7 = vsub.f32 %v7290_v8, %v8958_v22  ;;  %v3074_v26 = vadd.f32 %v3070_v6, %v3042_v59  ;;  %v8959_v37 = vld [vmem:[#allocation122_spill] sm:$0xff] }
 0x302   :  { %v3075_v10 = vadd.f32 %v3071_v60, %v3043_v19  ;;  %v3086_v47 = vmul.f32 %v3082_v21, %v8957_v30  ;;  %v3087_v53 = vmul.f32 %v3083_v50, %v8957_v30  ;;  %v3096_v28 = vmax.f32 %v3092_v1, 0.0  ;;  %v8964_v21 = vld [vmem:[#allocation125_spill] sm:$0xff] }
 0x303   :  { %v3097_v24 = vmax.f32 %v3093_v58, 0.0  ;;  %v3098_v11 = vmax.f32 %v3094_v44, 0.0  ;;  %v3099_v39 = vmax.f32 %v3095_v7, 0.0  ;;  %v3088_v5 = vadd.f32 %v3084_v0, %v3056_v17  ;;  %v8962_v17 = vld [vmem:[#allocation124_spill] sm:$0xff] }
 0x304   :  { %v3089_v57 = vadd.f32 %v3085_v61, %v3057_v16  ;;  %v3108_v51 = vsub.f32 %v7656_v49, %v8959_v37  ;;  %v3109_v31 = vsub.f32 %v7660_v63, %v8959_v37  ;;  %v3100_v15 = vmul.f32 %v3096_v28, %v8960_v13 }
 0x305   :  { %v3101_v33 = vmul.f32 %v3097_v24, %v8960_v13  ;;  %v3102_v52 = vmul.f32 %v3098_v11, %v8960_v13  ;;  %v3103_v29 = vmul.f32 %v3099_v39, %v8960_v13  ;;  %v3110_v38 = vsub.f32 %v7286_v35, %v8959_v37  ;;  %v8965_v24 = vld [vmem:[#allocation127_spill] sm:$0xff] }
 0x306   :  { %v3111_v46 = vsub.f32 %v7290_v8, %v8959_v37  ;;  %v3112_v45 = vmax.f32 %v3108_v51, 0.0  ;;  %v3113_v62 = vmax.f32 %v3109_v31, 0.0  ;;  %v3090_v9 = vadd.f32 %v3086_v47, %v3058_v56 }
 0x307   :  { %v3091_v59 = vadd.f32 %v3087_v53, %v3059_v12  ;;  %v3104_v19 = vadd.f32 %v3100_v15, %v3072_v41  ;;  %v3105_v42 = vadd.f32 %v3101_v33, %v3073_v34  ;;  %v3114_v36 = vmax.f32 %v3110_v38, 0.0  ;;  %v8963_v12 = vld [vmem:[#allocation126_spill] sm:$0xff] }
 0x308   :  { %v3115_v3 = vmax.f32 %v3111_v46, 0.0  ;;  %v3116_v55 = vmul.f32 %v3112_v45, %v8961_v4  ;;  %v3117_v32 = vmul.f32 %v3113_v62, %v8961_v4  ;;  %v3124_v16 = vsub.f32 %v7656_v49, %v8962_v17 }
 0x309   :  { %v3125_v35 = vsub.f32 %v7660_v63, %v8962_v17  ;;  %v3126_v8 = vsub.f32 %v7678_v23, %v8962_v17  ;;  %v3127_v40 = vsub.f32 %v7682_v20, %v8962_v17  ;;  %v3106_v14 = vadd.f32 %v3102_v52, %v3074_v26 }
 0x30a   :  { %v3107_v54 = vadd.f32 %v3103_v29, %v3075_v10  ;;  %v3118_v25 = vmul.f32 %v3114_v36, %v8961_v4  ;;  %v3119_v6 = vmul.f32 %v3115_v3, %v8961_v4  ;;  %v3128_v60 = vmax.f32 %v3124_v16, 0.0  ;;  %v8968_v36 = vld [vmem:[#allocation129_spill] sm:$0xff] }
 0x30b   :  { %v3129_v2 = vmax.f32 %v3125_v35, 0.0  ;;  %v3130_v48 = vmax.f32 %v3126_v8, 0.0  ;;  %v3131_v18 = vmax.f32 %v3127_v40, 0.0  ;;  %v3120_v27 = vadd.f32 %v3116_v55, %v3088_v5  ;;  %v8966_v5 = vld [vmem:[#allocation128_spill] sm:$0xff] }
 0x30c   :  { %v3121_v56 = vadd.f32 %v3117_v32, %v3089_v57  ;;  %v3140_v41 = vsub.f32 %v7656_v49, %v8963_v12  ;;  %v3141_v34 = vsub.f32 %v7660_v63, %v8963_v12  ;;  %v3132_v50 = vmul.f32 %v3128_v60, %v8964_v21 }
 0x30d   :  { %v3133_v30 = vmul.f32 %v3129_v2, %v8964_v21  ;;  %v3134_v0 = vmul.f32 %v3130_v48, %v8964_v21  ;;  %v3135_v61 = vmul.f32 %v3131_v18, %v8964_v21  ;;  %v3142_v22 = vsub.f32 %v7678_v23, %v8963_v12  ;;  %v8969_v2 = vld [vmem:[#allocation131_spill] sm:$0xff] }
 0x30e   :  { %v3143_v1 = vsub.f32 %v7682_v20, %v8963_v12  ;;  %v3144_v58 = vmax.f32 %v3140_v41, 0.0  ;;  %v3145_v44 = vmax.f32 %v3141_v34, 0.0  ;;  %v3122_v7 = vadd.f32 %v3118_v25, %v3090_v9 }
 0x30f   :  { %v3123_v26 = vadd.f32 %v3119_v6, %v3091_v59  ;;  %v3136_v10 = vadd.f32 %v3132_v50, %v3104_v19  ;;  %v3137_v47 = vadd.f32 %v3133_v30, %v3105_v42  ;;  %v3146_v53 = vmax.f32 %v3142_v22, 0.0  ;;  %v8967_v59 = vld [vmem:[#allocation130_spill] sm:$0xff] }
 0x310   :  { %v3147_v28 = vmax.f32 %v3143_v1, 0.0  ;;  %v3148_v11 = vmul.f32 %v3144_v58, %v8965_v24  ;;  %v3149_v39 = vmul.f32 %v3145_v44, %v8965_v24  ;;  %v3156_v57 = vsub.f32 %v7656_v49, %v8966_v5 }
 0x311   :  { %v3157_v37 = vsub.f32 %v7660_v63, %v8966_v5  ;;  %v3158_v51 = vsub.f32 %v7678_v23, %v8966_v5  ;;  %v3159_v31 = vsub.f32 %v7682_v20, %v8966_v5  ;;  %v3138_v13 = vadd.f32 %v3134_v0, %v3106_v14 }
 0x312   :  { %v3139_v15 = vadd.f32 %v3135_v61, %v3107_v54  ;;  %v3150_v33 = vmul.f32 %v3146_v53, %v8965_v24  ;;  %v3151_v52 = vmul.f32 %v3147_v28, %v8965_v24  ;;  %v3160_v29 = vmax.f32 %v3156_v57, 0.0  ;;  %v8972_v53 = vld [vmem:[#allocation133_spill] sm:$0xff] }
 0x313   :  { %v3161_v38 = vmax.f32 %v3157_v37, 0.0  ;;  %v3162_v46 = vmax.f32 %v3158_v51, 0.0  ;;  %v3163_v45 = vmax.f32 %v3159_v31, 0.0  ;;  %v3152_v62 = vadd.f32 %v3148_v11, %v3120_v27  ;;  %v8970_v27 = vld [vmem:[#allocation132_spill] sm:$0xff] }
 0x314   :  { %v3153_v9 = vadd.f32 %v3149_v39, %v3121_v56  ;;  %v3172_v19 = vsub.f32 %v7656_v49, %v8967_v59  ;;  %v3173_v42 = vsub.f32 %v7660_v63, %v8967_v59  ;;  %v3164_v3 = vmul.f32 %v3160_v29, %v8968_v36 }
 0x315   :  { %v3165_v4 = vmul.f32 %v3161_v38, %v8968_v36  ;;  %v3166_v55 = vmul.f32 %v3162_v46, %v8968_v36  ;;  %v3167_v32 = vmul.f32 %v3163_v45, %v8968_v36  ;;  %v3174_v17 = vsub.f32 %v7678_v23, %v8967_v59  ;;  %v8973_v38 = vld [vmem:[#allocation135_spill] sm:$0xff] }
 0x316   :  { %v3175_v16 = vsub.f32 %v7682_v20, %v8967_v59  ;;  %v3176_v35 = vmax.f32 %v3172_v19, 0.0  ;;  %v3177_v8 = vmax.f32 %v3173_v42, 0.0  ;;  %v3154_v40 = vadd.f32 %v3150_v33, %v3122_v7 }
 0x317   :  { %v3155_v14 = vadd.f32 %v3151_v52, %v3123_v26  ;;  %v3168_v54 = vadd.f32 %v3164_v3, %v3136_v10  ;;  %v3169_v25 = vadd.f32 %v3165_v4, %v3137_v47  ;;  %v3178_v6 = vmax.f32 %v3174_v17, 0.0  ;;  %v8971_v26 = vld [vmem:[#allocation134_spill] sm:$0xff] }
 0x318   :  { %v3179_v60 = vmax.f32 %v3175_v16, 0.0  ;;  %v3180_v48 = vmul.f32 %v3176_v35, %v8969_v2  ;;  %v3181_v18 = vmul.f32 %v3177_v8, %v8969_v2  ;;  %v3188_v56 = vsub.f32 %v7656_v49, %v8970_v27 }
 0x319   :  { %v3189_v12 = vsub.f32 %v7660_v63, %v8970_v27  ;;  %v3190_v41 = vsub.f32 %v7678_v23, %v8970_v27  ;;  %v3191_v34 = vsub.f32 %v7682_v20, %v8970_v27  ;;  %v3170_v21 = vadd.f32 %v3166_v55, %v3138_v13 }
 0x31a   :  { %v3171_v50 = vadd.f32 %v3167_v32, %v3139_v15  ;;  %v3182_v30 = vmul.f32 %v3178_v6, %v8969_v2  ;;  %v3183_v0 = vmul.f32 %v3179_v60, %v8969_v2  ;;  %v3192_v61 = vmax.f32 %v3188_v56, 0.0  ;;  %v8976_v6 = vld [vmem:[#allocation137_spill] sm:$0xff] }
 0x31b   :  { %v3193_v22 = vmax.f32 %v3189_v12, 0.0  ;;  %v3194_v1 = vmax.f32 %v3190_v41, 0.0  ;;  %v3195_v58 = vmax.f32 %v3191_v34, 0.0  ;;  %v3184_v44 = vadd.f32 %v3180_v48, %v3152_v62  ;;  %v8974_v62 = vld [vmem:[#allocation136_spill] sm:$0xff] }
 0x31c   :  { %v3185_v7 = vadd.f32 %v3181_v18, %v3153_v9  ;;  %v3204_v10 = vsub.f32 %v7656_v49, %v8971_v26  ;;  %v3205_v47 = vsub.f32 %v7660_v63, %v8971_v26  ;;  %v3196_v28 = vmul.f32 %v3192_v61, %v8972_v53 }
 0x31d   :  { %v3197_v24 = vmul.f32 %v3193_v22, %v8972_v53  ;;  %v3198_v11 = vmul.f32 %v3194_v1, %v8972_v53  ;;  %v3199_v39 = vmul.f32 %v3195_v58, %v8972_v53  ;;  %v3206_v5 = vsub.f32 %v7678_v23, %v8971_v26  ;;  %v8977_v22 = vld [vmem:[#allocation139_spill] sm:$0xff] }
 0x31e   :  { %v3207_v57 = vsub.f32 %v7682_v20, %v8971_v26  ;;  %v3208_v37 = vmax.f32 %v3204_v10, 0.0  ;;  %v3209_v51 = vmax.f32 %v3205_v47, 0.0  ;;  %v3186_v31 = vadd.f32 %v3182_v30, %v3154_v40 }
 0x31f   :  { %v3187_v13 = vadd.f32 %v3183_v0, %v3155_v14  ;;  %v3200_v15 = vadd.f32 %v3196_v28, %v3168_v54  ;;  %v3201_v33 = vadd.f32 %v3197_v24, %v3169_v25  ;;  %v3210_v52 = vmax.f32 %v3206_v5, 0.0  ;;  %v8975_v14 = vld [vmem:[#allocation138_spill] sm:$0xff] }
 0x320   :  { %v3211_v29 = vmax.f32 %v3207_v57, 0.0  ;;  %v3212_v46 = vmul.f32 %v3208_v37, %v8973_v38  ;;  %v3213_v45 = vmul.f32 %v3209_v51, %v8973_v38  ;;  %v3220_v9 = vsub.f32 %v7656_v49, %v8974_v62 }
 0x321   :  { %v3221_v59 = vsub.f32 %v7660_v63, %v8974_v62  ;;  %v3222_v19 = vsub.f32 %v7678_v23, %v8974_v62  ;;  %v3223_v42 = vsub.f32 %v7682_v20, %v8974_v62  ;;  %v3202_v36 = vadd.f32 %v3198_v11, %v3170_v21 }
 0x322   :  { %v3203_v3 = vadd.f32 %v3199_v39, %v3171_v50  ;;  %v3214_v4 = vmul.f32 %v3210_v52, %v8973_v38  ;;  %v3215_v55 = vmul.f32 %v3211_v29, %v8973_v38  ;;  %v3224_v32 = vmax.f32 %v3220_v9, 0.0 }
 0x323   :  { %v3225_v17 = vmax.f32 %v3221_v59, 0.0  ;;  %v3226_v16 = vmax.f32 %v3222_v19, 0.0  ;;  %v3227_v35 = vmax.f32 %v3223_v42, 0.0  ;;  %v3216_v8 = vadd.f32 %v3212_v46, %v3184_v44  ;;  %v8978_v44 = vld [vmem:[#allocation140_spill] sm:$0xff] }
 0x324   :  { %v3217_v40 = vadd.f32 %v3213_v45, %v3185_v7  ;;  %v3236_v54 = vsub.f32 %v7656_v49, %v8975_v14  ;;  %v3237_v25 = vsub.f32 %v7660_v63, %v8975_v14  ;;  %v3228_v60 = vmul.f32 %v3224_v32, %v8976_v6 }
 0x325   :  { %v3229_v2 = vmul.f32 %v3225_v17, %v8976_v6  ;;  %v3230_v48 = vmul.f32 %v3226_v16, %v8976_v6  ;;  %v3231_v18 = vmul.f32 %v3227_v35, %v8976_v6  ;;  %v3238_v27 = vsub.f32 %v7678_v23, %v8975_v14 }
 0x326   :  { %v3239_v56 = vsub.f32 %v7682_v20, %v8975_v14  ;;  %v3240_v12 = vmax.f32 %v3236_v54, 0.0  ;;  %v3241_v41 = vmax.f32 %v3237_v25, 0.0  ;;  %v3218_v34 = vadd.f32 %v3214_v4, %v3186_v31 }
 0x327   :  { %v3219_v21 = vadd.f32 %v3215_v55, %v3187_v13  ;;  %v3232_v50 = vadd.f32 %v3228_v60, %v3200_v15  ;;  %v3233_v30 = vadd.f32 %v3229_v2, %v3201_v33  ;;  %v3242_v0 = vmax.f32 %v3238_v27, 0.0 }
 0x328   :  { %v3243_v61 = vmax.f32 %v3239_v56, 0.0  ;;  %v3244_v1 = vmul.f32 %v3240_v12, %v8977_v22  ;;  %v3245_v58 = vmul.f32 %v3241_v41, %v8977_v22  ;;  %v3252_v7 = vsub.f32 %v7656_v49, %v8978_v44 }
 0x329   :  { %v3253_v26 = vsub.f32 %v7660_v63, %v8978_v44  ;;  %v3254_v10 = vsub.f32 %v7678_v23, %v8978_v44  ;;  %v3255_v47 = vsub.f32 %v7682_v20, %v8978_v44 }
 0x32a   :  { %4070 = shalt.err (!%p4067_p9)
}
 0x32b   :  { %s4071_s26 = scalar_lea.hbm %s8171_s3, 512 }
 0x32c   :  { %p4072_p10 = scmp.ne.s32.totalorder %s8171_s3, %s4071_s26  ;;  %p4075_p11 = scmp.lt.u32.totalorder %s4071_s26, %s8171_s3 }
 0x32e   :  { %p4077_p12 = pnand %p4075_p11, %p4072_p10 }
 0x330   :  { %4080 = shalt.err (!%p4077_p12)
}
 0x331   :  { %3751 = dma.vmem_to_hbm [thread:$0]  %s3749_s23, 512, %s8171_s3, [#allocation4]   ;;  %v3234_v53 = vadd.f32 %v3230_v48, %v3202_v36  ;;  %v3235_v28 = vadd.f32 %v3231_v18, %v3203_v3  ;;  %v3246_v24 = vmul.f32 %v3242_v0, %v8977_v22  ;;  %v3247_v11 = vmul.f32 %v3243_v61, %v8977_v22  ;;  %v8979_v13 = vld [vmem:[#allocation142_spill] sm:$0xff]  ;;  %v8980_v52 = vld [vmem:[#allocation141_spill] sm:$0xff]  ;;  %v8981_v17 = vld [vmem:[#allocation143_spill] sm:$0xff] }
 0x332   :  { %v3256_v39 = vmax.f32 %v3252_v7, 0.0  ;;  %v3257_v5 = vmax.f32 %v3253_v26, 0.0  ;;  %v3258_v57 = vmax.f32 %v3254_v10, 0.0  ;;  %v3259_v37 = vmax.f32 %v3255_v47, 0.0  ;;  %v8984_v0 = vld [vmem:[#allocation145_spill] sm:$0xff]  ;;  %s4117_s3 = smov [#allocation10]  }
 0x333   :  { %v3248_v51 = vadd.f32 %v3244_v1, %v3216_v8  ;;  %v3249_v31 = vadd.f32 %v3245_v58, %v3217_v40  ;;  %v3268_v15 = vsub.f32 %v7656_v49, %v8979_v13  ;;  %v3269_v33 = vsub.f32 %v7660_v63, %v8979_v13  ;;  %v8982_v8 = vld [vmem:[#allocation144_spill] sm:$0xff]  ;;  %s3758_s7 = sshll.u32 %s4117_s3, 4  ;;  %s3759_s7 = int_to_ptr.vmem [resolvable:$true] %s3758_s7 }
 0x334   :  { %v3260_v29 = vmul.f32 %v3256_v39, %v8980_v52  ;;  %v3261_v38 = vmul.f32 %v3257_v5, %v8980_v52  ;;  %v3262_v46 = vmul.f32 %v3258_v57, %v8980_v52  ;;  %v3263_v45 = vmul.f32 %v3259_v37, %v8980_v52  ;;  %v8985_v5 = vld [vmem:[#allocation147_spill] sm:$0xff]  ;;  %s4081_s8 = scalar_lea.vmem %s3759_s7, 512  ;;  %p4086_p0 = scmp.lt.s32.totalorder %s3759_s7, %s3759_s7 }
 0x335   :  { %v3270_v62 = vsub.f32 %v7678_v23, %v8979_v13  ;;  %v3271_v9 = vsub.f32 %v7682_v20, %v8979_v13  ;;  %v3272_v59 = vmax.f32 %v3268_v15, 0.0  ;;  %v3273_v19 = vmax.f32 %v3269_v33, 0.0  ;;  %p4082_p13 = scmp.ne.s32.totalorder %s3759_s7, %s4081_s8  ;;  %p4087_p1 = scmp.lt.s32.totalorder %s4081_s8, %s4081_s8 }
 0x336   :  { %v3250_v42 = vadd.f32 %v3246_v24, %v3218_v34  ;;  %v3251_v36 = vadd.f32 %v3247_v11, %v3219_v21  ;;  %v3264_v3 = vadd.f32 %v3260_v29, %v3232_v50  ;;  %v3265_v4 = vadd.f32 %v3261_v38, %v3233_v30  ;;  %v8983_v21 = vld [vmem:[#allocation146_spill] sm:$0xff] }
 0x337   :  { %v3274_v55 = vmax.f32 %v3270_v62, 0.0  ;;  %v3275_v32 = vmax.f32 %v3271_v9, 0.0  ;;  %v3276_v16 = vmul.f32 %v3272_v59, %v8981_v17  ;;  %v3277_v35 = vmul.f32 %v3273_v19, %v8981_v17  ;;  %p4088_p2 = por %p4087_p1, %p4086_p0 }
 0x338   :  { %v3284_v40 = vsub.f32 %v7656_v49, %v8982_v8  ;;  %v3285_v14 = vsub.f32 %v7660_v63, %v8982_v8  ;;  %v3286_v54 = vsub.f32 %v7678_v23, %v8982_v8  ;;  %v3287_v25 = vsub.f32 %v7682_v20, %v8982_v8 }
 0x339   :  { %v3266_v6 = vadd.f32 %v3262_v46, %v3234_v53  ;;  %v3267_v60 = vadd.f32 %v3263_v45, %v3235_v28  ;;  %v3278_v2 = vmul.f32 %v3274_v55, %v8981_v17  ;;  %v3279_v48 = vmul.f32 %v3275_v32, %v8981_v17  ;;  %v8988_v55 = vld [vmem:[#allocation149_spill] sm:$0xff]  ;;  %p4089_p3 = pnand %p4088_p2, %p4082_p13 }
 0x33a   :  { %v3288_v18 = vmax.f32 %v3284_v40, 0.0  ;;  %v3289_v27 = vmax.f32 %v3285_v14, 0.0  ;;  %v3290_v56 = vmax.f32 %v3286_v54, 0.0  ;;  %v3291_v12 = vmax.f32 %v3287_v25, 0.0 }
 0x33b   :  { %v3280_v41 = vadd.f32 %v3276_v16, %v3248_v51  ;;  %v3281_v34 = vadd.f32 %v3277_v35, %v3249_v31  ;;  %v3300_v50 = vsub.f32 %v7656_v49, %v8983_v21  ;;  %v3301_v30 = vsub.f32 %v7660_v63, %v8983_v21  ;;  %v8986_v51 = vld [vmem:[#allocation148_spill] sm:$0xff] }
 0x33c   :  { %v3292_v61 = vmul.f32 %v3288_v18, %v8984_v0  ;;  %v3293_v22 = vmul.f32 %v3289_v27, %v8984_v0  ;;  %v3294_v1 = vmul.f32 %v3290_v56, %v8984_v0  ;;  %v3295_v58 = vmul.f32 %v3291_v12, %v8984_v0  ;;  %v8989_v27 = vld [vmem:[#allocation151_spill] sm:$0xff] }
 0x33d   :  { %v3302_v44 = vsub.f32 %v7678_v23, %v8983_v21  ;;  %v3303_v7 = vsub.f32 %v7682_v20, %v8983_v21  ;;  %v3304_v26 = vmax.f32 %v3300_v50, 0.0  ;;  %v3305_v10 = vmax.f32 %v3301_v30, 0.0 }
 0x33e   :  { %v3282_v47 = vadd.f32 %v3278_v2, %v3250_v42  ;;  %v3283_v53 = vadd.f32 %v3279_v48, %v3251_v36  ;;  %v3296_v28 = vadd.f32 %v3292_v61, %v3264_v3  ;;  %v3297_v24 = vadd.f32 %v3293_v22, %v3265_v4  ;;  %v8987_v36 = vld [vmem:[#allocation150_spill] sm:$0xff] }
 0x33f   :  { %v3306_v11 = vmax.f32 %v3302_v44, 0.0  ;;  %v3307_v39 = vmax.f32 %v3303_v7, 0.0  ;;  %v3308_v57 = vmul.f32 %v3304_v26, %v8985_v5  ;;  %v3309_v37 = vmul.f32 %v3305_v10, %v8985_v5 }
 0x340   :  { %v3316_v31 = vsub.f32 %v7656_v49, %v8986_v51  ;;  %v3317_v13 = vsub.f32 %v7660_v63, %v8986_v51  ;;  %v3318_v15 = vsub.f32 %v7678_v23, %v8986_v51  ;;  %v3319_v33 = vsub.f32 %v7682_v20, %v8986_v51 }
 0x341   :  { %v3298_v52 = vadd.f32 %v3294_v1, %v3266_v6  ;;  %v3299_v29 = vadd.f32 %v3295_v58, %v3267_v60  ;;  %v3310_v38 = vmul.f32 %v3306_v11, %v8985_v5  ;;  %v3311_v46 = vmul.f32 %v3307_v39, %v8985_v5  ;;  %v8992_v11 = vld [vmem:[#allocation153_spill] sm:$0xff] }
 0x342   :  { %v3320_v45 = vmax.f32 %v3316_v31, 0.0  ;;  %v3321_v62 = vmax.f32 %v3317_v13, 0.0  ;;  %v3322_v9 = vmax.f32 %v3318_v15, 0.0  ;;  %v3323_v59 = vmax.f32 %v3319_v33, 0.0 }
 0x343   :  { %v3312_v19 = vadd.f32 %v3308_v57, %v3280_v41  ;;  %v3313_v42 = vadd.f32 %v3309_v37, %v3281_v34  ;;  %v3332_v3 = vsub.f32 %v7656_v49, %v8987_v36  ;;  %v3333_v4 = vsub.f32 %v7660_v63, %v8987_v36  ;;  %v8990_v41 = vld [vmem:[#allocation152_spill] sm:$0xff] }
 0x344   :  { %v3324_v32 = vmul.f32 %v3320_v45, %v8988_v55  ;;  %v3325_v17 = vmul.f32 %v3321_v62, %v8988_v55  ;;  %v3326_v16 = vmul.f32 %v3322_v9, %v8988_v55  ;;  %v3327_v35 = vmul.f32 %v3323_v59, %v8988_v55  ;;  %v8993_v62 = vld [vmem:[#allocation155_spill] sm:$0xff] }
 0x345   :  { %v3334_v8 = vsub.f32 %v7678_v23, %v8987_v36  ;;  %v3335_v40 = vsub.f32 %v7682_v20, %v8987_v36  ;;  %v3336_v14 = vmax.f32 %v3332_v3, 0.0  ;;  %v3337_v54 = vmax.f32 %v3333_v4, 0.0 }
 0x346   :  { %v3314_v25 = vadd.f32 %v3310_v38, %v3282_v47  ;;  %v3315_v6 = vadd.f32 %v3311_v46, %v3283_v53  ;;  %v3328_v60 = vadd.f32 %v3324_v32, %v3296_v28  ;;  %v3329_v2 = vadd.f32 %v3325_v17, %v3297_v24  ;;  %v8991_v53 = vld [vmem:[#allocation154_spill] sm:$0xff] }
 0x347   :  { %v3338_v48 = vmax.f32 %v3334_v8, 0.0  ;;  %v3339_v18 = vmax.f32 %v3335_v40, 0.0  ;;  %v3340_v56 = vmul.f32 %v3336_v14, %v8989_v27  ;;  %v3341_v12 = vmul.f32 %v3337_v54, %v8989_v27 }
 0x348   :  { %v3348_v34 = vsub.f32 %v7656_v49, %v8990_v41  ;;  %v3349_v21 = vsub.f32 %v7660_v63, %v8990_v41  ;;  %v3350_v50 = vsub.f32 %v7678_v23, %v8990_v41  ;;  %v3351_v30 = vsub.f32 %v7682_v20, %v8990_v41 }
 0x349   :  { %v3330_v0 = vadd.f32 %v3326_v16, %v3298_v52  ;;  %v3331_v61 = vadd.f32 %v3327_v35, %v3299_v29  ;;  %v3342_v22 = vmul.f32 %v3338_v48, %v8989_v27  ;;  %v3343_v1 = vmul.f32 %v3339_v18, %v8989_v27  ;;  %v8996_v48 = vld [vmem:[#allocation157_spill] sm:$0xff] }
 0x34a   :  { %v3352_v58 = vmax.f32 %v3348_v34, 0.0  ;;  %v3353_v44 = vmax.f32 %v3349_v21, 0.0  ;;  %v3354_v7 = vmax.f32 %v3350_v50, 0.0  ;;  %v3355_v26 = vmax.f32 %v3351_v30, 0.0 }
 0x34b   :  { %v3344_v10 = vadd.f32 %v3340_v56, %v3312_v19  ;;  %v3345_v47 = vadd.f32 %v3341_v12, %v3313_v42  ;;  %v3364_v28 = vsub.f32 %v7656_v49, %v8991_v53  ;;  %v3365_v24 = vsub.f32 %v7660_v63, %v8991_v53  ;;  %v8994_v19 = vld [vmem:[#allocation156_spill] sm:$0xff] }
 0x34c   :  { %v3356_v39 = vmul.f32 %v3352_v58, %v8992_v11  ;;  %v3357_v5 = vmul.f32 %v3353_v44, %v8992_v11  ;;  %v3358_v57 = vmul.f32 %v3354_v7, %v8992_v11  ;;  %v3359_v37 = vmul.f32 %v3355_v26, %v8992_v11  ;;  %v8997_v44 = vld [vmem:[#allocation159_spill] sm:$0xff] }
 0x34d   :  { %v3366_v51 = vsub.f32 %v7678_v23, %v8991_v53  ;;  %v3367_v31 = vsub.f32 %v7682_v20, %v8991_v53  ;;  %v3368_v13 = vmax.f32 %v3364_v28, 0.0  ;;  %v3369_v15 = vmax.f32 %v3365_v24, 0.0 }
 0x34e   :  { %v3346_v33 = vadd.f32 %v3342_v22, %v3314_v25  ;;  %v3347_v52 = vadd.f32 %v3343_v1, %v3315_v6  ;;  %v3360_v29 = vadd.f32 %v3356_v39, %v3328_v60  ;;  %v3361_v38 = vadd.f32 %v3357_v5, %v3329_v2  ;;  %v8995_v6 = vld [vmem:[#allocation158_spill] sm:$0xff] }
 0x34f   :  { %v3370_v46 = vmax.f32 %v3366_v51, 0.0  ;;  %v3371_v45 = vmax.f32 %v3367_v31, 0.0  ;;  %v3372_v9 = vmul.f32 %v3368_v13, %v8993_v62  ;;  %v3373_v59 = vmul.f32 %v3369_v15, %v8993_v62 }
 0x350   :  { %v3380_v42 = vsub.f32 %v7656_v49, %v8994_v19  ;;  %v3381_v36 = vsub.f32 %v7660_v63, %v8994_v19  ;;  %v3382_v3 = vsub.f32 %v7678_v23, %v8994_v19  ;;  %v3383_v4 = vsub.f32 %v7682_v20, %v8994_v19 }
 0x351   :  { %v3362_v55 = vadd.f32 %v3358_v57, %v3330_v0  ;;  %v3363_v32 = vadd.f32 %v3359_v37, %v3331_v61  ;;  %v3374_v17 = vmul.f32 %v3370_v46, %v8993_v62  ;;  %v3375_v16 = vmul.f32 %v3371_v45, %v8993_v62  ;;  %v9000_v46 = vld [vmem:[#allocation161_spill] sm:$0xff] }
 0x352   :  { %v3384_v35 = vmax.f32 %v3380_v42, 0.0  ;;  %v3385_v8 = vmax.f32 %v3381_v36, 0.0  ;;  %v3386_v40 = vmax.f32 %v3382_v3, 0.0  ;;  %v3387_v14 = vmax.f32 %v3383_v4, 0.0 }
 0x353   :  { %v3376_v54 = vadd.f32 %v3372_v9, %v3344_v10  ;;  %v3377_v25 = vadd.f32 %v3373_v59, %v3345_v47  ;;  %v3396_v60 = vsub.f32 %v7656_v49, %v8995_v6  ;;  %v3397_v2 = vsub.f32 %v7660_v63, %v8995_v6  ;;  %v8998_v10 = vld [vmem:[#allocation160_spill] sm:$0xff] }
 0x354   :  { %v3388_v18 = vmul.f32 %v3384_v35, %v8996_v48  ;;  %v3389_v27 = vmul.f32 %v3385_v8, %v8996_v48  ;;  %v3390_v56 = vmul.f32 %v3386_v40, %v8996_v48  ;;  %v3391_v12 = vmul.f32 %v3387_v14, %v8996_v48  ;;  %v9001_v8 = vld [vmem:[#allocation163_spill] sm:$0xff] }
 0x355   :  { %v3398_v41 = vsub.f32 %v7678_v23, %v8995_v6  ;;  %v3399_v34 = vsub.f32 %v7682_v20, %v8995_v6  ;;  %v3400_v21 = vmax.f32 %v3396_v60, 0.0  ;;  %v3401_v50 = vmax.f32 %v3397_v2, 0.0 }
 0x356   :  { %v3378_v30 = vadd.f32 %v3374_v17, %v3346_v33  ;;  %v3379_v0 = vadd.f32 %v3375_v16, %v3347_v52  ;;  %v3392_v61 = vadd.f32 %v3388_v18, %v3360_v29  ;;  %v3393_v22 = vadd.f32 %v3389_v27, %v3361_v38  ;;  %v8999_v52 = vld [vmem:[#allocation162_spill] sm:$0xff] }
 0x357   :  { %v3402_v1 = vmax.f32 %v3398_v41, 0.0  ;;  %v3403_v58 = vmax.f32 %v3399_v34, 0.0  ;;  %v3404_v7 = vmul.f32 %v3400_v21, %v8997_v44  ;;  %v3405_v26 = vmul.f32 %v3401_v50, %v8997_v44 }
 0x358   :  { %v3412_v47 = vsub.f32 %v7656_v49, %v8998_v10  ;;  %v3413_v53 = vsub.f32 %v7660_v63, %v8998_v10  ;;  %v3414_v28 = vsub.f32 %v7678_v23, %v8998_v10  ;;  %v3415_v24 = vsub.f32 %v7682_v20, %v8998_v10 }
 0x359   :  { %v3394_v11 = vadd.f32 %v3390_v56, %v3362_v55  ;;  %v3395_v39 = vadd.f32 %v3391_v12, %v3363_v32  ;;  %v3406_v5 = vmul.f32 %v3402_v1, %v8997_v44  ;;  %v3407_v57 = vmul.f32 %v3403_v58, %v8997_v44  ;;  %v9004_v1 = vld [vmem:[#allocation165_spill] sm:$0xff] }
 0x35a   :  { %v3416_v37 = vmax.f32 %v3412_v47, 0.0  ;;  %v3417_v51 = vmax.f32 %v3413_v53, 0.0  ;;  %v3418_v31 = vmax.f32 %v3414_v28, 0.0  ;;  %v3419_v13 = vmax.f32 %v3415_v24, 0.0 }
 0x35b   :  { %v3408_v15 = vadd.f32 %v3404_v7, %v3376_v54  ;;  %v3409_v33 = vadd.f32 %v3405_v26, %v3377_v25  ;;  %v3428_v29 = vsub.f32 %v7656_v49, %v8999_v52  ;;  %v3429_v38 = vsub.f32 %v7660_v63, %v8999_v52  ;;  %v9002_v54 = vld [vmem:[#allocation164_spill] sm:$0xff] }
 0x35c   :  { %v3420_v45 = vmul.f32 %v3416_v37, %v9000_v46  ;;  %v3421_v62 = vmul.f32 %v3417_v51, %v9000_v46  ;;  %v3422_v9 = vmul.f32 %v3418_v31, %v9000_v46  ;;  %v3423_v59 = vmul.f32 %v3419_v13, %v9000_v46  ;;  %v9005_v51 = vld [vmem:[#allocation167_spill] sm:$0xff] }
 0x35d   :  { %v3430_v19 = vsub.f32 %v7678_v23, %v8999_v52  ;;  %v3431_v42 = vsub.f32 %v7682_v20, %v8999_v52  ;;  %v3432_v36 = vmax.f32 %v3428_v29, 0.0  ;;  %v3433_v3 = vmax.f32 %v3429_v38, 0.0 }
 0x35e   :  { %v3410_v4 = vadd.f32 %v3406_v5, %v3378_v30  ;;  %v3411_v55 = vadd.f32 %v3407_v57, %v3379_v0  ;;  %v3424_v32 = vadd.f32 %v3420_v45, %v3392_v61  ;;  %v3425_v17 = vadd.f32 %v3421_v62, %v3393_v22  ;;  %v9003_v0 = vld [vmem:[#allocation166_spill] sm:$0xff] }
 0x35f   :  { %v3434_v16 = vmax.f32 %v3430_v19, 0.0  ;;  %v3435_v35 = vmax.f32 %v3431_v42, 0.0  ;;  %v3436_v40 = vmul.f32 %v3432_v36, %v9001_v8  ;;  %v3437_v14 = vmul.f32 %v3433_v3, %v9001_v8 }
 0x360   :  { %v3444_v25 = vsub.f32 %v7656_v49, %v9002_v54  ;;  %v3445_v6 = vsub.f32 %v7660_v63, %v9002_v54  ;;  %v3446_v60 = vsub.f32 %v7678_v23, %v9002_v54  ;;  %v3447_v2 = vsub.f32 %v7682_v20, %v9002_v54 }
 0x361   :  { %v3426_v48 = vadd.f32 %v3422_v9, %v3394_v11  ;;  %v3427_v18 = vadd.f32 %v3423_v59, %v3395_v39  ;;  %v3438_v27 = vmul.f32 %v3434_v16, %v9001_v8  ;;  %v3439_v56 = vmul.f32 %v3435_v35, %v9001_v8  ;;  %v9008_v16 = vld [vmem:[#allocation169_spill] sm:$0xff] }
 0x362   :  { %v3448_v12 = vmax.f32 %v3444_v25, 0.0  ;;  %v3449_v41 = vmax.f32 %v3445_v6, 0.0  ;;  %v3450_v34 = vmax.f32 %v3446_v60, 0.0  ;;  %v3451_v21 = vmax.f32 %v3447_v2, 0.0 }
 0x363   :  { %v3440_v50 = vadd.f32 %v3436_v40, %v3408_v15  ;;  %v3441_v30 = vadd.f32 %v3437_v14, %v3409_v33  ;;  %v3460_v61 = vsub.f32 %v7656_v49, %v9003_v0  ;;  %v3461_v22 = vsub.f32 %v7660_v63, %v9003_v0  ;;  %v9006_v15 = vld [vmem:[#allocation168_spill] sm:$0xff] }
 0x364   :  { %v3452_v58 = vmul.f32 %v3448_v12, %v9004_v1  ;;  %v3453_v44 = vmul.f32 %v3449_v41, %v9004_v1  ;;  %v3454_v7 = vmul.f32 %v3450_v34, %v9004_v1  ;;  %v3455_v26 = vmul.f32 %v3451_v21, %v9004_v1  ;;  %v9009_v41 = vld [vmem:[#allocation171_spill] sm:$0xff] }
 0x365   :  { %v3462_v10 = vsub.f32 %v7678_v23, %v9003_v0  ;;  %v3463_v47 = vsub.f32 %v7682_v20, %v9003_v0  ;;  %v3464_v53 = vmax.f32 %v3460_v61, 0.0  ;;  %v3465_v28 = vmax.f32 %v3461_v22, 0.0 }
 0x366   :  { %v3442_v24 = vadd.f32 %v3438_v27, %v3410_v4  ;;  %v3443_v11 = vadd.f32 %v3439_v56, %v3411_v55  ;;  %v3456_v39 = vadd.f32 %v3452_v58, %v3424_v32  ;;  %v3457_v5 = vadd.f32 %v3453_v44, %v3425_v17  ;;  %v9007_v55 = vld [vmem:[#allocation170_spill] sm:$0xff] }
 0x367   :  { %v3466_v57 = vmax.f32 %v3462_v10, 0.0  ;;  %v3467_v37 = vmax.f32 %v3463_v47, 0.0  ;;  %v3468_v31 = vmul.f32 %v3464_v53, %v9005_v51  ;;  %v3469_v13 = vmul.f32 %v3465_v28, %v9005_v51 }
 0x368   :  { %v3476_v33 = vsub.f32 %v7656_v49, %v9006_v15  ;;  %v3477_v52 = vsub.f32 %v7660_v63, %v9006_v15  ;;  %v3478_v29 = vsub.f32 %v7678_v23, %v9006_v15  ;;  %v3479_v38 = vsub.f32 %v7682_v20, %v9006_v15 }
 0x369   :  { %v3458_v46 = vadd.f32 %v3454_v7, %v3426_v48  ;;  %v3459_v45 = vadd.f32 %v3455_v26, %v3427_v18  ;;  %v3470_v62 = vmul.f32 %v3466_v57, %v9005_v51  ;;  %v3471_v9 = vmul.f32 %v3467_v37, %v9005_v51  ;;  %v9012_v57 = vld [vmem:[#allocation173_spill] sm:$0xff] }
 0x36a   :  { %v3480_v59 = vmax.f32 %v3476_v33, 0.0  ;;  %v3481_v19 = vmax.f32 %v3477_v52, 0.0  ;;  %v3482_v42 = vmax.f32 %v3478_v29, 0.0  ;;  %v3483_v36 = vmax.f32 %v3479_v38, 0.0 }
 0x36b   :  { %v3472_v3 = vadd.f32 %v3468_v31, %v3440_v50  ;;  %v3473_v4 = vadd.f32 %v3469_v13, %v3441_v30  ;;  %v3492_v32 = vsub.f32 %v7656_v49, %v9007_v55  ;;  %v3493_v17 = vsub.f32 %v7660_v63, %v9007_v55  ;;  %v9010_v50 = vld [vmem:[#allocation172_spill] sm:$0xff] }
 0x36c   :  { %v3484_v35 = vmul.f32 %v3480_v59, %v9008_v16  ;;  %v3485_v8 = vmul.f32 %v3481_v19, %v9008_v16  ;;  %v3486_v40 = vmul.f32 %v3482_v42, %v9008_v16  ;;  %v3487_v14 = vmul.f32 %v3483_v36, %v9008_v16  ;;  %v9013_v19 = vld [vmem:[#allocation175_spill] sm:$0xff] }
 0x36d   :  { %v3494_v54 = vsub.f32 %v7678_v23, %v9007_v55  ;;  %v3495_v25 = vsub.f32 %v7682_v20, %v9007_v55  ;;  %v3496_v6 = vmax.f32 %v3492_v32, 0.0  ;;  %v3497_v60 = vmax.f32 %v3493_v17, 0.0 }
 0x36e   :  { %v3474_v2 = vadd.f32 %v3470_v62, %v3442_v24  ;;  %v3475_v48 = vadd.f32 %v3471_v9, %v3443_v11  ;;  %v3488_v18 = vadd.f32 %v3484_v35, %v3456_v39  ;;  %v3489_v27 = vadd.f32 %v3485_v8, %v3457_v5  ;;  %v9011_v11 = vld [vmem:[#allocation174_spill] sm:$0xff] }
 0x36f   :  { %v3498_v56 = vmax.f32 %v3494_v54, 0.0  ;;  %v3499_v12 = vmax.f32 %v3495_v25, 0.0  ;;  %v3500_v34 = vmul.f32 %v3496_v6, %v9009_v41  ;;  %v3501_v21 = vmul.f32 %v3497_v60, %v9009_v41 }
 0x370   :  { %v3508_v30 = vsub.f32 %v7656_v49, %v9010_v50  ;;  %v3509_v0 = vsub.f32 %v7660_v63, %v9010_v50  ;;  %v3510_v61 = vsub.f32 %v7678_v23, %v9010_v50  ;;  %v3511_v22 = vsub.f32 %v7682_v20, %v9010_v50 }
 0x371   :  { %v3490_v1 = vadd.f32 %v3486_v40, %v3458_v46  ;;  %v3491_v58 = vadd.f32 %v3487_v14, %v3459_v45  ;;  %v3502_v44 = vmul.f32 %v3498_v56, %v9009_v41  ;;  %v3503_v7 = vmul.f32 %v3499_v12, %v9009_v41  ;;  %v9016_v56 = vld [vmem:[#allocation177_spill] sm:$0xff] }
 0x372   :  { %v3512_v26 = vmax.f32 %v3508_v30, 0.0  ;;  %v3513_v10 = vmax.f32 %v3509_v0, 0.0  ;;  %v3514_v47 = vmax.f32 %v3510_v61, 0.0  ;;  %v3515_v53 = vmax.f32 %v3511_v22, 0.0 }
 0x373   :  { %v3504_v28 = vadd.f32 %v3500_v34, %v3472_v3  ;;  %v3505_v24 = vadd.f32 %v3501_v21, %v3473_v4  ;;  %v3524_v39 = vsub.f32 %v7656_v49, %v9011_v11  ;;  %v3525_v5 = vsub.f32 %v7660_v63, %v9011_v11  ;;  %v9014_v3 = vld [vmem:[#allocation176_spill] sm:$0xff] }
 0x374   :  { %v3516_v37 = vmul.f32 %v3512_v26, %v9012_v57  ;;  %v3517_v51 = vmul.f32 %v3513_v10, %v9012_v57  ;;  %v3518_v31 = vmul.f32 %v3514_v47, %v9012_v57  ;;  %v3519_v13 = vmul.f32 %v3515_v53, %v9012_v57  ;;  %v9017_v10 = vld [vmem:[#allocation179_spill] sm:$0xff] }
 0x375   :  { %v3526_v15 = vsub.f32 %v7678_v23, %v9011_v11  ;;  %v3527_v33 = vsub.f32 %v7682_v20, %v9011_v11  ;;  %v3528_v52 = vmax.f32 %v3524_v39, 0.0  ;;  %v3529_v29 = vmax.f32 %v3525_v5, 0.0 }
 0x376   :  { %v3506_v38 = vadd.f32 %v3502_v44, %v3474_v2  ;;  %v3507_v46 = vadd.f32 %v3503_v7, %v3475_v48  ;;  %v3520_v45 = vadd.f32 %v3516_v37, %v3488_v18  ;;  %v3521_v62 = vadd.f32 %v3517_v51, %v3489_v27  ;;  %v9015_v48 = vld [vmem:[#allocation178_spill] sm:$0xff] }
 0x377   :  { %v3530_v9 = vmax.f32 %v3526_v15, 0.0  ;;  %v3531_v59 = vmax.f32 %v3527_v33, 0.0  ;;  %v3532_v42 = vmul.f32 %v3528_v52, %v9013_v19  ;;  %v3533_v36 = vmul.f32 %v3529_v29, %v9013_v19 }
 0x378   :  { %v3540_v4 = vsub.f32 %v7656_v49, %v9014_v3  ;;  %v3541_v55 = vsub.f32 %v7660_v63, %v9014_v3  ;;  %v3542_v32 = vsub.f32 %v7678_v23, %v9014_v3  ;;  %v3543_v17 = vsub.f32 %v7682_v20, %v9014_v3 }
 0x379   :  { %v3522_v16 = vadd.f32 %v3518_v31, %v3490_v1  ;;  %v3523_v35 = vadd.f32 %v3519_v13, %v3491_v58  ;;  %v3534_v8 = vmul.f32 %v3530_v9, %v9013_v19  ;;  %v3535_v40 = vmul.f32 %v3531_v59, %v9013_v19  ;;  %v9020_v9 = vld [vmem:[#allocation181_spill] sm:$0xff] }
 0x37a   :  { %v3544_v14 = vmax.f32 %v3540_v4, 0.0  ;;  %v3545_v54 = vmax.f32 %v3541_v55, 0.0  ;;  %v3546_v25 = vmax.f32 %v3542_v32, 0.0  ;;  %v3547_v6 = vmax.f32 %v3543_v17, 0.0 }
 0x37b   :  { %v3536_v60 = vadd.f32 %v3532_v42, %v3504_v28  ;;  %v3537_v2 = vadd.f32 %v3533_v36, %v3505_v24  ;;  %v3556_v18 = vsub.f32 %v7656_v49, %v9015_v48  ;;  %v3557_v27 = vsub.f32 %v7660_v63, %v9015_v48  ;;  %v9018_v28 = vld [vmem:[#allocation180_spill] sm:$0xff] }
 0x37c   :  { %v3548_v12 = vmul.f32 %v3544_v14, %v9016_v56  ;;  %v3549_v41 = vmul.f32 %v3545_v54, %v9016_v56  ;;  %v3550_v34 = vmul.f32 %v3546_v25, %v9016_v56  ;;  %v3551_v21 = vmul.f32 %v3547_v6, %v9016_v56  ;;  %v9021_v54 = vld [vmem:[#allocation183_spill] sm:$0xff] }
 0x37d   :  { %v3558_v50 = vsub.f32 %v7678_v23, %v9015_v48  ;;  %v3559_v30 = vsub.f32 %v7682_v20, %v9015_v48  ;;  %v3560_v0 = vmax.f32 %v3556_v18, 0.0  ;;  %v3561_v61 = vmax.f32 %v3557_v27, 0.0 }
 0x37e   :  { %v3538_v22 = vadd.f32 %v3534_v8, %v3506_v38  ;;  %v3539_v1 = vadd.f32 %v3535_v40, %v3507_v46  ;;  %v3552_v58 = vadd.f32 %v3548_v12, %v3520_v45  ;;  %v3553_v44 = vadd.f32 %v3549_v41, %v3521_v62  ;;  %v9019_v46 = vld [vmem:[#allocation182_spill] sm:$0xff] }
 0x37f   :  { %v3562_v7 = vmax.f32 %v3558_v50, 0.0  ;;  %v3563_v26 = vmax.f32 %v3559_v30, 0.0  ;;  %v3564_v47 = vmul.f32 %v3560_v0, %v9017_v10  ;;  %v3565_v53 = vmul.f32 %v3561_v61, %v9017_v10 }
 0x380   :  { %v3572_v24 = vsub.f32 %v7656_v49, %v9018_v28  ;;  %v3573_v11 = vsub.f32 %v7660_v63, %v9018_v28  ;;  %v3574_v39 = vsub.f32 %v7678_v23, %v9018_v28  ;;  %v3575_v5 = vsub.f32 %v7682_v20, %v9018_v28 }
 0x381   :  { %v3554_v57 = vadd.f32 %v3550_v34, %v3522_v16  ;;  %v3555_v37 = vadd.f32 %v3551_v21, %v3523_v35  ;;  %v3566_v51 = vmul.f32 %v3562_v7, %v9017_v10  ;;  %v3567_v31 = vmul.f32 %v3563_v26, %v9017_v10  ;;  %v9024_v7 = vld [vmem:[#allocation185_spill] sm:$0xff] }
 0x382   :  { %v3576_v13 = vmax.f32 %v3572_v24, 0.0  ;;  %v3577_v15 = vmax.f32 %v3573_v11, 0.0  ;;  %v3578_v33 = vmax.f32 %v3574_v39, 0.0  ;;  %v3579_v52 = vmax.f32 %v3575_v5, 0.0 }
 0x383   :  { %v3568_v29 = vadd.f32 %v3564_v47, %v3536_v60  ;;  %v3569_v38 = vadd.f32 %v3565_v53, %v3537_v2  ;;  %v3588_v45 = vsub.f32 %v7656_v49, %v9019_v46  ;;  %v3589_v62 = vsub.f32 %v7660_v63, %v9019_v46  ;;  %v9022_v60 = vld [vmem:[#allocation184_spill] sm:$0xff] }
 0x384   :  { %v3580_v59 = vmul.f32 %v3576_v13, %v9020_v9  ;;  %v3581_v19 = vmul.f32 %v3577_v15, %v9020_v9  ;;  %v3582_v42 = vmul.f32 %v3578_v33, %v9020_v9  ;;  %v3583_v36 = vmul.f32 %v3579_v52, %v9020_v9  ;;  %v9025_v15 = vld [vmem:[#allocation187_spill] sm:$0xff] }
 0x385   :  { %v3590_v3 = vsub.f32 %v7678_v23, %v9019_v46  ;;  %v3591_v4 = vsub.f32 %v7682_v20, %v9019_v46  ;;  %v3592_v55 = vmax.f32 %v3588_v45, 0.0  ;;  %v3593_v32 = vmax.f32 %v3589_v62, 0.0  ;;  %v8082_v46 = vld [vmem:[#allocation7 + $0x10] sm:$0xff]  ;;  %v8086_v45 = vld [vmem:[#allocation7 + $0x18] sm:$0xff] }
 0x386   :  { %v3570_v17 = vadd.f32 %v3566_v51, %v3538_v22  ;;  %v3571_v16 = vadd.f32 %v3567_v31, %v3539_v1  ;;  %v3584_v35 = vadd.f32 %v3580_v59, %v3552_v58  ;;  %v3585_v8 = vadd.f32 %v3581_v19, %v3553_v44  ;;  %v8060_v22 = vld [vmem:[#allocation7] sm:$0xff]  ;;  %v8064_v58 = vld [vmem:[#allocation7 + $0x8] sm:$0xff] }
 0x387   :  { %v3594_v40 = vmax.f32 %v3590_v3, 0.0  ;;  %v3595_v14 = vmax.f32 %v3591_v4, 0.0  ;;  %v3596_v25 = vmul.f32 %v3592_v55, %v9021_v54  ;;  %v3597_v6 = vmul.f32 %v3593_v32, %v9021_v54 }
 0x388   :  { %v3604_v2 = vsub.f32 %v7656_v49, %v9022_v60  ;;  %v3605_v48 = vsub.f32 %v7660_v63, %v9022_v60  ;;  %v3606_v18 = vsub.f32 %v7678_v23, %v9022_v60  ;;  %v3607_v27 = vsub.f32 %v7682_v20, %v9022_v60  ;;  %v9023_v63 = vld [vmem:[#allocation186_spill] sm:$0xff] }
 0x389   :  { %v3586_v56 = vadd.f32 %v3582_v42, %v3554_v57  ;;  %v3587_v12 = vadd.f32 %v3583_v36, %v3555_v37  ;;  %v3598_v41 = vmul.f32 %v3594_v40, %v9021_v54  ;;  %v3599_v34 = vmul.f32 %v3595_v14, %v9021_v54  ;;  %v9028_v40 = vld [vmem:[#allocation189_spill] sm:$0xff] }
 0x38a   :  { %v3608_v21 = vmax.f32 %v3604_v2, 0.0  ;;  %v3609_v50 = vmax.f32 %v3605_v48, 0.0  ;;  %v3610_v30 = vmax.f32 %v3606_v18, 0.0  ;;  %v3611_v0 = vmax.f32 %v3607_v27, 0.0 }
 0x38b   :  { %v3600_v49 = vadd.f32 %v3596_v25, %v3568_v29  ;;  %v3601_v61 = vadd.f32 %v3597_v6, %v3569_v38  ;;  %v3620_v1 = vsub.f32 %v8060_v22, %v9023_v63  ;;  %v3621_v44 = vsub.f32 %v8064_v58, %v9023_v63  ;;  %v9026_v29 = vld [vmem:[#allocation188_spill] sm:$0xff] }
 0x38c   :  { %v3612_v26 = vmul.f32 %v3608_v21, %v9024_v7  ;;  %v3613_v10 = vmul.f32 %v3609_v50, %v9024_v7  ;;  %v3614_v47 = vmul.f32 %v3610_v30, %v9024_v7  ;;  %v3615_v53 = vmul.f32 %v3611_v0, %v9024_v7  ;;  %v9029_v50 = vld [vmem:[#allocation191_spill] sm:$0xff] }
 0x38d   :  { %v3622_v28 = vsub.f32 %v7678_v23, %v9023_v63  ;;  %v3623_v24 = vsub.f32 %v7682_v20, %v9023_v63  ;;  %v3624_v11 = vmax.f32 %v3620_v1, 0.0  ;;  %v3625_v39 = vmax.f32 %v3621_v44, 0.0 }
 0x38e   :  { %v3602_v5 = vadd.f32 %v3598_v41, %v3570_v17  ;;  %v3603_v57 = vadd.f32 %v3599_v34, %v3571_v16  ;;  %v3616_v37 = vadd.f32 %v3612_v26, %v3584_v35  ;;  %v3617_v51 = vadd.f32 %v3613_v10, %v3585_v8  ;;  %v9027_v16 = vld [vmem:[#allocation190_spill] sm:$0xff] }
 0x38f   :  { %v3626_v31 = vmax.f32 %v3622_v28, 0.0  ;;  %v3627_v13 = vmax.f32 %v3623_v24, 0.0  ;;  %v3628_v33 = vmul.f32 %v3624_v11, %v9025_v15  ;;  %v3629_v52 = vmul.f32 %v3625_v39, %v9025_v15 }
 0x390   :  { %v3636_v38 = vsub.f32 %v8060_v22, %v9026_v29  ;;  %v3637_v23 = vsub.f32 %v8064_v58, %v9026_v29  ;;  %v3638_v20 = vsub.f32 %v8082_v46, %v9026_v29  ;;  %v3639_v62 = vsub.f32 %v8086_v45, %v9026_v29 }
 0x391   :  { %v3618_v9 = vadd.f32 %v3614_v47, %v3586_v56  ;;  %v3619_v59 = vadd.f32 %v3615_v53, %v3587_v12  ;;  %v3630_v19 = vmul.f32 %v3626_v31, %v9025_v15  ;;  %v3631_v42 = vmul.f32 %v3627_v13, %v9025_v15  ;;  %v9032_v31 = vld [vmem:[#allocation193_spill] sm:$0xff] }
 0x392   :  { %v3640_v36 = vmax.f32 %v3636_v38, 0.0  ;;  %v3641_v3 = vmax.f32 %v3637_v23, 0.0  ;;  %v3642_v4 = vmax.f32 %v3638_v20, 0.0  ;;  %v3643_v55 = vmax.f32 %v3639_v62, 0.0 }
 0x393   :  { %v3632_v32 = vadd.f32 %v3628_v33, %v3600_v49  ;;  %v3633_v17 = vadd.f32 %v3629_v52, %v3601_v61  ;;  %v3652_v35 = vsub.f32 %v8060_v22, %v9027_v16  ;;  %v3653_v8 = vsub.f32 %v8064_v58, %v9027_v16  ;;  %v9030_v49 = vld [vmem:[#allocation192_spill] sm:$0xff] }
 0x394   :  { %v3644_v14 = vmul.f32 %v3640_v36, %v9028_v40  ;;  %v3645_v54 = vmul.f32 %v3641_v3, %v9028_v40  ;;  %v3646_v25 = vmul.f32 %v3642_v4, %v9028_v40  ;;  %v3647_v6 = vmul.f32 %v3643_v55, %v9028_v40  ;;  %v9033_v3 = vld [vmem:[#allocation195_spill] sm:$0xff] }
 0x395   :  { %v3654_v60 = vsub.f32 %v8082_v46, %v9027_v16  ;;  %v3655_v2 = vsub.f32 %v8086_v45, %v9027_v16  ;;  %v3656_v48 = vmax.f32 %v3652_v35, 0.0  ;;  %v3657_v18 = vmax.f32 %v3653_v8, 0.0 }
 0x396   :  { %v3634_v27 = vadd.f32 %v3630_v19, %v3602_v5  ;;  %v3635_v56 = vadd.f32 %v3631_v42, %v3603_v57  ;;  %v3648_v12 = vadd.f32 %v3644_v14, %v3616_v37  ;;  %v3649_v41 = vadd.f32 %v3645_v54, %v3617_v51  ;;  %v9031_v57 = vld [vmem:[#allocation194_spill] sm:$0xff] }
 0x397   :  { %v3658_v34 = vmax.f32 %v3654_v60, 0.0  ;;  %v3659_v21 = vmax.f32 %v3655_v2, 0.0  ;;  %v3660_v30 = vmul.f32 %v3656_v48, %v9029_v50  ;;  %v3661_v0 = vmul.f32 %v3657_v18, %v9029_v50 }
 0x398   :  { %v3668_v61 = vsub.f32 %v8060_v22, %v9030_v49  ;;  %v3669_v63 = vsub.f32 %v8064_v58, %v9030_v49  ;;  %v3670_v1 = vsub.f32 %v8082_v46, %v9030_v49  ;;  %v3671_v44 = vsub.f32 %v8086_v45, %v9030_v49 }
 0x399   :  { %v3650_v7 = vadd.f32 %v3646_v25, %v3618_v9  ;;  %v3651_v26 = vadd.f32 %v3647_v6, %v3619_v59  ;;  %v3662_v10 = vmul.f32 %v3658_v34, %v9029_v50  ;;  %v3663_v47 = vmul.f32 %v3659_v21, %v9029_v50  ;;  %v9036_v34 = vld [vmem:[#allocation197_spill] sm:$0xff] }
 0x39a   :  { %v3672_v53 = vmax.f32 %v3668_v61, 0.0  ;;  %v3673_v28 = vmax.f32 %v3669_v63, 0.0  ;;  %v3674_v24 = vmax.f32 %v3670_v1, 0.0  ;;  %v3675_v11 = vmax.f32 %v3671_v44, 0.0 }
 0x39b   :  { %v3664_v39 = vadd.f32 %v3660_v30, %v3632_v32  ;;  %v3665_v5 = vadd.f32 %v3661_v0, %v3633_v17  ;;  %v3684_v37 = vsub.f32 %v8060_v22, %v9031_v57  ;;  %v3685_v51 = vsub.f32 %v8064_v58, %v9031_v57  ;;  %v9034_v32 = vld [vmem:[#allocation196_spill] sm:$0xff] }
 0x39c   :  { %v3676_v13 = vmul.f32 %v3672_v53, %v9032_v31  ;;  %v3677_v15 = vmul.f32 %v3673_v28, %v9032_v31  ;;  %v3678_v33 = vmul.f32 %v3674_v24, %v9032_v31  ;;  %v3679_v52 = vmul.f32 %v3675_v11, %v9032_v31 }
 0x39d   :  { %v3686_v29 = vsub.f32 %v8082_v46, %v9031_v57  ;;  %v3687_v38 = vsub.f32 %v8086_v45, %v9031_v57  ;;  %v3688_v23 = vmax.f32 %v3684_v37, 0.0  ;;  %v3689_v20 = vmax.f32 %v3685_v51, 0.0 }
 0x39e   :  { %v3666_v62 = vadd.f32 %v3662_v10, %v3634_v27  ;;  %v3667_v9 = vadd.f32 %v3663_v47, %v3635_v56  ;;  %v3680_v59 = vadd.f32 %v3676_v13, %v3648_v12  ;;  %v3681_v19 = vadd.f32 %v3677_v15, %v3649_v41  ;;  %v9035_v56 = vld [vmem:[#allocation198_spill] sm:$0xff] }
 0x39f   :  { %v3690_v42 = vmax.f32 %v3686_v29, 0.0  ;;  %v3691_v36 = vmax.f32 %v3687_v38, 0.0  ;;  %v3692_v4 = vmul.f32 %v3688_v23, %v9033_v3  ;;  %v3693_v55 = vmul.f32 %v3689_v20, %v9033_v3 }
 0x3a0   :  { %v3700_v17 = vsub.f32 %v8060_v22, %v9034_v32  ;;  %v3701_v16 = vsub.f32 %v8064_v58, %v9034_v32  ;;  %v3702_v35 = vsub.f32 %v8082_v46, %v9034_v32  ;;  %v3703_v8 = vsub.f32 %v8086_v45, %v9034_v32 }
 0x3a1   :  { %v3682_v40 = vadd.f32 %v3678_v33, %v3650_v7  ;;  %v3683_v14 = vadd.f32 %v3679_v52, %v3651_v26  ;;  %v3694_v54 = vmul.f32 %v3690_v42, %v9033_v3  ;;  %v3695_v25 = vmul.f32 %v3691_v36, %v9033_v3 }
 0x3a2   :  { %v3704_v6 = vmax.f32 %v3700_v17, 0.0  ;;  %v3705_v60 = vmax.f32 %v3701_v16, 0.0  ;;  %v3706_v2 = vmax.f32 %v3702_v35, 0.0  ;;  %v3707_v48 = vmax.f32 %v3703_v8, 0.0 }
 0x3a3   :  { %v3696_v18 = vadd.f32 %v3692_v4, %v3664_v39  ;;  %v3697_v27 = vadd.f32 %v3693_v55, %v3665_v5  ;;  %v3716_v12 = vsub.f32 %v8060_v22, %v9035_v56  ;;  %v3717_v41 = vsub.f32 %v8064_v58, %v9035_v56 }
 0x3a4   :  { %v3708_v21 = vmul.f32 %v3704_v6, %v9036_v34  ;;  %v3709_v50 = vmul.f32 %v3705_v60, %v9036_v34  ;;  %v3710_v30 = vmul.f32 %v3706_v2, %v9036_v34  ;;  %v3711_v0 = vmul.f32 %v3707_v48, %v9036_v34 }
 0x3a5   :  { %v3718_v49 = vsub.f32 %v8082_v46, %v9035_v56  ;;  %v3719_v61 = vsub.f32 %v8086_v45, %v9035_v56  ;;  %v3720_v63 = vmax.f32 %v3716_v12, 0.0  ;;  %v3721_v1 = vmax.f32 %v3717_v41, 0.0 }
 0x3a6   :  { %v3698_v22 = vadd.f32 %v3694_v54, %v3666_v62  ;;  %v3699_v44 = vadd.f32 %v3695_v25, %v3667_v9  ;;  %v3712_v7 = vadd.f32 %v3708_v21, %v3680_v59  ;;  %v3713_v58 = vadd.f32 %v3709_v50, %v3681_v19 }
 0x3a7   :  { %v3722_v26 = vmax.f32 %v3718_v49, 0.0  ;;  %v3723_v10 = vmax.f32 %v3719_v61, 0.0  ;;  %v3724_v47 = vmul.f32 %v3720_v63, %v6886_v43  ;;  %v3725_v53 = vmul.f32 %v3721_v1, %v6886_v43 }
 0x3a8   :  { %v3714_v28 = vadd.f32 %v3710_v30, %v3682_v40  ;;  %v3715_v24 = vadd.f32 %v3711_v0, %v3683_v14 }
 0x3a9   :  { %v3726_v11 = vmul.f32 %v3722_v26, %v6886_v43  ;;  %v3727_v46 = vmul.f32 %v3723_v10, %v6886_v43  ;;  %v3728_v39 = vadd.f32 %v3724_v47, %v3696_v18  ;;  %v3729_v45 = vadd.f32 %v3725_v53, %v3697_v27 }
 0x3ab   :  { %v3730_v5 = vadd.f32 %v3726_v11, %v3698_v22  ;;  %v3731_v57 = vadd.f32 %v3727_v46, %v3699_v44  ;;  %v3732_v37 = vadd.f32 %v3728_v39, %v3712_v7  ;;  %v3733_v51 = vadd.f32 %v3729_v45, %v3713_v58 }
 0x3ad   :  { %v3734_v31 = vadd.f32 %v3730_v5, %v3714_v28  ;;  %v3735_v13 = vadd.f32 %v3731_v57, %v3715_v24  ;;  %3738 = vst [vmem:[#allocation10] sm:$0xff] %v3732_v37  ;;  %3739 = vst [vmem:[#allocation10 + $0x8] sm:$0xff] %v3733_v51 }
 0x3af   :  { %3740 = vst [vmem:[#allocation10 + $0x10] sm:$0xff] %v3734_v31  ;;  %3741 = vst [vmem:[#allocation10 + $0x18] sm:$0xff] %v3735_v13 }
 0x3b0   :  { %4092 = shalt.err (!%p4089_p3)
}
 0x3b1   :  { %s4093_s10 = scalar_lea.hbm %s8172_s4, 512 }
 0x3b2   :  { %p4094_p4 = scmp.ne.s32.totalorder %s8172_s4, %s4093_s10  ;;  %p4097_p5 = scmp.lt.u32.totalorder %s4093_s10, %s8172_s4 }
 0x3b4   :  { %p4099_p6 = pnand %p4097_p5, %p4094_p4 }
 0x3b6   :  { %4102 = shalt.err (!%p4099_p6)
}
 0x3b7   :  { %3761 = dma.vmem_to_hbm [thread:$0]  %s3759_s7, 512, %s8172_s4, [#allocation11]  }
 0x3b8   :  { %4109 = dma.done.wait [#allocation4], 512  }
 0x3b9   :  { %4110 = vsyncadd [#allocation4], 4294966784 }
 0x3ba   :  { %4111 = dma.done.wait [#allocation11], 512  }
 0x3bb   :  { %4112 = vsyncadd [#allocation11], 4294966784 }
 0x3bc   :  { %3768 = vsyncpa [#allocation3], 1 }
 0x3bd   :  { %3769 = vsyncpa [#allocation8], 1 }
 0x3be   :  { %3770 = vsyncpa [#allocation4], 1 }
 0x3bf   :  { %3771 = vsyncpa [#allocation11], 1 }
 0x3c0   :  { %3772 = vsyncpa [#allocation5], 1 }

</bundles_post_ra>
